<compile_context>
chip_gen: v6e
topology: v6e:2x2x1
jax: 0.10.0
libtpu: 0.0.40
codegen_flags: <defaults>
</compile_context>

<pallas_src>
import functools

import numpy as np
import jax
import jax.numpy as jnp
from jax.experimental import pallas as pl
from jax.experimental.pallas import tpu as pltpu


def _round_up(x, m):
    return ((x + m - 1) // m) * m


def _pick_row_tile(m_rows, target):
    """Largest multiple-of-8 divisor of m_rows that is <= target (else m_rows)."""
    if m_rows <= max(target, 8):
        return m_rows
    start = (min(target, m_rows) // 8) * 8
    for tm in range(start, 7, -8):
        if m_rows % tm == 0:
            return tm
    return m_rows


def _basic_block_kernel(x_ref, w1_ref, b1_ref, w2_ref, b2_ref, o_ref,
                        *, Wp, W, M, TM, E, Cp):
    # x_ref : (1, B_ext, Cp) f32  flat zero-padded image (extra Wp+1 zero rows
    #                             in front so the conv1 halo window never needs
    #                             a negative row index).
    # w*_ref: (9*Cp, Cp) bf16     im2col conv weights (BN scale folded in);
    #                             tap (dy,dx) row-major -> group dy = rows
    #                             [dy*3*Cp, (dy+1)*3*Cp).
    # b*_ref: (1, Cp)  f32        folded BN bias.
    # o_ref : (1, TM, Cp) f32     output rows [r0, r0+TM) of the top-left frame.
    t = pl.program_id(1)
    r0 = pl.multiple_of(t * TM, 8)          # first output row of this tile
    K3 = 3 * Cp

    # ---- conv1 + BN1 + ReLU over the halo window (E >= TM + 2*Wp + 2 rows) --
    # Window row j holds y1 row g = r0 + j - (Wp + 1).  Rows with g outside
    # [0, M) and the 2 padding columns per image row are zeroed below, so the
    # window directly serves as the zero-padded conv2 input (no `mid` re-pad,
    # no scratch round trip).
    acc1 = None
    for dy in range(3):                      # per-kernel-row accumulated matmuls
        start = r0 + dy * Wp                 # K = 3*Cp per matmul (>=256 on v6e/v7x)
        xg = x_ref[0, pl.ds(start, E + 2), :].astype(jnp.bfloat16)
        cols = jnp.concatenate([xg[0:E], xg[1:E + 1], xg[2:E + 2]], axis=-1)
        part = jnp.dot(cols, w1_ref[dy * K3:(dy + 1) * K3, :],
                       preferred_element_type=jnp.float32)
        acc1 = part if acc1 is None else acc1 + part
    y1 = jnp.maximum(acc1 + b1_ref[...], 0.0)           # f32 elementwise

    j = jax.lax.broadcasted_iota(jnp.int32, (E, 1), 0)
    g = j + (r0 - (Wp + 1))                              # global y1 row for window row j
    valid = (g >= 0) & (g < M) & ((g % Wp) < W)          # row halo + pad columns
    win = jnp.where(valid, y1, 0.0).astype(jnp.bfloat16)

    # ---- conv2 + BN2 bias on the TM output rows -----------------------------
    acc2 = None
    for dy in range(3):
        base = dy * Wp
        cols = jnp.concatenate([win[base:base + TM],
                                win[base + 1:base + 1 + TM],
                                win[base + 2:base + 2 + TM]], axis=-1)
        part = jnp.dot(cols, w2_ref[dy * K3:(dy + 1) * K3, :],
                       preferred_element_type=jnp.float32)
        acc2 = part if acc2 is None else acc2 + part

    # ---- residual add + final ReLU (f32; residual comes from the f32 input) --
    resid = x_ref[0, pl.ds(r0 + 2 * Wp + 2, TM), :]
    o_ref[0] = jnp.maximum(acc2 + b2_ref[...] + resid, 0.0)


def basic_block(x_nchw, w1, g1, be1, m1, v1, w2, g2, be2, m2, v2,
                eps=1e-5, row_tile_target=None):
    N, C, H, W = x_nchw.shape
    Cout = w1.shape[-1]
    assert C == Cout, "downsample=None requires in_channels == out_channels"

    Wp = W + 2
    if W >= 32:                       # sublane-align dy*Wp tap offsets for big W
        Wp = _round_up(Wp, 8)
    M = H * Wp                        # output rows per image (top-left flat frame)
    Cp = _round_up(C, 128)            # lane-dense channel padding

    if row_tile_target is None:
        row_tile_target = max(256, 8 * Wp)   # keep halo recompute ~<=25%
    TM = _pick_row_tile(M, row_tile_target)
    T = M // TM
    E = _round_up(TM + 2 * Wp + 2, 8)        # conv1 halo-window rows
    F = Wp + 1                               # leading zero rows of the flat image
    B_img = (H + 3) * Wp                     # rows of the zero-padded image
    B_ext = _round_up(max((M - TM) + 2 * Wp + E + 2, F + B_img), 8)

    # Fold BatchNorm (inference mode): scale into conv weights, bias separate.
    s1 = g1 / jnp.sqrt(v1 + eps)
    s2 = g2 / jnp.sqrt(v2 + eps)
    b1 = be1 - m1 * s1
    b2 = be2 - m2 * s2

    def prep_w(w, s):
        wf = w.astype(jnp.float32) * s[None, None, None, :]
        wf = jnp.pad(wf, ((0, 0), (0, 0), (0, Cp - C), (0, Cp - Cout)))
        # (3,3,Cp,Cp) -> (9*Cp, Cp); tap (dy,dx) row-major matches the kernel.
        return wf.reshape(9 * Cp, Cp).astype(jnp.bfloat16)

    w1cat = prep_w(w1, s1)
    w2cat = prep_w(w2, s2)
    b1p = jnp.pad(b1.astype(jnp.float32), (0, Cp - Cout)).reshape(1, Cp)
    b2p = jnp.pad(b2.astype(jnp.float32), (0, Cp - Cout)).reshape(1, Cp)

    # NCHW -> NHWC, zero pad (1 top, 2 bottom, 1 left, Wp-W-1 right), pad
    # channels to Cp, flatten rows, and prepend F zero rows (so halo indices
    # never go negative) plus trailing zero rows up to B_ext.
    x = jnp.transpose(x_nchw, (0, 2, 3, 1)).astype(jnp.float32)
    xp = jnp.pad(x, ((0, 0), (1, 2), (1, Wp - W - 1), (0, Cp - C)))
    xf = xp.reshape(N, B_img, Cp)
    xe = jnp.pad(xf, ((0, 0), (F, B_ext - F - B_img), (0, 0)))

    kernel = functools.partial(_basic_block_kernel,
                               Wp=Wp, W=W, M=M, TM=TM, E=E, Cp=Cp)

    # VMEM limit from the actual block footprint, clamped to chip capacity.
    x_bytes = B_ext * Cp * 4 * 2                 # double-buffered input image
    w_bytes = 2 * 9 * Cp * Cp * 2                # bf16 weights, single-buffered
    b_bytes = 2 * Cp * 4
    o_bytes = TM * Cp * 4 * 2
    tmp_bytes = E * Cp * (4 + 2 + 4) + E * 3 * Cp * 2 + TM * Cp * (4 + 3 * 2)
    need = int(1.5 * (x_bytes + w_bytes + b_bytes + o_bytes + tmp_bytes)) + (8 << 20)
    try:
        cap = int(pltpu.get_tpu_info().vmem_capacity_bytes)
    except Exception:
        cap = 128 * 1024 * 1024
    vmem_limit = int(min(max(need, 32 << 20), int(cap * 0.75)))

    def _call(single_buffer):
        const_kwargs = {}
        if single_buffer:
            const_kwargs = dict(pipeline_mode=pl.Buffered(buffer_count=1))

        def const_spec(shape):
            return pl.BlockSpec(shape, lambda n, t: (0, 0), **const_kwargs)

        return pl.pallas_call(
            kernel,
            out_shape=jax.ShapeDtypeStruct((N, M, Cp), jnp.float32),
            grid_spec=pltpu.PrefetchScalarGridSpec(
                num_scalar_prefetch=0,
                grid=(N, T),
                in_specs=[
                    pl.BlockSpec((1, B_ext, Cp), lambda n, t: (n, 0, 0)),
                    const_spec((9 * Cp, Cp)),
                    const_spec((1, Cp)),
                    const_spec((9 * Cp, Cp)),
                    const_spec((1, Cp)),
                ],
                out_specs=pl.BlockSpec((1, TM, Cp), lambda n, t: (n, t, 0)),
            ),
            compiler_params=pltpu.CompilerParams(
                dimension_semantics=("parallel", "parallel"),
                vmem_limit_bytes=vmem_limit),
        )(xe, w1cat, b1p, w2cat, b2p)

    try:
        out_flat = _call(single_buffer=True)
    except Exception:
        # pl.Buffered(1) not supported on this jax version -> default buffering.
        out_flat = _call(single_buffer=False)

    # (N, H*Wp, Cp) -> (N, H, Wp, Cp) -> strip pad columns / channels -> NCHW.
    out = out_flat.reshape(N, H, Wp, Cp)[:, :, :W, :C]
    return jnp.transpose(out, (0, 3, 1, 2))


def _reference(x_nchw, w1, g1, be1, m1, v1, w2, g2, be2, m2, v2, eps=1e-5):
    """Pure-JAX f32 reference (lax conv) matching the PyTorch module."""
    x = jnp.transpose(x_nchw, (0, 2, 3, 1)).astype(jnp.float32)
    dn = ("NHWC", "HWIO", "NHWC")
    y = jax.lax.conv_general_dilated(x, w1, (1, 1), "SAME", dimension_numbers=dn)
    y = (y - m1) / jnp.sqrt(v1 + eps) * g1 + be1
    y = jnp.maximum(y, 0.0)
    y = jax.lax.conv_general_dilated(y, w2, (1, 1), "SAME", dimension_numbers=dn)
    y = (y - m2) / jnp.sqrt(v2 + eps) * g2 + be2
    y = jnp.maximum(y + x, 0.0)
    return jnp.transpose(y, (0, 3, 1, 2))


if __name__ == "__main__":
    N, C, H, W = 2, 4, 16, 16          # in_channels == out_channels == 4
    key = jax.random.PRNGKey(0)
    kx, kw1, kw2, kg1, kb1, km1, kv1, kg2, kb2, km2, kv2 = jax.random.split(key, 11)

    x = jax.random.normal(kx, (N, C, H, W), jnp.float32)

    # Conv weights in HWIO layout (3,3,Cin,Cout), no bias (nn.Conv2d bias=False).
    w1 = 0.1 * jax.random.normal(kw1, (3, 3, C, C), jnp.float32)
    w2 = 0.1 * jax.random.normal(kw2, (3, 3, C, C), jnp.float32)

    # Deterministic BatchNorm parameters / running stats (inference mode).
    g1 = 1.0 + 0.1 * jax.random.normal(kg1, (C,), jnp.float32)
    be1 = 0.1 * jax.random.normal(kb1, (C,), jnp.float32)
    m1 = 0.1 * jax.random.normal(km1, (C,), jnp.float32)
    v1 = 1.0 + 0.1 * jax.random.uniform(kv1, (C,), jnp.float32)
    g2 = 1.0 + 0.1 * jax.random.normal(kg2, (C,), jnp.float32)
    be2 = 0.1 * jax.random.normal(kb2, (C,), jnp.float32)
    m2 = 0.1 * jax.random.normal(km2, (C,), jnp.float32)
    v2 = 1.0 + 0.1 * jax.random.uniform(kv2, (C,), jnp.float32)

    # Default row-tile target makes this 16x16 test use 2 row tiles per image,
    # so the halo / multi-tile path is exercised.
    out = basic_block(x, w1, g1, be1, m1, v1, w2, g2, be2, m2, v2)
    out = jax.block_until_ready(out)

    ref = _reference(x, w1, g1, be1, m1, v1, w2, g2, be2, m2, v2)
    assert out.shape == (N, C, H, W)
    # Kernel uses bf16 MXU inputs (per perf review); compare against the f32
    # reference with a bf16-appropriate tolerance.
    assert np.allclose(np.asarray(out), np.asarray(ref), atol=5e-2, rtol=5e-2)

    print("KERNEL_OK")
</pallas_src>

<mosaic_0001>
module attributes {stable_mosaic.version = 11 : i64} {
  func.func @_basic_block_kernel(%arg0: i32, %arg1: i32, %arg2: memref<1x368x128xf32, #tpu.memory_space<vmem>>, %arg3: memref<1152x128xbf16, #tpu.memory_space<vmem>>, %arg4: memref<1x128xf32, #tpu.memory_space<vmem>>, %arg5: memref<1152x128xbf16, #tpu.memory_space<vmem>>, %arg6: memref<1x128xf32, #tpu.memory_space<vmem>>, %arg7: memref<1x144x128xf32, #tpu.memory_space<vmem>>) attributes {dimension_semantics = [#tpu.dimension_semantics<parallel>, #tpu.dimension_semantics<parallel>], iteration_bounds = array<i64: 2, 2>, scalar_prefetch = 0 : i64, scratch_operands = 0 : i64, tpu.core_type = #tpu.core_type<tc>, window_params = [{transform_indices = @transform_0, window_bounds = array<i64: 1, 368, 128>}, {pipeline_mode = #tpu.pipeline_mode<synchronous>, transform_indices = @transform_1, window_bounds = array<i64: 1152, 128>}, {pipeline_mode = #tpu.pipeline_mode<synchronous>, transform_indices = @transform_2, window_bounds = array<i64: 1, 128>}, {pipeline_mode = #tpu.pipeline_mode<synchronous>, transform_indices = @transform_3, window_bounds = array<i64: 1152, 128>}, {pipeline_mode = #tpu.pipeline_mode<synchronous>, transform_indices = @transform_4, window_bounds = array<i64: 1, 128>}, {transform_indices = @transform_5, window_bounds = array<i64: 1, 144, 128>}]} {
    %c144_i32 = arith.constant 144 : i32
    %0 = arith.muli %arg1, %c144_i32 : i32
    %1 = tpu.assume_multiple %0, 8 : i32
    %c0_i32 = arith.constant 0 : i32
    %2 = arith.addi %1, %c0_i32 : i32
    %c0 = arith.constant 0 : index
    %3 = arith.index_cast %2 : i32 to index
    %c0_0 = arith.constant 0 : index
    %4 = vector.load %arg2[%c0, %3, %c0_0] : memref<1x368x128xf32, #tpu.memory_space<vmem>>, vector<1x186x128xf32>
    %5 = vector.shape_cast %4 : vector<1x186x128xf32> to vector<186x128xf32>
    %6 = arith.truncf %5 : vector<186x128xf32> to vector<186x128xbf16>
    %7 = vector.extract_strided_slice %6 {offsets = [0, 0], sizes = [184, 128], strides = [1, 1]} : vector<186x128xbf16> to vector<184x128xbf16>
    %8 = vector.extract_strided_slice %6 {offsets = [1, 0], sizes = [184, 128], strides = [1, 1]} : vector<186x128xbf16> to vector<184x128xbf16>
    %9 = vector.extract_strided_slice %6 {offsets = [2, 0], sizes = [184, 128], strides = [1, 1]} : vector<186x128xbf16> to vector<184x128xbf16>
    %10 = tpu.concatenate %7, %8, %9 in 1 : vector<184x128xbf16>, vector<184x128xbf16>, vector<184x128xbf16> -> vector<184x384xbf16>
    %c0_1 = arith.constant 0 : index
    %c0_2 = arith.constant 0 : index
    %11 = vector.load %arg3[%c0_1, %c0_2] : memref<1152x128xbf16, #tpu.memory_space<vmem>>, vector<384x128xbf16>
    %cst = arith.constant dense<0.000000e+00> : vector<184x128xf32>
    %12 = tpu.matmul %10, %11, %cst {dimension_numbers = #tpu.dot_dimension_numbers<[1], [0], [0], [1], [0, 0, 1, 1], [], []>} : vector<184x384xbf16>, vector<384x128xbf16>, vector<184x128xf32> -> vector<184x128xf32>
    %c18_i32 = arith.constant 18 : i32
    %13 = arith.addi %1, %c18_i32 : i32
    %c0_3 = arith.constant 0 : index
    %14 = arith.index_cast %13 : i32 to index
    %c0_4 = arith.constant 0 : index
    %15 = vector.load %arg2[%c0_3, %14, %c0_4] : memref<1x368x128xf32, #tpu.memory_space<vmem>>, vector<1x186x128xf32>
    %16 = vector.shape_cast %15 : vector<1x186x128xf32> to vector<186x128xf32>
    %17 = arith.truncf %16 : vector<186x128xf32> to vector<186x128xbf16>
    %18 = vector.extract_strided_slice %17 {offsets = [0, 0], sizes = [184, 128], strides = [1, 1]} : vector<186x128xbf16> to vector<184x128xbf16>
    %19 = vector.extract_strided_slice %17 {offsets = [1, 0], sizes = [184, 128], strides = [1, 1]} : vector<186x128xbf16> to vector<184x128xbf16>
    %20 = vector.extract_strided_slice %17 {offsets = [2, 0], sizes = [184, 128], strides = [1, 1]} : vector<186x128xbf16> to vector<184x128xbf16>
    %21 = tpu.concatenate %18, %19, %20 in 1 : vector<184x128xbf16>, vector<184x128xbf16>, vector<184x128xbf16> -> vector<184x384xbf16>
    %c384 = arith.constant 384 : index
    %c0_5 = arith.constant 0 : index
    %22 = vector.load %arg3[%c384, %c0_5] : memref<1152x128xbf16, #tpu.memory_space<vmem>>, vector<384x128xbf16>
    %cst_6 = arith.constant dense<0.000000e+00> : vector<184x128xf32>
    %23 = tpu.matmul %21, %22, %cst_6 {dimension_numbers = #tpu.dot_dimension_numbers<[1], [0], [0], [1], [0, 0, 1, 1], [], []>} : vector<184x384xbf16>, vector<384x128xbf16>, vector<184x128xf32> -> vector<184x128xf32>
    %24 = arith.addf %12, %23 : vector<184x128xf32>
    %c36_i32 = arith.constant 36 : i32
    %25 = arith.addi %1, %c36_i32 : i32
    %c0_7 = arith.constant 0 : index
    %26 = arith.index_cast %25 : i32 to index
    %c0_8 = arith.constant 0 : index
    %27 = vector.load %arg2[%c0_7, %26, %c0_8] : memref<1x368x128xf32, #tpu.memory_space<vmem>>, vector<1x186x128xf32>
    %28 = vector.shape_cast %27 : vector<1x186x128xf32> to vector<186x128xf32>
    %29 = arith.truncf %28 : vector<186x128xf32> to vector<186x128xbf16>
    %30 = vector.extract_strided_slice %29 {offsets = [0, 0], sizes = [184, 128], strides = [1, 1]} : vector<186x128xbf16> to vector<184x128xbf16>
    %31 = vector.extract_strided_slice %29 {offsets = [1, 0], sizes = [184, 128], strides = [1, 1]} : vector<186x128xbf16> to vector<184x128xbf16>
    %32 = vector.extract_strided_slice %29 {offsets = [2, 0], sizes = [184, 128], strides = [1, 1]} : vector<186x128xbf16> to vector<184x128xbf16>
    %33 = tpu.concatenate %30, %31, %32 in 1 : vector<184x128xbf16>, vector<184x128xbf16>, vector<184x128xbf16> -> vector<184x384xbf16>
    %c768 = arith.constant 768 : index
    %c0_9 = arith.constant 0 : index
    %34 = vector.load %arg3[%c768, %c0_9] : memref<1152x128xbf16, #tpu.memory_space<vmem>>, vector<384x128xbf16>
    %cst_10 = arith.constant dense<0.000000e+00> : vector<184x128xf32>
    %35 = tpu.matmul %33, %34, %cst_10 {dimension_numbers = #tpu.dot_dimension_numbers<[1], [0], [0], [1], [0, 0, 1, 1], [], []>} : vector<184x384xbf16>, vector<384x128xbf16>, vector<184x128xf32> -> vector<184x128xf32>
    %36 = arith.addf %24, %35 : vector<184x128xf32>
    %c0_11 = arith.constant 0 : index
    %c0_12 = arith.constant 0 : index
    %37 = vector.load %arg4[%c0_11, %c0_12] : memref<1x128xf32, #tpu.memory_space<vmem>>, vector<1x128xf32>
    %38 = vector.broadcast %37 : vector<1x128xf32> to vector<184x128xf32>
    %39 = arith.addf %36, %38 : vector<184x128xf32>
    %cst_13 = arith.constant 0.000000e+00 : f32
    %40 = vector.broadcast %cst_13 : f32 to vector<184x128xf32>
    %41 = arith.maximumf %39, %40 : vector<184x128xf32>
    %42 = tpu.iota {dimensions = array<i32: 0>} : vector<184x1xi32>
    %c19_i32 = arith.constant 19 : i32
    %43 = arith.subi %1, %c19_i32 : i32
    %44 = vector.broadcast %43 : i32 to vector<184x1xi32>
    %45 = arith.addi %42, %44 : vector<184x1xi32>
    %c0_i32_14 = arith.constant 0 : i32
    %46 = vector.broadcast %c0_i32_14 : i32 to vector<184x1xi32>
    %47 = arith.cmpi sge, %45, %46 : vector<184x1xi32>
    %c288_i32 = arith.constant 288 : i32
    %48 = vector.broadcast %c288_i32 : i32 to vector<184x1xi32>
    %49 = arith.cmpi slt, %45, %48 : vector<184x1xi32>
    %50 = arith.andi %47, %49 : vector<184x1xi1>
    %c18_i32_15 = arith.constant 18 : i32
    %c0_i32_16 = arith.constant 0 : i32
    %51 = arith.cmpi eq, %c18_i32_15, %c0_i32_16 : i32
    %c1_i32 = arith.constant 1 : i32
    %52 = arith.select %51, %c1_i32, %c18_i32_15 : i32
    %53 = vector.broadcast %52 : i32 to vector<184x1xi32>
    %54 = arith.remsi %45, %53 : vector<184x1xi32>
    %c0_i32_17 = arith.constant 0 : i32
    %55 = vector.broadcast %c0_i32_17 : i32 to vector<184x1xi32>
    %56 = arith.cmpi ne, %54, %55 : vector<184x1xi32>
    %c0_i32_18 = arith.constant 0 : i32
    %57 = vector.broadcast %c0_i32_18 : i32 to vector<184x1xi32>
    %58 = arith.cmpi slt, %54, %57 : vector<184x1xi32>
    %c0_i32_19 = arith.constant 0 : i32
    %59 = arith.cmpi slt, %52, %c0_i32_19 : i32
    %60 = vector.broadcast %59 : i1 to vector<184x1xi1>
    %61 = vector.broadcast %60 : vector<184x1xi1> to vector<184x1xi1>
    %62 = arith.xori %58, %61 : vector<184x1xi1>
    %63 = arith.andi %62, %56 : vector<184x1xi1>
    %64 = vector.broadcast %52 : i32 to vector<184x1xi32>
    %65 = arith.addi %54, %64 : vector<184x1xi32>
    %66 = arith.select %63, %65, %54 : vector<184x1xi1>, vector<184x1xi32>
    %c16_i32 = arith.constant 16 : i32
    %67 = vector.broadcast %c16_i32 : i32 to vector<184x1xi32>
    %68 = arith.cmpi slt, %66, %67 : vector<184x1xi32>
    %69 = arith.andi %50, %68 : vector<184x1xi1>
    %cst_20 = arith.constant 0.000000e+00 : f32
    %70 = vector.shape_cast %69 : vector<184x1xi1> to vector<184x1xi1>
    %71 = vector.broadcast %70 : vector<184x1xi1> to vector<184x128xi1>
    %72 = vector.broadcast %cst_20 : f32 to vector<184x128xf32>
    %73 = arith.select %71, %41, %72 : vector<184x128xi1>, vector<184x128xf32>
    %74 = arith.truncf %73 : vector<184x128xf32> to vector<184x128xbf16>
    %75 = vector.extract_strided_slice %74 {offsets = [0, 0], sizes = [144, 128], strides = [1, 1]} : vector<184x128xbf16> to vector<144x128xbf16>
    %76 = vector.extract_strided_slice %74 {offsets = [1, 0], sizes = [144, 128], strides = [1, 1]} : vector<184x128xbf16> to vector<144x128xbf16>
    %77 = vector.extract_strided_slice %74 {offsets = [2, 0], sizes = [144, 128], strides = [1, 1]} : vector<184x128xbf16> to vector<144x128xbf16>
    %78 = tpu.concatenate %75, %76, %77 in 1 : vector<144x128xbf16>, vector<144x128xbf16>, vector<144x128xbf16> -> vector<144x384xbf16>
    %c0_21 = arith.constant 0 : index
    %c0_22 = arith.constant 0 : index
    %79 = vector.load %arg5[%c0_21, %c0_22] : memref<1152x128xbf16, #tpu.memory_space<vmem>>, vector<384x128xbf16>
    %cst_23 = arith.constant dense<0.000000e+00> : vector<144x128xf32>
    %80 = tpu.matmul %78, %79, %cst_23 {dimension_numbers = #tpu.dot_dimension_numbers<[1], [0], [0], [1], [0, 0, 1, 1], [], []>} : vector<144x384xbf16>, vector<384x128xbf16>, vector<144x128xf32> -> vector<144x128xf32>
    %81 = vector.extract_strided_slice %74 {offsets = [18, 0], sizes = [144, 128], strides = [1, 1]} : vector<184x128xbf16> to vector<144x128xbf16>
    %82 = vector.extract_strided_slice %74 {offsets = [19, 0], sizes = [144, 128], strides = [1, 1]} : vector<184x128xbf16> to vector<144x128xbf16>
    %83 = vector.extract_strided_slice %74 {offsets = [20, 0], sizes = [144, 128], strides = [1, 1]} : vector<184x128xbf16> to vector<144x128xbf16>
    %84 = tpu.concatenate %81, %82, %83 in 1 : vector<144x128xbf16>, vector<144x128xbf16>, vector<144x128xbf16> -> vector<144x384xbf16>
    %c384_24 = arith.constant 384 : index
    %c0_25 = arith.constant 0 : index
    %85 = vector.load %arg5[%c384_24, %c0_25] : memref<1152x128xbf16, #tpu.memory_space<vmem>>, vector<384x128xbf16>
    %cst_26 = arith.constant dense<0.000000e+00> : vector<144x128xf32>
    %86 = tpu.matmul %84, %85, %cst_26 {dimension_numbers = #tpu.dot_dimension_numbers<[1], [0], [0], [1], [0, 0, 1, 1], [], []>} : vector<144x384xbf16>, vector<384x128xbf16>, vector<144x128xf32> -> vector<144x128xf32>
    %87 = arith.addf %80, %86 : vector<144x128xf32>
    %88 = vector.extract_strided_slice %74 {offsets = [36, 0], sizes = [144, 128], strides = [1, 1]} : vector<184x128xbf16> to vector<144x128xbf16>
    %89 = vector.extract_strided_slice %74 {offsets = [37, 0], sizes = [144, 128], strides = [1, 1]} : vector<184x128xbf16> to vector<144x128xbf16>
    %90 = vector.extract_strided_slice %74 {offsets = [38, 0], sizes = [144, 128], strides = [1, 1]} : vector<184x128xbf16> to vector<144x128xbf16>
    %91 = tpu.concatenate %88, %89, %90 in 1 : vector<144x128xbf16>, vector<144x128xbf16>, vector<144x128xbf16> -> vector<144x384xbf16>
    %c768_27 = arith.constant 768 : index
    %c0_28 = arith.constant 0 : index
    %92 = vector.load %arg5[%c768_27, %c0_28] : memref<1152x128xbf16, #tpu.memory_space<vmem>>, vector<384x128xbf16>
    %cst_29 = arith.constant dense<0.000000e+00> : vector<144x128xf32>
    %93 = tpu.matmul %91, %92, %cst_29 {dimension_numbers = #tpu.dot_dimension_numbers<[1], [0], [0], [1], [0, 0, 1, 1], [], []>} : vector<144x384xbf16>, vector<384x128xbf16>, vector<144x128xf32> -> vector<144x128xf32>
    %94 = arith.addf %87, %93 : vector<144x128xf32>
    %c36_i32_30 = arith.constant 36 : i32
    %95 = arith.addi %1, %c36_i32_30 : i32
    %c2_i32 = arith.constant 2 : i32
    %96 = arith.addi %95, %c2_i32 : i32
    %c0_31 = arith.constant 0 : index
    %97 = arith.index_cast %96 : i32 to index
    %c0_32 = arith.constant 0 : index
    %98 = vector.load %arg2[%c0_31, %97, %c0_32] : memref<1x368x128xf32, #tpu.memory_space<vmem>>, vector<1x144x128xf32>
    %99 = vector.shape_cast %98 : vector<1x144x128xf32> to vector<144x128xf32>
    %c0_33 = arith.constant 0 : index
    %c0_34 = arith.constant 0 : index
    %100 = vector.load %arg6[%c0_33, %c0_34] : memref<1x128xf32, #tpu.memory_space<vmem>>, vector<1x128xf32>
    %101 = vector.broadcast %100 : vector<1x128xf32> to vector<144x128xf32>
    %102 = arith.addf %94, %101 : vector<144x128xf32>
    %103 = arith.addf %102, %99 : vector<144x128xf32>
    %cst_35 = arith.constant 0.000000e+00 : f32
    %104 = vector.broadcast %cst_35 : f32 to vector<144x128xf32>
    %105 = arith.maximumf %103, %104 : vector<144x128xf32>
    %c0_36 = arith.constant 0 : index
    %c0_37 = arith.constant 0 : index
    %c0_38 = arith.constant 0 : index
    %106 = vector.load %arg7[%c0_36, %c0_37, %c0_38] : memref<1x144x128xf32, #tpu.memory_space<vmem>>, vector<1x144x128xf32>
    %107 = vector.shape_cast %106 : vector<1x144x128xf32> to vector<144x128xf32>
    %108 = vector.shape_cast %105 : vector<144x128xf32> to vector<1x144x128xf32>
    tpu.vector_store %arg7[%c0_36, %c0_37, %c0_38], %108 {strides = array<i32>} : memref<1x144x128xf32, #tpu.memory_space<vmem>>, vector<1x144x128xf32>,
    return
  }
  func.func @transform_0(%arg0: i32, %arg1: i32) -> (i32, i32, i32) {
    %c0_i32 = arith.constant 0 : i32
    %c0_i32_0 = arith.constant 0 : i32
    %c0_i32_1 = arith.constant 0 : i32
    return %arg0, %c0_i32, %c0_i32_0 : i32, i32, i32
  }
  func.func @transform_1(%arg0: i32, %arg1: i32) -> (i32, i32) {
    %c0_i32 = arith.constant 0 : i32
    %c0_i32_0 = arith.constant 0 : i32
    %c0_i32_1 = arith.constant 0 : i32
    return %c0_i32, %c0_i32_0 : i32, i32
  }
  func.func @transform_2(%arg0: i32, %arg1: i32) -> (i32, i32) {
    %c0_i32 = arith.constant 0 : i32
    %c0_i32_0 = arith.constant 0 : i32
    %c0_i32_1 = arith.constant 0 : i32
    return %c0_i32, %c0_i32_0 : i32, i32
  }
  func.func @transform_3(%arg0: i32, %arg1: i32) -> (i32, i32) {
    %c0_i32 = arith.constant 0 : i32
    %c0_i32_0 = arith.constant 0 : i32
    %c0_i32_1 = arith.constant 0 : i32
    return %c0_i32, %c0_i32_0 : i32, i32
  }
  func.func @transform_4(%arg0: i32, %arg1: i32) -> (i32, i32) {
    %c0_i32 = arith.constant 0 : i32
    %c0_i32_0 = arith.constant 0 : i32
    %c0_i32_1 = arith.constant 0 : i32
    return %c0_i32, %c0_i32_0 : i32, i32
  }
  func.func @transform_5(%arg0: i32, %arg1: i32) -> (i32, i32, i32) {
    %c0_i32 = arith.constant 0 : i32
    %c0_i32_0 = arith.constant 0 : i32
    return %arg0, %arg1, %c0_i32 : i32, i32, i32
  }
}

module attributes {stable_mosaic.version = 11 : i64} {
  func.func @_basic_block_kernel(%arg0: i32, %arg1: i32, %arg2: memref<1x368x128xf32, #tpu.memory_space<vmem>>, %arg3: memref<1152x128xbf16, #tpu.memory_space<vmem>>, %arg4: memref<1x128xf32, #tpu.memory_space<vmem>>, %arg5: memref<1152x128xbf16, #tpu.memory_space<vmem>>, %arg6: memref<1x128xf32, #tpu.memory_space<vmem>>, %arg7: memref<1x144x128xf32, #tpu.memory_space<vmem>>) attributes {dimension_semantics = [#tpu.dimension_semantics<parallel>, #tpu.dimension_semantics<parallel>], iteration_bounds = array<i64: 2, 2>, scalar_prefetch = 0 : i64, scratch_operands = 0 : i64, tpu.core_type = #tpu.core_type<tc>, window_params = [{transform_indices = @transform_0, window_bounds = array<i64: 1, 368, 128>}, {pipeline_mode = #tpu.pipeline_mode<synchronous>, transform_indices = @transform_1, window_bounds = array<i64: 1152, 128>}, {pipeline_mode = #tpu.pipeline_mode<synchronous>, transform_indices = @transform_2, window_bounds = array<i64: 1, 128>}, {pipeline_mode = #tpu.pipeline_mode<synchronous>, transform_indices = @transform_3, window_bounds = array<i64: 1152, 128>}, {pipeline_mode = #tpu.pipeline_mode<synchronous>, transform_indices = @transform_4, window_bounds = array<i64: 1, 128>}, {transform_indices = @transform_5, window_bounds = array<i64: 1, 144, 128>}]} {
    %c144_i32 = arith.constant 144 : i32
    %0 = arith.muli %arg1, %c144_i32 : i32
    %1 = tpu.assume_multiple %0, 8 : i32
    %c0_i32 = arith.constant 0 : i32
    %2 = arith.addi %1, %c0_i32 : i32
    %c0 = arith.constant 0 : index
    %3 = arith.index_cast %2 : i32 to index
    %c0_0 = arith.constant 0 : index
    %4 = vector.load %arg2[%c0, %3, %c0_0] : memref<1x368x128xf32, #tpu.memory_space<vmem>>, vector<1x186x128xf32>
    %5 = vector.shape_cast %4 : vector<1x186x128xf32> to vector<186x128xf32>
    %6 = arith.truncf %5 : vector<186x128xf32> to vector<186x128xbf16>
    %7 = vector.extract_strided_slice %6 {offsets = [0, 0], sizes = [184, 128], strides = [1, 1]} : vector<186x128xbf16> to vector<184x128xbf16>
    %8 = vector.extract_strided_slice %6 {offsets = [1, 0], sizes = [184, 128], strides = [1, 1]} : vector<186x128xbf16> to vector<184x128xbf16>
    %9 = vector.extract_strided_slice %6 {offsets = [2, 0], sizes = [184, 128], strides = [1, 1]} : vector<186x128xbf16> to vector<184x128xbf16>
    %10 = tpu.concatenate %7, %8, %9 in 1 : vector<184x128xbf16>, vector<184x128xbf16>, vector<184x128xbf16> -> vector<184x384xbf16>
    %c0_1 = arith.constant 0 : index
    %c0_2 = arith.constant 0 : index
    %11 = vector.load %arg3[%c0_1, %c0_2] : memref<1152x128xbf16, #tpu.memory_space<vmem>>, vector<384x128xbf16>
    %cst = arith.constant dense<0.000000e+00> : vector<184x128xf32>
    %12 = tpu.matmul %10, %11, %cst {dimension_numbers = #tpu.dot_dimension_numbers<[1], [0], [0], [1], [0, 0, 1, 1], [], []>} : vector<184x384xbf16>, vector<384x128xbf16>, vector<184x128xf32> -> vector<184x128xf32>
    %c18_i32 = arith.constant 18 : i32
    %13 = arith.addi %1, %c18_i32 : i32
    %c0_3 = arith.constant 0 : index
    %14 = arith.index_cast %13 : i32 to index
    %c0_4 = arith.constant 0 : index
    %15 = vector.load %arg2[%c0_3, %14, %c0_4] : memref<1x368x128xf32, #tpu.memory_space<vmem>>, vector<1x186x128xf32>
    %16 = vector.shape_cast %15 : vector<1x186x128xf32> to vector<186x128xf32>
    %17 = arith.truncf %16 : vector<186x128xf32> to vector<186x128xbf16>
    %18 = vector.extract_strided_slice %17 {offsets = [0, 0], sizes = [184, 128], strides = [1, 1]} : vector<186x128xbf16> to vector<184x128xbf16>
    %19 = vector.extract_strided_slice %17 {offsets = [1, 0], sizes = [184, 128], strides = [1, 1]} : vector<186x128xbf16> to vector<184x128xbf16>
    %20 = vector.extract_strided_slice %17 {offsets = [2, 0], sizes = [184, 128], strides = [1, 1]} : vector<186x128xbf16> to vector<184x128xbf16>
    %21 = tpu.concatenate %18, %19, %20 in 1 : vector<184x128xbf16>, vector<184x128xbf16>, vector<184x128xbf16> -> vector<184x384xbf16>
    %c384 = arith.constant 384 : index
    %c0_5 = arith.constant 0 : index
    %22 = vector.load %arg3[%c384, %c0_5] : memref<1152x128xbf16, #tpu.memory_space<vmem>>, vector<384x128xbf16>
    %cst_6 = arith.constant dense<0.000000e+00> : vector<184x128xf32>
    %23 = tpu.matmul %21, %22, %cst_6 {dimension_numbers = #tpu.dot_dimension_numbers<[1], [0], [0], [1], [0, 0, 1, 1], [], []>} : vector<184x384xbf16>, vector<384x128xbf16>, vector<184x128xf32> -> vector<184x128xf32>
    %24 = arith.addf %12, %23 : vector<184x128xf32>
    %c36_i32 = arith.constant 36 : i32
    %25 = arith.addi %1, %c36_i32 : i32
    %c0_7 = arith.constant 0 : index
    %26 = arith.index_cast %25 : i32 to index
    %c0_8 = arith.constant 0 : index
    %27 = vector.load %arg2[%c0_7, %26, %c0_8] : memref<1x368x128xf32, #tpu.memory_space<vmem>>, vector<1x186x128xf32>
    %28 = vector.shape_cast %27 : vector<1x186x128xf32> to vector<186x128xf32>
    %29 = arith.truncf %28 : vector<186x128xf32> to vector<186x128xbf16>
    %30 = vector.extract_strided_slice %29 {offsets = [0, 0], sizes = [184, 128], strides = [1, 1]} : vector<186x128xbf16> to vector<184x128xbf16>
    %31 = vector.extract_strided_slice %29 {offsets = [1, 0], sizes = [184, 128], strides = [1, 1]} : vector<186x128xbf16> to vector<184x128xbf16>
    %32 = vector.extract_strided_slice %29 {offsets = [2, 0], sizes = [184, 128], strides = [1, 1]} : vector<186x128xbf16> to vector<184x128xbf16>
    %33 = tpu.concatenate %30, %31, %32 in 1 : vector<184x128xbf16>, vector<184x128xbf16>, vector<184x128xbf16> -> vector<184x384xbf16>
    %c768 = arith.constant 768 : index
    %c0_9 = arith.constant 0 : index
    %34 = vector.load %arg3[%c768, %c0_9] : memref<1152x128xbf16, #tpu.memory_space<vmem>>, vector<384x128xbf16>
    %cst_10 = arith.constant dense<0.000000e+00> : vector<184x128xf32>
    %35 = tpu.matmul %33, %34, %cst_10 {dimension_numbers = #tpu.dot_dimension_numbers<[1], [0], [0], [1], [0, 0, 1, 1], [], []>} : vector<184x384xbf16>, vector<384x128xbf16>, vector<184x128xf32> -> vector<184x128xf32>
    %36 = arith.addf %24, %35 : vector<184x128xf32>
    %c0_11 = arith.constant 0 : index
    %c0_12 = arith.constant 0 : index
    %37 = vector.load %arg4[%c0_11, %c0_12] : memref<1x128xf32, #tpu.memory_space<vmem>>, vector<1x128xf32>
    %38 = vector.broadcast %37 : vector<1x128xf32> to vector<184x128xf32>
    %39 = arith.addf %36, %38 : vector<184x128xf32>
    %cst_13 = arith.constant 0.000000e+00 : f32
    %40 = vector.broadcast %cst_13 : f32 to vector<184x128xf32>
    %41 = arith.maximumf %39, %40 : vector<184x128xf32>
    %42 = tpu.iota {dimensions = array<i32: 0>} : vector<184x1xi32>
    %c19_i32 = arith.constant 19 : i32
    %43 = arith.subi %1, %c19_i32 : i32
    %44 = vector.broadcast %43 : i32 to vector<184x1xi32>
    %45 = arith.addi %42, %44 : vector<184x1xi32>
    %c0_i32_14 = arith.constant 0 : i32
    %46 = vector.broadcast %c0_i32_14 : i32 to vector<184x1xi32>
    %47 = arith.cmpi sge, %45, %46 : vector<184x1xi32>
    %c288_i32 = arith.constant 288 : i32
    %48 = vector.broadcast %c288_i32 : i32 to vector<184x1xi32>
    %49 = arith.cmpi slt, %45, %48 : vector<184x1xi32>
    %50 = arith.andi %47, %49 : vector<184x1xi1>
    %c18_i32_15 = arith.constant 18 : i32
    %c0_i32_16 = arith.constant 0 : i32
    %51 = arith.cmpi eq, %c18_i32_15, %c0_i32_16 : i32
    %c1_i32 = arith.constant 1 : i32
    %52 = arith.select %51, %c1_i32, %c18_i32_15 : i32
    %53 = vector.broadcast %52 : i32 to vector<184x1xi32>
    %54 = arith.remsi %45, %53 : vector<184x1xi32>
    %c0_i32_17 = arith.constant 0 : i32
    %55 = vector.broadcast %c0_i32_17 : i32 to vector<184x1xi32>
    %56 = arith.cmpi ne, %54, %55 : vector<184x1xi32>
    %c0_i32_18 = arith.constant 0 : i32
    %57 = vector.broadcast %c0_i32_18 : i32 to vector<184x1xi32>
    %58 = arith.cmpi slt, %54, %57 : vector<184x1xi32>
    %c0_i32_19 = arith.constant 0 : i32
    %59 = arith.cmpi slt, %52, %c0_i32_19 : i32
    %60 = vector.broadcast %59 : i1 to vector<184x1xi1>
    %61 = vector.broadcast %60 : vector<184x1xi1> to vector<184x1xi1>
    %62 = arith.xori %58, %61 : vector<184x1xi1>
    %63 = arith.andi %62, %56 : vector<184x1xi1>
    %64 = vector.broadcast %52 : i32 to vector<184x1xi32>
    %65 = arith.addi %54, %64 : vector<184x1xi32>
    %66 = arith.select %63, %65, %54 : vector<184x1xi1>, vector<184x1xi32>
    %c16_i32 = arith.constant 16 : i32
    %67 = vector.broadcast %c16_i32 : i32 to vector<184x1xi32>
    %68 = arith.cmpi slt, %66, %67 : vector<184x1xi32>
    %69 = arith.andi %50, %68 : vector<184x1xi1>
    %cst_20 = arith.constant 0.000000e+00 : f32
    %70 = vector.shape_cast %69 : vector<184x1xi1> to vector<184x1xi1>
    %71 = vector.broadcast %70 : vector<184x1xi1> to vector<184x128xi1>
    %72 = vector.broadcast %cst_20 : f32 to vector<184x128xf32>
    %73 = arith.select %71, %41, %72 : vector<184x128xi1>, vector<184x128xf32>
    %74 = arith.truncf %73 : vector<184x128xf32> to vector<184x128xbf16>
    %75 = vector.extract_strided_slice %74 {offsets = [0, 0], sizes = [144, 128], strides = [1, 1]} : vector<184x128xbf16> to vector<144x128xbf16>
    %76 = vector.extract_strided_slice %74 {offsets = [1, 0], sizes = [144, 128], strides = [1, 1]} : vector<184x128xbf16> to vector<144x128xbf16>
    %77 = vector.extract_strided_slice %74 {offsets = [2, 0], sizes = [144, 128], strides = [1, 1]} : vector<184x128xbf16> to vector<144x128xbf16>
    %78 = tpu.concatenate %75, %76, %77 in 1 : vector<144x128xbf16>, vector<144x128xbf16>, vector<144x128xbf16> -> vector<144x384xbf16>
    %c0_21 = arith.constant 0 : index
    %c0_22 = arith.constant 0 : index
    %79 = vector.load %arg5[%c0_21, %c0_22] : memref<1152x128xbf16, #tpu.memory_space<vmem>>, vector<384x128xbf16>
    %cst_23 = arith.constant dense<0.000000e+00> : vector<144x128xf32>
    %80 = tpu.matmul %78, %79, %cst_23 {dimension_numbers = #tpu.dot_dimension_numbers<[1], [0], [0], [1], [0, 0, 1, 1], [], []>} : vector<144x384xbf16>, vector<384x128xbf16>, vector<144x128xf32> -> vector<144x128xf32>
    %81 = vector.extract_strided_slice %74 {offsets = [18, 0], sizes = [144, 128], strides = [1, 1]} : vector<184x128xbf16> to vector<144x128xbf16>
    %82 = vector.extract_strided_slice %74 {offsets = [19, 0], sizes = [144, 128], strides = [1, 1]} : vector<184x128xbf16> to vector<144x128xbf16>
    %83 = vector.extract_strided_slice %74 {offsets = [20, 0], sizes = [144, 128], strides = [1, 1]} : vector<184x128xbf16> to vector<144x128xbf16>
    %84 = tpu.concatenate %81, %82, %83 in 1 : vector<144x128xbf16>, vector<144x128xbf16>, vector<144x128xbf16> -> vector<144x384xbf16>
    %c384_24 = arith.constant 384 : index
    %c0_25 = arith.constant 0 : index
    %85 = vector.load %arg5[%c384_24, %c0_25] : memref<1152x128xbf16, #tpu.memory_space<vmem>>, vector<384x128xbf16>
    %cst_26 = arith.constant dense<0.000000e+00> : vector<144x128xf32>
    %86 = tpu.matmul %84, %85, %cst_26 {dimension_numbers = #tpu.dot_dimension_numbers<[1], [0], [0], [1], [0, 0, 1, 1], [], []>} : vector<144x384xbf16>, vector<384x128xbf16>, vector<144x128xf32> -> vector<144x128xf32>
    %87 = arith.addf %80, %86 : vector<144x128xf32>
    %88 = vector.extract_strided_slice %74 {offsets = [36, 0], sizes = [144, 128], strides = [1, 1]} : vector<184x128xbf16> to vector<144x128xbf16>
    %89 = vector.extract_strided_slice %74 {offsets = [37, 0], sizes = [144, 128], strides = [1, 1]} : vector<184x128xbf16> to vector<144x128xbf16>
    %90 = vector.extract_strided_slice %74 {offsets = [38, 0], sizes = [144, 128], strides = [1, 1]} : vector<184x128xbf16> to vector<144x128xbf16>
    %91 = tpu.concatenate %88, %89, %90 in 1 : vector<144x128xbf16>, vector<144x128xbf16>, vector<144x128xbf16> -> vector<144x384xbf16>
    %c768_27 = arith.constant 768 : index
    %c0_28 = arith.constant 0 : index
    %92 = vector.load %arg5[%c768_27, %c0_28] : memref<1152x128xbf16, #tpu.memory_space<vmem>>, vector<384x128xbf16>
    %cst_29 = arith.constant dense<0.000000e+00> : vector<144x128xf32>
    %93 = tpu.matmul %91, %92, %cst_29 {dimension_numbers = #tpu.dot_dimension_numbers<[1], [0], [0], [1], [0, 0, 1, 1], [], []>} : vector<144x384xbf16>, vector<384x128xbf16>, vector<144x128xf32> -> vector<144x128xf32>
    %94 = arith.addf %87, %93 : vector<144x128xf32>
    %c36_i32_30 = arith.constant 36 : i32
    %95 = arith.addi %1, %c36_i32_30 : i32
    %c2_i32 = arith.constant 2 : i32
    %96 = arith.addi %95, %c2_i32 : i32
    %c0_31 = arith.constant 0 : index
    %97 = arith.index_cast %96 : i32 to index
    %c0_32 = arith.constant 0 : index
    %98 = vector.load %arg2[%c0_31, %97, %c0_32] : memref<1x368x128xf32, #tpu.memory_space<vmem>>, vector<1x144x128xf32>
    %99 = vector.shape_cast %98 : vector<1x144x128xf32> to vector<144x128xf32>
    %c0_33 = arith.constant 0 : index
    %c0_34 = arith.constant 0 : index
    %100 = vector.load %arg6[%c0_33, %c0_34] : memref<1x128xf32, #tpu.memory_space<vmem>>, vector<1x128xf32>
    %101 = vector.broadcast %100 : vector<1x128xf32> to vector<144x128xf32>
    %102 = arith.addf %94, %101 : vector<144x128xf32>
    %103 = arith.addf %102, %99 : vector<144x128xf32>
    %cst_35 = arith.constant 0.000000e+00 : f32
    %104 = vector.broadcast %cst_35 : f32 to vector<144x128xf32>
    %105 = arith.maximumf %103, %104 : vector<144x128xf32>
    %c0_36 = arith.constant 0 : index
    %c0_37 = arith.constant 0 : index
    %c0_38 = arith.constant 0 : index
    %106 = vector.load %arg7[%c0_36, %c0_37, %c0_38] : memref<1x144x128xf32, #tpu.memory_space<vmem>>, vector<1x144x128xf32>
    %107 = vector.shape_cast %106 : vector<1x144x128xf32> to vector<144x128xf32>
    %108 = vector.shape_cast %105 : vector<144x128xf32> to vector<1x144x128xf32>
    tpu.vector_store %arg7[%c0_36, %c0_37, %c0_38], %108 {strides = array<i32>} : memref<1x144x128xf32, #tpu.memory_space<vmem>>, vector<1x144x128xf32>,
    return
  }
  func.func @transform_0(%arg0: i32, %arg1: i32) -> (i32, i32, i32) {
    %c0_i32 = arith.constant 0 : i32
    %c0_i32_0 = arith.constant 0 : i32
    %c0_i32_1 = arith.constant 0 : i32
    return %arg0, %c0_i32, %c0_i32_0 : i32, i32, i32
  }
  func.func @transform_1(%arg0: i32, %arg1: i32) -> (i32, i32) {
    %c0_i32 = arith.constant 0 : i32
    %c0_i32_0 = arith.constant 0 : i32
    %c0_i32_1 = arith.constant 0 : i32
    return %c0_i32, %c0_i32_0 : i32, i32
  }
  func.func @transform_2(%arg0: i32, %arg1: i32) -> (i32, i32) {
    %c0_i32 = arith.constant 0 : i32
    %c0_i32_0 = arith.constant 0 : i32
    %c0_i32_1 = arith.constant 0 : i32
    return %c0_i32, %c0_i32_0 : i32, i32
  }
  func.func @transform_3(%arg0: i32, %arg1: i32) -> (i32, i32) {
    %c0_i32 = arith.constant 0 : i32
    %c0_i32_0 = arith.constant 0 : i32
    %c0_i32_1 = arith.constant 0 : i32
    return %c0_i32, %c0_i32_0 : i32, i32
  }
  func.func @transform_4(%arg0: i32, %arg1: i32) -> (i32, i32) {
    %c0_i32 = arith.constant 0 : i32
    %c0_i32_0 = arith.constant 0 : i32
    %c0_i32_1 = arith.constant 0 : i32
    return %c0_i32, %c0_i32_0 : i32, i32
  }
  func.func @transform_5(%arg0: i32, %arg1: i32) -> (i32, i32, i32) {
    %c0_i32 = arith.constant 0 : i32
    %c0_i32_0 = arith.constant 0 : i32
    return %arg0, %arg1, %c0_i32 : i32, i32, i32
  }
}

</mosaic_0001>

<bundles_post_ra>
// kernel: tpu_custom_call.1
= control target key start
LH: loop header
LB: loop body
LE: loop exit
PB: predicated region body
PF: predicated region fallthrough
CT: control target
= control target key end

     0   :  { %s9628_s0 = inlined_call_operand.hbm [shape: f32[2,368,128], index: 0, kind: input, shape index: {}]   ;;  %s9629_s1 = inlined_call_operand.hbm [shape: bf16[1152,128], index: 1, kind: input, shape index: {}]   ;;  %s9630_s2 = inlined_call_operand.vmem [shape: f32[1,128], index: 2, kind: input, shape index: {}]   ;;  %s9631_s3 = inlined_call_operand.hbm [shape: bf16[1152,128], index: 3, kind: input, shape index: {}]   ;;  %s9632_s4 = inlined_call_operand.vmem [shape: f32[1,128], index: 4, kind: input, shape index: {}]   ;;  %s9633_s5 = inlined_call_operand.hbm [shape: f32[2,288,128], index: 5, kind: output, shape index: {}]  }
   0x1   :  { %9771 = sst [smem:[#allocation70_spill]] %s9629_s1 }
   0x2   :  { %9772 = sst [smem:[#allocation71_spill]] %s9631_s3 }
   0x3   :  { %9773 = sst [smem:[#allocation72_spill]] %s9633_s5 }
   0x4   :  { %10 = vsyncpa [#allocation3], 0 }
   0x5   :  { %12 = vsyncpa [#allocation3 + $0x1], 0 }
   0x6   :  { %13 = vsyncpa [#allocation6], 0 }
   0x7   :  { %14 = vsyncpa [#allocation4], 0 }
   0x8   :  { %16 = vsyncpa [#allocation4 + $0x1], 0  ;;  %s6373_s18 = smov 0   ;;  %s6375_s19 = smov 0  }
   0x9   :  { %s6377_s20 = smov 0   ;;  %s6379_s21 = smov 0  }
   0xa   :  { %s6381_s22 = smov 0   ;;  %s6383_s23 = smov 0  }
   0xb   :  { %s6385_s24 = smov 0   ;;  %s6387_s25 = smov 0  }
   0xc   :  { %s6389_s26 = smov 0   ;;  %s6391_s27 = smov 0  }
   0xd   :  { %s6393_s28 = smov 0  }
   0xe LB: > { %9774 = sst [smem:[#allocation12_spill]] %s6289_s18  ;;  %s4645_s29 = sadd.s32 4294967295, %s6329_s28   ;;  %s6329_s28 = sphi %s6393_s28, %s22_s28   ;;  %s6325_s27 = sphi %s6391_s27, %s10418_s27   ;;  %s6321_s26 = sphi %s6389_s26, %s10410_s26   ;;  %s6317_s25 = sphi %s6387_s25, %s10417_s25   ;;  %s6313_s24 = sphi %s6385_s24, %s10409_s24   ;;  %s6309_s23 = sphi %s6383_s23, %s10416_s23   ;;  %s6305_s22 = sphi %s6381_s22, %s10415_s22   ;;  %s6301_s21 = sphi %s6379_s21, %s10414_s21   ;;  %s6297_s20 = sphi %s6377_s20, %s10413_s20   ;;  %s6293_s19 = sphi %s6375_s19, %s10412_s19   ;;  %s6289_s18 = sphi %s6373_s18, %s10411_s18  }
   0xf   : > { %9775 = sst [smem:[#allocation13_spill]] %s6317_s25  ;;  %s4646_s30 = sadd.s32 4294967294, %s6329_s28  }
  0x10   : > { %9776 = sst [smem:[#allocation14_spill]] %s6321_s26  ;;  %p54_p0 = scmp.ne.s32.totalorder %s6305_s22, %s6301_s21 }
  0x11   : > { %p6429_p1 = scmp.eq.s32.totalorder %s4645_s29, 0  ;;  %p163_p2 = scmp.ne.s32.totalorder %s6297_s20, %s6293_s19 }
  0x12   : > { %p164_p4 = scmp.eq.s32.totalorder %s4645_s29, 3  ;;  %p169_p5 = scmp.ne.s32.totalorder %s6293_s19, %s6289_s18 }
  0x13   : > { %s9777_s6 = scalar_select %p6429_p1, 1, 0 }
  0x14   : > { %p6438_p3 = por %p6429_p1, %p54_p0  ;;  %p170_p6 = scmp.eq.s32.totalorder %s4646_s30, 3 }
  0x15   : > { %p6444_p7 = por %p164_p4, %p163_p2  ;;  %p4647_p8 = scmp.ge.s32.totalorder %s6329_s28, 1 }
  0x16   : > { %p6449_p9 = por %p170_p6, %p169_p5  ;;  %p177_p10 = scmp.lt.s32.totalorder %s6329_s28, 5 }
  0x17   : > { %s9779_s9 = scalar_select %p6444_p7, 1, 0 }
  0x18   : > { %s9781_s10 = scalar_select %p6449_p9, 1, 0 }
  0x19   : > { %9780 = sst [smem:[#allocation15_spill]] %s9779_s9  ;;  %p6454_p11 = pnand %p4647_p8, %p177_p10 }
  0x1a   : > { %9782 = sst [smem:[#allocation16_spill]] %s9781_s10  ;;  %s6331_s12 = smov [#allocation5]  }
  0x1b   : > { %s189_s13 = sshll.u32 %s6331_s12, 4  ;;  %p5861_p12 = pneg %p6454_p11  ;;  %s190_s13 = int_to_ptr.vmem [resolvable:$true] %s189_s13 }
  0x1c   : > { %s6332_s15 = smov [#allocation7]   ;;  %s6136_s17 = scalar_lea.vmem %s190_s13, 9216 }
  0x1d   : > { %p6462_p13 = pnand %p5861_p12, %p6429_p1  ;;  %s205_s16 = sshll.u32 %s6332_s15, 4  ;;  %s206_s16 = int_to_ptr.vmem [resolvable:$true] %s205_s16 }
  0x1e   : > { %p6137_p2 = scmp.ne.s32.totalorder %s190_s13, %s6136_s17  ;;  %p6144_p6 = scmp.lt.s32.totalorder %s190_s13, %s190_s13 }
  0x1f   : > { %p6127_p0 = pneg %p6462_p13  ;;  %p6145_p8 = scmp.lt.s32.totalorder %s6136_s17, %s6136_s17 }
  0x21   : > { %p6139_p4 = pnand %p6137_p2, %p6127_p0  ;;  %p6146_p10 = por %p6145_p8, %p6144_p6 }
  0x23   : > { %p6140_p5 = pneg %p6139_p4 }
  0x25   : > { %p6147_p12 = pnand %p6146_p10, %p6140_p5 }
  0x27   : > { %6150 = shalt.err (!%p6147_p12)
}
  0x28   : > { %s6333_s21 = smov 64   ;;  %s6334_s29 = smov 4  }
  0x29   : > { %s9785_s1 = sld [smem:[#allocation70_spill]]  ;;  %s6162_s15 = scalar_lea.vmem %s206_s16, 9216 }
  0x2a   : > { %p6163_p9 = scmp.ne.s32.totalorder %s206_s16, %s6162_s15  ;;  %p6170_p7 = scmp.lt.s32.totalorder %s206_s16, %s206_s16 }
  0x2b   : > { %p6171_p1 = scmp.lt.s32.totalorder %s6162_s15, %s6162_s15 }
  0x2c   : > { %p6165_p2 = pnand %p6163_p9, %p6127_p0 }
  0x2d   : > { %p6172_p6 = por %p6171_p1, %p6170_p7 }
  0x2e   : > { %p6166_p4 = pneg %p6165_p2 }
  0x2f   : > { %5864 = dma.hbm_to_vmem [thread:$0]  (!%p6462_p13), %s9785_s1, 9216, %s190_s13, [#allocation6], %s6333_s21, %s6333_s21, %s6334_s29  }
  0x30   : > { %p6173_p5 = pnand %p6172_p6, %p6166_p4 }
  0x32   : > { %6176 = shalt.err (!%p6173_p5)
}
  0x33   : > { %s9786_s3 = sld [smem:[#allocation71_spill]]  ;;  %s31_s13 = sadd.s32 1, %s6321_s26 }
  0x34   : > { %s34_s30 = sadd.s32 1, %s6325_s27  ;;  %p32_p1 = scmp.ge.s32.totalorder %s31_s13, 2 }
  0x35   : > { %s41_s14 = sadd.s32 1, %s6309_s23  ;;  %p48_p7 = scmp.ne.s32.totalorder %s6309_s23, %s6305_s22 }
  0x36   : > { %p49_p9 = scmp.eq.s32.totalorder %s6329_s28, 0  ;;  %s10420_s13 = smov (%p32_p1, %s31_s13), 0 }
  0x37   : > { %9787 = sst [smem:[#allocation17_spill]] %s10420_s13  ;;  %s10422_s30 = smov (!%p32_p1, %s34_s30), %s6325_s27 }
  0x38   : > { %p6493_p0 = por %p49_p9, %p48_p7  ;;  %s149_s12 = ssub.s32 %s6321_s26, %s10420_s13 }
  0x39   : > { %5867 = dma.hbm_to_vmem [thread:$0]  (!%p6462_p13), %s9786_s3, 9216, %s206_s16, [#allocation6], %s6333_s21, %s6333_s21, %s6334_s29  }
  0x3a   : > { %p36_p13 = scmp.ge.s32.totalorder %s10422_s30, 2  ;;  %p5878_p8 = scmp.lt.s32.totalorder %s6329_s28, 4 }
  0x3b   : > { %s222_s16 = sand.u32 1, %s6309_s23   ;;  %s5799_s21 = smul.u32 5888, %s6325_s27 }
  0x3c   : > { %s10424_s30 = smov (%p36_p13, %s10422_s30), 0  ;;  %s5798_s29 = smul.u32 368, %s222_s16 }
  0x3d   : > { %s38_s15 = ssub.s32 %s6325_s27, %s10424_s30  ;;  %s6509_s3 = scalar_lea.hbm %s9628_s0, %s5799_s21 }
  0x3e   : > { %p39_p10 = scmp.eq.s32.totalorder %s38_s15, 0  ;;  %s150_s10 = sor.u32 %s149_s12, %s38_s15 }
  0x3f   : > { %p151_p12 = scmp.eq.s32.totalorder %s150_s10, 0  ;;  %s9789_s26 = sadd.s32 1, %s6297_s20 }
  0x40   : > { %s6512_s13 = scalar_select %p39_p10, %s6309_s23, %s41_s14  }
  0x41   : > { %s6517_s18 = scalar_select %p151_p12, %s6297_s20, %s9789_s26  }
  0x42   : > { %s226_s5 = scalar_lea.vmem [#allocation2], %s5798_s29  ;;  %p6523_p2 = pnand %p5878_p8, %p6493_p0 }
  0x43   : > { %s233_s9 = sshll.u32 %s226_s5, 4  ;;  %s223_s1 = scalar_lea.sflag [#allocation3], %s222_s16  ;;  %s234_s9 = int_to_ptr.vmem [resolvable:$true] %s233_s9 }
  0x44   : > { %p6179_p4 = pneg %p6523_p2  ;;  %s6190_s12 = scalar_lea.vmem %s234_s9, 5888 }
  0x45   : > { %p6191_p6 = scmp.ne.s32.totalorder %s234_s9, %s6190_s12  ;;  %s6335_s10 = smov [#allocation2]  }
  0x46   : > { %s6195_s26 = sshll.u32 %s6335_s10, 4  ;;  %s6196_s26 = int_to_ptr.vmem [resolvable:$false] %s6195_s26 }
  0x47   : > { %p6193_p5 = pnand %p6191_p6, %p6179_p4  ;;  %s6197_s14 = scalar_lea.vmem %s6196_s26, 11776 }
  0x48   : > { %p6198_p7 = scmp.lt.s32.totalorder %s234_s9, %s6196_s26  ;;  %p6199_p9 = scmp.lt.s32.totalorder %s6197_s14, %s6190_s12 }
  0x49   : > { %p6194_p1 = pneg %p6193_p5 }
  0x4a   : > { %p6200_p13 = por %p6199_p9, %p6198_p7 }
  0x4c   : > { %p6201_p0 = pnand %p6200_p13, %p6194_p1 }
  0x4e   : > { %6204 = shalt.err (!%p6201_p0)
}
  0x4f   : > { %s6336_s5 = smov 128   ;;  %s6337_s7 = smov 8  }
  0x50   : > { %5871 = dma.hbm_to_vmem [thread:$0]  (!%p6523_p2), %s6509_s3, 5888, %s234_s9, %s223_s1, %s6336_s5, %s6336_s5, %s6337_s7  }
  0x51   : > { %245 = sbr.rel (%p6454_p11) target bundleno = 1030 (0x406), region = 40 }
  0x56   : > { %s247_s16 = sand.u32 1, %s6305_s22  }
  0x57   : > { %s6535_s21 = smul.u32 368, %s247_s16  ;;  %s248_s29 = scalar_lea.sflag [#allocation3], %s247_s16 }
  0x59   : > { %s251_s15 = scalar_lea.vmem [#allocation2], %s6535_s21 }
  0x5a   : > { %6276 = dma.done.wait (%p6438_p3), %s248_s29, 5888  }
  0x5b   : > { %6278 = vsyncadd (%p6438_p3), %s248_s29, 4294961408  ;;  %p9791_p8 = scmp.ne.s32.totalorder %s9777_s6, 0 }
  0x5d   : > { %6280 = dma.done.wait (%p9791_p8), [#allocation6], 18432  }
  0x5e   : > { %6282 = vsyncadd (%p9791_p8), [#allocation6], 4294948864  ;;  %v5980_v0 = vld [vmem:[#allocation5 + $0x138] sm:$0xff]   ;;  %v5983_v3 = vld [vmem:[#allocation5 + $0x130] sm:$0xff]   ;;  %s288_s3 = smul.u32 144, %s6313_s24  ;;  %vm9668_vm0 = vcmask 1046528  }
  0x5f   : > { %v5981_v1 = vld [vmem:[#allocation5 + $0x178] sm:$0xff]   ;;  %4921 = vmatprep.subr.bf16.mxu0 %v5980_v0  ;;  %v5984_v4 = vld [vmem:[#allocation5 + $0x170] sm:$0xff]   ;;  %v5986_v6 = vld [vmem:[#allocation5 + $0x128] sm:$0xff]   ;;  %vm9667_vm1 = vsmask.f32 7424  ;;  %vm9665_vm3 = vmmov 0  }
  0x60   : > { %v5982_v2 = vld [vmem:[#allocation5 + $0xf8] sm:$0xff]   ;;  %5506 = vmatprep.subr.bf16.mxu1 %v5981_v1  ;;  %v5985_v5 = vld [vmem:[#allocation5 + $0xf0] sm:$0xff]   ;;  %v5987_v7 = vld [vmem:[#allocation5 + $0x168] sm:$0xff]   ;;  %s6551_s25 = scalar_lea.vmem %s251_s15, %s288_s3 [#allocation2]  ;;  %s4776_s6 = sadd.s32 4294967277, %s288_s3 }
  0x61   : > { %4922 = vmatpush3.bf16.msra.mxu0 %v5982_v2  ;;  %5507 = vmatpush3.bf16.msra.mxu1 %v5981_v1  ;;  %v5988_v8 = vld [vmem:[#allocation5 + $0xe8] sm:$0xff]   ;;  %v5989_v9 = vld [vmem:[#allocation5 + $0x120] sm:$0xff]   ;;  %v5992_v12 = vld [vmem:[#allocation5 + $0x118] sm:$0xff]   ;;  %s283_s1 = sand.u32 1, %s6293_s19   ;;  %s10401_s5 = sld [smem:[#allocation13_spill]] }
  0x62   : > { %4923 = vmatprep.subr.bf16.mxu0 %v5983_v3  ;;  %5508 = vmatprep.subr.bf16.mxu1 %v5984_v4  ;;  %v5990_v10 = vld [vmem:[#allocation5 + $0x160] sm:$0xff]   ;;  %v5993_v13 = vld [vmem:[#allocation5 + $0x158] sm:$0xff]   ;;  %v5995_v15 = vld [vmem:[#allocation5 + $0x110] sm:$0xff]   ;;  %s5801_s26 = smul.u32 144, %s283_s1  ;;  %s10403_s8 = sld [smem:[#allocation72_spill]] }
  0x63   : > { %v5991_v11 = vld [vmem:[#allocation5 + $0xe0] sm:$0xff]   ;;  %v5994_v14 = vld [vmem:[#allocation5 + $0xd8] sm:$0xff]   ;;  %v5996_v16 = vld [vmem:[#allocation5 + $0x150] sm:$0xff]   ;;  %s4520_s7 = smul.u32 18, %s6313_s24  ;;  %s10402_s24 = sld [smem:[#allocation15_spill]] }
  0x64   : > { %v5997_v17 = vld [vmem:[#allocation5 + $0xd0] sm:$0xff]   ;;  %v5998_v18 = vld [vmem:[#allocation5 + $0x108] sm:$0xff]   ;;  %v6001_v21 = vld [vmem:[#allocation5 + $0x100] sm:$0xff]   ;;  %s9488_s14 = scalar_lea.vmem [#allocation8], %s5801_s26  ;;  %s6340_s17 = smov [#allocation8]  }
  0x65   : > { %4924 = vmatpush3.bf16.msra.mxu0 %v5985_v5  ;;  %5509 = vmatpush3.bf16.msra.mxu1 %v5984_v4  ;;  %v5999_v19 = vld [vmem:[#allocation5 + $0x148] sm:$0xff]   ;;  %v6002_v22 = vld [vmem:[#allocation5 + $0x140] sm:$0xff]   ;;  %v4655_v23 = vld [vmem:[%s6551_s25 + $0x12] sm:$0xff]  ;;  %s4528_s29 = sshll.u32 %s9488_s14, 4  ;;  %s6209_s12 = sshll.u32 %s6340_s17, 4  ;;  %s9558_s29 = int_to_ptr.vmem [resolvable:$true] %s4528_s29  ;;  %s6210_s12 = int_to_ptr.vmem [resolvable:$false] %s6209_s12 }
  0x66   : > { %4925 = vmatprep.subr.bf16.mxu0 %v5986_v6  ;;  %5510 = vmatprep.subr.bf16.mxu1 %v5987_v7  ;;  %v6000_v20 = vld [vmem:[#allocation5 + $0xc8] sm:$0xff]   ;;  %v4656_v24 = vld [vmem:[%s6551_s25 + $0x1a] sm:$0xff]  ;;  %v4659_v28 = vld [vmem:[%s6551_s25 + $0x32] sm:$0xff]  ;;  %s6205_s11 = scalar_lea.vmem %s9558_s29, 2304  ;;  %s6211_s10 = scalar_lea.vmem %s6210_s12, 4608 }
  0x67   : > { %v4657_v25 = vld [vmem:[%s6551_s25 + $0x22] sm:$0xff]  ;;  %v4658_v26 = vld [vmem:[%s6551_s25 + $0x2a] sm:$0xff]  ;;  %v556_v27 = vpack.c.bf16 %v4656_v24, %v4655_v23  ;;  %v4660_v29 = vld [vmem:[%s6551_s25 + $0x3a] sm:$0xff]  ;;  %s5848_s16 = smul.u32 36, %s10401_s5  ;;  %p6206_p3 = scmp.ne.s32.totalorder %s9558_s29, %s6205_s11 }
  0x68   : > { %v6003_v30 = vld [vmem:[#allocation5 + $0xc0] sm:$0xff]   ;;  %v6559_v31 = vpack.c.bf16 %v4658_v26, %v4657_v25  ;;  %v6561_v32 = vpack.c.bf16 %v4660_v29, %v4659_v28  ;;  %v6004_v36 = vld [vmem:[#allocation5 + $0xb8] sm:$0xff]   ;;  %v4662_v38 = vld [vmem:[%s6551_s25 + $0x4a] sm:$0xff]  ;;  %p6212_p2 = scmp.lt.s32.totalorder %s9558_s29, %s6210_s12  ;;  %p6213_p4 = scmp.lt.s32.totalorder %s6211_s10, %s6205_s11 }
  0x69   : > { %4926 = vmatpush3.bf16.msra.mxu0 %v5988_v8  ;;  %5511 = vmatpush3.bf16.msra.mxu1 %v5987_v7  ;;  %v569_v33 = vshrl.u32 %v556_v27, 16  ;;  %v571_v34 = vshll.u32 %v556_v27, 16  ;;  %v687_v35 = vrot.slane %v556_v27, 1  ;;  %v4661_v37 = vld [vmem:[%s6551_s25 + $0x42] sm:$0xff]  ;;  %v4663_v43 = vld [vmem:[%s6551_s25 + $0x52] sm:$0xff]  ;;  %v4664_v44 = vld [vmem:[%s6551_s25 + $0x5a] sm:$0xff]  ;;  %s4525_s21 = sadd.s32 %s5848_s16, %s4520_s7 }
  0x6a   : > { %4927 = vmatprep.subr.bf16.mxu0 %v5989_v9  ;;  %5512 = vmatprep.subr.bf16.mxu1 %v5990_v10  ;;  %v576_v39 = vshll.u32 %v6559_v31, 16  ;;  %v688_v40 = vrot.slane %v6559_v31, 1  ;;  %v690_v41 = vrot.slane %v6561_v32, 1  ;;  %v580_v42 = vshrl.u32 %v6559_v31, 16  ;;  %v4665_v50 = vld [vmem:[%s6551_s25 + $0x62] sm:$0xff]  ;;  %v4666_v51 = vld [vmem:[%s6551_s25 + $0x6a] sm:$0xff]  ;;  %p6214_p6 = por %p6213_p4, %p6212_p2 }
  0x6b   : > { %v573_v45 = vrot.slane %v571_v34, 1  ;;  %v584_v46 = vshll.u32 %v6561_v32, 16  ;;  %v6572_v47 = vpack.c.bf16 %v4662_v38, %v4661_v37  ;;  %v6579_v57 = vpack.c.bf16 %v4664_v44, %v4663_v43  ;;  %v6006_v59 = vld [vmem:[#allocation5 + $0x78] sm:$0xff]   ;;  %v6005_v61 = vld [vmem:[#allocation5 + $0xb0] sm:$0xff]   ;;  %v6013_v26 = vld [vmem:[#allocation5 + $0x60] sm:$0xff]   ;;  %s4918_s15 = sshll.u32 %s4525_s21, 7 }
  0x6c   : > { %v578_v48 = vrot.slane %v576_v39, 1  ;;  %v689_v49 = vsel %vm9668_vm0, %v687_v35, %v688_v40  ;;  %v691_v55 = vsel %vm9668_vm0, %v688_v40, %v690_v41  ;;  %v588_v62 = vshrl.u32 %v6561_v32, 16  ;;  %v6007_v2 = vld [vmem:[#allocation5 + $0x38] sm:$0xff]   ;;  %v6008_v3 = vld [vmem:[#allocation5 + $0x70] sm:$0xff]   ;;  %v6014_v28 = vld [vmem:[#allocation5 + $0x20] sm:$0xff]   ;;  %s9563_s9 = scalar_lea.hbm %s10403_s8, %s4918_s15  ;;  %p10404_p11 = scmp.ne.s32.totalorder %s10402_s24, 0 }
  0x6d   : > { %4928 = vmatpush3.bf16.msra.mxu0 %v5991_v11  ;;  %5513 = vmatpush3.bf16.msra.mxu1 %v5990_v10  ;;  %v574_v52 = vor.u32 %v573_v45, %v569_v33  ;;  %v586_v53 = vrot.slane %v584_v46, 1  ;;  %v692_v54 = vrot.slane %v6572_v47, 1  ;;  %v592_v58 = vshll.u32 %v6572_v47, 16  ;;  %v4667_v6 = vld [vmem:[%s6551_s25 + $0x72] sm:$0xff]  ;;  %v4668_v7 = vld [vmem:[%s6551_s25 + $0x7a] sm:$0xff]  ;;  %v4669_v11 = vld [vmem:[%s6551_s25 + $0x82] sm:$0xff] }
  0x6e   : > { %4929 = vmatprep.subr.bf16.mxu0 %v5992_v12  ;;  %5514 = vmatprep.subr.bf16.mxu1 %v5993_v13  ;;  %v582_v56 = vor.u32 %v580_v42, %v578_v48  ;;  %v6584_v63 = vpack.c.bf16 %v4666_v51, %v4665_v50  ;;  %v694_v4 = vrot.slane %v6579_v57, 1  ;;  %v6009_v8 = vld [vmem:[#allocation5 + $0x30] sm:$0xff]   ;;  %v4672_v25 = vld [vmem:[%s6551_s25 + $0x9a] sm:$0xff]  ;;  %v4673_v33 = vld [vmem:[%s6551_s25 + $0xa2] sm:$0xff]  ;;  %v604_v37 = vshrl.u32 %v6579_v57, 16  ;;  %p6207_p10 = pnand %p6206_p3, %p10404_p11 }
  0x6f   : > { %5522 = vmatprep.mubr.bf16.mxu1 %v689_v49  ;;  %v579_v60 = vsel %vm9667_vm1, %v574_v52, %v578_v48  ;;  %v693_v1 = vsel %vm9668_vm0, %v690_v41, %v692_v54  ;;  %v594_v5 = vrot.slane %v592_v58, 1  ;;  %v590_v9 = vor.u32 %v588_v62, %v586_v53  ;;  %v4670_v12 = vld [vmem:[%s6551_s25 + $0x8a] sm:$0xff]  ;;  %v4671_v24 = vld [vmem:[%s6551_s25 + $0x92] sm:$0xff]  ;;  %v4676_v48 = vld [vmem:[%s6551_s25 + $0xba] sm:$0xff] }
  0x70   : > { %946 = vmatprep.mubr.bf16.mxu0 %v579_v60  ;;  %v587_v0 = vsel %vm9667_vm1, %v582_v56, %v586_v53  ;;  %v696_v10 = vrot.slane %v6584_v63, 1  ;;  %v4674_v34 = vld [vmem:[%s6551_s25 + $0xaa] sm:$0xff]  ;;  %v608_v40 = vshll.u32 %v6584_v63, 16  ;;  %v6015_v42 = vld [vmem:[#allocation5 + $0x58] sm:$0xff]   ;;  %v4677_v53 = vld [vmem:[%s6551_s25 + $0xc2] sm:$0xff]  ;;  %v612_v60 = vshrl.u32 %v6584_v63, 16  ;;  %p6208_p12 = pneg %p6207_p10 }
  0x71   : > { %4930 = vmatpush3.bf16.msra.mxu0 %v5994_v14  ;;  %5515 = vmatpush3.bf16.msra.mxu1 %v5993_v13  ;;  %v6594_v13 = vpack.c.bf16 %v4668_v7, %v4667_v6  ;;  %v6011_v14 = vld [vmem:[#allocation5 + $0xa8] sm:$0xff]   ;;  %v6617_v41 = vpack.c.bf16 %v4674_v34, %v4673_v33  ;;  %v6016_v43 = vld [vmem:[#allocation5 + $0x18] sm:$0xff]   ;;  %v6017_v45 = vld [vmem:[#allocation5 + $0x50] sm:$0xff]  }
  0x72   : > { %4931 = vmatprep.subr.bf16.mxu0 %v5995_v15  ;;  %5516 = vmatprep.subr.bf16.mxu1 %v5996_v16  ;;  %v695_v15 = vsel %vm9668_vm0, %v692_v54, %v694_v4  ;;  %v4675_v44 = vld [vmem:[%s6551_s25 + $0xb2] sm:$0xff]  ;;  %v610_v50 = vrot.slane %v608_v40, 1  ;;  %v4678_v54 = vld [vmem:[%s6551_s25 + $0xca] sm:$0x3]  ;;  %p6215_p5 = pnand %p6214_p6, %p6208_p12 }
  0x73   : > { %v698_v23 = vrot.slane %v6594_v13, 1  ;;  %v704_v51 = vrot.slane %v6617_v41, 1  ;;  %v6019_v52 = vld [vmem:[#allocation5 + $0x10] sm:$0xff]   ;;  %v6024_v56 = vld [vmem:[#allocation5 + $0x98] sm:$0xff]   ;;  %v6020_v62 = vld [vmem:[#allocation5 + $0x48] sm:$0xff]  }
  0x74   : > { %v6025_v6 = vld [vmem:[#allocation5 + $0x90] sm:$0xff]   ;;  %v293_v7 = vld [vmem:[%s6551_s25 + $0x18] sm:$0xff] }
  0x75   : > { %4932 = vmatpush3.bf16.msra.mxu0 %v5997_v17  ;;  %5517 = vmatpush3.bf16.msra.mxu1 %v5996_v16  ;;  %v600_v16 = vshll.u32 %v6579_v57, 16  ;;  %v595_v17 = vsel %vm9667_vm1, %v590_v9, %v594_v5  ;;  %v699_v35 = vsel %vm9668_vm0, %v696_v10, %v698_v23  ;;  %v6027_v9 = vld [vmem:[#allocation5 + $0x88] sm:$0xff]   ;;  %v296_v40 = vld [vmem:[%s6551_s25 + $0x30] sm:$0xff] }
  0x76   : > { %4933 = vmatprep.subr.bf16.mxu0 %v5998_v18  ;;  %5518 = vmatprep.subr.bf16.mxu1 %v5999_v19  ;;  %v697_v18 = vsel %vm9668_vm0, %v694_v4, %v696_v10  ;;  %v292_v4 = vld [vmem:[%s6551_s25 + $0x10] sm:$0xff] }
  0x79   : > { %4934 = vmatpush3.bf16.msra.mxu0 %v6000_v20  ;;  %5519 = vmatpush3.bf16.msra.mxu1 %v5999_v19  ;;  %v596_v19 = vshrl.u32 %v6572_v47, 16  ;;  %v6601_v20 = vpack.c.bf16 %v4670_v12, %v4669_v11  ;;  %v614_v12 = vor.u32 %v612_v60, %v610_v50  ;;  %v6028_v60 = vld [vmem:[#allocation5 + $0x230] sm:$0xff]  }
  0x7a   : > { %4935 = vmatprep.subr.bf16.mxu0 %v6001_v21  ;;  %5520 = vmatprep.subr.bf16.mxu1 %v6002_v22  ;;  %v6010_v21 = vld [vmem:[#allocation5 + $0x68] sm:$0xff]  }
  0x7b   : > { %v598_v29 = vor.u32 %v596_v19, %v594_v5  ;;  %v624_v19 = vshll.u32 %v6601_v20, 16 }
  0x7d   : > { %4936 = vmatpush3.bf16.msra.mxu0 %v6003_v30  ;;  %5521 = vmatpush3.bf16.msra.mxu1 %v6002_v22  ;;  %v6012_v22 = vld [vmem:[#allocation5 + $0x28] sm:$0xff]   ;;  %v700_v30 = vrot.slane %v6601_v20, 1 }
  0x7e   : > { %5546 = vmatprep.subr.bf16.mxu0 %v6004_v36  ;;  %5029 = vmatprep.subr.bf16.mxu1 %v6006_v59  ;;  %v6629_v59 = vpack.c.bf16 %v4676_v48, %v4675_v44 }
  0x7f   : > { %v701_v39 = vsel %vm9668_vm0, %v698_v23, %v700_v30  ;;  %v295_v23 = vld [vmem:[%s6551_s25 + $0x28] sm:$0xff] }
  0x80   : > { %947 = vmatmul.mubr.bf16.vlgmr.msra.gmra.mxu0 %v556_v27  ;;  %5523 = vmatmul.mubr.bf16.vlgmr.msra.gmra.mxu1 %v691_v55  ;;  %v602_v27 = vrot.slane %v600_v16, 1  ;;  %v291_v55 = vld [vmem:[%s6551_s25 + $0x8] sm:$0xff]  ;;  %v706_v10 = vrot.slane %v6629_v59, 1 }
  0x81   : > { %5547 = vmatpush3.bf16.msra.mxu0 %v6004_v36  ;;  %954 = vmatprep.mubr.bf16.mxu0 %v587_v0  ;;  %v6611_v36 = vpack.c.bf16 %v4672_v25, %v4671_v24  ;;  %v6021_v0 = vld [vmem:[#allocation5 + $0x8] sm:$0xff]  }
  0x82   : > { %5526 = vmatprep.mubr.bf16.mxu1 %v693_v1  ;;  %5548 = vmatprep.subr.bf16.mxu0 %v6005_v61  ;;  %v603_v38 = vsel %vm9667_vm1, %v598_v29, %v602_v27  ;;  %v606_v49 = vor.u32 %v604_v37, %v602_v27  ;;  %v6029_v29 = vld [vmem:[#allocation5 + $0x80] sm:$0xff]  }
  0x83   : > { %5030 = vmatpush3.bf16.msra.mxu1 %v6007_v2  ;;  %v702_v46 = vrot.slane %v6611_v36, 1 }
  0x84   : > { %5031 = vmatprep.subr.bf16.mxu1 %v6008_v3  ;;  %v611_v1 = vsel %vm9667_vm1, %v606_v49, %v610_v50  ;;  %v6635_v3 = vpack.c.bf16 %v4678_v54, %v4677_v53  ;;  %v640_v53 = vshll.u32 %v6617_v41, 16 }
  0x85   : > { %5549 = vmatpush3.bf16.msra.mxu0 %v6005_v61  ;;  %v703_v58 = vsel %vm9668_vm0, %v700_v30, %v702_v46  ;;  %v616_v61 = vshll.u32 %v6594_v13, 16  ;;  %v705_v2 = vsel %vm9668_vm0, %v702_v46, %v704_v51  ;;  %v6031_v30 = vld [vmem:[#allocation5 + $0x1f8] sm:$0xff]  }
  0x86   : > { %5550 = vmatprep.subr.bf16.mxu0 %v6011_v14 }
  0x87   : > { %5032 = vmatpush3.bf16.msra.mxu1 %v6009_v8  ;;  %v6022_v8 = vld [vmem:[#allocation5 + $0x40] sm:$0xff]   ;;  %v618_v11 = vrot.slane %v616_v61, 1  ;;  %v642_v61 = vrot.slane %v640_v53, 1 }
  0x88   : > { %955 = vmatmul.mubr.bf16.gmra.mxu0 %v6559_v31  ;;  %5527 = vmatmul.mubr.bf16.gmra.mxu1 %v695_v15  ;;  %v6018_v31 = vld [vmem:[#allocation5 + $0xa0] sm:$0xff]   ;;  %v6644_v15 = vpack.c.bf16 %v293_v7, %v292_v4  ;;  %v6030_v4 = vld [vmem:[#allocation5 + $0x228] sm:$0xff]   ;;  %v648_v7 = vshll.u32 %v6629_v59, 16 }
  0x89   : > { %962 = vmatprep.mubr.bf16.mxu0 %v595_v17  ;;  %5530 = vmatprep.mubr.bf16.mxu1 %v697_v18  ;;  %v620_v17 = vshrl.u32 %v6594_v13, 16  ;;  %v707_v18 = vsel %vm9668_vm0, %v704_v51, %v706_v10  ;;  %v619_v24 = vsel %vm9667_vm1, %v614_v12, %v618_v11  ;;  %v301_v12 = vld [vmem:[%s6551_s25 + $0x58] sm:$0xff] }
  0x8a   : > { %5033 = vmatprep.subr.bf16.mxu1 %v6010_v21  ;;  %5551 = vmatpush3.bf16.msra.mxu0 %v6011_v14  ;;  %v708_v14 = vrot.slane %v6635_v3, 1  ;;  %v335_v27 = vshll.u32 %v6644_v15, 16  ;;  %v448_v53 = vrot.slane %v6644_v15, 1 }
  0x8b   : > { %5034 = vmatpush3.bf16.msra.mxu1 %v6012_v22  ;;  %5552 = vmatprep.subr.bf16.mxu0 %v6018_v31  ;;  %v294_v22 = vld [vmem:[%s6551_s25 + $0x20] sm:$0xff]  ;;  %v622_v34 = vor.u32 %v620_v17, %v618_v11  ;;  %v300_v11 = vld [vmem:[%s6551_s25 + $0x50] sm:$0xff] }
  0x8c   : > { %5035 = vmatprep.subr.bf16.mxu1 %v6013_v26  ;;  %v709_v25 = vsel %vm9668_vm0, %v706_v10, %v708_v14  ;;  %v6657_v33 = vpack.c.bf16 %v295_v23, %v294_v22  ;;  %v337_v37 = vrot.slane %v335_v27, 1  ;;  %v652_v22 = vshrl.u32 %v6629_v59, 16 }
  0x8e   : > { %5553 = vmatpush3.bf16.msra.mxu0 %v6018_v31  ;;  %v626_v31 = vrot.slane %v624_v19, 1  ;;  %v6692_v19 = vpack.c.bf16 %v301_v12, %v300_v11 }
  0x8f   : > { %5036 = vmatpush3.bf16.msra.mxu1 %v6014_v28  ;;  %5554 = vmatprep.subr.bf16.mxu0 %v6024_v56  ;;  %v6026_v28 = vld [vmem:[#allocation5 + $0x238] sm:$0xff]  }
  0x90   : > { %963 = vmatmul.mubr.bf16.gmra.mxu0 %v6561_v32  ;;  %5531 = vmatmul.mubr.bf16.gmra.mxu1 %v699_v35  ;;  %v290_v32 = vld [vmem:[%s6551_s25] sm:$0xff]  ;;  %v627_v44 = vsel %vm9667_vm1, %v622_v34, %v626_v31  ;;  %v6043_v34 = vld [vmem:[#allocation5 + $0x210] sm:$0xff]  }
  0x91   : > { %970 = vmatprep.mubr.bf16.mxu0 %v603_v38  ;;  %5534 = vmatprep.mubr.bf16.mxu1 %v701_v39  ;;  %v6638_v5 = vpack.c.bf16 %v291_v55, %v290_v32  ;;  %v628_v38 = vshrl.u32 %v6601_v20, 16  ;;  %v632_v39 = vshll.u32 %v6611_v36, 16  ;;  %v347_v55 = vshrl.u32 %v6657_v33, 16 }
  0x92   : > { %5037 = vmatprep.subr.bf16.mxu1 %v6015_v42  ;;  %5555 = vmatpush3.bf16.msra.mxu0 %v6024_v56  ;;  %v343_v42 = vshll.u32 %v6657_v33, 16  ;;  %v298_v56 = vld [vmem:[%s6551_s25 + $0x40] sm:$0xff] }
  0x93   : > { %5038 = vmatpush3.bf16.msra.mxu1 %v6016_v43  ;;  %v330_v16 = vshll.u32 %v6638_v5, 16  ;;  %5556 = vmatprep.subr.bf16.mxu0 %v6025_v6  ;;  %v328_v21 = vshrl.u32 %v6638_v5, 16  ;;  %v297_v43 = vld [vmem:[%s6551_s25 + $0x38] sm:$0xff]  ;;  %v630_v48 = vor.u32 %v628_v38, %v626_v31  ;;  %v634_v49 = vrot.slane %v632_v39, 1 }
  0x94   : > { %5039 = vmatprep.subr.bf16.mxu1 %v6017_v45  ;;  %v6668_v46 = vpack.c.bf16 %v297_v43, %v296_v40  ;;  %v345_v51 = vrot.slane %v343_v42, 1  ;;  %v6048_v40 = vld [vmem:[#allocation5 + $0x208] sm:$0xff]   ;;  %v306_v43 = vld [vmem:[%s6551_s25 + $0x80] sm:$0xff] }
  0x95   : > { %v332_v26 = vrot.slane %v330_v16, 1  ;;  %v635_v32 = vsel %vm9667_vm1, %v630_v48, %v634_v49  ;;  %v650_v16 = vrot.slane %v648_v7, 1  ;;  %v310_v7 = vld [vmem:[%s6551_s25 + $0xa0] sm:$0xff] }
  0x96   : > { %5557 = vmatpush3.bf16.msra.mxu0 %v6025_v6  ;;  %v351_v54 = vshll.u32 %v6668_v46, 16  ;;  %v644_v6 = vshrl.u32 %v6617_v41, 16 }
  0x97   : > { %5040 = vmatpush3.bf16.msra.mxu1 %v6019_v52  ;;  %5558 = vmatprep.subr.bf16.mxu0 %v6027_v9  ;;  %v333_v35 = vor.u32 %v332_v26, %v328_v21  ;;  %v636_v52 = vshrl.u32 %v6611_v36, 16  ;;  %v6038_v21 = vld [vmem:[#allocation5 + $0x218] sm:$0xff]   ;;  %v304_v26 = vld [vmem:[%s6551_s25 + $0x70] sm:$0xff] }
  0x98   : > { %971 = vmatmul.mubr.bf16.gmra.mxu0 %v6572_v47  ;;  %5535 = vmatmul.mubr.bf16.gmra.mxu1 %v703_v58  ;;  %v6023_v47 = vld [vmem:[#allocation5] sm:$0xff]   ;;  %v299_v58 = vld [vmem:[%s6551_s25 + $0x48] sm:$0xff] }
  0x99   : > { %978 = vmatprep.mubr.bf16.mxu0 %v611_v1  ;;  %5538 = vmatprep.mubr.bf16.mxu1 %v705_v2  ;;  %v338_v45 = vsel %vm9667_vm1, %v333_v35, %v337_v37  ;;  %v349_v1 = vor.u32 %v347_v55, %v345_v51  ;;  %v6680_v2 = vpack.c.bf16 %v299_v58, %v298_v56  ;;  %v450_v55 = vrot.slane %v6657_v33, 1 }
  0x9a   : > { %5041 = vmatprep.subr.bf16.mxu1 %v6020_v62  ;;  %5559 = vmatpush3.bf16.msra.mxu0 %v6027_v9  ;;  %v353_v62 = vrot.slane %v351_v54, 1 }
  0x9b   : > { %5042 = vmatpush3.bf16.msra.mxu1 %v6021_v0  ;;  %5560 = vmatprep.subr.bf16.mxu0 %v6029_v29  ;;  %v638_v0 = vor.u32 %v636_v52, %v634_v49  ;;  %v359_v10 = vshll.u32 %v6680_v2, 16  ;;  %v363_v23 = vshrl.u32 %v6680_v2, 16  ;;  %v660_v49 = vshrl.u32 %v6635_v3, 16 }
  0x9c   : > { %5043 = vmatprep.subr.bf16.mxu1 %v6022_v8  ;;  %v354_v9 = vsel %vm9667_vm1, %v349_v1, %v353_v62  ;;  %v447_v52 = vrot.slane %v6638_v5, 1 }
  0x9d   : > { %v643_v8 = vsel %vm9667_vm1, %v638_v0, %v642_v61 }
  0x9e   : > { %5561 = vmatpush3.bf16.msra.mxu0 %v6029_v29  ;;  %v367_v29 = vshll.u32 %v6692_v19, 16 }
  0x9f   : > { %5044 = vmatpush3.bf16.msra.mxu1 %v6023_v47  ;;  %5137 = vmatprep.subr.bf16.mxu0 %v6031_v30  ;;  %v646_v47 = vor.u32 %v644_v6, %v642_v61  ;;  %v305_v30 = vld [vmem:[%s6551_s25 + $0x78] sm:$0xff] }
  0xa0   : > { %979 = vmatmul.mubr.bf16.gmra.mxu0 %v6579_v57  ;;  %5539 = vmatmul.mubr.bf16.gmra.mxu1 %v707_v18  ;;  %v339_v57 = vshrl.u32 %v6644_v15, 16  ;;  %v361_v18 = vrot.slane %v359_v10, 1  ;;  %v6708_v35 = vpack.c.bf16 %v305_v30, %v304_v26  ;;  %v6034_v26 = vld [vmem:[#allocation5 + $0x1f0] sm:$0xff]  }
  0xa1   : > { %986 = vmatprep.mubr.bf16.mxu0 %v619_v24  ;;  %5542 = vmatprep.mubr.bf16.mxu1 %v709_v25  ;;  %v302_v24 = vld [vmem:[%s6551_s25 + $0x60] sm:$0xff]  ;;  %v303_v25 = vld [vmem:[%s6551_s25 + $0x68] sm:$0xff]  ;;  %v651_v27 = vsel %vm9667_vm1, %v646_v47, %v650_v16  ;;  %v449_v47 = vsel %vm9668_vm0, %v447_v52, %v448_v53 }
  0xa2   : > { %5586 = vmatprep.subr.bf16.mxu1 %v6026_v28  ;;  %v341_v50 = vor.u32 %v339_v57, %v337_v37  ;;  %v6706_v31 = vpack.c.bf16 %v303_v25, %v302_v24  ;;  %v654_v37 = vor.u32 %v652_v22, %v650_v16  ;;  %v365_v39 = vor.u32 %v363_v23, %v361_v18  ;;  %v313_v16 = vld [vmem:[%s6551_s25 + $0xb8] sm:$0x3] }
  0xa3   : > { %v369_v57 = vrot.slane %v367_v29, 1  ;;  %v460_v12 = vrot.slane %v6708_v35, 1  ;;  %v6032_v25 = vld [vmem:[#allocation5 + $0x1b8] sm:$0xff]  }
  0xa4   : > { %v375_v42 = vshll.u32 %v6706_v31, 16 }
  0xa5   : > { %v370_v48 = vsel %vm9667_vm1, %v365_v39, %v369_v57  ;;  %v6037_v39 = vld [vmem:[#allocation5 + $0x1a8] sm:$0xff]  }
  0xa8   : > { %987 = vmatmul.mubr.bf16.gmra.mxu0 %v6584_v63  ;;  %5543 = vmatmul.mubr.bf16.gmra.mxu1 %v708_v14  ;;  %v346_v63 = vsel %vm9667_vm1, %v341_v50, %v345_v51  ;;  %v6033_v14 = vld [vmem:[#allocation5 + $0x220] sm:$0xff]   ;;  %v371_v50 = vshrl.u32 %v6692_v19, 16  ;;  %v379_v51 = vshrl.u32 %v6706_v31, 16 }
  0xa9   : > { %994 = vmatprep.mubr.bf16.mxu0 %v627_v44  ;;  %1346 = vmatprep.mubr.bf16.mxu1 %v338_v45  ;;  %v307_v44 = vld [vmem:[%s6551_s25 + $0x88] sm:$0xff] }
  0xaa   : > { %v6721_v54 = vpack.c.bf16 %v307_v44, %v306_v43  ;;  %v373_v58 = vor.u32 %v371_v50, %v369_v57  ;;  %v6042_v50 = vld [vmem:[#allocation5 + $0x198] sm:$0xff]  }
  0xac   : > { %v391_v61 = vshll.u32 %v6721_v54, 16 }
  0xb0   : > { %995 = vmatmul.mubr.bf16.gmra.mxu0 %v6594_v13  ;;  %1347 = vmatmul.mubr.bf16.vlgmr.msra.gmra.mxu1 %v6638_v5  ;;  %v355_v13 = vshrl.u32 %v6668_v46, 16  ;;  %v387_v5 = vshrl.u32 %v6708_v35, 16 }
  0xb1   : > { %1002 = vmatprep.mubr.bf16.mxu0 %v635_v32  ;;  %1354 = vmatprep.mubr.bf16.mxu1 %v346_v63  ;;  %v6051_v32 = vld [vmem:[#allocation5 + $0x200] sm:$0xff]   ;;  %v377_v63 = vrot.slane %v375_v42, 1 }
  0xb2   : > { %5587 = vmatpush3.bf16.msra.mxu1 %v6026_v28  ;;  %v357_v17 = vor.u32 %v355_v13, %v353_v62  ;;  %v309_v62 = vld [vmem:[%s6551_s25 + $0x98] sm:$0xff]  ;;  %v6039_v42 = vld [vmem:[#allocation5 + $0x1e0] sm:$0xff]  }
  0xb3   : > { %5588 = vmatprep.subr.bf16.mxu1 %v6028_v60  ;;  %v378_v1 = vsel %vm9667_vm1, %v373_v58, %v377_v63  ;;  %v381_v13 = vor.u32 %v379_v51, %v377_v63  ;;  %v6044_v51 = vld [vmem:[#allocation5 + $0x1d0] sm:$0xff]   ;;  %v4727_v63 = vld [vmem:[%s6551_s25 + $0x24] sm:$0xff] }
  0xb4   : > { %v362_v28 = vsel %vm9667_vm1, %v357_v17, %v361_v18  ;;  %v6049_v58 = vld [vmem:[#allocation5 + $0x1c0] sm:$0xff]  }
  0xb6   : > { %5589 = vmatpush3.bf16.msra.mxu1 %v6028_v60  ;;  %v454_v60 = vrot.slane %v6680_v2, 1 }
  0xb7   : > { %5590 = vmatprep.subr.bf16.mxu1 %v6030_v4 }
  0xb8   : > { %1003 = vmatmul.mubr.bf16.gmra.mxu0 %v6601_v20  ;;  %1355 = vmatmul.mubr.bf16.gmra.mxu1 %v6644_v15  ;;  %v656_v20 = vshll.u32 %v6635_v3, 16  ;;  %v452_v15 = vrot.slane %v6668_v46, 1 }
  0xb9   : > { %1010 = vmatprep.mubr.bf16.mxu0 %v643_v8  ;;  %1362 = vmatprep.mubr.bf16.mxu1 %v354_v9  ;;  %v393_v8 = vrot.slane %v391_v61, 1  ;;  %v311_v9 = vld [vmem:[%s6551_s25 + $0xa8] sm:$0xff] }
  0xba   : > { %5591 = vmatpush3.bf16.msra.mxu1 %v6030_v4  ;;  %v658_v38 = vrot.slane %v656_v20, 1  ;;  %v456_v4 = vrot.slane %v6692_v19, 1  ;;  %v6749_v17 = vpack.c.bf16 %v311_v9, %v310_v7  ;;  %v453_v30 = vsel %vm9668_vm0, %v450_v55, %v452_v15 }
  0xbb   : > { %5592 = vmatprep.subr.bf16.mxu1 %v6033_v14  ;;  %v455_v43 = vsel %vm9668_vm0, %v452_v15, %v454_v60  ;;  %v4729_v15 = vld [vmem:[%s6551_s25 + $0x34] sm:$0xff] }
  0xbc   : > { %v659_v45 = vsel %vm9667_vm1, %v654_v37, %v658_v38  ;;  %v662_v0 = vor.u32 %v660_v49, %v658_v38  ;;  %v407_v23 = vshll.u32 %v6749_v17, 16  ;;  %v411_v24 = vshrl.u32 %v6749_v17, 16  ;;  %v6036_v37 = vld [vmem:[#allocation5 + $0x1e8] sm:$0xff]  }
  0xbe   : > { %5593 = vmatpush3.bf16.msra.mxu1 %v6033_v14  ;;  %v312_v14 = vld [vmem:[%s6551_s25 + $0xb0] sm:$0xff]  ;;  %v409_v57 = vrot.slane %v407_v23, 1 }
  0xbf   : > { %5594 = vmatprep.subr.bf16.mxu1 %v6038_v21  ;;  %v6754_v22 = vpack.c.bf16 %v313_v16, %v312_v14 }
  0xc0   : > { %1011 = vmatmul.mubr.bf16.gmra.mxu0 %v6611_v36  ;;  %1363 = vmatmul.mubr.bf16.gmra.mxu1 %v6657_v33  ;;  %v383_v36 = vshll.u32 %v6708_v35, 16  ;;  %v395_v33 = vshrl.u32 %v6721_v54, 16 }
  0xc1   : > { %1018 = vmatprep.mubr.bf16.mxu0 %v651_v27  ;;  %1370 = vmatprep.mubr.bf16.mxu1 %v362_v28  ;;  %v415_v27 = vshll.u32 %v6754_v22, 16  ;;  %v451_v28 = vsel %vm9668_vm0, %v448_v53, %v450_v55  ;;  %v4728_v55 = vld [vmem:[%s6551_s25 + $0x2c] sm:$0xff] }
  0xc2   : > { %5595 = vmatpush3.bf16.msra.mxu1 %v6038_v21  ;;  %v385_v56 = vrot.slane %v383_v36, 1  ;;  %v462_v21 = vrot.slane %v6721_v54, 1  ;;  %v397_v38 = vor.u32 %v395_v33, %v393_v8  ;;  %v457_v36 = vsel %vm9668_vm0, %v454_v60, %v456_v4 }
  0xc3   : > { %5596 = vmatprep.subr.bf16.mxu1 %v6043_v34  ;;  %v419_v33 = vshrl.u32 %v6754_v22, 16 }
  0xc4   : > { %v389_v20 = vor.u32 %v387_v5, %v385_v56  ;;  %v6047_v5 = vld [vmem:[#allocation5 + $0x188] sm:$0xff]  }
  0xc6   : > { %5597 = vmatpush3.bf16.msra.mxu1 %v6043_v34  ;;  %v394_v29 = vsel %vm9667_vm1, %v389_v20, %v393_v8  ;;  %v6035_v34 = vld [vmem:[#allocation5 + $0x1b0] sm:$0xff]  }
  0xc7   : > { %5598 = vmatprep.subr.bf16.mxu1 %v6048_v40 }
  0xc8   : > { %1019 = vmatmul.mubr.bf16.gmra.mxu0 %v6617_v41  ;;  %1371 = vmatmul.mubr.bf16.gmra.mxu1 %v6668_v46  ;;  %v308_v41 = vld [vmem:[%s6551_s25 + $0x90] sm:$0xff]  ;;  %v458_v46 = vrot.slane %v6706_v31, 1 }
  0xc9   : > { %1026 = vmatprep.mubr.bf16.mxu0 %v659_v45  ;;  %1378 = vmatprep.mubr.bf16.mxu1 %v370_v48  ;;  %v6738_v6 = vpack.c.bf16 %v309_v62, %v308_v41  ;;  %v6040_v45 = vld [vmem:[#allocation5 + $0x1a0] sm:$0xff]   ;;  %v6041_v48 = vld [vmem:[#allocation5 + $0x1d8] sm:$0xff]   ;;  %v1596_v41 = vpack.c.bf16 %v4728_v55, %v4727_v63 }
  0xca   : > { %5599 = vmatpush3.bf16.msra.mxu1 %v6048_v40  ;;  %v417_v40 = vrot.slane %v415_v27, 1  ;;  %v461_v53 = vsel %vm9668_vm0, %v458_v46, %v460_v12  ;;  %v4730_v62 = vld [vmem:[%s6551_s25 + $0x3c] sm:$0xff] }
  0xcb   : > { %5600 = vmatprep.subr.bf16.mxu1 %v6051_v32  ;;  %v399_v10 = vshll.u32 %v6738_v6, 16  ;;  %v403_v11 = vshrl.u32 %v6738_v6, 16  ;;  %v1609_v8 = vshrl.u32 %v1596_v41, 16  ;;  %v1727_v16 = vrot.slane %v1596_v41, 1 }
  0xcc   : > { %v421_v7 = vor.u32 %v419_v33, %v417_v40 }
  0xcd   : > { %v401_v18 = vrot.slane %v399_v10, 1 }
  0xce   : > { %5601 = vmatpush3.bf16.msra.mxu1 %v6051_v32  ;;  %v6045_v32 = vld [vmem:[#allocation5 + $0x190] sm:$0xff]  }
  0xcf   : > { %v402_v44 = vsel %vm9667_vm1, %v397_v38, %v401_v18  ;;  %v405_v49 = vor.u32 %v403_v11, %v401_v18  ;;  %v4731_v11 = vld [vmem:[%s6551_s25 + $0x44] sm:$0xff]  ;;  %v4733_v18 = vld [vmem:[%s6551_s25 + $0x54] sm:$0xff] }
  0xd0   : > { %1027 = vmatmul.mubr.bf16.gmra.mxu0 %v6629_v59  ;;  %1379 = vmatmul.mubr.bf16.gmra.mxu1 %v6680_v2  ;;  %v386_v59 = vsel %vm9667_vm1, %v381_v13, %v385_v56  ;;  %v459_v2 = vsel %vm9668_vm0, %v456_v4, %v458_v46  ;;  %v413_v56 = vor.u32 %v411_v24, %v409_v57  ;;  %v1611_v4 = vshll.u32 %v1596_v41, 16 }
  0xd1   : > { %1034 = vmatprep.mubr.bf16.mxu0 %v662_v0  ;;  %1386 = vmatprep.mubr.bf16.mxu1 %v378_v1  ;;  %v410_v52 = vsel %vm9667_vm1, %v405_v49, %v409_v57  ;;  %v468_v0 = vrot.slane %v6754_v22, 1  ;;  %v6805_v1 = vpack.c.bf16 %v4730_v62, %v4729_v15  ;;  %v4739_v49 = vld [vmem:[%s6551_s25 + $0x84] sm:$0xff]  ;;  %v4746_v62 = vld [vmem:[%s6551_s25 + $0xbc] sm:$0xff] }
  0xd2   : > { %v418_v60 = vsel %vm9667_vm1, %v413_v56, %v417_v40  ;;  %v1613_v9 = vrot.slane %v1611_v4, 1 }
  0xd3   : > { %v1616_v10 = vshll.u32 %v6805_v1, 16  ;;  %v1620_v23 = vshrl.u32 %v6805_v1, 16 }
  0xd5   : > { %v1618_v14 = vrot.slane %v1616_v10, 1  ;;  %v4747_v10 = vld [vmem:[%s6551_s25 + $0xc4] sm:$0xff] }
  0xd7   : > { %v1622_v27 = vor.u32 %v1620_v23, %v1618_v14 }
  0xd8   : > { %1035 = vmatmul.mubr.bf16.gmra.mxu0 %v6635_v3  ;;  %1387 = vmatmul.mubr.bf16.gmra.mxu1 %v6692_v19  ;;  %v464_v3 = vrot.slane %v6738_v6, 1  ;;  %v6046_v19 = vld [vmem:[#allocation5 + $0x1c8] sm:$0xff]  }
  0xd9   : > { %1394 = vmatprep.mubr.bf16.mxu1 %v386_v59  ;;  %5562 = vmatprep.mubr.bf16.mxu0 %v449_v47  ;;  %v1728_v59 = vrot.slane %v6805_v1, 1 }
  0xda   : > { %v465_v61 = vsel %vm9668_vm0, %v462_v21, %v464_v3 }
  0xe0   : > { %1395 = vmatmul.mubr.bf16.gmra.mxu1 %v6706_v31  ;;  %5563 = vmatmul.mubr.bf16.vlgmr.msra.gmra.mxu0 %v451_v28  ;;  %v463_v31 = vsel %vm9668_vm0, %v460_v12, %v462_v21  ;;  %v4732_v12 = vld [vmem:[%s6551_s25 + $0x4c] sm:$0xff]  ;;  %v4734_v21 = vld [vmem:[%s6551_s25 + $0x5c] sm:$0xff] }
  0xe1   : > { %5138 = vmatpush3.bf16.msra.mxu0 %v6032_v25  ;;  %1402 = vmatprep.mubr.bf16.mxu1 %v394_v29  ;;  %v6816_v47 = vpack.c.bf16 %v4732_v12, %v4731_v11  ;;  %v6825_v25 = vpack.c.bf16 %v4734_v21, %v4733_v18  ;;  %v4735_v29 = vld [vmem:[%s6551_s25 + $0x64] sm:$0xff]  ;;  %v4748_v11 = vld [vmem:[%s6551_s25 + $0xcc] sm:$0xff]  ;;  %v4749_v12 = vld [vmem:[%s6551_s25 + $0xd4] sm:$0xff] }
  0xe2   : > { %5139 = vmatprep.subr.bf16.mxu0 %v6034_v26  ;;  %5566 = vmatprep.mubr.bf16.mxu0 %v453_v30  ;;  %v4736_v30 = vld [vmem:[%s6551_s25 + $0x6c] sm:$0xff] }
  0xe3   : > { %v1624_v24 = vshll.u32 %v6816_v47, 16  ;;  %v1730_v26 = vrot.slane %v6816_v47, 1  ;;  %v1732_v28 = vrot.slane %v6825_v25, 1  ;;  %v1632_v40 = vshll.u32 %v6825_v25, 16 }
  0xe5   : > { %5140 = vmatpush3.bf16.msra.mxu0 %v6035_v34  ;;  %v4737_v34 = vld [vmem:[%s6551_s25 + $0x74] sm:$0xff]  ;;  %v1731_v38 = vsel %vm9668_vm0, %v1728_v59, %v1730_v26 }
  0xe6   : > { %5141 = vmatprep.subr.bf16.mxu0 %v6036_v37  ;;  %v4738_v37 = vld [vmem:[%s6551_s25 + $0x7c] sm:$0xff] }
  0xe8   : > { %1403 = vmatmul.mubr.bf16.gmra.mxu1 %v6708_v35  ;;  %5567 = vmatmul.mubr.bf16.gmra.mxu0 %v455_v43  ;;  %v466_v35 = vrot.slane %v6749_v17, 1  ;;  %v6840_v43 = vpack.c.bf16 %v4738_v37, %v4737_v34 }
  0xe9   : > { %5142 = vmatpush3.bf16.msra.mxu0 %v6037_v39  ;;  %1410 = vmatprep.mubr.bf16.mxu1 %v402_v44  ;;  %v6835_v39 = vpack.c.bf16 %v4736_v30, %v4735_v29 }
  0xea   : > { %5570 = vmatprep.mubr.bf16.mxu0 %v457_v36  ;;  %5143 = vmatprep.subr.bf16.mxu0 %v6039_v42  ;;  %v467_v46 = vsel %vm9668_vm0, %v464_v3, %v466_v35  ;;  %v469_v13 = vsel %vm9668_vm0, %v466_v35, %v468_v0  ;;  %v1626_v3 = vrot.slane %v1624_v24, 1  ;;  %v1733_v42 = vsel %vm9668_vm0, %v1730_v26, %v1732_v28 }
  0xeb   : > { %v1734_v44 = vrot.slane %v6835_v39, 1  ;;  %v1640_v63 = vshll.u32 %v6835_v39, 16  ;;  %v1644_v33 = vshrl.u32 %v6835_v39, 16 }
  0xec   : > { %v1627_v57 = vsel %vm9667_vm1, %v1622_v27, %v1626_v3 }
  0xed   : > { %5144 = vmatpush3.bf16.msra.mxu0 %v6040_v45  ;;  %v1634_v45 = vrot.slane %v1632_v40, 1 }
  0xee   : > { %5145 = vmatprep.subr.bf16.mxu0 %v6041_v48  ;;  %v1736_v48 = vrot.slane %v6840_v43, 1 }
  0xf0   : > { %1411 = vmatmul.mubr.bf16.gmra.mxu1 %v6721_v54  ;;  %5571 = vmatmul.mubr.bf16.gmra.mxu0 %v459_v2  ;;  %v6050_v54 = vld [vmem:[#allocation5 + $0x180] sm:$0xff]   ;;  %v4741_v2 = vld [vmem:[%s6551_s25 + $0x94] sm:$0xff]  ;;  %v1737_v55 = vsel %vm9668_vm0, %v1734_v44, %v1736_v48 }
  0xf1   : > { %1418 = vmatprep.mubr.bf16.mxu1 %v410_v52  ;;  %5574 = vmatprep.mubr.bf16.mxu0 %v461_v53  ;;  %v1735_v52 = vsel %vm9668_vm0, %v1732_v28, %v1734_v44  ;;  %v1636_v53 = vshrl.u32 %v6825_v25, 16 }
  0xf2   : > { %5146 = vmatpush3.bf16.msra.mxu0 %v6042_v50  ;;  %v4740_v50 = vld [vmem:[%s6551_s25 + $0x8c] sm:$0xff] }
  0xf3   : > { %5147 = vmatprep.subr.bf16.mxu0 %v6044_v51  ;;  %v4742_v51 = vld [vmem:[%s6551_s25 + $0x9c] sm:$0xff] }
  0xf4   : > { %v6855_v56 = vpack.c.bf16 %v4742_v51, %v4741_v2 }
  0xf6   : > { %5148 = vmatpush3.bf16.msra.mxu0 %v6045_v32  ;;  %v6850_v32 = vpack.c.bf16 %v4740_v50, %v4739_v49  ;;  %v1740_v15 = vrot.slane %v6855_v56, 1  ;;  %v1664_v29 = vshll.u32 %v6855_v56, 16 }
  0xf7   : > { %5149 = vmatprep.subr.bf16.mxu0 %v6046_v19 }
  0xf8   : > { %1419 = vmatmul.mubr.bf16.gmra.mxu1 %v6738_v6  ;;  %5575 = vmatmul.mubr.bf16.gmra.mxu0 %v463_v31  ;;  %v1614_v6 = vor.u32 %v1613_v9, %v1609_v8  ;;  %v1638_v31 = vor.u32 %v1636_v53, %v1634_v45  ;;  %v1656_v18 = vshll.u32 %v6850_v32, 16  ;;  %v1660_v28 = vshrl.u32 %v6850_v32, 16 }
  0xf9   : > { %1426 = vmatprep.mubr.bf16.mxu1 %v418_v60  ;;  %5578 = vmatprep.mubr.bf16.mxu0 %v465_v61  ;;  %v4743_v60 = vld [vmem:[%s6551_s25 + $0xa4] sm:$0xff]  ;;  %v4744_v61 = vld [vmem:[%s6551_s25 + $0xac] sm:$0xff]  ;;  %v1666_v34 = vrot.slane %v1664_v29, 1 }
  0xfa   : > { %5150 = vmatpush3.bf16.msra.mxu0 %v6047_v5  ;;  %v1619_v20 = vsel %vm9667_vm1, %v1614_v6, %v1618_v14  ;;  %v1738_v5 = vrot.slane %v6850_v32, 1  ;;  %v4750_v6 = vld [vmem:[%s6551_s25 + $0xdc] sm:$0x3]  ;;  %v1652_v14 = vshrl.u32 %v6840_v43, 16  ;;  %v1658_v24 = vrot.slane %v1656_v18, 1 }
  0xfb   : > { %5151 = vmatprep.subr.bf16.mxu0 %v6049_v58  ;;  %v1642_v58 = vrot.slane %v1640_v63, 1 }
  0xfc   : > { %v1739_v35 = vsel %vm9668_vm0, %v1736_v48, %v1738_v5  ;;  %v1741_v4 = vsel %vm9668_vm0, %v1738_v5, %v1740_v15 }
  0xfe   : > { %5152 = vmatpush3.bf16.msra.mxu0 %v6050_v54  ;;  %v1643_v54 = vsel %vm9667_vm1, %v1638_v31, %v1642_v58 }
 0x100   : > { %1427 = vmatmul.mubr.bf16.gmra.mxu1 %v6749_v17  ;;  %5579 = vmatmul.mubr.bf16.gmra.mxu0 %v467_v46  ;;  %v1729_v17 = vsel %vm9668_vm0, %v1727_v16, %v1728_v59  ;;  %v6882_v59 = vpack.c.bf16 %v4748_v11, %v4747_v10 }
 0x101   : > { %1434 = vmatprep.mubr.bf16.mxu1 %v421_v7  ;;  %5582 = vmatprep.mubr.bf16.mxu0 %v469_v13  ;;  %v1646_v13 = vor.u32 %v1644_v33, %v1642_v58 }
 0x102   : > { %v1688_v31 = vshll.u32 %v6882_v59, 16 }
 0x108   : > { %1435 = vmatmul.mubr.bf16.gmra.mxu1 %v6754_v22  ;;  %5583 = vmatmul.mubr.bf16.gmra.mxu0 %v468_v0  ;;  %v1628_v22 = vshrl.u32 %v6816_v47, 16  ;;  %v6866_v0 = vpack.c.bf16 %v4744_v61, %v4743_v60 }
 0x109   : > { %1986 = vmatprep.mubr.bf16.mxu0 %v1619_v20  ;;  %5602 = vmatprep.mubr.bf16.mxu1 %v1729_v17  ;;  %v6887_v20 = vpack.c.bf16 %v4750_v6, %v4749_v12  ;;  %v1746_v17 = vrot.slane %v6882_v59, 1 }
 0x10a   : > { %v1630_v36 = vor.u32 %v1628_v22, %v1626_v3  ;;  %v1742_v7 = vrot.slane %v6866_v0, 1  ;;  %v1672_v22 = vshll.u32 %v6866_v0, 16 }
 0x10b   : > { %v1748_v26 = vrot.slane %v6887_v20, 1 }
 0x10c   : > { %v1635_v19 = vsel %vm9667_vm1, %v1630_v36, %v1634_v45  ;;  %v1743_v16 = vsel %vm9668_vm0, %v1740_v15, %v1742_v7  ;;  %v1674_v40 = vrot.slane %v1672_v22, 1 }
 0x10d   : > { %v1749_v30 = vsel %vm9668_vm0, %v1746_v17, %v1748_v26 }
 0x110   : > { %1987 = vmatmul.mubr.bf16.vlgmr.msra.gmra.mxu0 %v1596_v41  ;;  %5603 = vmatmul.mubr.bf16.vlgmr.msra.gmra.mxu1 %v1731_v38  ;;  %v4745_v41 = vld [vmem:[%s6551_s25 + $0xb4] sm:$0xff]  ;;  %v1668_v38 = vshrl.u32 %v6855_v56, 16 }
 0x111   : > { %1994 = vmatprep.mubr.bf16.mxu0 %v1627_v57  ;;  %5606 = vmatprep.mubr.bf16.mxu1 %v1733_v42  ;;  %v6871_v46 = vpack.c.bf16 %v4746_v62, %v4745_v41  ;;  %v1690_v62 = vrot.slane %v1688_v31, 1  ;;  %v6055_v31 = vld [vmem:[#allocation7 + $0x130] sm:$0xff]  }
 0x112   : > { %v1670_v57 = vor.u32 %v1668_v38, %v1666_v34 }
 0x113   : > { %v1744_v9 = vrot.slane %v6871_v46, 1  ;;  %v1680_v44 = vshll.u32 %v6871_v46, 16  ;;  %v1684_v5 = vshrl.u32 %v6871_v46, 16 }
 0x114   : > { %v1675_v42 = vsel %vm9667_vm1, %v1670_v57, %v1674_v40  ;;  %v6052_v57 = vld [vmem:[#allocation7 + $0x138] sm:$0xff]  }
 0x115   : > { %v1745_v21 = vsel %vm9668_vm0, %v1742_v7, %v1744_v9  ;;  %v1747_v27 = vsel %vm9668_vm0, %v1744_v9, %v1746_v17  ;;  %v1682_v2 = vrot.slane %v1680_v44, 1  ;;  %v1696_v9 = vshll.u32 %v6887_v20, 16  ;;  %v6054_v44 = vld [vmem:[#allocation7 + $0x178] sm:$0xff]   ;;  %5245 = vmatprep.subr.bf16.mxu1 %v6052_v57 }
 0x117   : > { %v1686_v41 = vor.u32 %v1684_v5, %v1682_v2  ;;  %v6970_v5 = vstv %s4776_s6 }
 0x118   : > { %1995 = vmatmul.mubr.bf16.gmra.mxu0 %v6805_v1  ;;  %5607 = vmatmul.mubr.bf16.gmra.mxu1 %v1735_v52  ;;  %v1648_v1 = vshll.u32 %v6840_v43, 16 }
 0x119   : > { %2002 = vmatprep.mubr.bf16.mxu0 %v1635_v19  ;;  %5610 = vmatprep.mubr.bf16.mxu1 %v1737_v55 }
 0x11a   : > { %v1650_v8 = vrot.slane %v1648_v1, 1 }
 0x11c   : > { %v1654_v23 = vor.u32 %v1652_v14, %v1650_v8 }
 0x11e   : > { %v1659_v3 = vsel %vm9667_vm1, %v1654_v23, %v1658_v24 }
 0x120   : > { %2003 = vmatmul.mubr.bf16.gmra.mxu0 %v6816_v47  ;;  %5611 = vmatmul.mubr.bf16.gmra.mxu1 %v1739_v35  ;;  %v1651_v47 = vsel %vm9667_vm1, %v1646_v13, %v1650_v8  ;;  %v1691_v13 = vsel %vm9667_vm1, %v1686_v41, %v1690_v62  ;;  %v1692_v8 = vshrl.u32 %v6882_v59, 16 }
 0x121   : > { %2010 = vmatprep.mubr.bf16.mxu0 %v1643_v54  ;;  %5614 = vmatprep.mubr.bf16.mxu1 %v1741_v4 }
 0x128   : > { %2011 = vmatmul.mubr.bf16.gmra.mxu0 %v6825_v25  ;;  %5615 = vmatmul.mubr.bf16.gmra.mxu1 %v1743_v16  ;;  %v1662_v25 = vor.u32 %v1660_v28, %v1658_v24  ;;  %v1694_v16 = vor.u32 %v1692_v8, %v1690_v62  ;;  %v1700_v28 = vshrl.u32 %v6887_v20, 16 }
 0x129   : > { %2018 = vmatprep.mubr.bf16.mxu0 %v1651_v47  ;;  %5618 = vmatprep.mubr.bf16.mxu1 %v1745_v21  ;;  %v1698_v47 = vrot.slane %v1696_v9, 1  ;;  %v6057_v9 = vld [vmem:[#allocation7 + $0x128] sm:$0xff]  }
 0x12a   : > { %v1667_v37 = vsel %vm9667_vm1, %v1662_v25, %v1666_v34 }
 0x12b   : > { %v1702_v22 = vor.u32 %v1700_v28, %v1698_v47 }
 0x130   : > { %2019 = vmatmul.mubr.bf16.gmra.mxu0 %v6835_v39  ;;  %5619 = vmatmul.mubr.bf16.gmra.mxu1 %v1747_v27  ;;  %v1676_v39 = vshrl.u32 %v6866_v0, 16 }
 0x131   : > { %2026 = vmatprep.mubr.bf16.mxu0 %v1659_v3  ;;  %5622 = vmatprep.mubr.bf16.mxu1 %v1749_v30 }
 0x132   : > { %v1678_v50 = vor.u32 %v1676_v39, %v1674_v40  ;;  %v6053_v40 = vld [vmem:[#allocation7 + $0xf8] sm:$0xff]  }
 0x133   : > { %5246 = vmatpush3.bf16.msra.mxu1 %v6053_v40 }
 0x134   : > { %v1683_v55 = vsel %vm9667_vm1, %v1678_v50, %v1682_v2  ;;  %5247 = vmatprep.subr.bf16.mxu1 %v6055_v31 }
 0x138   : > { %2027 = vmatmul.mubr.bf16.gmra.mxu0 %v6840_v43  ;;  %5623 = vmatmul.mubr.bf16.gmra.mxu1 %v1748_v26 }
 0x139   : > { %2034 = vmatprep.mubr.bf16.mxu0 %v1667_v37 }
 0x140   : > { %v4937_v36 = vpop.f32.mrf.mxu0  ;;  %v5524_v45 = vpop.f32.mrf.mxu1  ;;  %2035 = vmatmul.mubr.bf16.gmra.mxu0 %v6850_v32 }
 0x141   : > { %2042 = vmatprep.mubr.bf16.mxu0 %v1675_v42 }
 0x142   : > { %v4938_v48 = vpop.f32.mrf.mxu0  ;;  %v1076_v49 = vpop.f32.mrf.mxu1 }
 0x143   : > { %v4939_v43 = vadd.f32 %v4938_v48, %v4937_v36 }
 0x144   : > { %v4940_v51 = vpop.f32.mrf.mxu0  ;;  %v5525_v52 = vpop.f32.mrf.mxu1 }
 0x145   : > { %v6906_v53 = vadd.f32 %v4939_v43, %v1076_v49  ;;  %v2286_v49 = vlaneseq }
 0x146   : > { %v4941_v19 = vpop.f32.mrf.mxu0  ;;  %v6908_v63 = vpop.f32.mrf.mxu1 }
 0x147   : > { %v6913_v32 = vadd.f32 %v4941_v19, %v4940_v51 }
 0x148   : > { %v4943_v58 = vpop.f32.mrf.mxu0  ;;  %v5528_v15 = vpop.f32.mrf.mxu1  ;;  %2043 = vmatmul.mubr.bf16.gmra.mxu0 %v6855_v56 }
 0x149   : > { %2050 = vmatprep.mubr.bf16.mxu0 %v1683_v55  ;;  %v6966_v55 = vshrl.u32 %v2286_v49, 7 }
 0x14a   : > { %v4944_v60 = vpop.f32.mrf.mxu0  ;;  %v1092_v61 = vpop.f32.mrf.mxu1 }
 0x14b   : > { %v4945_v35 = vadd.f32 %v4944_v60, %v4943_v58  ;;  %v6056_v58 = vld [vmem:[#allocation7 + $0xf0] sm:$0xff]   ;;  %v2288_v8 = vadd.s32 8, %v6966_v55  ;;  %v2290_v40 = vadd.s32 24, %v6966_v55 }
 0x14c   : > { %v4946_v33 = vpop.f32.mrf.mxu0  ;;  %v5529_v54 = vpop.f32.mrf.mxu1  ;;  %5248 = vmatpush3.bf16.msra.mxu1 %v6056_v58 }
 0x14d   : > { %v6916_v1 = vadd.f32 %v5524_v45, %v4945_v35  ;;  %v6981_v35 = vadd.s32 %v6970_v5, %v6966_v55  ;;  %5249 = vmatprep.subr.bf16.mxu1 %v6057_v9  ;;  %v6995_v28 = vadd.s32 %v6970_v5, %v2288_v8  ;;  %v7023_v8 = vadd.s32 %v6970_v5, %v2290_v40  ;;  %v6069_v9 = vld [vmem:[#allocation7 + $0x150] sm:$0xff]  }
 0x14e   : > { %v4947_v4 = vpop.f32.mrf.mxu0  ;;  %v6918_v7 = vpop.f32.mrf.mxu1  ;;  %v2292_v40 = vadd.s32 40, %v6966_v55 }
 0x14f   : > { %v4948_v56 = vadd.f32 %v4947_v4, %v4946_v33  ;;  %v6062_v33 = vld [vmem:[#allocation7 + $0x168] sm:$0xff]   ;;  %vm2404_vm2 = vcmp.lt.s32.totalorder %v6981_v35, 0  ;;  %vm2415_vm4 = vcmp.lt.s32.totalorder %v6995_v28, 0  ;;  %vm2437_vm8 = vcmp.lt.s32.totalorder %v7023_v8, 0 }
 0x150   : > { %v4949_v10 = vpop.f32.mrf.mxu0  ;;  %v6923_v11 = vpop.f32.mrf.mxu1  ;;  %2051 = vmatmul.mubr.bf16.gmra.mxu0 %v6866_v0  ;;  %v1699_v0 = vsel %vm9667_vm1, %v1694_v16, %v1698_v47  ;;  %v6060_v16 = vld [vmem:[#allocation7 + $0x120] sm:$0xff]  }
 0x151   : > { %v6926_v12 = vadd.f32 %v5525_v52, %v4948_v56  ;;  %2058 = vmatprep.mubr.bf16.mxu0 %v1691_v13  ;;  %v6065_v47 = vld [vmem:[#allocation7 + $0x160] sm:$0xff]  }
 0x152   : > { %v4950_v6 = vpop.f32.mrf.mxu0  ;;  %v1108_v14 = vpop.f32.mrf.mxu1 }
 0x153   : > { %v4951_v18 = vadd.f32 %v4950_v6, %v4949_v10  ;;  %v6058_v6 = vld [vmem:[#allocation7 + $0xe8] sm:$0xff]  }
 0x154   : > { %v6928_v21 = vpop.f32.mrf.mxu0  ;;  %v6930_v17 = vpop.f32.mrf.mxu1  ;;  %5250 = vmatpush3.bf16.msra.mxu1 %v6058_v6 }
 0x155   : > { %v6932_v23 = vadd.f32 %v4951_v18, %v1092_v61  ;;  %v6059_v61 = vld [vmem:[#allocation7 + $0x170] sm:$0xff]   ;;  %5251 = vmatprep.subr.bf16.mxu1 %v6060_v16 }
 0x156   : > { %v6934_v24 = vpop.f32.mrf.mxu0  ;;  %v6936_v26 = vpop.f32.mrf.mxu1 }
 0x158   : > { %v4955_v27 = vpop.f32.mrf.mxu0  ;;  %v6939_v3 = vpop.f32.mrf.mxu1  ;;  %2059 = vmatmul.mubr.bf16.gmra.mxu0 %v6871_v46  ;;  %v9644_v46 = vmov 0.0  }
 0x159   : > { %2066 = vmatprep.mubr.bf16.mxu0 %v1699_v0  ;;  %5626 = vmatprep.subr.bf16.mxu0 %v9644_v46 }
 0x15a   : > { %v4956_v29 = vpop.f32.mrf.mxu0  ;;  %v6943_v30 = vpop.f32.mrf.mxu1  ;;  %5627 = vmatpush3.bf16.msra.mxu0 %v6054_v44 }
 0x15b   : > { %v4957_v25 = vadd.f32 %v4956_v29, %v4955_v27  ;;  %5628 = vmatprep.subr.bf16.mxu0 %v9644_v46 }
 0x15c   : > { %v4958_v34 = vpop.f32.mrf.mxu0  ;;  %v6945_v37 = vpop.f32.mrf.mxu1 }
 0x15d   : > { %v6947_v38 = vadd.f32 %v5528_v15, %v4957_v25 }
 0x15e   : > { %v4959_v42 = vpop.f32.mrf.mxu0  ;;  %v6949_v39 = vpop.f32.mrf.mxu1  ;;  %5629 = vmatpush3.bf16.msra.mxu0 %v6059_v61 }
 0x15f   : > { %v4960_v36 = vadd.f32 %v4959_v42, %v4958_v34  ;;  %5630 = vmatprep.subr.bf16.mxu0 %v9644_v46  ;;  %v2289_v34 = vadd.s32 16, %v6966_v55  ;;  %v6067_v42 = vld [vmem:[#allocation7 + $0x158] sm:$0xff]  }
 0x160   : > { %v4961_v45 = vpop.f32.mrf.mxu0  ;;  %v6952_v48 = vpop.f32.mrf.mxu1  ;;  %2067 = vmatmul.mubr.bf16.gmra.mxu0 %v6882_v59 }
 0x161   : > { %v6955_v50 = vadd.f32 %v5529_v54, %v4960_v36  ;;  %2074 = vmatprep.mubr.bf16.mxu0 %v1702_v22  ;;  %v6061_v22 = vld [vmem:[#allocation7 + $0xe0] sm:$0xff]  }
 0x162   : > { %v4962_v2 = vpop.f32.mrf.mxu0  ;;  %v6957_v43 = vpop.f32.mrf.mxu1  ;;  %5631 = vmatpush3.bf16.msra.mxu0 %v6062_v33  ;;  %5252 = vmatpush3.bf16.msra.mxu1 %v6061_v22  ;;  %v6064_v33 = vld [vmem:[#allocation7 + $0xd8] sm:$0xff]   ;;  %v6072_v22 = vld [vmem:[#allocation7 + $0x148] sm:$0xff]  }
 0x163   : > { %v4963_v51 = vadd.f32 %v4962_v2, %v4961_v45  ;;  %5632 = vmatprep.subr.bf16.mxu0 %v9644_v46  ;;  %v2416_v2 = vsub.s32 0, %v6995_v28 }
 0x164   : > { %v6962_v52 = vpop.f32.mrf.mxu0  ;;  %v6964_v19 = vpop.f32.mrf.mxu1 }
 0x165   : > { %v6968_v59 = vadd.f32 %v4963_v51, %v1108_v14  ;;  %v6063_v51 = vld [vmem:[#allocation7 + $0x118] sm:$0xff]   ;;  %v7031_v6 = vmin.u32 %v2416_v2, %v6995_v28 }
 0x166   : > { %v6972_v15 = vpop.f32.mrf.mxu0  ;;  %v6974_v60 = vpop.f32.mrf.mxu1  ;;  %5633 = vmatpush3.bf16.msra.mxu0 %v6065_v47  ;;  %5253 = vmatprep.subr.bf16.mxu1 %v6063_v51 }
 0x167   : > { %5634 = vmatprep.subr.bf16.mxu0 %v9644_v46  ;;  %5254 = vmatpush3.bf16.msra.mxu1 %v6064_v33 }
 0x168   : > { %v4967_v41 = vpop.f32.mrf.mxu0  ;;  %v6976_v62 = vpop.f32.mrf.mxu1  ;;  %2075 = vmatmul.mubr.bf16.gmra.mxu0 %v6887_v20  ;;  %v2405_v20 = vsub.s32 0, %v6981_v35 }
 0x169   : > { %5642 = vmatprep.mubr.msk.bf16.mxu0 %vm9665_vm3, %v9644_v46 }
 0x16a   : > { %v4968_v54 = vpop.f32.mrf.mxu0  ;;  %v6983_v4 = vpop.f32.mrf.mxu1  ;;  %5635 = vmatpush3.bf16.msra.mxu0 %v6067_v42 }
 0x16b   : > { %v4969_v13 = vadd.f32 %v4968_v54, %v4967_v41  ;;  %v7014_v41 = vadd.s32 %v6970_v5, %v2289_v34  ;;  %5636 = vmatprep.subr.bf16.mxu0 %v9644_v46  ;;  %v2438_v34 = vsub.s32 0, %v7023_v8 }
 0x16c   : > { %v4970_v56 = vpop.f32.mrf.mxu0  ;;  %v5545_v10 = vpop.f32.mrf.mxu1 }
 0x16d   : > { %v6989_v14 = vadd.f32 %v6923_v11, %v4969_v13  ;;  %v6998_v11 = vmin.u32 %v2405_v20, %v6981_v35  ;;  %v1080_v20 = vadd.f32 %v6913_v32, %v6908_v63  ;;  %vm2426_vm7 = vcmp.lt.s32.totalorder %v7014_v41, 0 }
 0x16e   : > { %v4971_v18 = vpop.f32.mrf.mxu0  ;;  %v6991_v0 = vpop.f32.mrf.mxu1  ;;  %5637 = vmatpush3.bf16.msra.mxu0 %v6069_v9  ;;  %v6071_v9 = vld [vmem:[#allocation7 + $0xc8] sm:$0xff]   ;;  %vm2360_vm3 = vcmp.lt.s32.totalorder %v7014_v41, 288 }
 0x16f   : > { %9792 = vst [vmem:[#allocation18_spill] sm:$0xff] %v6991_v0  ;;  %v4972_v27 = vadd.f32 %v4971_v18, %v4970_v56  ;;  %v2427_v18 = vsub.s32 0, %v7014_v41  ;;  %5638 = vmatprep.subr.bf16.mxu0 %v9644_v46 }
 0x170   : > { %v4973_v29 = vpop.f32.mrf.mxu0  ;;  %v5045_v25 = vpop.f32.mrf.mxu1 }
 0x171   : > { %v7002_v57 = vadd.f32 %v6930_v17, %v4972_v27  ;;  %v7010_v17 = vmul.u32.u64.low 3817748708, %v6998_v11  ;;  %v7011_v61 = vmul.u32.u64.high 3817748708, %v6998_v11, %v7010_v17  ;;  %v2291_v27 = vadd.s32 32, %v6966_v55 }
 0x172   : > { %v4974_v44 = vpop.f32.mrf.mxu0  ;;  %v5046_v36 = vpop.f32.mrf.mxu1  ;;  %v7046_v17 = vmin.u32 %v2427_v18, %v7014_v41  ;;  %5639 = vmatpush3.bf16.msra.mxu0 %v6072_v22 }
 0x173   : > { %v4975_v45 = vadd.f32 %v4974_v44, %v4973_v29  ;;  %v5047_v49 = vadd.f32 %v5046_v36, %v5045_v25  ;;  %v6068_v29 = vld [vmem:[#allocation7 + $0xd0] sm:$0xff]   ;;  %v7049_v33 = vadd.s32 %v6970_v5, %v2291_v27  ;;  %5640 = vmatprep.subr.bf16.mxu0 %v9644_v46  ;;  %v6073_v27 = vld [vmem:[#allocation7 + $0x100] sm:$0xff]  }
 0x174   : > { %v7007_v31 = vpop.f32.mrf.mxu0  ;;  %v5048_v58 = vpop.f32.mrf.mxu1 }
 0x175   : > { %v7017_v54 = vadd.f32 %v4975_v45, %v6943_v30  ;;  %v7020_v13 = vadd.f32 %v5047_v49, %v6906_v53  ;;  %v6066_v53 = vld [vmem:[#allocation7 + $0x110] sm:$0xff]   ;;  %v7041_v36 = vmul.u32.u64.low 3817748708, %v7031_v6  ;;  %v7042_v45 = vmul.u32.u64.high 3817748708, %v7031_v6, %v7041_v36  ;;  %v6070_v49 = vld [vmem:[#allocation7 + $0x108] sm:$0xff]   ;;  %9794 = vst [vmem:[#allocation20_spill] sm:$0xff] %v7049_v33 }
 0x176   : > { %v7025_v56 = vpop.f32.mrf.mxu0  ;;  %v5049_v10 = vpop.f32.mrf.mxu1  ;;  %5255 = vmatprep.subr.bf16.mxu1 %v6066_v53  ;;  %v6074_v53 = vld [vmem:[#allocation7 + $0x140] sm:$0xff]   ;;  %v2449_v22 = vsub.s32 0, %v7049_v33 }
 0x177   : > { %v5050_v30 = vadd.f32 %v5049_v10, %v5048_v58  ;;  %5256 = vmatpush3.bf16.msra.mxu1 %v6068_v29  ;;  %v2410_v58 = vshrl.u32 %v7011_v61, 4  ;;  %5641 = vmatpush3.bf16.msra.mxu0 %v6074_v53 }
 0x178   : > { %v4979_v16 = vpop.f32.mrf.mxu0  ;;  %v5051_v47 = vpop.f32.mrf.mxu1  ;;  %5257 = vmatprep.subr.bf16.mxu1 %v6070_v49  ;;  %5678 = vmatprep.subr.bf16.mxu0 %v9644_v46 }
 0x179   : > { %v7035_v25 = vadd.f32 %v5050_v30, %v1080_v20  ;;  %v7058_v30 = vmin.u32 %v2438_v34, %v7023_v8 }
 0x17a   : > { %v4980_v63 = vpop.f32.mrf.mxu0  ;;  %v5052_v32 = vpop.f32.mrf.mxu1 }
 0x17b   : > { %9793 = vst [vmem:[#allocation19_spill] sm:$0xff] %v7035_v25  ;;  %v4981_v42 = vadd.f32 %v4980_v63, %v4979_v16  ;;  %v5053_v44 = vadd.f32 %v5052_v32, %v5051_v47  ;;  %v7061_v47 = vadd.s32 %v6970_v5, %v2292_v40  ;;  %5258 = vmatpush3.bf16.msra.mxu1 %v6071_v9  ;;  %v2411_v63 = vmul.u32 18, %v2410_v58 }
 0x17c   : > { %v4982_v2 = vpop.f32.mrf.mxu0  ;;  %v5054_v51 = vpop.f32.mrf.mxu1  ;;  %v7065_v34 = vmul.u32.u64.low 3817748708, %v7046_v17  ;;  %v7066_v32 = vmul.u32.u64.high 3817748708, %v7046_v17, %v7065_v34  ;;  %v7076_v36 = vmul.u32.u64.low 3817748708, %v7058_v30  ;;  %v7077_v49 = vmul.u32.u64.high 3817748708, %v7058_v30, %v7076_v36  ;;  %5259 = vmatprep.subr.bf16.mxu1 %v6073_v27 }
 0x17d   : > { %v7052_v10 = vadd.f32 %v6939_v3, %v4981_v42  ;;  %v7055_v20 = vadd.f32 %v5053_v44, %v6916_v1  ;;  %9795 = vst [vmem:[#allocation21_spill] sm:$0xff] %v7061_v47  ;;  %v6075_v42 = vld [vmem:[#allocation7 + $0xc0] sm:$0xff]   ;;  %v2460_v58 = vsub.s32 0, %v7061_v47  ;;  %v2412_v34 = vsub.s32 %v6998_v11, %v2411_v63 }
 0x17e   : > { %v4983_v61 = vpop.f32.mrf.mxu0  ;;  %v5055_v16 = vpop.f32.mrf.mxu1 }
 0x17f   : > { %v4984_v18 = vadd.f32 %v4983_v61, %v4982_v2  ;;  %v5056_v3 = vadd.f32 %v5055_v16, %v5054_v51  ;;  %5260 = vmatpush3.bf16.msra.mxu1 %v6075_v42  ;;  %v2413_v63 = vsub.s32 0, %v2412_v34 }
 0x180   : > { %v4985_v29 = vpop.f32.mrf.mxu0  ;;  %v5057_v1 = vpop.f32.mrf.mxu1 }
 0x181   : > { %v7070_v44 = vadd.f32 %v6945_v37, %v4984_v18  ;;  %v7073_v40 = vadd.f32 %v5056_v3, %v6926_v12  ;;  %v4954_v37 = vadd.f32 %v6934_v24, %v6928_v21  ;;  %v2421_v12 = vshrl.u32 %v7042_v45, 4 }
 0x182   : > { %v4986_v2 = vpop.f32.mrf.mxu0  ;;  %v5058_v51 = vpop.f32.mrf.mxu1  ;;  %v7087_v3 = vmin.u32 %v2449_v22, %v7049_v33  ;;  %v7099_v24 = vmin.u32 %v2460_v58, %v7061_v47  ;;  %v2293_v45 = vadd.s32 48, %v6966_v55  ;;  %v2443_v58 = vshrl.u32 %v7077_v49, 4 }
 0x183   : > { %v4987_v9 = vadd.f32 %v4986_v2, %v4985_v29  ;;  %v5059_v61 = vadd.f32 %v5058_v51, %v5057_v1  ;;  %v1096_v29 = vadd.f32 %v4954_v37, %v6918_v7  ;;  %v2422_v22 = vmul.u32 18, %v2421_v12 }
 0x184   : > { %v7084_v16 = vpop.f32.mrf.mxu0  ;;  %v5060_v18 = vpop.f32.mrf.mxu1  ;;  %v2432_v2 = vshrl.u32 %v7066_v32, 4  ;;  %v7113_v7 = vmul.u32.u64.low 3817748708, %v7099_v24  ;;  %v7114_v37 = vmul.u32.u64.high 3817748708, %v7099_v24, %v7113_v7  ;;  %v7117_v12 = vadd.s32 %v6970_v5, %v2293_v45 }
 0x185   : > { %v7090_v53 = vadd.f32 %v4987_v9, %v6957_v43  ;;  %v7093_v27 = vadd.f32 %v5059_v61, %v6932_v23  ;;  %v7105_v23 = vmul.u32.u64.low 3817748708, %v7087_v3  ;;  %v7106_v51 = vmul.u32.u64.high 3817748708, %v7087_v3, %v7105_v23 }
 0x186   : > { %v7096_v42 = vpop.f32.mrf.mxu0  ;;  %v5061_v21 = vpop.f32.mrf.mxu1  ;;  %9797 = vst [vmem:[#allocation23_spill] sm:$0xff] %v7117_v12  ;;  %v2433_v49 = vmul.u32 18, %v2432_v2  ;;  %v7130_v45 = vsel %vm2404_vm2, %v2413_v63, %v2412_v34 }
 0x187   : > { %v5062_v1 = vadd.f32 %v5061_v21, %v5060_v18  ;;  %v2423_v21 = vsub.s32 %v7031_v6, %v2422_v22  ;;  %9798 = vst [vmem:[#allocation24_spill] sm:$0xff] %v7130_v45  ;;  %vm2657_vm5 = vcmp.ne.s32.totalorder %v7130_v45, 0  ;;  %v2454_v34 = vshrl.u32 %v7106_v51, 4 }
 0x188   : > { %v4991_v36 = vpop.f32.mrf.mxu0  ;;  %v5063_v43 = vpop.f32.mrf.mxu1  ;;  %vm2680_vm6 = vcmp.lt.s32.totalorder %v7130_v45, 0 }
 0x189   : > { %v7108_v11 = vadd.f32 %v5062_v1, %v1096_v29  ;;  %v2424_v46 = vsub.s32 0, %v2423_v21  ;;  %vm7184_vm9 = vmand %vm2680_vm6, %vm2657_vm5  ;;  %vm2459_vm5 = vcmp.lt.s32.totalorder %v7061_v47, 0 }
 0x18a   : > { %v4992_v9 = vpop.f32.mrf.mxu0  ;;  %v5064_v61 = vpop.f32.mrf.mxu1 }
 0x18b   : > { %9796 = vst [vmem:[#allocation22_spill] sm:$0xff] %v7108_v11  ;;  %v4993_v32 = vadd.f32 %v4992_v9, %v4991_v36  ;;  %v5065_v18 = vadd.f32 %v5064_v61, %v5063_v43  ;;  %v2444_v36 = vmul.u32 18, %v2443_v58  ;;  %v6076_v43 = vld [vmem:[#allocation7 + $0x78] sm:$0xff]   ;;  %v2471_v9 = vsub.s32 0, %v7117_v12 }
 0x18c   : > { %v4994_v29 = vpop.f32.mrf.mxu0  ;;  %v5066_v1 = vpop.f32.mrf.mxu1  ;;  %5332 = vmatprep.subr.bf16.mxu1 %v6076_v43  ;;  %v7147_v43 = vadd.s32 18, %v7130_v45 }
 0x18d   : > { %v7123_v23 = vadd.f32 %v6952_v48, %v4993_v32  ;;  %v7126_v11 = vadd.f32 %v5065_v18, %v6947_v38  ;;  %v2434_v38 = vsub.s32 %v7046_v17, %v2433_v49  ;;  %v2445_v32 = vsub.s32 %v7058_v30, %v2444_v36 }
 0x18e   : > { %v4995_v6 = vpop.f32.mrf.mxu0  ;;  %v5067_v22 = vpop.f32.mrf.mxu1  ;;  %v2294_v18 = vadd.s32 56, %v6966_v55  ;;  %9799 = vst [vmem:[#allocation25_spill] sm:$0xff] %v7147_v43  ;;  %v2465_v17 = vshrl.u32 %v7114_v37, 4  ;;  %v7151_v51 = vmin.u32 %v2471_v9, %v7117_v12  ;;  %v7157_v30 = vsel %vm2415_vm4, %v2424_v46, %v2423_v21 }
 0x18f   : > { %v4996_v61 = vadd.f32 %v4995_v6, %v4994_v29  ;;  %v5068_v7 = vadd.f32 %v5067_v22, %v5066_v1  ;;  %9800 = vst [vmem:[#allocation26_spill] sm:$0xff] %v7157_v30  ;;  %v2435_v22 = vsub.s32 0, %v2434_v38  ;;  %v2455_v37 = vmul.u32 18, %v2454_v34 }
 0x190   : > { %v4997_v2 = vpop.f32.mrf.mxu0  ;;  %v5069_v48 = vpop.f32.mrf.mxu1  ;;  %v2295_v34 = vadd.s32 64, %v6966_v55  ;;  %vm2658_vm10 = vcmp.ne.s32.totalorder %v7157_v30, 0  ;;  %vm2681_vm11 = vcmp.lt.s32.totalorder %v7157_v30, 0  ;;  %vm2448_vm4 = vcmp.lt.s32.totalorder %v7049_v33, 0 }
 0x191   : > { %v7138_v63 = vadd.f32 %v6964_v19, %v4996_v61  ;;  %v7141_v58 = vadd.f32 %v5068_v7, %v6955_v50  ;;  %v4966_v50 = vadd.f32 %v6972_v15, %v6962_v52  ;;  %v2446_v15 = vsub.s32 0, %v2445_v32  ;;  %vm7219_vm13 = vmand %vm2681_vm11, %vm2658_vm10 }
 0x192   : > { %v4998_v29 = vpop.f32.mrf.mxu0  ;;  %v5070_v1 = vpop.f32.mrf.mxu1  ;;  %v7170_v61 = vadd.s32 %v6970_v5, %v2294_v18  ;;  %v2466_v7 = vmul.u32 18, %v2465_v17  ;;  %v7191_v17 = vsel %vm2426_vm7, %v2435_v22, %v2434_v38 }
 0x193   : > { %v4999_v19 = vadd.f32 %v4998_v29, %v4997_v2  ;;  %v5071_v49 = vadd.f32 %v5070_v1, %v5069_v48  ;;  %v7175_v2 = vmul.u32.u64.low 3817748708, %v7151_v51  ;;  %v7176_v48 = vmul.u32.u64.high 3817748708, %v7151_v51, %v7175_v2 }
 0x194   : > { %v7159_v36 = vpop.f32.mrf.mxu0  ;;  %v5072_v6 = vpop.f32.mrf.mxu1  ;;  %v2467_v22 = vsub.s32 %v7099_v24, %v2466_v7  ;;  %vm2659_vm12 = vcmp.ne.s32.totalorder %v7191_v17, 0  ;;  %v9806_v24 = vmov 0  ;;  %vm2682_vm14 = vcmp.lt.s32.totalorder %v7191_v17, 0 }
 0x195   : > { %v7164_v9 = vadd.f32 %v4999_v19, %v6983_v4  ;;  %v7167_v52 = vadd.f32 %v5071_v49, %v6968_v59  ;;  %v1112_v4 = vadd.f32 %v4966_v50, %v6936_v26  ;;  %v9801_v59 = vmov 0  ;;  %vm7251_vm6 = vmand %vm2682_vm14, %vm2659_vm12 }
 0x196   : > { %v7172_v46 = vpop.f32.mrf.mxu0  ;;  %v5073_v21 = vpop.f32.mrf.mxu1  ;;  %v9802_v59 = vsel %vm7184_vm9, 4294967295, %v9801_v59  ;;  %v2456_v19 = vsub.s32 %v7087_v3, %v2455_v37  ;;  %v7199_v50 = vsel %vm2437_vm8, %v2446_v15, %v2445_v32  ;;  %v2482_v49 = vsub.s32 0, %v7170_v61 }
 0x197   : > { %v5074_v29 = vadd.f32 %v5073_v21, %v5072_v6  ;;  %9803 = vst [vmem:[#allocation27_spill] sm:$0xff] %v9802_v59  ;;  %v7208_v3 = vadd.s32 %v6970_v5, %v2295_v34  ;;  %v2296_v37 = vadd.s32 72, %v6966_v55  ;;  %v7212_v32 = vadd.s32 18, %v7157_v30 }
 0x198   : > { %v5003_v18 = vpop.f32.mrf.mxu0  ;;  %v5075_v1 = vpop.f32.mrf.mxu1  ;;  %v9807_v24 = vsel %vm7219_vm13, 4294967295, %v9806_v24  ;;  %vm2660_vm15 = vcmp.ne.s32.totalorder %v7199_v50, 0  ;;  %vm2683_vm2 = vcmp.lt.s32.totalorder %v7199_v50, 0  ;;  %v2457_v7 = vsub.s32 0, %v2456_v19 }
 0x199   : > { %v7194_v26 = vadd.f32 %v5074_v29, %v1112_v4  ;;  %9805 = vst [vmem:[#allocation29_spill] sm:$0xff] %v7212_v32  ;;  %9808 = vst [vmem:[#allocation30_spill] sm:$0xff] %v9807_v24  ;;  %v2476_v38 = vshrl.u32 %v7176_v48, 4  ;;  %v7239_v25 = vadd.s32 %v6970_v5, %v2296_v37  ;;  %v7256_v37 = vadd.s32 18, %v7191_v17 }
 0x19a   : > { %v5004_v6 = vpop.f32.mrf.mxu0  ;;  %v5076_v21 = vpop.f32.mrf.mxu1  ;;  %vm7276_vm7 = vmand %vm2683_vm2, %vm2660_vm15  ;;  %vm2470_vm2 = vcmp.lt.s32.totalorder %v7117_v12, 0 }
 0x19b   : > { %9804 = vst [vmem:[#allocation28_spill] sm:$0xff] %v7194_v26  ;;  %v5005_v2 = vadd.f32 %v5004_v6, %v5003_v18  ;;  %v5077_v4 = vadd.f32 %v5076_v21, %v5075_v1  ;;  %v7234_v1 = vmin.u32 %v2482_v49, %v7170_v61  ;;  %v2493_v26 = vsub.s32 0, %v7208_v3 }
 0x19c   : > { %v5006_v15 = vpop.f32.mrf.mxu0  ;;  %v5078_v29 = vpop.f32.mrf.mxu1  ;;  %v2297_v49 = vadd.s32 80, %v6966_v55 }
 0x19d   : > { %v7227_v34 = vadd.f32 %v6976_v62, %v5005_v2  ;;  %v7230_v18 = vadd.f32 %v5077_v4, %v6989_v14  ;;  %v2468_v15 = vsub.s32 0, %v2467_v22 }
 0x19e   : > { %v5007_v6 = vpop.f32.mrf.mxu0  ;;  %v5079_v21 = vpop.f32.mrf.mxu1  ;;  %v7296_v45 = vadd.s32 %v6970_v5, %v2297_v49 }
 0x19f   : > { %9809 = vst [vmem:[#allocation31_spill] sm:$0xff] %v7227_v34  ;;  %v5080_v62 = vadd.f32 %v5079_v21, %v5078_v29  ;;  %v7259_v29 = vadd.s32 18, %v7199_v50  ;;  %v7263_v6 = vsel %vm2448_vm4, %v2457_v7, %v2456_v19  ;;  %v2298_v21 = vadd.s32 88, %v6966_v55 }
 0x1a0   : > { %v5081_v2 = vpop.f32.mrf.mxu1  ;;  %v5564_v4 = vpop.f32.mrf.mxu0  ;;  %9812 = vst [vmem:[#allocation32_spill] sm:$0xff] %v7263_v6  ;;  %v7281_v24 = vmul.u32.u64.low 3817748708, %v7234_v1  ;;  %v7282_v19 = vmul.u32.u64.high 3817748708, %v7234_v1, %v7281_v24  ;;  %v7284_v47 = vsel %vm2459_vm5, %v2468_v15, %v2467_v22  ;;  %9818 = vst [vmem:[#allocation36_spill] sm:$0xff] %v7296_v45  ;;  %vm2661_vm8 = vcmp.ne.s32.totalorder %v7263_v6, 0 }
 0x1a1   : > { %v7267_v14 = vadd.f32 %v5564_v4, %v7055_v20  ;;  %v7270_v30 = vadd.f32 %v5080_v62, %v7002_v57  ;;  %9816 = vst [vmem:[#allocation34_spill] sm:$0xff] %v7284_v47  ;;  %v2477_v20 = vmul.u32 18, %v2476_v38  ;;  %v7287_v57 = vmin.u32 %v2493_v26, %v7208_v3 }
 0x1a2   : > { %v5082_v7 = vpop.f32.mrf.mxu1  ;;  %v1476_v34 = vpop.f32.mrf.mxu0  ;;  %v2504_v62 = vsub.s32 0, %v7239_v25  ;;  %v4978_v4 = vadd.f32 %v7025_v56, %v7007_v31  ;;  %v7307_v31 = vadd.s32 %v6970_v5, %v2298_v21  ;;  %vm2684_vm10 = vcmp.lt.s32.totalorder %v7263_v6, 0 }
 0x1a3   : > { %9813 = vst [vmem:[#allocation33_spill] sm:$0xff] %v7267_v14  ;;  %v5083_v14 = vadd.f32 %v5082_v7, %v5081_v2  ;;  %v7293_v33 = vadd.f32 %v1476_v34, %v7020_v13  ;;  %v2299_v13 = vadd.s32 96, %v6966_v55  ;;  %vm2662_vm11 = vcmp.ne.s32.totalorder %v7284_v47, 0  ;;  %vm7350_vm14 = vmand %vm2684_vm10, %vm2661_vm8 }
 0x1a4   : > { %v5084_v24 = vpop.f32.mrf.mxu1  ;;  %v5565_v43 = vpop.f32.mrf.mxu0  ;;  %9819 = vst [vmem:[#allocation37_spill] sm:$0xff] %v7307_v31  ;;  %v7322_v49 = vmul.u32.u64.low 3817748708, %v7287_v57  ;;  %v7323_v2 = vmul.u32.u64.high 3817748708, %v7287_v57, %v7322_v49  ;;  %v7326_v21 = vmin.u32 %v2504_v62, %v7239_v25  ;;  %vm2685_vm12 = vcmp.lt.s32.totalorder %v7284_v47, 0 }
 0x1a5   : > { %9817 = vst [vmem:[#allocation35_spill] sm:$0xff] %v7293_v33  ;;  %v7311_v56 = vadd.f32 %v5565_v43, %v7073_v40  ;;  %v7314_v22 = vadd.f32 %v5083_v14, %v7017_v54  ;;  %v1128_v40 = vadd.f32 %v4978_v4, %v6949_v39  ;;  %v2478_v43 = vsub.s32 %v7151_v51, %v2477_v20  ;;  %vm7369_vm15 = vmand %vm2685_vm12, %vm2662_vm11 }
 0x1a6   : > { %v5085_v34 = vpop.f32.mrf.mxu1  ;;  %v7318_v15 = vpop.f32.mrf.mxu0  ;;  %v2515_v14 = vsub.s32 0, %v7296_v45  ;;  %v2526_v26 = vsub.s32 0, %v7307_v31  ;;  %v2300_v49 = vadd.s32 104, %v6966_v55  ;;  %v7343_v51 = vadd.s32 18, %v7263_v6 }
 0x1a7   : > { %9820 = vst [vmem:[#allocation38_spill] sm:$0xff] %v7311_v56  ;;  %9821 = vst [vmem:[#allocation39_spill] sm:$0xff] %v7318_v15  ;;  %v5086_v54 = vadd.f32 %v5085_v34, %v5084_v24  ;;  %v7334_v56 = vadd.s32 %v6970_v5, %v2299_v13  ;;  %v2487_v20 = vshrl.u32 %v7282_v19, 4  ;;  %vm2481_vm4 = vcmp.lt.s32.totalorder %v7170_v61, 0 }
 0x1a8   : > { %v5087_v7 = vpop.f32.mrf.mxu1  ;;  %v5568_v38 = vpop.f32.mrf.mxu0  ;;  %9825 = vst [vmem:[#allocation43_spill] sm:$0xff] %v7343_v51  ;;  %v7374_v15 = vmin.u32 %v2515_v14, %v7296_v45  ;;  %vm2492_vm10 = vcmp.lt.s32.totalorder %v7208_v3, 0  ;;  %vm2503_vm12 = vcmp.lt.s32.totalorder %v7239_v25, 0 }
 0x1a9   : > { %9822 = vst [vmem:[#allocation40_spill] sm:$0xff] %v7334_v56  ;;  %v7338_v62 = vadd.f32 %v5568_v38, %v7126_v11  ;;  %v7340_v39 = vadd.f32 %v5086_v54, %v1128_v40  ;;  %v7355_v11 = vadd.s32 18, %v7284_v47  ;;  %v2301_v40 = vadd.s32 112, %v6966_v55 }
 0x1aa   : > { %v5088_v4 = vpop.f32.mrf.mxu1  ;;  %v1492_v24 = vpop.f32.mrf.mxu0  ;;  %v7358_v38 = vmul.u32.u64.low 3817748708, %v7326_v21  ;;  %v7359_v34 = vmul.u32.u64.high 3817748708, %v7326_v21, %v7358_v38  ;;  %v2488_v59 = vmul.u32 18, %v2487_v20 }
 0x1ab   : > { %9823 = vst [vmem:[#allocation41_spill] sm:$0xff] %v7338_v62  ;;  %9824 = vst [vmem:[#allocation42_spill] sm:$0xff] %v7340_v39  ;;  %v5089_v19 = vadd.f32 %v5088_v4, %v5087_v7  ;;  %v7363_v54 = vadd.f32 %v1492_v24, %v7093_v27  ;;  %v9830_v62 = vmov 0  ;;  %v2479_v39 = vsub.s32 0, %v2478_v43 }
 0x1ac   : > { %9828 = vst [vmem:[#allocation44_spill] sm:$0xff] %v7355_v11  ;;  %v9831_v62 = vsel %vm7369_vm15, 4294967295, %v9830_v62  ;;  %v5090_v33 = vpop.f32.mrf.mxu1  ;;  %v5569_v38 = vpop.f32.mrf.mxu0  ;;  %v7378_v7 = vmin.u32 %v2526_v26, %v7307_v31  ;;  %v2537_v27 = vsub.s32 0, %v7334_v56  ;;  %v7382_v4 = vadd.s32 %v6970_v5, %v2300_v49 }
 0x1ad   : > { %9829 = vst [vmem:[#allocation45_spill] sm:$0xff] %v7363_v54  ;;  %9832 = vst [vmem:[#allocation46_spill] sm:$0xff] %v9831_v62  ;;  %v7385_v24 = vadd.f32 %v5569_v38, %v7141_v58  ;;  %v1405_v54 = vadd.f32 %v5089_v19, %v7052_v10  ;;  %v2498_v58 = vshrl.u32 %v7323_v2, 4  ;;  %v7401_v10 = vadd.s32 %v6970_v5, %v2301_v40 }
 0x1ae   : > { %9833 = vst [vmem:[#allocation47_spill] sm:$0xff] %v7382_v4  ;;  %v5091_v12 = vpop.f32.mrf.mxu1  ;;  %v7392_v0 = vpop.f32.mrf.mxu0  ;;  %v7403_v19 = vsel %vm2470_vm2, %v2479_v39, %v2478_v43  ;;  %v7406_v20 = vmul.u32.u64.low 3817748708, %v7374_v15  ;;  %v7407_v38 = vmul.u32.u64.high 3817748708, %v7374_v15, %v7406_v20  ;;  %v7414_v26 = vmin.u32 %v2537_v27, %v7334_v56 }
 0x1af   : > { %9834 = vst [vmem:[#allocation48_spill] sm:$0xff] %v7385_v24  ;;  %9835 = vst [vmem:[#allocation49_spill] sm:$0xff] %v7392_v0  ;;  %v5092_v49 = vadd.f32 %v5091_v12, %v5090_v33  ;;  %v7410_v0 = vmul.u32.u64.low 3817748708, %v7378_v7  ;;  %v7411_v62 = vmul.u32.u64.high 3817748708, %v7378_v7, %v7410_v0  ;;  %v2548_v2 = vsub.s32 0, %v7382_v4 }
 0x1b0   : > { %9836 = vst [vmem:[#allocation50_spill] sm:$0xff] %v7401_v10  ;;  %v5093_v14 = vpop.f32.mrf.mxu1  ;;  %v5572_v24 = vpop.f32.mrf.mxu0  ;;  %v2489_v12 = vsub.s32 %v7234_v1, %v2488_v59  ;;  %v2302_v43 = vadd.s32 120, %v6966_v55  ;;  %vm2663_vm5 = vcmp.ne.s32.totalorder %v7403_v19, 0  ;;  %v2499_v47 = vmul.u32 18, %v2498_v58 }
 0x1b1   : > { %v7418_v40 = vadd.f32 %v5572_v24, %v7230_v18  ;;  %v1408_v33 = vadd.f32 %v5092_v49, %v7070_v44  ;;  %v2559_v0 = vsub.s32 0, %v7401_v10  ;;  %v2303_v27 = vadd.s32 128, %v6966_v55 }
 0x1b2   : > { %v5094_v39 = vpop.f32.mrf.mxu1  ;;  %v1508_v20 = vpop.f32.mrf.mxu0  ;;  %v4990_v11 = vadd.f32 %v7096_v42, %v7084_v16  ;;  %v2509_v44 = vshrl.u32 %v7359_v34, 4  ;;  %vm2686_vm8 = vcmp.lt.s32.totalorder %v7403_v19, 0  ;;  %v7448_v34 = vadd.s32 %v6970_v5, %v2302_v43 }
 0x1b3   : > { %9837 = vst [vmem:[#allocation51_spill] sm:$0xff] %v7418_v40  ;;  %v5095_v18 = vadd.f32 %v5094_v39, %v5093_v14  ;;  %v7429_v24 = vadd.f32 %v1508_v20, %v7167_v52  ;;  %v7435_v58 = vmul.u32.u64.low 3817748708, %v7414_v26  ;;  %v7436_v49 = vmul.u32.u64.high 3817748708, %v7414_v26, %v7435_v58  ;;  %vm7483_vm11 = vmand %vm2686_vm8, %vm2663_vm5 }
 0x1b4   : > { %v5096_v59 = vpop.f32.mrf.mxu1  ;;  %v5573_v1 = vpop.f32.mrf.mxu0  ;;  %v7439_v40 = vmin.u32 %v2548_v2, %v7382_v4  ;;  %v2490_v52 = vsub.s32 0, %v2489_v12  ;;  %v7453_v20 = vadd.s32 18, %v7403_v19  ;;  %v7456_v58 = vmin.u32 %v2559_v0, %v7401_v10 }
 0x1b5   : > { %9838 = vst [vmem:[#allocation52_spill] sm:$0xff] %v7429_v24  ;;  %v7442_v16 = vadd.f32 %v5573_v1, %v7270_v30  ;;  %v7445_v42 = vadd.f32 %v5095_v18, %v7090_v53  ;;  %v7459_v2 = vadd.s32 %v6970_v5, %v2303_v27  ;;  %v2304_v30 = vadd.s32 136, %v6966_v55 }
 0x1b6   : > { %v5097_v14 = vpop.f32.mrf.mxu1  ;;  %v7450_v39 = vpop.f32.mrf.mxu0  ;;  %v1144_v53 = vadd.f32 %v4990_v11, %v6974_v60  ;;  %v2500_v43 = vsub.s32 %v7287_v57, %v2499_v47  ;;  %v2510_v1 = vmul.u32 18, %v2509_v44  ;;  %v2531_v6 = vshrl.u32 %v7411_v62, 4 }
 0x1b7   : > { %9839 = vst [vmem:[#allocation53_spill] sm:$0xff] %v7442_v16  ;;  %9840 = vst [vmem:[#allocation54_spill] sm:$0xff] %v7450_v39  ;;  %v5098_v18 = vadd.f32 %v5097_v14, %v5096_v59  ;;  %v2520_v39 = vshrl.u32 %v7407_v38, 4  ;;  %v7467_v0 = vmul.u32.u64.low 3817748708, %v7439_v40  ;;  %v7468_v10 = vmul.u32.u64.high 3817748708, %v7439_v40, %v7467_v0 }
 0x1b8   : > { %9841 = vst [vmem:[#allocation55_spill] sm:$0xff] %v7459_v2  ;;  %v5099_v16 = vpop.f32.mrf.mxu1  ;;  %v5576_v24 = vpop.f32.mrf.mxu0  ;;  %v7476_v60 = vsel %vm2481_vm4, %v2490_v52, %v2489_v12  ;;  %v2570_v47 = vsub.s32 0, %v7448_v34  ;;  %v9844_v62 = vmov 0  ;;  %v7493_v12 = vadd.s32 %v6970_v5, %v2304_v30 }
 0x1b9   : > { %v7470_v27 = vadd.f32 %v5576_v24, %v1405_v54  ;;  %v7472_v51 = vadd.f32 %v5098_v18, %v1144_v53  ;;  %v9845_v62 = vsel %vm7483_vm11, 4294967295, %v9844_v62  ;;  %v2581_v24 = vsub.s32 0, %v7459_v2 }
 0x1ba   : > { %v5100_v57 = vpop.f32.mrf.mxu1  ;;  %v1524_v11 = vpop.f32.mrf.mxu0  ;;  %v7488_v54 = vmul.u32.u64.low 3817748708, %v7456_v58  ;;  %v7489_v38 = vmul.u32.u64.high 3817748708, %v7456_v58, %v7488_v54  ;;  %9846 = vst [vmem:[#allocation58_spill] sm:$0xff] %v7493_v12  ;;  %v2501_v52 = vsub.s32 0, %v2500_v43  ;;  %v2511_v14 = vsub.s32 %v7326_v21, %v2510_v1 }
 0x1bb   : > { %9842 = vst [vmem:[#allocation56_spill] sm:$0xff] %v7470_v27  ;;  %9843 = vst [vmem:[#allocation57_spill] sm:$0xff] %v7472_v51  ;;  %v5101_v44 = vadd.f32 %v5100_v57, %v5099_v16  ;;  %v7496_v59 = vadd.f32 %v1524_v11, %v7314_v22  ;;  %v2521_v0 = vmul.u32 18, %v2520_v39  ;;  %v2532_v27 = vmul.u32 18, %v2531_v6 }
 0x1bc   : > { %v5102_v53 = vpop.f32.mrf.mxu1  ;;  %v5577_v18 = vpop.f32.mrf.mxu0  ;;  %v2542_v54 = vshrl.u32 %v7436_v49, 4  ;;  %v7509_v16 = vmin.u32 %v2570_v47, %v7448_v34  ;;  %vm2664_vm2 = vcmp.ne.s32.totalorder %v7476_v60, 0  ;;  %vm2687_vm4 = vcmp.lt.s32.totalorder %v7476_v60, 0 }
 0x1bd   : > { %9847 = vst [vmem:[#allocation59_spill] sm:$0xff] %v7496_v59  ;;  %v7501_v51 = vadd.f32 %v5577_v18, %v1408_v33  ;;  %v1421_v30 = vadd.f32 %v5101_v44, %v7123_v23  ;;  %vm2514_vm5 = vcmp.lt.s32.totalorder %v7296_v45, 0  ;;  %v7517_v6 = vmin.u32 %v2581_v24, %v7459_v2 }
 0x1be   : > { %v5103_v21 = vpop.f32.mrf.mxu1  ;;  %v7511_v1 = vpop.f32.mrf.mxu0  ;;  %v2592_v23 = vsub.s32 0, %v7493_v12  ;;  %vm2337_vm8 = vcmp.ge.s32.totalorder %v7014_v41, 0  ;;  %v7523_v49 = vadd.s32 18, %v7476_v60  ;;  %v7527_v39 = vsel %vm2492_vm10, %v2501_v52, %v2500_v43  ;;  %vm7541_vm10 = vmand %vm2687_vm4, %vm2664_vm2 }
 0x1bf   : > { %9848 = vst [vmem:[#allocation60_spill] sm:$0xff] %v7501_v51  ;;  %9849 = vst [vmem:[#allocation61_spill] sm:$0xff] %v7511_v1  ;;  %v5104_v33 = vadd.f32 %v5103_v21, %v5102_v53  ;;  %v2512_v47 = vsub.s32 0, %v2511_v14  ;;  %v2522_v24 = vsub.s32 %v7374_v15, %v2521_v0  ;;  %v2533_v44 = vsub.s32 %v7378_v7, %v2532_v27 }
 0x1c0   : > { %v5105_v57 = vpop.f32.mrf.mxu1  ;;  %v5580_v11 = vpop.f32.mrf.mxu0  ;;  %v2543_v53 = vmul.u32 18, %v2542_v54  ;;  %v2553_v18 = vshrl.u32 %v7468_v10, 4  ;;  %v9851_v43 = vmov 0  ;;  %v2564_v10 = vshrl.u32 %v7489_v38, 4 }
 0x1c1   : > { %v7534_v21 = vadd.f32 %v5580_v11, %v1421_v30  ;;  %v1424_v22 = vadd.f32 %v5104_v33, %v7138_v63  ;;  %v9852_v43 = vsel %vm7541_vm10, 4294967295, %v9851_v43  ;;  %v7555_v63 = vmin.u32 %v2592_v23, %v7493_v12 }
 0x1c2   : > { %v7546_v52 = vmul.u32.u64.low 3817748708, %v7509_v16  ;;  %v7547_v15 = vmul.u32.u64.high 3817748708, %v7509_v16, %v7546_v52  ;;  %v5106_v7 = vpop.f32.mrf.mxu1  ;;  %v1540_v27 = vpop.f32.mrf.mxu0  ;;  %v7551_v0 = vmul.u32.u64.low 3817748708, %v7517_v6  ;;  %v7552_v54 = vmul.u32.u64.high 3817748708, %v7517_v6, %v7551_v0 }
 0x1c3   : > { %9850 = vst [vmem:[#allocation62_spill] sm:$0xff] %v7534_v21  ;;  %v5002_v30 = vadd.f32 %v7172_v46, %v7159_v36  ;;  %v5107_v33 = vadd.f32 %v5106_v7, %v5105_v57  ;;  %v7560_v11 = vadd.f32 %v1540_v27, %v7445_v42  ;;  %v2305_v38 = vadd.s32 144, %v6966_v55 }
 0x1c4   : > { %v5108_v52 = vpop.f32.mrf.mxu1  ;;  %v5581_v21 = vpop.f32.mrf.mxu0  ;;  %v9854_v23 = vsel %vm7251_vm6, %v7256_v37, %v7191_v17  ;;  %v9855_v0 = vmov 0  ;;  %v7581_v46 = vsel %vm2503_vm12, %v2512_v47, %v2511_v14  ;;  %v2523_v42 = vsub.s32 0, %v2522_v24 }
 0x1c5   : > { %9853 = vst [vmem:[#allocation63_spill] sm:$0xff] %v7560_v11  ;;  %vm7570_vm1 = vcmp.lt.s32.totalorder %v9854_v23, 16  ;;  %v7583_v48 = vadd.f32 %v5581_v21, %v1424_v22  ;;  %v1429_v17 = vadd.f32 %v5107_v33, %v7164_v9  ;;  %v9859_v37 = vsel %vm7276_vm7, %v7259_v29, %v7199_v50  ;;  %v9864_v50 = vld [vmem:[#allocation18_spill] sm:$0xff] }
 0x1c6   : > { %v9856_v0 = vsel %vm7570_vm1, 4294967295, %v9855_v0  ;;  %vm7591_vm6 = vcmp.lt.s32.totalorder %v9859_v37, 16  ;;  %v9860_v57 = vmov 0  ;;  %v2534_v7 = vsub.s32 0, %v2533_v44  ;;  %v5109_v23 = vpop.f32.mrf.mxu1  ;;  %v7595_v36 = vpop.f32.mrf.mxu0 }
 0x1c7   : > { %9857 = vst [vmem:[#allocation64_spill] sm:$0xff] %v9856_v0  ;;  %9858 = vst [vmem:[#allocation65_spill] sm:$0xff] %v7583_v48  ;;  %v9861_v57 = vsel %vm7591_vm6, 4294967295, %v9860_v57  ;;  %v2554_v27 = vmul.u32 18, %v2553_v18  ;;  %v2544_v9 = vsub.s32 %v7414_v26, %v2543_v53  ;;  %v2565_v14 = vmul.u32 18, %v2564_v10 }
 0x1c8   : > { %9862 = vst [vmem:[#allocation66_spill] sm:$0xff] %v9861_v57  ;;  %9863 = vst [vmem:[#allocation67_spill] sm:$0xff] %v7595_v36  ;;  %v7601_v32 = vmul.u32.u64.low 3817748708, %v7555_v63  ;;  %v7602_v22 = vmul.u32.u64.high 3817748708, %v7555_v63, %v7601_v32  ;;  %v1160_v29 = vadd.f32 %v5002_v30, %v9864_v50  ;;  %v5110_v47 = vadd.f32 %v5109_v23, %v5108_v52  ;;  %v5111_v21 = vpop.f32.mrf.mxu1  ;;  %v5584_v33 = vpop.f32.mrf.mxu0  ;;  %v9868_v23 = vld [vmem:[#allocation25_spill] sm:$0xff] }
 0x1c9   : > { %vm2525_vm7 = vcmp.lt.s32.totalorder %v7307_v31, 0  ;;  %v7607_v18 = vadd.s32 %v6970_v5, %v2305_v38  ;;  %vm2688_vm12 = vcmp.lt.s32.totalorder %v7527_v39, 0  ;;  %v7611_v37 = vadd.s32 18, %v7527_v39  ;;  %v9869_v32 = vld [vmem:[#allocation24_spill] sm:$0xff] }
 0x1ca   : > { %v7615_v26 = vadd.f32 %v5110_v47, %v1160_v29  ;;  %v7619_v53 = vsel %vm2514_vm5, %v2523_v42, %v2522_v24  ;;  %v2555_v10 = vsub.s32 %v7439_v40, %v2554_v27  ;;  %v5112_v30 = vpop.f32.mrf.mxu1  ;;  %v1556_v38 = vpop.f32.mrf.mxu0  ;;  %v9870_v50 = vsel %vm7184_vm9, %v9868_v23, %v9869_v32  ;;  %vm7636_vm5 = vmand %vm2337_vm8, %vm2360_vm3  ;;  %v9877_v40 = vld [vmem:[#allocation20_spill] sm:$0xff]  ;;  %v9884_v32 = vld [vmem:[#allocation21_spill] sm:$0xff] }
 0x1cb   : > { %9865 = vst [vmem:[#allocation18_spill] sm:$0xff] %v7607_v18  ;;  %vm7628_vm4 = vcmp.lt.s32.totalorder %v9870_v50, 16  ;;  %v9871_v48 = vmov 0  ;;  %v9874_v24 = vmov 0  ;;  %v7644_v42 = vsel %vm2525_vm7, %v2534_v7, %v2533_v44 }
 0x1cc   : > { %9866 = vst [vmem:[#allocation68_spill] sm:$0xff] %v7615_v26  ;;  %v9872_v48 = vsel %vm7628_vm4, 4294967295, %v9871_v48  ;;  %v9875_v24 = vsel %vm7636_vm5, 4294967295, %v9874_v24  ;;  %v2545_v27 = vsub.s32 0, %v2544_v9  ;;  %v2566_v29 = vsub.s32 %v7456_v58, %v2565_v14  ;;  %v5114_v7 = vpop.f32.mrf.mxu1 }
 0x1cd   : > { %9873 = vst [vmem:[#allocation27_spill] sm:$0xff] %v9872_v48  ;;  %9876 = vst [vmem:[#allocation25_spill] sm:$0xff] %v9875_v24  ;;  %v2575_v47 = vshrl.u32 %v7547_v15, 4  ;;  %v5113_v52 = vadd.f32 %v5112_v30, %v5111_v21  ;;  %v7648_v23 = vadd.f32 %v1556_v38, %v1429_v17  ;;  %vm9879_vm3 = vcmp.lt.s32.totalorder %v7023_v8, 288  ;;  %v5585_v15 = vpop.f32.mrf.mxu0  ;;  %v9889_v21 = vld [vmem:[#allocation43_spill] sm:$0xff]  ;;  %v9890_v30 = vld [vmem:[#allocation32_spill] sm:$0xff] }
 0x1ce   : > { %vm9880_vm9 = vcmp.ge.s32.totalorder %v7023_v8, 0  ;;  %v9881_v41 = vmov 0  ;;  %v2586_v44 = vshrl.u32 %v7552_v54, 4  ;;  %v2603_v58 = vsub.s32 0, %v7607_v18  ;;  %v9888_v54 = vld [vmem:[#allocation31_spill] sm:$0xff]  ;;  %v9898_v7 = vld [vmem:[#allocation50_spill] sm:$0xff] }
 0x1cf   : > { %9878 = vst [vmem:[#allocation24_spill] sm:$0xff] %v7648_v23  ;;  %vm7654_vm8 = vmand %vm9880_vm9, %vm9879_vm3  ;;  %vm9885_vm2 = vcmp.ne.s32.totalorder %v7527_v39, 0  ;;  %v9886_v8 = vmov 0  ;;  %v7671_v17 = vadd.s32 18, %v7581_v46  ;;  %v1437_v14 = vadd.f32 %v5113_v52, %v9888_v54  ;;  %v7696_v13 = vpop.f32.mrf.mxu0  ;;  %v5115_v54 = vpop.f32.mrf.mxu1 }
 0x1d0   : > { %v9882_v41 = vsel %vm7654_vm8, 4294967295, %v9881_v41  ;;  %vm7666_vm10 = vmand %vm2688_vm12, %vm9885_vm2  ;;  %v9891_v38 = vsel %vm7350_vm14, %v9889_v21, %v9890_v30  ;;  %v9892_v50 = vmov 0  ;;  %vm9894_vm12 = vcmp.ne.s32.totalorder %v7581_v46, 0  ;;  %9899 = vst [vmem:[#allocation21_spill] sm:$0xff] %v7696_v13  ;;  %v9909_v54 = vld [vmem:[#allocation44_spill] sm:$0xff]  ;;  %v9910_v13 = vld [vmem:[#allocation34_spill] sm:$0xff] }
 0x1d1   : > { %9883 = vst [vmem:[#allocation20_spill] sm:$0xff] %v9882_v41  ;;  %v9887_v8 = vsel %vm7666_vm10, 4294967295, %v9886_v8  ;;  %vm7682_vm2 = vcmp.lt.s32.totalorder %v9891_v38, 16  ;;  %vm9895_vm7 = vcmp.lt.s32.totalorder %v7581_v46, 0  ;;  %v9896_v15 = vmov 0 }
 0x1d2   : > { %v9893_v50 = vsel %vm7682_vm2, 4294967295, %v9892_v50  ;;  %vm7690_vm3 = vmand %vm9895_vm7, %vm9894_vm12  ;;  %v2556_v52 = vsub.s32 0, %v2555_v10  ;;  %vm9900_vm14 = vcmp.lt.s32.totalorder %v6981_v35, 288  ;;  %vm9901_vm2 = vcmp.ge.s32.totalorder %v6981_v35, 0  ;;  %v9920_v35 = vld [vmem:[#allocation29_spill] sm:$0xff] }
 0x1d3   : > { %v9897_v15 = vsel %vm7690_vm3, 4294967295, %v9896_v15  ;;  %vm7702_vm11 = vmand %vm9901_vm2, %vm9900_vm14  ;;  %v9902_v21 = vmov 0  ;;  %vm9905_vm7 = vcmp.lt.s32.totalorder %v7334_v56, 0  ;;  %v2567_v38 = vsub.s32 0, %v2566_v29 }
 0x1d4   : > { %v9903_v21 = vsel %vm7702_vm11, 4294967295, %v9902_v21  ;;  %v7708_v30 = vsel %vm9905_vm7, %v2545_v27, %v2544_v9  ;;  %v2576_v26 = vmul.u32 18, %v2575_v47  ;;  %v2597_v23 = vshrl.u32 %v7602_v22, 4  ;;  %v7730_v27 = vpop.f32.mrf.mxu1 }
 0x1d5   : > { %9904 = vst [vmem:[#allocation31_spill] sm:$0xff] %v9903_v21  ;;  %9906 = vst [vmem:[#allocation43_spill] sm:$0xff] %v7708_v30  ;;  %v7711_v11 = vadd.f32 %v5584_v33, %v1437_v14  ;;  %v9911_v51 = vsel %vm7369_vm15, %v9909_v54, %v9910_v13  ;;  %v9912_v59 = vmov 0  ;;  %v2587_v9 = vmul.u32 18, %v2586_v44  ;;  %v5153_v33 = vpop.f32.mrf.mxu0  ;;  %v9921_v54 = vld [vmem:[#allocation26_spill] sm:$0xff] }
 0x1d6   : > { %vm7722_vm2 = vcmp.lt.s32.totalorder %v9911_v51, 16  ;;  %v7728_v22 = vmin.u32 %v2603_v58, %v7607_v18  ;;  %v7745_v44 = vadd.s32 18, %v7619_v53  ;;  %v2306_v58 = vadd.s32 152, %v6966_v55 }
 0x1d7   : > { %9907 = vst [vmem:[#allocation32_spill] sm:$0xff] %v7711_v11  ;;  %v9913_v59 = vsel %vm7722_vm2, 4294967295, %v9912_v59  ;;  %vm9914_vm15 = vcmp.lt.s32.totalorder %v6995_v28, 288  ;;  %vm9915_vm12 = vcmp.ge.s32.totalorder %v6995_v28, 0  ;;  %v9916_v14 = vmov 0  ;;  %v5154_v13 = vpop.f32.mrf.mxu0 }
 0x1d8   : > { %vm7752_vm7 = vmand %vm9915_vm12, %vm9914_vm15  ;;  %v9922_v51 = vsel %vm7219_vm13, %v9920_v35, %v9921_v54  ;;  %v9923_v47 = vmov 0  ;;  %vm9926_vm14 = vcmp.ne.s32.totalorder %v7619_v53, 0  ;;  %vm9927_vm0 = vcmp.lt.s32.totalorder %v7619_v53, 0  ;;  %v2116_v35 = vpop.f32.mrf.mxu1  ;;  %v9931_v54 = vld [vmem:[#allocation23_spill] sm:$0xff] }
 0x1d9   : > { %v9917_v14 = vsel %vm7752_vm7, 4294967295, %v9916_v14  ;;  %vm7761_vm9 = vcmp.lt.s32.totalorder %v9922_v51, 16  ;;  %vm7769_vm3 = vmand %vm9927_vm0, %vm9926_vm14  ;;  %v7774_v28 = vadd.s32 18, %v7644_v42  ;;  %vm2669_vm12 = vcmp.ne.s32.totalorder %v7708_v30, 0 }
 0x1da   : > { %9918 = vst [vmem:[#allocation46_spill] sm:$0xff] %v9917_v14  ;;  %v9924_v47 = vsel %vm7761_vm9, 4294967295, %v9923_v47  ;;  %vm2692_vm15 = vcmp.lt.s32.totalorder %v7708_v30, 0  ;;  %vm9930_vm13 = vcmp.lt.s32.totalorder %v7382_v4, 0  ;;  %vm9932_vm14 = vcmp.ne.s32.totalorder %v7644_v42, 0 }
 0x1db   : > { %9925 = vst [vmem:[#allocation44_spill] sm:$0xff] %v9924_v47  ;;  %v7780_v51 = vsel %vm9930_vm13, %v2556_v52, %v2555_v10  ;;  %vm9933_vm7 = vcmp.lt.s32.totalorder %v7644_v42, 0  ;;  %v9934_v36 = vmov 0  ;;  %v7793_v56 = vadd.s32 18, %v7708_v30  ;;  %vm7831_vm10 = vmand %vm2692_vm15, %vm2669_vm12 }
 0x1dc   : > { %vm7788_vm9 = vmand %vm9933_vm7, %vm9932_vm14  ;;  %vm9937_vm13 = vcmp.lt.s32.totalorder %v9898_v7, 0  ;;  %v2577_v52 = vsub.s32 %v7509_v16, %v2576_v26  ;;  %v2598_v4 = vmul.u32 18, %v2597_v23  ;;  %v5155_v1 = vadd.f32 %v5154_v13, %v5153_v33  ;;  %v5156_v26 = vpop.f32.mrf.mxu0 }
 0x1dd   : > { %v9935_v36 = vsel %vm7788_vm9, 4294967295, %v9934_v36  ;;  %9936 = vst [vmem:[#allocation34_spill] sm:$0xff] %v7793_v56  ;;  %v7797_v10 = vsel %vm9937_vm13, %v2567_v38, %v2566_v29  ;;  %v2588_v31 = vsub.s32 %v7517_v6, %v2587_v9  ;;  %vm9938_vm7 = vmand %vm7636_vm5, %vm7570_vm1  ;;  %v9940_v16 = vmov 0  ;;  %v7821_v6 = vpop.f32.mrf.mxu1 }
 0x1de   : > { %v7804_v18 = vmul.u32.u64.low 3817748708, %v7728_v22  ;;  %v7805_v45 = vmul.u32.u64.high 3817748708, %v7728_v22, %v7804_v18  ;;  %vm9939_vm14 = vmand %vm7654_vm8, %vm7591_vm6  ;;  %v9943_v29 = vmov 0  ;;  %v7838_v23 = vadd.s32 %v6970_v5, %v2306_v58 }
 0x1df   : > { %vm7817_vm13 = vmpackc.low %vm9939_vm14, %vm9938_vm7  ;;  %v9944_v29 = vsel %vm7831_vm10, 4294967295, %v9943_v29  ;;  %v2117_v38 = vadd.f32 %v5155_v1, %v2116_v35  ;;  %vm9947_vm12 = vcmp.ge.s32.totalorder %v9877_v40, 0  ;;  %vm9950_vm7 = vnez %v9845_v62  ;;  %v7872_v62 = vld [vmem:[%s9630_s2] ss:$0 sm:$0xff]  ;;  %v9962_v18 = vld [vmem:[#allocation35_spill] sm:$0xff] }
 0x1e0   : > { %v9941_v16 = vsel %vm7817_vm13, 4294967295, %v9940_v16  ;;  %9945 = vst [vmem:[#allocation29_spill] sm:$0xff] %v9944_v29  ;;  %vm9946_vm13 = vcmp.lt.s32.totalorder %v9877_v40, 288  ;;  %v9951_v33 = vsel %vm9950_vm7, %v7453_v20, %v7403_v19  ;;  %v9952_v1 = vmov 0  ;;  %v5157_v19 = vpop.f32.mrf.mxu0  ;;  %v2119_v20 = vpop.f32.mrf.mxu1  ;;  %v9975_v29 = vld [vmem:[#allocation22_spill] sm:$0xff] }
 0x1e1   : > { %9942 = vst [vmem:[#allocation30_spill] sm:$0xff] %v9941_v16  ;;  %vm7848_vm15 = vmand %vm9947_vm12, %vm9946_vm13  ;;  %vm7857_vm14 = vcmp.lt.s32.totalorder %v9951_v33, 16  ;;  %v7866_v40 = vadd.s32 18, %v7780_v51  ;;  %vm9954_vm7 = vcmp.lt.s32.totalorder %v9884_v32, 288  ;;  %vm9955_vm12 = vcmp.ge.s32.totalorder %v9884_v32, 0 }
 0x1e2   : > { %v9953_v1 = vsel %vm7857_vm14, 4294967295, %v9952_v1  ;;  %vm7878_vm0 = vmand %vm9955_vm12, %vm9954_vm7  ;;  %v9956_v13 = vmov 0  ;;  %vm9958_vm6 = vnez %v9852_v43  ;;  %v9960_v33 = vmov 0  ;;  %v7907_v57 = vpop.f32.mrf.mxu1 }
 0x1e3   : > { %v9957_v13 = vsel %vm7878_vm0, 4294967295, %v9956_v13  ;;  %v9959_v35 = vsel %vm9958_vm6, %v7523_v49, %v7476_v60  ;;  %v2578_v58 = vsub.s32 0, %v2577_v52  ;;  %v2599_v32 = vsub.s32 %v7555_v63, %v2598_v4  ;;  %9967 = vst [vmem:[#allocation26_spill] sm:$0xff] %v7907_v57  ;;  %v9976_v57 = vld [vmem:[#allocation49_spill] sm:$0xff] }
 0x1e4   : > { %vm7887_vm13 = vcmp.lt.s32.totalorder %v9959_v35, 16  ;;  %v2210_v16 = vadd.f32 %v2117_v38, %v9962_v18  ;;  %v5158_v7 = vadd.f32 %v5157_v19, %v5156_v26  ;;  %vm9963_vm6 = vcmp.ne.s32.totalorder %v7780_v51, 0  ;;  %v5159_v35 = vpop.f32.mrf.mxu0  ;;  %v9969_v18 = vld [vmem:[#allocation19_spill] sm:$0xff]  ;;  %v7935_v24 = vpop.f32.mrf.mxu1 }
 0x1e5   : > { %v9961_v33 = vsel %vm7887_vm13, 4294967295, %v9960_v33  ;;  %vm9964_vm7 = vcmp.lt.s32.totalorder %v7780_v51, 0  ;;  %v9965_v60 = vmov 0  ;;  %v2589_v49 = vsub.s32 0, %v2588_v31  ;;  %v9970_v38 = vld [vmem:[#allocation39_spill] sm:$0xff] }
 0x1e6   : > { %vm7903_vm12 = vmand %vm9964_vm7, %vm9963_vm6  ;;  %vm9968_vm1 = vnez %v9893_v50  ;;  %v7914_v4 = vadd.s32 18, %v7797_v10  ;;  %v2614_v63 = vsub.s32 0, %v7838_v23  ;;  %v2307_v26 = vadd.s32 160, %v6966_v55  ;;  %v5160_v0 = vpop.f32.mrf.mxu0 }
 0x1e7   : > { %v9966_v60 = vsel %vm7903_vm12, 4294967295, %v9965_v60  ;;  %v1480_v19 = vadd.f32 %v9970_v38, %v9969_v18  ;;  %v2240_v43 = vadd.f32 %v7872_v62, %v2210_v16  ;;  %v2120_v30 = vadd.f32 %v5158_v7, %v2119_v20 }
 0x1e8   : > { %vm9971_vm6 = vcmp.ne.s32.totalorder %v7797_v10, 0  ;;  %vm9972_vm7 = vcmp.lt.s32.totalorder %v7797_v10, 0  ;;  %v9973_v56 = vmov 0  ;;  %v7933_v41 = vadd.f32 %v9976_v57, %v9975_v29 }
 0x1e9   : > { %vm7926_vm8 = vmand %vm9972_vm7, %vm9971_vm6  ;;  %vm9977_vm7 = vcmp.lt.s32.totalorder %v7448_v34, 0  ;;  %v2600_v16 = vsub.s32 0, %v2599_v32  ;;  %v2211_v29 = vadd.f32 %v2120_v30, %v1480_v19  ;;  %v5161_v20 = vadd.f32 %v5160_v0, %v5159_v35 }
 0x1ea   : > { %v9974_v56 = vsel %vm7926_vm8, 4294967295, %v9973_v56  ;;  %v7949_v57 = vsel %vm9977_vm7, %v2578_v58, %v2577_v52  ;;  %vm9978_vm9 = vcmp.lt.s32.totalorder %v7459_v2, 0  ;;  %v2608_v38 = vshrl.u32 %v7805_v45, 4  ;;  %vm9980_vm6 = vmand %vm7848_vm15, %vm9968_vm1  ;;  %v5162_v45 = vpop.f32.mrf.mxu0 }
 0x1eb   : > { %v7955_v18 = vsel %vm9978_vm9, %v2589_v49, %v2588_v31  ;;  %vm9981_vm7 = vmand %vm7878_vm0, %vm7722_vm2  ;;  %v9982_v0 = vmov 0  ;;  %v2263_v30 = vmax.f32 %v2240_v43, 0.0  ;;  %vm9985_vm9 = vnez %v9924_v47  ;;  %v7976_v31 = vpop.f32.mrf.mxu1 }
 0x1ec   : > { %9979 = vst [vmem:[#allocation23_spill] sm:$0xff] %v7955_v18  ;;  %vm7968_vm12 = vmpackc.low %vm9981_vm7, %vm9980_vm6  ;;  %vm9986_vm10 = vnez %v9917_v14  ;;  %v7983_v58 = vmin.u32 %v2614_v63, %v7838_v23  ;;  %v7986_v49 = vadd.s32 %v6970_v5, %v2307_v26  ;;  %v2241_v43 = vadd.f32 %v7872_v62, %v2211_v29  ;;  %v5163_v63 = vpop.f32.mrf.mxu0 }
 0x1ed   : > { %v9983_v0 = vsel %vm7968_vm12, 4294967295, %v9982_v0  ;;  %v2125_v35 = vadd.f32 %v7730_v27, %v5161_v20  ;;  %vm9988_vm6 = vcmp.lt.s32.totalorder %v9931_v54, 288  ;;  %vm9989_vm7 = vcmp.ge.s32.totalorder %v9931_v54, 0  ;;  %v8000_v52 = vpop.f32.mrf.mxu1 }
 0x1ee   : > { %9984 = vst [vmem:[#allocation35_spill] sm:$0xff] %v9983_v0  ;;  %9987 = vst [vmem:[#allocation19_spill] sm:$0xff] %v7986_v49  ;;  %vm9992_vm2 = vcmp.lt.s32.totalorder %v7170_v61, 288  ;;  %vm9993_vm0 = vcmp.ge.s32.totalorder %v7170_v61, 0  ;;  %v9994_v27 = vmov 0  ;;  %v9998_v26 = vmov 0 }
 0x1ef   : > { %vm7994_vm5 = vmand %vm9989_vm7, %vm9988_vm6  ;;  %vm9996_vm6 = vnez %v9887_v8  ;;  %v8020_v29 = vadd.s32 18, %v7949_v57  ;;  %v2264_v20 = vmax.f32 %v2241_v43, 0.0  ;;  %v10002_v8 = vld [vmem:[#allocation33_spill] sm:$0xff]  ;;  %v5164_v0 = vadd.f32 %v5163_v63, %v5162_v45 }
 0x1f0   : > { %vm8006_vm1 = vmand %vm9993_vm0, %vm9992_vm2  ;;  %v9997_v54 = vsel %vm9996_vm6, %v7611_v37, %v7527_v39  ;;  %vm10001_vm2 = vcmp.lt.s32.totalorder %v7493_v12, 0  ;;  %v2212_v7 = vadd.f32 %v2125_v35, %v10002_v8  ;;  %vm10003_vm0 = vnez %v9897_v15  ;;  %v8047_v15 = vpop.f32.mrf.mxu1  ;;  %v10012_v8 = vld [vmem:[#allocation28_spill] sm:$0xff] }
 0x1f1   : > { %v9995_v27 = vsel %vm8006_vm1, 4294967295, %v9994_v27  ;;  %vm8015_vm7 = vcmp.lt.s32.totalorder %v9997_v54, 16  ;;  %v8026_v61 = vsel %vm10001_vm2, %v2600_v16, %v2599_v32  ;;  %v10004_v39 = vsel %vm10003_vm0, %v7671_v17, %v7581_v46  ;;  %vm10008_vm2 = vmand %vm7702_vm11, %vm7628_vm4  ;;  %v5165_v16 = vpop.f32.mrf.mxu0  ;;  %10009 = vst [vmem:[#allocation49_spill] sm:$0xff] %v8047_v15 }
 0x1f2   : > { %v9999_v26 = vsel %vm8015_vm7, 4294967295, %v9998_v26  ;;  %vm8034_vm6 = vcmp.lt.s32.totalorder %v10004_v39, 16  ;;  %v10005_v37 = vmov 0  ;;  %v2609_v54 = vmul.u32 18, %v2608_v38  ;;  %vm10010_vm0 = vmand %vm9986_vm10, %vm9985_vm9  ;;  %v10013_v39 = vld [vmem:[#allocation54_spill] sm:$0xff]  ;;  %v8073_v48 = vpop.f32.mrf.mxu1 }
 0x1f3   : > { %10000 = vst [vmem:[#allocation39_spill] sm:$0xff] %v9999_v26  ;;  %v10006_v37 = vsel %vm8034_vm6, 4294967295, %v10005_v37  ;;  %v2864_v32 = vsel %vm10008_vm2, %v2263_v30, 0.0  ;;  %v8050_v46 = vmul.u32.u64.low 3817748708, %v7983_v58  ;;  %v8051_v17 = vmul.u32.u64.high 3817748708, %v7983_v58, %v8050_v46  ;;  %v5166_v47 = vpop.f32.mrf.mxu0  ;;  %v10095_v26 = vld [vmem:[#allocation41_spill] sm:$0xff] }
 0x1f4   : > { %10007 = vst [vmem:[#allocation22_spill] sm:$0xff] %v10006_v37  ;;  %v2625_v38 = vsub.s32 0, %v7986_v49  ;;  %v2865_v45 = vsel %vm10010_vm0, %v2264_v20, 0.0  ;;  %v8059_v43 = vpack.c.bf16 %v2264_v20, %v2263_v30  ;;  %v2242_v35 = vadd.f32 %v7872_v62, %v2212_v7  ;;  %v10020_v30 = vld [vmem:[#allocation38_spill] sm:$0xff] }
 0x1f5   : > { %v2128_v63 = vadd.f32 %v7821_v6, %v5164_v0  ;;  %v8069_v46 = vadd.f32 %v10013_v39, %v10012_v8  ;;  %v8071_v14 = vpack.c.bf16 %v2865_v45, %v2864_v32  ;;  %vm10015_vm0 = vcmp.ne.s32.totalorder %v7949_v57, 0  ;;  %v10021_v45 = vld [vmem:[#allocation36_spill] sm:$0xff]  ;;  %v10026_v39 = vld [vmem:[#allocation18_spill] sm:$0xff] }
 0x1f6   : > { %10011 = vst [vmem:[#allocation33_spill] sm:$0xff] %v8059_v43  ;;  %vm10016_vm12 = vcmp.lt.s32.totalorder %v7949_v57, 0  ;;  %v8084_v7 = vadd.s32 18, %v7955_v18  ;;  %v2308_v0 = vadd.s32 168, %v6966_v55  ;;  %v5167_v32 = vadd.f32 %v5166_v47, %v5165_v16  ;;  %v8102_v47 = vpop.f32.mrf.mxu1  ;;  %v10028_v16 = vld [vmem:[#allocation37_spill] sm:$0xff] }
 0x1f7   : > { %10014 = vst [vmem:[#allocation28_spill] sm:$0xff] %v8069_v46  ;;  %vm8079_vm8 = vmand %vm10016_vm12, %vm10015_vm0  ;;  %v2213_v20 = vadd.f32 %v2128_v63, %v10020_v30  ;;  %vm10022_vm10 = vcmp.ne.s32.totalorder %v7955_v18, 0  ;;  %vm10023_vm4 = vcmp.lt.s32.totalorder %v7955_v18, 0  ;;  %v10024_v8 = vmov 0  ;;  %v5168_v63 = vpop.f32.mrf.mxu0  ;;  %v10051_v46 = vld [vmem:[#allocation45_spill] sm:$0xff] }
 0x1f8   : > { %10019 = vst [vmem:[#allocation54_spill] sm:$0xff] %v8084_v7  ;;  %vm8094_vm12 = vmand %vm10023_vm4, %vm10022_vm10  ;;  %v8100_v43 = vsub.s32 %v7728_v22, %v2609_v54  ;;  %v2265_v21 = vmax.f32 %v2242_v35, 0.0  ;;  %v8109_v30 = vmin.u32 %v2625_v38, %v7986_v49  ;;  %v10032_v22 = vmov 0 }
 0x1f9   : > { %v10025_v8 = vsel %vm8094_vm12, 4294967295, %v10024_v8  ;;  %10027 = vst [vmem:[#allocation38_spill] sm:$0xff] %v8102_v47  ;;  %vm10030_vm4 = vmand %vm7994_vm5, %vm7857_vm14  ;;  %v2243_v54 = vadd.f32 %v7872_v62, %v2213_v20  ;;  %v2133_v35 = vadd.f32 %v5167_v32, %v7935_v24  ;;  %vm10035_vm9 = vcmp.lt.s32.totalorder %v7208_v3, 288  ;;  %v10041_v20 = vld [vmem:[#allocation61_spill] sm:$0xff]  ;;  %v5169_v24 = vpop.f32.mrf.mxu0  ;;  %v8146_v32 = vpop.f32.mrf.mxu1 }
 0x1fa   : > { %10029 = vst [vmem:[#allocation36_spill] sm:$0xff] %v8109_v30  ;;  %vm10031_vm0 = vmand %vm8006_vm1, %vm7887_vm13  ;;  %vm10036_vm10 = vcmp.ge.s32.totalorder %v7208_v3, 0  ;;  %v10037_v38 = vmov 0  ;;  %v8140_v49 = vadd.s32 18, %v8026_v61  ;;  %v10045_v3 = vmov 0 }
 0x1fb   : > { %vm8121_vm2 = vmpackc.low %vm10031_vm0, %vm10030_vm4  ;;  %vm10044_vm0 = vcmp.ge.s32.totalorder %v7239_v25, 0  ;;  %v10048_v47 = vsel %vm7769_vm3, %v7745_v44, %v7619_v53  ;;  %v2214_v11 = vadd.f32 %v2133_v35, %v10051_v46  ;;  %v5170_v2 = vadd.f32 %v5169_v24, %v5168_v63  ;;  %v10060_v63 = vld [vmem:[#allocation25_spill] sm:$0xff] }
 0x1fc   : > { %v10033_v22 = vsel %vm8121_vm2, 4294967295, %v10032_v22  ;;  %vm8131_vm11 = vmand %vm10036_vm10, %vm10035_vm9  ;;  %vm10043_vm9 = vcmp.lt.s32.totalorder %v7239_v25, 288  ;;  %vm8161_vm4 = vcmp.lt.s32.totalorder %v10048_v47, 16  ;;  %v8170_v25 = vadd.s32 %v6970_v5, %v2308_v0  ;;  %v8197_v47 = vpop.f32.mrf.mxu1 }
 0x1fd   : > { %10034 = vst [vmem:[#allocation37_spill] sm:$0xff] %v10033_v22  ;;  %v10038_v38 = vsel %vm8131_vm11, 4294967295, %v10037_v38  ;;  %v10040_v22 = vld [vmem:[#allocation42_spill] sm:$0xff]  ;;  %vm8152_vm10 = vmand %vm10044_vm0, %vm10043_vm9  ;;  %vm10052_vm3 = vnez %v9935_v36  ;;  %v10054_v44 = vmov 0  ;;  %vm10056_vm0 = vcmp.ne.s32.totalorder %v8026_v61, 0  ;;  %v10062_v36 = vld [vmem:[#allocation64_spill] sm:$0xff] }
 0x1fe   : > { %10039 = vst [vmem:[#allocation69_spill] sm:$0xff] %v10038_v38  ;;  %v8144_v15 = vadd.f32 %v10041_v20, %v10040_v22  ;;  %v10046_v3 = vsel %vm8152_vm10, 4294967295, %v10045_v3  ;;  %v2902_v20 = vshll.u32 %v8071_v14, 16  ;;  %v10053_v53 = vsel %vm10052_vm3, %v7774_v28, %v7644_v42  ;;  %v5171_v28 = vpop.f32.mrf.mxu0  ;;  %10065 = vst [vmem:[#allocation45_spill] sm:$0xff] %v8197_v47  ;;  %v10068_v22 = vld [vmem:[#allocation66_spill] sm:$0xff] }
 0x1ff   : > { %10047 = vst [vmem:[#allocation61_spill] sm:$0xff] %v10046_v3  ;;  %vm8179_vm9 = vcmp.lt.s32.totalorder %v10053_v53, 16  ;;  %vm10057_vm2 = vcmp.lt.s32.totalorder %v8026_v61, 0  ;;  %v10058_v0 = vmov 0  ;;  %v2611_v46 = vsub.s32 0, %v8100_v43  ;;  %v10066_v53 = vld [vmem:[#allocation20_spill] sm:$0xff] }
 0x200   : > { %10042 = vst [vmem:[#allocation42_spill] sm:$0xff] %v8144_v15  ;;  %v2266_v15 = vmax.f32 %v2243_v54, 0.0  ;;  %v10055_v44 = vsel %vm8179_vm9, 4294967295, %v10054_v44  ;;  %vm8187_vm12 = vmand %vm10057_vm2, %vm10056_vm0  ;;  %vm10061_vm13 = vnez %v10060_v63  ;;  %vm10063_vm1 = vnez %v10062_v36  ;;  %v10088_v3 = vld [vmem:[#allocation43_spill] sm:$0xff] }
 0x201   : > { %v10059_v0 = vsel %vm8187_vm12, 4294967295, %v10058_v0  ;;  %vm10064_vm14 = vmand %vm10061_vm13, %vm10063_vm1  ;;  %v2619_v54 = vshrl.u32 %v8051_v17, 4  ;;  %v8201_v35 = vmul.u32.u64.low 3817748708, %v8109_v30  ;;  %v8202_v24 = vmul.u32.u64.high 3817748708, %v8109_v30, %v8201_v35 }
 0x202   : > { %v2866_v42 = vsel %vm10064_vm14, %v2265_v21, 0.0  ;;  %vm10067_vm2 = vnez %v10066_v53  ;;  %vm10069_vm3 = vnez %v10068_v22  ;;  %v8209_v63 = vpack.c.bf16 %v2266_v15, %v2265_v21  ;;  %vm9731_vm1 = vmand %vm8131_vm11, %vm8015_vm7  ;;  %v5172_v35 = vpop.f32.mrf.mxu0  ;;  %v8223_v22 = vpop.f32.mrf.mxu1 }
 0x203   : > { %vm10070_vm0 = vmand %vm10067_vm2, %vm10069_vm3  ;;  %v2244_v36 = vadd.f32 %v7872_v62, %v2214_v11  ;;  %v2136_v7 = vadd.f32 %v5170_v2, %v8000_v52  ;;  %10072 = vst [vmem:[#allocation64_spill] sm:$0xff] %v8223_v22  ;;  %v2636_v21 = vsub.s32 0, %v8170_v25  ;;  %v2904_v52 = vrot.slane %v2902_v20, 1  ;;  %v10073_v11 = vld [vmem:[#allocation40_spill] sm:$0xff]  ;;  %v10078_v2 = vld [vmem:[#allocation47_spill] sm:$0xff] }
 0x204   : > { %v2867_v18 = vsel %vm10070_vm0, %v2266_v15, 0.0  ;;  %10071 = vst [vmem:[#allocation25_spill] sm:$0xff] %v8209_v63  ;;  %vm9729_vm14 = vmand %vm8152_vm10, %vm8034_vm6  ;;  %v2900_v53 = vshrl.u32 %v8071_v14, 16  ;;  %v2994_v63 = vrot.slane %v8071_v14, 1  ;;  %v10079_v22 = vld [vmem:[#allocation26_spill] sm:$0xff]  ;;  %vm10082_vm2 = vcmp.ge.s32.totalorder %v10021_v45, 0 }
 0x205   : > { %v8217_v17 = vpack.c.bf16 %v2867_v18, %v2866_v42  ;;  %v2215_v15 = vadd.f32 %v2136_v7, %v7933_v41  ;;  %v5173_v18 = vadd.f32 %v5172_v35, %v5171_v28  ;;  %v2309_v42 = vadd.s32 176, %v6966_v55  ;;  %vm8245_vm3 = vmpackc.low %vm9729_vm14, %vm9731_vm1  ;;  %v5174_v55 = vpop.f32.mrf.mxu0  ;;  %v8250_v28 = vpop.f32.mrf.mxu1  ;;  %v10085_v14 = vld [vmem:[#allocation29_spill] sm:$0xff] }
 0x206   : > { %v10074_v41 = vmov 0  ;;  %v2267_v20 = vmax.f32 %v2244_v36, 0.0  ;;  %10077 = vst [vmem:[#allocation66_spill] sm:$0xff] %v8250_v28  ;;  %vm10080_vm14 = vcmp.lt.s32.totalorder %v10026_v39, 0  ;;  %v2620_v36 = vmul.u32 18, %v2619_v54 }
 0x207   : > { %v10075_v41 = vsel %vm8245_vm3, 4294967295, %v10074_v41  ;;  %v2907_v35 = vshll.u32 %v8217_v17, 16  ;;  %v2245_v47 = vadd.f32 %v7872_v62, %v2215_v15  ;;  %v2141_v37 = vadd.f32 %v10079_v22, %v5173_v18  ;;  %v10087_v15 = vld [vmem:[#allocation34_spill] sm:$0xff] }
 0x208   : > { %10076 = vst [vmem:[#allocation20_spill] sm:$0xff] %v10075_v41  ;;  %v8261_v7 = vsel %vm10080_vm14, %v2611_v46, %v8100_v43  ;;  %v5175_v41 = vpop.f32.mrf.mxu0  ;;  %vm10081_vm1 = vcmp.lt.s32.totalorder %v10021_v45, 288  ;;  %vm10086_vm13 = vnez %v10085_v14  ;;  %v10090_v18 = vmov 0  ;;  %v8280_v43 = vpop.f32.mrf.mxu1 }
 0x209   : > { %vm8267_vm0 = vmand %vm10082_vm2, %vm10081_vm1  ;;  %v10089_v22 = vsel %vm10086_vm13, %v10087_v15, %v10088_v3  ;;  %v2909_v46 = vrot.slane %v2907_v35, 1  ;;  %v8283_v54 = vmin.u32 %v2636_v21, %v8170_v25  ;;  %v2905_v45 = vor.u32 %v2904_v52, %v2900_v53  ;;  %v10112_v52 = vld [vmem:[#allocation48_spill] sm:$0xff] }
 0x20a   : > { %vm8276_vm3 = vcmp.lt.s32.totalorder %v10089_v22, 16  ;;  %v10092_v39 = vrot.slane %v8217_v17, 1  ;;  %vm10093_vm1 = vcmask 1046528   ;;  %v2268_v14 = vmax.f32 %v2245_v47, 0.0 }
 0x20b   : > { %v10091_v18 = vsel %vm8276_vm3, 4294967295, %v10090_v18  ;;  %v2216_v38 = vadd.f32 %v2141_v37, %v10095_v26  ;;  %v5176_v3 = vadd.f32 %v5175_v41, %v5174_v55  ;;  %vm10096_vm14 = vcmp.lt.s32.totalorder %v10028_v16, 288  ;;  %v10113_v41 = vld [vmem:[#allocation50_spill] sm:$0xff] }
 0x20c   : > { %v8288_v30 = vsel %vm10093_vm1, %v2994_v63, %v10092_v39  ;;  %vm10097_vm13 = vcmp.ge.s32.totalorder %v10028_v16, 0  ;;  %v10098_v15 = vmov 0  ;;  %vm10100_vm6 = vnez %v9966_v60  ;;  %v5177_v16 = vpop.f32.mrf.mxu0  ;;  %v8317_v60 = vpop.f32.mrf.mxu1 }
 0x20d   : > { %10094 = vst [vmem:[#allocation40_spill] sm:$0xff] %v8288_v30  ;;  %vm8295_vm2 = vmand %vm10097_vm13, %vm10096_vm14  ;;  %v10101_v21 = vsel %vm10100_vm6, %v7866_v40, %v7780_v51  ;;  %v10102_v39 = vmov 0  ;;  %v8310_v26 = vadd.s32 %v6970_v5, %v2309_v42  ;;  %vm10104_vm14 = vnez %v9893_v50  ;;  %v10209_v30 = vld [vmem:[#allocation64_spill] sm:$0xff] }
 0x20e   : > { %v10099_v15 = vsel %vm8295_vm2, 4294967295, %v10098_v15  ;;  %vm8304_vm10 = vcmp.lt.s32.totalorder %v10101_v21, 16  ;;  %vm10105_vm13 = vmand %vm7848_vm15, %vm10104_vm14  ;;  %vm2675_vm6 = vcmp.ne.s32.totalorder %v8261_v7, 0  ;;  %vm2698_vm7 = vcmp.lt.s32.totalorder %v8261_v7, 0  ;;  %v5178_v63 = vpop.f32.mrf.mxu0 }
 0x20f   : > { %v10103_v39 = vsel %vm8304_vm10, 4294967295, %v10102_v39  ;;  %v2868_v37 = vsel %vm10105_vm13, %v2267_v20, 0.0  ;;  %vm10106_vm11 = vsmask.f32 7424  ;;  %vm10108_vm1 = vnez %v9957_v13  ;;  %vm9744_vm15 = vmand %vm8267_vm0, %vm8161_vm4 }
 0x210   : > { %v8322_v51 = vsel %vm10106_vm11, %v2905_v45, %v2909_v46  ;;  %vm10109_vm12 = vnez %v9913_v59  ;;  %v8329_v9 = vpack.c.bf16 %v2268_v14, %v2267_v20  ;;  %v2246_v50 = vadd.f32 %v7872_v62, %v2216_v38  ;;  %vm9743_vm11 = vmand %vm8295_vm2, %vm8179_vm9  ;;  %v8343_v59 = vpop.f32.mrf.mxu1  ;;  %v5180_v22 = vpop.f32.mrf.mxu0 }
 0x211   : > { %10107 = vst [vmem:[#allocation47_spill] sm:$0xff] %v8322_v51  ;;  %vm10110_vm10 = vmand %vm10108_vm1, %vm10109_vm12  ;;  %v2144_v40 = vadd.f32 %v7976_v31, %v5176_v3  ;;  %v2621_v13 = vsub.s32 %v7983_v58, %v2620_v36  ;;  %v8347_v38 = vmul.u32.u64.low 3817748708, %v8283_v54  ;;  %v8348_v31 = vmul.u32.u64.high 3817748708, %v8283_v54, %v8347_v38  ;;  %v10220_v51 = vld [vmem:[#allocation59_spill] sm:$0xff] }
 0x212   : > { %v2869_v5 = vsel %vm10110_vm10, %v2268_v14, 0.0  ;;  %10111 = vst [vmem:[#allocation26_spill] sm:$0xff] %v8329_v9  ;;  %v5179_v53 = vadd.f32 %v5178_v63, %v5177_v16  ;;  %v8354_v20 = vadd.s32 18, %v8261_v7  ;;  %v2647_v55 = vsub.s32 0, %v8310_v26  ;;  %vm8367_vm1 = vmpackc.low %vm9743_vm11, %vm9744_vm15  ;;  %v8376_v3 = vpop.f32.mrf.mxu1  ;;  %v10131_v9 = vld [vmem:[#allocation67_spill] sm:$0xff] }
 0x213   : > { %v8337_v47 = vpack.c.bf16 %v2869_v5, %v2868_v37  ;;  %v2217_v42 = vadd.f32 %v2144_v40, %v10112_v52  ;;  %v10114_v58 = vmov 0  ;;  %v2269_v36 = vmax.f32 %v2246_v50, 0.0  ;;  %vm8384_vm11 = vmand %vm2698_vm7, %vm2675_vm6  ;;  %v5181_v50 = vpop.f32.mrf.mxu0 }
 0x214   : > { %v10115_v58 = vsel %vm8367_vm1, 4294967295, %v10114_v58  ;;  %v2911_v45 = vshrl.u32 %v8217_v17, 16  ;;  %v2149_v37 = vadd.f32 %v5179_v53, %v8073_v48  ;;  %v10117_v16 = vmov 0 }
 0x215   : > { %10116 = vst [vmem:[#allocation29_spill] sm:$0xff] %v10115_v58  ;;  %v9746_v35 = vrot.slane %v8337_v47, 1  ;;  %v2915_v14 = vshll.u32 %v8337_v47, 16  ;;  %v2247_v21 = vadd.f32 %v7872_v62, %v2217_v42  ;;  %v10118_v16 = vsel %vm8384_vm11, 4294967295, %v10117_v16  ;;  %v8413_v42 = vpop.f32.mrf.mxu1  ;;  %v10130_v58 = vld [vmem:[#allocation57_spill] sm:$0xff] }
 0x216   : > { %v2630_v5 = vshrl.u32 %v8202_v24, 4  ;;  %vm10119_vm14 = vcmp.lt.s32.totalorder %v10073_v11, 288  ;;  %vm10120_vm13 = vcmp.ge.s32.totalorder %v10073_v11, 0  ;;  %v10121_v40 = vmov 0 }
 0x217   : > { %vm8393_vm12 = vmand %vm10120_vm13, %vm10119_vm14  ;;  %v10123_v48 = vrot.slane %v8217_v17, 1  ;;  %vm10124_vm7 = vcmask 1046528   ;;  %v2913_v38 = vor.u32 %v2911_v45, %v2909_v46  ;;  %v2917_v52 = vrot.slane %v2915_v14, 1 }
 0x218   : > { %v10122_v40 = vsel %vm8393_vm12, 4294967295, %v10121_v40  ;;  %vm10126_vm6 = vnez %v9974_v56  ;;  %v2622_v53 = vsub.s32 0, %v2621_v13  ;;  %v8417_v17 = vadd.f32 %v10131_v9, %v10130_v58 }
 0x219   : > { %v8402_v63 = vsel %vm10124_vm7, %v10123_v48, %v9746_v35  ;;  %v10127_v24 = vsel %vm10126_vm6, %v7914_v4, %v7797_v10  ;;  %v2270_v48 = vmax.f32 %v2247_v21, 0.0  ;;  %v10132_v35 = vld [vmem:[#allocation52_spill] sm:$0xff]  ;;  %v5182_v45 = vadd.f32 %v5181_v50, %v5180_v22 }
 0x21a   : > { %10125 = vst [vmem:[#allocation34_spill] sm:$0xff] %v8402_v63  ;;  %vm8409_vm15 = vcmp.lt.s32.totalorder %v10127_v24, 16  ;;  %v2218_v46 = vadd.f32 %v2149_v37, %v10132_v35  ;;  %vm10133_vm14 = vcmp.lt.s32.totalorder %v10078_v2, 288  ;;  %vm10134_vm13 = vcmp.ge.s32.totalorder %v10078_v2, 0  ;;  %v5183_v2 = vpop.f32.mrf.mxu0  ;;  %v10153_v37 = vld [vmem:[#allocation28_spill] sm:$0xff] }
 0x21b   : > { %vm8424_vm7 = vmand %vm10134_vm13, %vm10133_vm14  ;;  %v10135_v56 = vmov 0  ;;  %v10137_v10 = vsel %vm8079_vm8, %v8020_v29, %v7949_v57  ;;  %vm10140_vm10 = vnez %v9953_v1  ;;  %vm10142_vm14 = vsmask.f32 7424  ;;  %v8449_v57 = vpop.f32.mrf.mxu1 }
 0x21c   : > { %v10136_v56 = vsel %vm8424_vm7, 4294967295, %v10135_v56  ;;  %vm8433_vm6 = vcmp.lt.s32.totalorder %v10137_v10, 16  ;;  %vm10141_vm1 = vmand %vm7994_vm5, %vm10140_vm10  ;;  %v8443_v58 = vsel %vm10142_vm14, %v2913_v38, %v2917_v52  ;;  %10144 = vst [vmem:[#allocation41_spill] sm:$0xff] %v8449_v57  ;;  %v8452_v29 = vmin.u32 %v2647_v55, %v8310_v26  ;;  %v5184_v55 = vpop.f32.mrf.mxu0 }
 0x21d   : > { %v2870_v9 = vsel %vm10141_vm1, %v2269_v36, 0.0  ;;  %10143 = vst [vmem:[#allocation43_spill] sm:$0xff] %v8443_v58  ;;  %vm10145_vm8 = vnez %v9995_v27  ;;  %vm10146_vm13 = vnez %v9961_v33  ;;  %v8459_v19 = vpack.c.bf16 %v2270_v48, %v2269_v36  ;;  %vm9747_vm10 = vmand %vm8393_vm12, %vm8276_vm3  ;;  %v10150_v33 = vld [vmem:[#allocation55_spill] sm:$0xff] }
 0x21e   : > { %vm10147_vm5 = vmand %vm10145_vm8, %vm10146_vm13  ;;  %v2248_v35 = vadd.f32 %v7872_v62, %v2218_v46  ;;  %v2152_v22 = vadd.f32 %v5182_v45, %v8146_v32  ;;  %vm10149_vm1 = vnez %v10103_v39  ;;  %v8479_v32 = vpop.f32.mrf.mxu1  ;;  %v2631_v36 = vmul.u32 18, %v2630_v5  ;;  %v5186_v46 = vpop.f32.mrf.mxu0 }
 0x21f   : > { %v2871_v1 = vsel %vm10147_vm5, %v2270_v48, 0.0  ;;  %10148 = vst [vmem:[#allocation48_spill] sm:$0xff] %v8459_v19  ;;  %vm10151_vm5 = vcmp.lt.s32.totalorder %v7838_v23, 0  ;;  %10152 = vst [vmem:[#allocation50_spill] sm:$0xff] %v8479_v32  ;;  %v2641_v21 = vshrl.u32 %v8348_v31, 4  ;;  %v5185_v38 = vadd.f32 %v5184_v55, %v5183_v2  ;;  %v10154_v48 = vld [vmem:[#allocation58_spill] sm:$0xff] }
 0x220   : > { %v8467_v14 = vpack.c.bf16 %v2871_v1, %v2870_v9  ;;  %v8477_v27 = vsel %vm10151_vm5, %v2622_v53, %v2621_v13  ;;  %v2219_v50 = vadd.f32 %v2152_v22, %v10153_v37  ;;  %v2919_v24 = vshrl.u32 %v8337_v47, 16  ;;  %vm10155_vm5 = vmand %vm8424_vm7, %vm10149_vm1  ;;  %v5625_v10 = vpop.f32.mrf.mxu1  ;;  %v10159_v1 = vld [vmem:[#allocation49_spill] sm:$0xff]  ;;  %v10161_v55 = vld [vmem:[#allocation54_spill] sm:$0xff] }
 0x221   : > { %vm8496_vm13 = vmpackc.low %vm10155_vm5, %vm9747_vm10  ;;  %v10156_v13 = vmov 0  ;;  %v3957_v31 = vrot.slane %v8337_v47, 2  ;;  %v2271_v53 = vmax.f32 %v2248_v35, 0.0  ;;  %v2157_v22 = vadd.f32 %v10159_v1, %v5185_v38  ;;  %v10162_v37 = vld [vmem:[#allocation23_spill] sm:$0xff]  ;;  %v5187_v10 = vpop.f32.mrf.mxu0 }
 0x222   : > { %v10157_v13 = vsel %vm8496_vm13, 4294967295, %v10156_v13  ;;  %v2923_v45 = vshll.u32 %v8467_v14, 16  ;;  %v2249_v2 = vadd.f32 %v7872_v62, %v2219_v50  ;;  %vm10160_vm5 = vnez %v10025_v8 }
 0x223   : > { %10158 = vst [vmem:[#allocation57_spill] sm:$0xff] %v10157_v13  ;;  %v10163_v6 = vsel %vm10160_vm5, %v10161_v55, %v10162_v37  ;;  %v8516_v35 = vmul.u32.u64.low 3817748708, %v8452_v29  ;;  %v8517_v5 = vmul.u32.u64.high 3817748708, %v8452_v29, %v8516_v35  ;;  %v10166_v9 = vrot.slane %v8467_v14, 1 }
 0x224   : > { %vm8511_vm10 = vcmp.lt.s32.totalorder %v10163_v6, 16  ;;  %v10167_v50 = vrot.slane %v8337_v47, 1  ;;  %vm10168_vm14 = vcmask 1046528   ;;  %v2921_v8 = vor.u32 %v2919_v24, %v2917_v52 }
 0x225   : > { %v2925_v1 = vrot.slane %v2923_v45, 1  ;;  %vm10169_vm5 = vcmp.lt.s32.totalorder %v10113_v41, 288  ;;  %vm10170_vm8 = vcmp.ge.s32.totalorder %v10113_v41, 0  ;;  %vm10173_vm11 = vnez %v10059_v0  ;;  %v10180_v41 = vld [vmem:[#allocation51_spill] sm:$0xff]  ;;  %v10186_v0 = vld [vmem:[#allocation69_spill] sm:$0xff] }
 0x226   : > { %v8525_v38 = vsel %vm10168_vm14, %v10167_v50, %v10166_v9  ;;  %vm8531_vm13 = vmand %vm10170_vm8, %vm10169_vm5  ;;  %v10174_v55 = vsel %vm10173_vm11, %v8140_v49, %v8026_v61  ;;  %v10175_v47 = vmov 0  ;;  %v10177_v52 = vrot.slane %v8467_v14, 2  ;;  %v10185_v61 = vld [vmem:[#allocation19_spill] sm:$0xff] }
 0x227   : > { %vm8540_vm1 = vcmp.lt.s32.totalorder %v10174_v55, 16  ;;  %vm10178_vm14 = vcmask 1045504   ;;  %v2272_v45 = vmax.f32 %v2249_v2, 0.0  ;;  %v2220_v9 = vadd.f32 %v2157_v22, %v10180_v41  ;;  %v5189_v2 = vpop.f32.mrf.mxu0  ;;  %v6086_v55 = vld [vmem:[#allocation7 + $0xb8] sm:$0xff]   ;;  %v10195_v41 = vld [vmem:[#allocation22_spill] sm:$0xff] }
 0x228   : > { %v10176_v47 = vsel %vm8540_vm1, 4294967295, %v10175_v47  ;;  %v8547_v24 = vsel %vm10178_vm14, %v3957_v31, %v10177_v52  ;;  %v5188_v37 = vadd.f32 %v5187_v10, %v5186_v46  ;;  %vm10181_vm8 = vcmp.lt.s32.totalorder %v7448_v34, 288  ;;  %v10188_v31 = vld [vmem:[#allocation39_spill] sm:$0xff]  ;;  %v10192_v10 = vld [vmem:[#allocation36_spill] sm:$0xff]  ;;  %v10193_v52 = vld [vmem:[#allocation61_spill] sm:$0xff] }
 0x229   : > { %10179 = vst [vmem:[#allocation67_spill] sm:$0xff] %v8547_v24  ;;  %vm10182_vm5 = vcmp.ge.s32.totalorder %v7448_v34, 0  ;;  %vm2676_vm7 = vcmp.ne.s32.totalorder %v8477_v27, 0  ;;  %vm10187_vm12 = vnez %v10186_v0  ;;  %vm10189_vm1 = vnez %v10188_v31  ;;  %v10199_v24 = vld [vmem:[#allocation38_spill] sm:$0xff] }
 0x22a   : > { %vm8555_vm11 = vmand %vm10182_vm5, %vm10181_vm8  ;;  %v3135_v22 = vrot.slane %v8402_v63, 1  ;;  %vm10191_vm2 = vsmask.f32 7424  ;;  %v8572_v50 = vsub.s32 %v10192_v10, %v2631_v36  ;;  %vm10194_vm8 = vnez %v10193_v52 }
 0x22b   : > { %vm10190_vm9 = vmand %vm10187_vm12, %vm10189_vm1  ;;  %v8569_v34 = vsel %vm10191_vm2, %v2921_v8, %v2925_v1  ;;  %vm10196_vm5 = vnez %v10195_v41  ;;  %v8579_v35 = vpack.c.bf16 %v2272_v45, %v2271_v53  ;;  %v2250_v31 = vadd.f32 %v7872_v62, %v2220_v9  ;;  %v5190_v8 = vpop.f32.mrf.mxu0 }
 0x22c   : > { %v2872_v46 = vsel %vm10190_vm9, %v2271_v53, 0.0  ;;  %vm10197_vm14 = vmand %vm10194_vm8, %vm10196_vm5  ;;  %v2160_v19 = vadd.f32 %v10199_v24, %v5188_v37  ;;  %v10200_v10 = vrot.slane %v8525_v38, 1  ;;  %vm10201_vm2 = vcmask 1046528   ;;  %v10202_v24 = vld [vmem:[#allocation53_spill] sm:$0xff] }
 0x22d   : > { %v2873_v0 = vsel %vm10197_vm14, %v2272_v45, 0.0  ;;  %10198 = vst [vmem:[#allocation52_spill] sm:$0xff] %v8579_v35  ;;  %vm9760_vm9 = vmand %vm8531_vm13, %vm8409_vm15  ;;  %v3132_v41 = vrot.slane %v8443_v58, 1  ;;  %v9761_v53 = vrot.slane %v8569_v34, 1  ;;  %v5191_v9 = vadd.f32 %v5190_v8, %v5189_v2  ;;  %v6077_v37 = vld [vmem:[#allocation7 + $0x38] sm:$0xff]   ;;  %v5192_v2 = vpop.f32.mrf.mxu0  ;;  %v6087_v35 = vld [vmem:[#allocation7 + $0xb0] sm:$0xff]  }
 0x22e   : > { %v8587_v36 = vpack.c.bf16 %v2873_v0, %v2872_v46  ;;  %v3137_v52 = vsel %vm10201_vm2, %v3135_v22, %v10200_v10  ;;  %vm9759_vm12 = vmand %vm8555_vm11, %vm8433_vm6  ;;  %v2221_v45 = vadd.f32 %v2160_v19, %v10202_v24  ;;  %v2927_v46 = vshrl.u32 %v8467_v14, 16  ;;  %v6078_v24 = vld [vmem:[#allocation7 + $0x70] sm:$0xff]  }
 0x22f   : > { %5643 = vmatmul.mubr.bf16.vlgmr.msra.gmra.mxu0 %v3137_v52  ;;  %v2642_v0 = vmul.u32 18, %v2641_v21  ;;  %vm8610_vm1 = vmpackc.low %vm9759_vm12, %vm9760_vm9  ;;  %v10203_v22 = vmov 0  ;;  %v2273_v19 = vmax.f32 %v2250_v31, 0.0  ;;  %v10207_v8 = vmov 0.0  }
 0x230   : > { %v10204_v22 = vsel %vm8610_vm1, 4294967295, %v10203_v22  ;;  %vm10206_vm14 = vmmov %vm10201_vm2  ;;  %vm10208_vm8 = vmmov 0   ;;  %v9763_v10 = vrot.slane %v8587_v36, 1  ;;  %v2931_v52 = vshll.u32 %v8587_v36, 16  ;;  %5679 = vmatpush3.bf16.msra.mxu0 %v6086_v55 }
 0x231   : > { %10205 = vst [vmem:[#allocation55_spill] sm:$0xff] %v10204_v22  ;;  %v3134_v21 = vsel %vm10206_vm14, %v3132_v41, %v9761_v53  ;;  %5646 = vmatprep.mubr.msk.bf16.mxu0 %vm10208_vm8, %v10207_v8  ;;  %v2251_v58 = vadd.f32 %v7872_v62, %v2221_v45  ;;  %v2165_v22 = vadd.f32 %v5191_v9, %v10209_v30  ;;  %vm10210_vm5 = vcmp.lt.s32.totalorder %v10150_v33, 288  ;;  %v5193_v45 = vpop.f32.mrf.mxu0 }
 0x232   : > { %3365 = vmatprep.mubr.bf16.mxu1 %v3134_v21  ;;  %vm10211_vm2 = vcmp.ge.s32.totalorder %v10150_v33, 0  ;;  %v8632_v41 = vadd.s32 18, %v8477_v27  ;;  %5680 = vmatprep.subr.bf16.mxu0 %v10207_v8  ;;  %v10214_v30 = vrot.slane %v8467_v14, 1  ;;  %vm10215_vm12 = vcmask 1046528  }
 0x233   : > { %vm8627_vm14 = vmand %vm10211_vm2, %vm10210_vm5  ;;  %3366 = vmatmul.mubr.bf16.vlgmr.msra.gmra.mxu1 %v8402_v63  ;;  %v2929_v9 = vor.u32 %v2927_v46, %v2925_v1  ;;  %v2933_v21 = vrot.slane %v2931_v52, 1  ;;  %vm10216_vm5 = vcmp.lt.s32.totalorder %v10154_v48, 288  ;;  %vm10217_vm2 = vcmp.ge.s32.totalorder %v10154_v48, 0  ;;  %v5195_v1 = vpop.f32.mrf.mxu0 }
 0x234   : > { %v8642_v33 = vsel %vm10215_vm12, %v10214_v30, %v9763_v10  ;;  %vm8648_vm9 = vmand %vm10217_vm2, %vm10216_vm5  ;;  %v2633_v55 = vsub.s32 0, %v8572_v50  ;;  %v2274_v63 = vmax.f32 %v2251_v58, 0.0  ;;  %v2222_v57 = vadd.f32 %v2165_v22, %v10220_v51  ;;  %5333 = vmatpush3.bf16.msra.mxu1 %v6077_v37  ;;  %v6079_v10 = vld [vmem:[#allocation7 + $0x30] sm:$0xff]   ;;  %v6080_v51 = vld [vmem:[#allocation7 + $0x68] sm:$0xff]   ;;  %5681 = vmatpush3.bf16.msra.mxu0 %v6087_v35 }
 0x235   : > { %v5194_v32 = vadd.f32 %v5193_v45, %v5192_v2  ;;  %v9765_v30 = vrot.slane %v8642_v33, 1  ;;  %vm10221_vm12 = vmand %vm8267_vm0, %vm8161_vm4  ;;  %vm10222_vm5 = vsmask.f32 7424  ;;  %5334 = vmatprep.subr.bf16.mxu1 %v6078_v24  ;;  %v8669_v58 = vsub.s32 %v8283_v54, %v2642_v0  ;;  %5682 = vmatprep.subr.bf16.mxu0 %v10207_v8  ;;  %v10237_v0 = vld [vmem:[#allocation42_spill] sm:$0xff] }
 0x236   : > { %v2874_v48 = vsel %vm10221_vm12, %v2273_v19, 0.0  ;;  %v8661_v46 = vsel %vm10222_vm5, %v2929_v9, %v2933_v21  ;;  %v10223_v12 = vrot.slane %v8587_v36, 2  ;;  %v10224_v28 = vrot.slane %v8467_v14, 2  ;;  %v6090_v14 = vld [vmem:[#allocation7 + $0xa8] sm:$0xff]  }
 0x237   : > { %vm10225_vm4 = vcmask 1045504   ;;  %vm10227_vm0 = vnez %v10099_v15  ;;  %vm10228_vm12 = vnez %v10055_v44  ;;  %v8683_v2 = vpack.c.bf16 %v2274_v63, %v2273_v19  ;;  %v5196_v15 = vpop.f32.mrf.mxu0  ;;  %v6081_v9 = vld [vmem:[#allocation7 + $0x28] sm:$0xff]  }
 0x238   : > { %v8676_v37 = vsel %vm10225_vm4, %v10224_v28, %v10223_v12  ;;  %vm10229_vm5 = vmand %vm10227_vm0, %vm10228_vm12  ;;  %v2252_v52 = vadd.f32 %v7872_v62, %v2222_v57  ;;  %v2168_v54 = vadd.f32 %v5194_v32, %v8280_v43  ;;  %vm10230_vm3 = vnez %v10176_v47  ;;  %5335 = vmatpush3.bf16.msra.mxu1 %v6079_v10 }
 0x239   : > { %10226 = vst [vmem:[#allocation28_spill] sm:$0xff] %v8676_v37  ;;  %v2875_v22 = vsel %vm10229_vm5, %v2274_v63, 0.0  ;;  %vm9767_vm2 = vmand %vm8648_vm9, %vm10230_vm3  ;;  %v10231_v44 = vrot.slane %v8525_v38, 1  ;;  %vm10232_vm4 = vcmask 1046528   ;;  %v9764_v57 = vrot.slane %v8661_v46, 1  ;;  %5336 = vmatprep.subr.bf16.mxu1 %v6080_v51  ;;  %5683 = vmatpush3.bf16.msra.mxu0 %v6090_v14 }
 0x23a   : > { %v8692_v35 = vpack.c.bf16 %v2875_v22, %v2874_v48  ;;  %vm10233_vm0 = vcmp.lt.s32.totalorder %v8477_v27, 0  ;;  %vm10236_vm5 = vcmp.lt.s32.totalorder %v10185_v61, 0  ;;  %v2223_v19 = vadd.f32 %v2168_v54, %v10237_v0  ;;  %v6082_v22 = vld [vmem:[#allocation7 + $0x60] sm:$0xff]   ;;  %5684 = vmatprep.subr.bf16.mxu0 %v10207_v8 }
 0x23b   : > { %v3141_v63 = vsel %vm10232_vm4, %v10231_v44, %v9765_v30  ;;  %vm8704_vm12 = vmand %vm10233_vm0, %vm2676_vm7  ;;  %v8711_v32 = vsel %vm10236_vm5, %v2633_v55, %v8572_v50  ;;  %v5197_v24 = vadd.f32 %v5196_v15, %v5195_v1  ;;  %v2935_v45 = vshrl.u32 %v8587_v36, 16  ;;  %v5198_v55 = vpop.f32.mrf.mxu0  ;;  %v10244_v15 = vld [vmem:[#allocation45_spill] sm:$0xff]  ;;  %v6091_v0 = vld [vmem:[#allocation7 + $0xa0] sm:$0xff]  }
 0x23c   : > { %5647 = vmatmul.mubr.bf16.gmra.mxu0 %v3141_v63  ;;  %v2652_v48 = vshrl.u32 %v8517_v5, 4  ;;  %vm10238_vm7 = vmand %vm8627_vm14, %vm8511_vm10  ;;  %v10239_v50 = vmov 0  ;;  %v2275_v10 = vmax.f32 %v2252_v52, 0.0  ;;  %v10242_v5 = vrot.slane %v8569_v34, 1  ;;  %5337 = vmatpush3.bf16.msra.mxu1 %v6081_v9 }
 0x23d   : > { %vm8726_vm4 = vmpackc.low %vm9767_vm2, %vm10238_vm7  ;;  %vm10243_vm0 = vcmask 1046528   ;;  %5650 = vmatprep.mubr.msk.bf16.mxu0 %vm10208_vm8, %v10207_v8  ;;  %v3003_v12 = vrot.slane %v8692_v35, 1  ;;  %v2939_v28 = vshll.u32 %v8692_v35, 16  ;;  %v2253_v54 = vadd.f32 %v7872_v62, %v2223_v19  ;;  %5338 = vmatprep.subr.bf16.mxu1 %v6082_v22  ;;  %v10257_v22 = vld [vmem:[#allocation66_spill] sm:$0xff] }
 0x23e   : > { %v10240_v50 = vsel %vm8726_vm4, 4294967295, %v10239_v50  ;;  %v3139_v1 = vsel %vm10243_vm0, %v10242_v5, %v9764_v57  ;;  %v2173_v52 = vadd.f32 %v10244_v15, %v5197_v24  ;;  %v2644_v63 = vsub.s32 0, %v8669_v58  ;;  %v5199_v5 = vpop.f32.mrf.mxu0  ;;  %vm10246_vm5 = vmmov %vm10243_vm0  ;;  %v10247_v57 = vld [vmem:[#allocation56_spill] sm:$0xff]  ;;  %5685 = vmatpush3.bf16.msra.mxu0 %v6091_v0 }
 0x23f   : > { %10241 = vst [vmem:[#allocation58_spill] sm:$0xff] %v10240_v50  ;;  %3373 = vmatprep.mubr.bf16.mxu1 %v3139_v1  ;;  %v10245_v51 = vrot.slane %v8587_v36, 1  ;;  %v2937_v24 = vor.u32 %v2935_v45, %v2933_v21  ;;  %v2941_v1 = vrot.slane %v2939_v28, 1  ;;  %v3972_v15 = vrot.slane %v8692_v35, 2  ;;  %v6083_v50 = vld [vmem:[#allocation7 + $0x20] sm:$0xff]   ;;  %5686 = vmatprep.subr.bf16.mxu0 %v10207_v8 }
 0x240   : > { %3374 = vmatmul.mubr.bf16.gmra.mxu1 %v8525_v38  ;;  %v2276_v44 = vmax.f32 %v2253_v54, 0.0  ;;  %v2224_v14 = vadd.f32 %v2173_v52, %v10247_v57  ;;  %v5200_v30 = vadd.f32 %v5199_v5, %v5198_v55  ;;  %vm10248_vm0 = vnez %v10122_v40  ;;  %v5201_v45 = vpop.f32.mrf.mxu0  ;;  %v6084_v54 = vld [vmem:[#allocation7 + $0x58] sm:$0xff]  }
 0x241   : > { %v8752_v19 = vsel %vm10246_vm5, %v10245_v51, %v3003_v12  ;;  %vm10249_vm5 = vnez %v10091_v18  ;;  %vm10251_vm4 = vsmask.f32 7424  ;;  %v2653_v57 = vmul.u32 18, %v2652_v48  ;;  %v6093_v48 = vld [vmem:[#allocation7 + $0x98] sm:$0xff]   ;;  %5339 = vmatpush3.bf16.msra.mxu1 %v6083_v50 }
 0x242   : > { %v9770_v37 = vrot.slane %v8752_v19, 1  ;;  %vm10250_vm2 = vmand %vm10248_vm0, %vm10249_vm5  ;;  %v8765_v28 = vsel %vm10251_vm4, %v2937_v24, %v2941_v1  ;;  %v10252_v9 = vrot.slane %v8587_v36, 2  ;;  %vm10253_vm1 = vcmask 1045504   ;;  %v5202_v36 = vpop.f32.mrf.mxu0  ;;  %5340 = vmatprep.subr.bf16.mxu1 %v6084_v54  ;;  %5687 = vmatpush3.bf16.msra.mxu0 %v6093_v48 }
 0x243   : > { %v2876_v21 = vsel %vm10250_vm2, %v2275_v10, 0.0  ;;  %vm10254_vm7 = vnez %v10136_v56  ;;  %vm10255_vm3 = vnez %v10103_v39  ;;  %v8779_v40 = vpack.c.bf16 %v2276_v44, %v2275_v10  ;;  %v10260_v10 = vld [vmem:[#allocation60_spill] sm:$0xff]  ;;  %5688 = vmatprep.subr.bf16.mxu0 %v10207_v8 }
 0x244   : > { %v8772_v55 = vsel %vm10253_vm1, %v10252_v9, %v3972_v15  ;;  %vm10256_vm0 = vmand %vm10254_vm7, %vm10255_vm3  ;;  %v2254_v52 = vadd.f32 %v7872_v62, %v2224_v14  ;;  %v2176_v5 = vadd.f32 %v10257_v22, %v5200_v30  ;;  %v10258_v24 = vrot.slane %v8642_v33, 1 }
 0x245   : > { %v2877_v18 = vsel %vm10256_vm0, %v2276_v44, 0.0  ;;  %vm10259_vm1 = vcmask 1046528   ;;  %v9769_v39 = vrot.slane %v8765_v28, 1  ;;  %vm2700_vm3 = vcmp.lt.s32.totalorder %v8711_v32, 0 }
 0x246   : > { %v8783_v51 = vpack.c.bf16 %v2877_v18, %v2876_v21  ;;  %v3145_v56 = vsel %vm10259_vm1, %v10258_v24, %v9770_v37  ;;  %v2225_v44 = vadd.f32 %v2176_v5, %v10260_v10  ;;  %v5203_v30 = vadd.f32 %v5202_v36, %v5201_v45  ;;  %v6085_v21 = vld [vmem:[#allocation7 + $0x18] sm:$0xff]   ;;  %v5204_v18 = vpop.f32.mrf.mxu0  ;;  %vm10263_vm4 = vmmov %vm10259_vm1  ;;  %v6088_v5 = vld [vmem:[#allocation7 + $0x50] sm:$0xff]  }
 0x247   : > { %5651 = vmatmul.mubr.bf16.gmra.mxu0 %v3145_v56  ;;  %v2943_v0 = vshrl.u32 %v8692_v35, 16  ;;  %vm10261_vm2 = vcmp.lt.s32.totalorder %v8170_v25, 0  ;;  %v2277_v9 = vmax.f32 %v2254_v52, 0.0  ;;  %v10262_v22 = vrot.slane %v8661_v46, 1  ;;  %v6095_v56 = vld [vmem:[#allocation7 + $0x90] sm:$0xff]   ;;  %vm10264_vm5 = vmmov %vm10259_vm1  ;;  %5341 = vmatpush3.bf16.msra.mxu1 %v6085_v21 }
 0x248   : > { %v8798_v14 = vsel %vm10261_vm2, %v2644_v63, %v8669_v58  ;;  %5654 = vmatprep.mubr.msk.bf16.mxu0 %vm10208_vm8, %v10207_v8  ;;  %v3005_v45 = vrot.slane %v8783_v51, 1  ;;  %v2947_v50 = vshll.u32 %v8783_v51, 16  ;;  %v2255_v58 = vadd.f32 %v7872_v62, %v2225_v44  ;;  %v5205_v10 = vpop.f32.mrf.mxu0  ;;  %v6089_v37 = vld [vmem:[#allocation7 + $0x10] sm:$0xff]   ;;  %vm10267_vm2 = vmand %vm8531_vm13, %vm8409_vm15  ;;  %5342 = vmatprep.subr.bf16.mxu1 %v6088_v5 }
 0x249   : > { %v3143_v24 = vsel %vm10263_vm4, %v10262_v22, %v9769_v39  ;;  %v2181_v63 = vadd.f32 %v5203_v30, %v8343_v59  ;;  %v8812_v52 = vadd.s32 18, %v8711_v32  ;;  %v8816_v36 = vsub.s32 %v8452_v29, %v2653_v57  ;;  %v10265_v57 = vld [vmem:[#allocation63_spill] sm:$0xff]  ;;  %vm10270_vm15 = vmand %vm8555_vm11, %vm8433_vm6  ;;  %5689 = vmatpush3.bf16.msra.mxu0 %v6095_v56 }
 0x24a   : > { %3381 = vmatprep.mubr.bf16.mxu1 %v3143_v24  ;;  %v8824_v59 = vsel %vm10264_vm5, %v3003_v12, %v3005_v45  ;;  %v2945_v54 = vor.u32 %v2943_v0, %v2941_v1  ;;  %v2949_v44 = vrot.slane %v2947_v50, 1  ;;  %v3978_v30 = vrot.slane %v8783_v51, 2  ;;  %v10266_v24 = vld [vmem:[#allocation18_spill] sm:$0xff]  ;;  %v5207_v1 = vpop.f32.mrf.mxu0  ;;  %5690 = vmatprep.subr.bf16.mxu0 %v10207_v8 }
 0x24b   : > { %3382 = vmatmul.mubr.bf16.gmra.mxu1 %v8642_v33  ;;  %v2278_v29 = vmax.f32 %v2255_v58, 0.0  ;;  %v2226_v48 = vadd.f32 %v2181_v63, %v10265_v57  ;;  %v5206_v22 = vadd.f32 %v5205_v10, %v5204_v18  ;;  %v3148_v39 = vrot.slane %v8824_v59, 1  ;;  %v6092_v18 = vld [vmem:[#allocation7 + $0x48] sm:$0xff]  }
 0x24c   : > { %v2878_v12 = vsel %vm10267_vm2, %v2277_v9, 0.0  ;;  %vm10268_vm4 = vsmask.f32 7424  ;;  %vm2354_vm5 = vcmp.ge.s32.totalorder %v7838_v23, 0  ;;  %vm2377_vm0 = vcmp.lt.s32.totalorder %v7838_v23, 288  ;;  %v6096_v58 = vld [vmem:[#allocation7 + $0x88] sm:$0xff]   ;;  %v5208_v35 = vpop.f32.mrf.mxu0  ;;  %5343 = vmatpush3.bf16.msra.mxu1 %v6089_v37 }
 0x24d   : > { %v8838_v0 = vsel %vm10268_vm4, %v2945_v54, %v2949_v44  ;;  %vm2678_vm1 = vcmp.ne.s32.totalorder %v8798_v14, 0  ;;  %vm10269_vm7 = vcmask 1045504   ;;  %v2879_v6 = vsel %vm10270_vm15, %v2278_v29, 0.0  ;;  %v6094_v57 = vld [vmem:[#allocation7 + $0x8] sm:$0xff]   ;;  %5344 = vmatprep.subr.bf16.mxu1 %v6092_v18  ;;  %5691 = vmatpush3.bf16.msra.mxu0 %v6096_v58 }
 0x24e   : > { %v8848_v11 = vsel %vm10269_vm7, %v3972_v15, %v3978_v30  ;;  %v8855_v21 = vpack.c.bf16 %v2278_v29, %v2277_v9  ;;  %v2256_v50 = vadd.f32 %v7872_v62, %v2226_v48  ;;  %v2184_v5 = vadd.f32 %v5206_v22, %v8413_v42  ;;  %v5210_v22 = vpop.f32.mrf.mxu0  ;;  %5692 = vmatprep.subr.bf16.mxu0 %v10207_v8 }
 0x24f   : > { %v8859_v63 = vpack.c.bf16 %v2879_v6, %v2878_v12  ;;  %vm10271_vm13 = vnez %v10118_v16  ;;  %v10275_v15 = vrot.slane %v8752_v19, 1  ;;  %vm10276_vm6 = vcmask 1046528   ;;  %v6097_v12 = vld [vmem:[#allocation7 + $0x40] sm:$0xff]  }
 0x250   : > { %v10272_v49 = vsel %vm10271_vm13, %v8354_v20, %v8261_v7  ;;  %v3146_v9 = vrot.slane %v8838_v0, 1  ;;  %vm10277_vm11 = vcmp.ne.s32.totalorder %v8711_v32, 0  ;;  %vm2701_vm4 = vcmp.lt.s32.totalorder %v8798_v14, 0  ;;  %5345 = vmatpush3.bf16.msra.mxu1 %v6094_v57  ;;  %v6100_v57 = vld [vmem:[#allocation7 + $0x1f8] sm:$0xff]  }
 0x251   : > { %vm8866_vm7 = vcmp.lt.s32.totalorder %v10272_v49, 16  ;;  %v3149_v42 = vsel %vm10276_vm6, %v10275_v15, %v3148_v39  ;;  %vm8880_vm2 = vmand %vm2700_vm3, %vm10277_vm11  ;;  %v2227_v7 = vadd.f32 %v2184_v5, %v8417_v17  ;;  %v5209_v20 = vadd.f32 %v5208_v35, %v5207_v1  ;;  %v6099_v5 = vld [vmem:[#allocation7 + $0x80] sm:$0xff]   ;;  %v5211_v35 = vpop.f32.mrf.mxu0  ;;  %5346 = vmatprep.subr.bf16.mxu1 %v6097_v12 }
 0x252   : > { %5655 = vmatmul.mubr.bf16.gmra.mxu0 %v3149_v42  ;;  %v10280_v56 = vsel %vm8704_vm12, %v8632_v41, %v8477_v27  ;;  %v2951_v54 = vshrl.u32 %v8783_v51, 16  ;;  %v2655_v29 = vsub.s32 0, %v8816_v36  ;;  %v2279_v48 = vmax.f32 %v2256_v50, 0.0  ;;  %vm10284_vm3 = vmmov %vm10276_vm6  ;;  %v10286_v42 = vld [vmem:[#allocation62_spill] sm:$0xff] }
 0x253   : > { %vm8892_vm15 = vcmp.lt.s32.totalorder %v10280_v56, 16  ;;  %v10283_v17 = vrot.slane %v8765_v28, 1  ;;  %5658 = vmatprep.mubr.msk.bf16.mxu0 %vm10208_vm8, %v10207_v8  ;;  %v3007_v27 = vrot.slane %v8859_v63, 1  ;;  %v2955_v41 = vshll.u32 %v8859_v63, 16  ;;  %vm10285_vm12 = vmmov %vm10284_vm3  ;;  %5693 = vmatpush3.bf16.msra.mxu0 %v6099_v5 }
 0x254   : > { %v2257_v37 = vadd.f32 %v7872_v62, %v2227_v7  ;;  %v2189_v1 = vadd.f32 %v8317_v60, %v5209_v20  ;;  %v2769_v6 = vsel %vm8880_vm2, %v8812_v52, %v8711_v32  ;;  %v8914_v50 = vadd.s32 18, %v8798_v14  ;;  %vm8934_vm11 = vmand %vm2701_vm4, %vm2678_vm1  ;;  %5730 = vmatprep.subr.bf16.mxu0 %v10207_v8 }
 0x255   : > { %v3147_v43 = vsel %vm10284_vm3, %v10283_v17, %v3146_v9  ;;  %v8922_v62 = vsel %vm10285_vm12, %v3005_v45, %v3007_v27  ;;  %v2953_v60 = vor.u32 %v2951_v54, %v2949_v44  ;;  %v2957_v18 = vrot.slane %v2955_v41, 1  ;;  %v6098_v44 = vld [vmem:[#allocation7] sm:$0xff]   ;;  %vm10289_vm3 = vmand %vm8627_vm14, %vm8511_vm10  ;;  %v5213_v54 = vpop.f32.mrf.mxu0 }
 0x256   : > { %3389 = vmatprep.mubr.bf16.mxu1 %v3147_v43  ;;  %v3984_v49 = vrot.slane %v8859_v63, 2  ;;  %v2280_v15 = vmax.f32 %v2257_v37, 0.0  ;;  %v2228_v58 = vadd.f32 %v2189_v1, %v10286_v42  ;;  %v5212_v7 = vadd.f32 %v5211_v35, %v5210_v22  ;;  %5347 = vmatpush3.bf16.msra.mxu1 %v6098_v44 }
 0x257   : > { %3390 = vmatmul.mubr.bf16.gmra.mxu1 %v8752_v19  ;;  %v3152_v20 = vrot.slane %v8922_v62, 1  ;;  %v2880_v56 = vsel %vm10289_vm3, %v2279_v48, 0.0  ;;  %vm10290_vm12 = vsmask.f32 7424  ;;  %vm2356_vm13 = vcmp.ge.s32.totalorder %v8170_v25, 0  ;;  %v5214_v53 = vpop.f32.mrf.mxu0  ;;  %5419 = vmatprep.subr.bf16.mxu1 %v6100_v57  ;;  %v10305_v57 = vld [vmem:[#allocation24_spill] sm:$0xff] }
 0x258   : > { %v8944_v22 = vsel %vm10290_vm12, %v2953_v60, %v2957_v18  ;;  %vm2379_vm6 = vcmp.lt.s32.totalorder %v8170_v25, 288  ;;  %vm10291_vm1 = vcmp.lt.s32.totalorder %v8310_v26, 0  ;;  %vm10292_vm10 = vcmask 1045504  }
 0x259   : > { %v8951_v17 = vsel %vm10291_vm1, %v2655_v29, %v8816_v36  ;;  %v8958_v13 = vsel %vm10292_vm10, %v3978_v30, %v3984_v49  ;;  %vm10293_vm14 = vnez %v10176_v47  ;;  %v8965_v43 = vpack.c.bf16 %v2280_v15, %v2279_v48  ;;  %v8970_v36 = vld [vmem:[%s9630_s2] ss:$0 sm:$0xff]  ;;  %vm9000_vm10 = vmand %vm2354_vm5, %vm2377_vm0 }
 0x25a   : > { %vm10294_vm4 = vmand %vm8648_vm9, %vm10293_vm14  ;;  %v2258_v29 = vadd.f32 %v8970_v36, %v2228_v58  ;;  %v2192_v51 = vadd.f32 %v8376_v3, %v5212_v7  ;;  %vm10295_vm3 = vcmp.lt.s32.totalorder %v10266_v24, 288  ;;  %vm10296_vm12 = vcmp.ge.s32.totalorder %v10266_v24, 0  ;;  %v10300_v24 = vld [vmem:[#allocation65_spill] sm:$0xff] }
 0x25b   : > { %v2881_v31 = vsel %vm10294_vm4, %v2280_v15, 0.0  ;;  %vm8980_vm9 = vmand %vm10296_vm12, %vm10295_vm3  ;;  %vm10299_vm1 = vcmask 1046528   ;;  %v3150_v3 = vrot.slane %v8944_v22, 1  ;;  %v2770_v41 = vsel %vm8934_vm11, %v8914_v50, %v8798_v14  ;;  %v5216_v50 = vpop.f32.mrf.mxu0 }
 0x25c   : > { %v8974_v30 = vpack.c.bf16 %v2881_v31, %v2880_v56  ;;  %v3153_v48 = vsel %vm10299_vm1, %v3148_v39, %v3152_v20  ;;  %v2229_v12 = vadd.f32 %v2192_v51, %v10300_v24  ;;  %v5215_v39 = vadd.f32 %v5214_v53, %v5213_v54  ;;  %vm10303_vm11 = vmmov %vm10299_vm1  ;;  %v10306_v53 = vld [vmem:[#allocation68_spill] sm:$0xff] }
 0x25d   : > { %5659 = vmatmul.mubr.bf16.gmra.mxu0 %v3153_v48  ;;  %vm2679_vm14 = vcmp.ne.s32.totalorder %v8951_v17, 0  ;;  %v2959_v1 = vshrl.u32 %v8859_v63, 16  ;;  %v2281_v14 = vmax.f32 %v2258_v29, 0.0  ;;  %v3151_v5 = vsel %vm10303_vm11, %v3146_v9, %v3150_v3  ;;  %vm2813_vm4 = vmand %vm8980_vm9, %vm8866_vm7  ;;  %v10304_v9 = vld [vmem:[#allocation50_spill] sm:$0xff]  ;;  %v5217_v58 = vpop.f32.mrf.mxu0  ;;  %v10307_v48 = vld [vmem:[#allocation21_spill] sm:$0xff] }
 0x25e   : > { %5662 = vmatprep.mubr.msk.bf16.mxu0 %vm10208_vm8, %v10207_v8  ;;  %vm2380_vm5 = vcmp.lt.s32.totalorder %v8310_v26, 288  ;;  %v3009_v23 = vrot.slane %v8974_v30, 1  ;;  %v2963_v35 = vshll.u32 %v8974_v30, 16  ;;  %v2259_v60 = vadd.f32 %v8970_v36, %v2229_v12  ;;  %3397 = vmatprep.mubr.bf16.mxu1 %v3151_v5  ;;  %vm2814_vm12 = vmand %vm9000_vm10, %vm8892_vm15  ;;  %v2199_v12 = vpop.f32.mrf.mxu1 }
 0x25f   : > { %v2197_v15 = vadd.f32 %v5215_v39, %v10304_v9  ;;  %vm2702_vm3 = vcmp.lt.s32.totalorder %v8951_v17, 0  ;;  %v2748_v42 = vadd.s32 18, %v8951_v17  ;;  %3398 = vmatmul.mubr.bf16.gmra.mxu1 %v8824_v59  ;;  %v2961_v45 = vor.u32 %v2959_v1, %v2957_v18  ;;  %v5219_v18 = vpop.f32.mrf.mxu0 }
 0x260   : > { %v9031_v7 = vsel %vm10299_vm1, %v3007_v27, %v3009_v23  ;;  %v2965_v44 = vrot.slane %v2963_v35, 1  ;;  %v3990_v56 = vrot.slane %v8974_v30, 2  ;;  %v2282_v54 = vmax.f32 %v2259_v60, 0.0  ;;  %vm9047_vm11 = vmand %vm2702_vm3, %vm2679_vm14 }
 0x261   : > { %v2230_v31 = vadd.f32 %v2197_v15, %v10305_v57  ;;  %v5218_v29 = vadd.f32 %v5217_v58, %v5216_v50  ;;  %v3156_v51 = vrot.slane %v9031_v7, 1  ;;  %v1560_v24 = vadd.f32 %v10307_v48, %v10306_v53 }
 0x262   : > { %v2882_v27 = vsel %vm2813_vm4, %v2281_v14, 0.0  ;;  %vm10310_vm1 = vsmask.f32 7424  ;;  %vm10311_vm0 = vcmask 1045504   ;;  %v2883_v4 = vsel %vm2814_vm12, %v2282_v54, 0.0  ;;  %vm9096_vm4 = vmand %vm2356_vm13, %vm2379_vm6 }
 0x263   : > { %v9052_v1 = vsel %vm10310_vm1, %v2961_v45, %v2965_v44  ;;  %v9057_v47 = vsel %vm10311_vm0, %v3984_v49, %v3990_v56  ;;  %v2260_v14 = vadd.f32 %v8970_v36, %v2230_v31  ;;  %v2200_v50 = vadd.f32 %v5218_v29, %v2199_v12  ;;  %v10326_v29 = vld [vmem:[#allocation32_spill] sm:$0xff] }
 0x264   : > { %vm10312_vm7 = vcmask 1046528   ;;  %v9068_v35 = vpack.c.bf16 %v2883_v4, %v2882_v27  ;;  %vm10313_vm9 = vcmp.lt.s32.totalorder %v10185_v61, 288  ;;  %vm10314_vm14 = vcmp.ge.s32.totalorder %v10185_v61, 0 }
 0x265   : > { %v3157_v5 = vsel %vm10312_vm7, %v3152_v20, %v3156_v51  ;;  %vm9074_vm0 = vmand %vm10314_vm14, %vm10313_vm9  ;;  %vm9083_vm15 = vcmp.lt.s32.totalorder %v2769_v6, 16  ;;  %vm9087_vm10 = vcmp.lt.s32.totalorder %v2770_v41, 16  ;;  %v5220_v20 = vpop.f32.mrf.mxu0  ;;  %v3154_v61 = vrot.slane %v9052_v1, 1 }
 0x266   : > { %v2231_v37 = vadd.f32 %v2200_v50, %v1560_v24  ;;  %v5221_v32 = vadd.f32 %v5220_v20, %v5219_v18  ;;  %v2771_v52 = vsel %vm9047_vm11, %v2748_v42, %v8951_v17  ;;  %5663 = vmatmul.mubr.bf16.gmra.mxu0 %v3157_v5  ;;  %v2967_v6 = vshrl.u32 %v8974_v30, 16  ;;  %vm10323_vm2 = vmmov %vm10312_vm7  ;;  %v10324_v42 = vld [vmem:[#allocation41_spill] sm:$0xff] }
 0x267   : > { %v2283_v41 = vmax.f32 %v2260_v14, 0.0  ;;  %v3155_v60 = vsel %vm10323_vm2, %v3150_v3, %v3154_v61  ;;  %5666 = vmatprep.mubr.msk.bf16.mxu0 %vm10208_vm8, %v10207_v8  ;;  %v3011_v25 = vrot.slane %v9068_v35, 1  ;;  %v2971_v9 = vshll.u32 %v9068_v35, 16  ;;  %v5222_v15 = vpop.f32.mrf.mxu0  ;;  %vm2815_vm13 = vmand %vm9074_vm0, %vm9083_vm15 }
 0x268   : > { %v2261_v17 = vadd.f32 %v8970_v36, %v2231_v37  ;;  %v2205_v30 = vadd.f32 %v10324_v42, %v5221_v32  ;;  %3405 = vmatprep.mubr.bf16.mxu1 %v3155_v60  ;;  %vm2816_vm6 = vmand %vm9096_vm4, %vm9087_vm10  ;;  %v2969_v58 = vor.u32 %v2967_v6, %v2965_v44  ;;  %v3996_v57 = vrot.slane %v9068_v35, 2 }
 0x269   : > { %3406 = vmatmul.mubr.bf16.gmra.mxu1 %v8922_v62  ;;  %vm10325_vm3 = vmmov %vm10323_vm2  ;;  %v2973_v45 = vrot.slane %v2971_v9, 1  ;;  %v5223_v54 = vpop.f32.mrf.mxu0  ;;  %vm10327_vm12 = vcmp.ge.s32.totalorder %v8310_v26, 0  ;;  %vm9133_vm1 = vcmp.lt.s32.totalorder %v2771_v52, 16  ;;  %v2884_v44 = vsel %vm2815_vm13, %v2283_v41, 0.0 }
 0x26a   : > { %v9121_v3 = vsel %vm10325_vm3, %v3009_v23, %v3011_v25  ;;  %v2284_v31 = vmax.f32 %v2261_v17, 0.0  ;;  %v2232_v53 = vadd.f32 %v2205_v30, %v10326_v29  ;;  %vm9129_vm11 = vmand %vm10327_vm12, %vm2380_vm5  ;;  %vm10332_vm7 = vsmask.f32 7424 }
 0x26b   : > { %v3160_v23 = vrot.slane %v9121_v3, 1  ;;  %v9144_v27 = vsel %vm10332_vm7, %v2969_v58, %v2973_v45  ;;  %vm10333_vm9 = vcmask 1045504   ;;  %vm10334_vm5 = vmmov %vm10323_vm2 }
 0x26c   : > { %v9147_v26 = vsel %vm10333_vm9, %v3990_v56, %v3996_v57  ;;  %v2885_v12 = vsel %vm2816_vm6, %v2284_v31, 0.0  ;;  %v2262_v18 = vadd.f32 %v8970_v36, %v2232_v53  ;;  %v3158_v4 = vrot.slane %v9144_v27, 1  ;;  %vm2817_vm14 = vmand %vm9129_vm11, %vm9133_vm1 }
 0x26d   : > { %v3161_v39 = vsel %vm10334_vm5, %v3156_v51, %v3160_v23  ;;  %v2897_v14 = vpack.c.bf16 %v2885_v12, %v2884_v44  ;;  %vm10335_vm0 = vmmov %vm10323_vm2  ;;  %v3070_v56 = vshrl.u32 %v9068_v35, 16 }
 0x26e   : > { %v2285_v50 = vmax.f32 %v2262_v18, 0.0  ;;  %5667 = vmatmul.mubr.bf16.gmra.mxu0 %v3161_v39  ;;  %v3159_v5 = vsel %vm10335_vm0, %v3154_v61, %v3158_v4  ;;  %vm10336_vm15 = vmmov %vm10335_vm0 }
 0x26f   : > { %3413 = vmatprep.mubr.bf16.mxu1 %v3159_v5  ;;  %5670 = vmatprep.mubr.msk.bf16.mxu0 %vm10208_vm8, %v10207_v8  ;;  %v3082_v36 = vrot.slane %v2897_v14, 1  ;;  %v3074_v51 = vshll.u32 %v2897_v14, 16  ;;  %v3072_v10 = vor.u32 %v3070_v56, %v2973_v45  ;;  %v3078_v49 = vshrl.u32 %v2897_v14, 16  ;;  %vm10337_vm10 = vmmov %vm10333_vm9  ;;  %v10350_v56 = vld [vmem:[#allocation47_spill] sm:$0xff] }
 0x270   : > { %v2886_v63 = vsel %vm2817_vm14, %v2285_v50, 0.0  ;;  %v4002_v20 = vrot.slane %v2897_v14, 2  ;;  %vm10338_vm4 = vmmov %vm10332_vm7 }
 0x271   : > { %v2898_v37 = vpack.c.bf16 %v2886_v63, %v2886_v63  ;;  %3414 = vmatmul.mubr.bf16.gmra.mxu1 %v9031_v7  ;;  %v9162_v16 = vsel %vm10336_vm15, %v3011_v25, %v3082_v36  ;;  %v3076_v32 = vrot.slane %v3074_v51, 1  ;;  %v3168_v61 = vrot.slane %v3082_v36, 1  ;;  %vm10339_vm2 = vmmov %vm10335_vm0  ;;  %v10351_v51 = vld [vmem:[#allocation31_spill] sm:$0xff] }
 0x272   : > { %v3164_v35 = vrot.slane %v9162_v16, 1  ;;  %v9166_v52 = vsel %vm10337_vm10, %v3996_v57, %v4002_v20  ;;  %vm10340_vm13 = vmmov %vm10335_vm0  ;;  %v4000_v12 = vrot.slane %v9162_v16, 2  ;;  %v10353_v63 = vld [vmem:[#allocation27_spill] sm:$0xff] }
 0x273   : > { %v9169_v6 = vsel %vm10338_vm4, %v3072_v10, %v3076_v32  ;;  %v3080_v41 = vor.u32 %v3078_v49, %v3076_v32  ;;  %v3898_v60 = vshll.u32 %v2898_v37, 16  ;;  %v3902_v30 = vshrl.u32 %v2898_v37, 16  ;;  %vm10341_vm6 = vmmov %vm10335_vm0  ;;  %v10356_v10 = vld [vmem:[#allocation46_spill] sm:$0xff]  ;;  %v10358_v49 = vld [vmem:[#allocation44_spill] sm:$0xff] }
 0x274   : > { %v3165_v9 = vsel %vm10339_vm2, %v3160_v23, %v3164_v35  ;;  %v3162_v15 = vrot.slane %v9169_v6, 1  ;;  %v3169_v17 = vsel %vm10340_vm13, %v3164_v35, %v3168_v61  ;;  %v4008_v58 = vrot.slane %v2898_v37, 2  ;;  %vm10342_vm3 = vmmov %vm10335_vm0  ;;  %v6102_v32 = vld [vmem:[#allocation7 + $0x1f0] sm:$0xff]   ;;  %v10362_v35 = vld [vmem:[#allocation33_spill] sm:$0xff] }
 0x275   : > { %v3166_v25 = vrot.slane %v3080_v41, 1  ;;  %v3900_v42 = vrot.slane %v3898_v60, 1  ;;  %v3906_v54 = vrot.slane %v2898_v37, 1  ;;  %v3998_v31 = vrot.slane %v9169_v6, 2  ;;  %vm10343_vm12 = vmmov %vm10338_vm4  ;;  %v6101_v37 = vld [vmem:[#allocation7 + $0x1b8] sm:$0xff]   ;;  %v9222_v61 = vld [vmem:[#allocation7 + $0x230] sm:$0xff]  }
 0x276   : > { %5671 = vmatmul.mubr.bf16.gmra.mxu0 %v3165_v9  ;;  %v3163_v45 = vsel %vm10341_vm6, %v3158_v4, %v3162_v15  ;;  %vm10344_vm11 = vmmov %vm10333_vm9  ;;  %vm10354_vm15 = vnez %v10353_v63  ;;  %vm10357_vm4 = vnez %v10356_v10  ;;  %vm10359_vm2 = vnez %v10358_v49  ;;  %v6103_v60 = vld [vmem:[#allocation7 + $0x1b0] sm:$0xff]   ;;  %v6104_v9 = vld [vmem:[#allocation7 + $0x1e8] sm:$0xff]  }
 0x277   : > { %3421 = vmatprep.mubr.bf16.mxu1 %v3163_v45  ;;  %v3167_v57 = vsel %vm10342_vm3, %v3162_v15, %v3166_v25  ;;  %5674 = vmatprep.mubr.msk.bf16.mxu0 %vm10208_vm8, %v10207_v8  ;;  %v3901_v29 = vsel %vm10343_vm12, %v3080_v41, %v3900_v42  ;;  %v3904_v53 = vor.u32 %v3902_v30, %v3900_v42  ;;  %vm10345_vm1 = vmmov %vm10335_vm0  ;;  %v4012_v44 = vrot.slane %v3906_v54, 2  ;;  %v10363_v41 = vld [vmem:[#allocation43_spill] sm:$0xff]  ;;  %v6106_v42 = vld [vmem:[#allocation7 + $0x1e0] sm:$0xff]  }
 0x278   : > { %v4004_v48 = vrot.slane %v3901_v29, 2  ;;  %v9181_v24 = vsel %vm10344_vm11, %v4002_v20, %v4008_v58  ;;  %v3907_v23 = vsel %vm10345_vm1, %v3082_v36, %v3906_v54  ;;  %vm10346_vm7 = vmmov %vm10333_vm9  ;;  %v9206_v36 = vld [vmem:[#allocation7 + $0x238] sm:$0xff]   ;;  %vm10352_vm0 = vnez %v10351_v51  ;;  %v10361_v20 = vld [vmem:[#allocation40_spill] sm:$0xff] }
 0x279   : > { %3422 = vmatmul.mubr.bf16.gmra.mxu1 %v9121_v3  ;;  %v4010_v18 = vrot.slane %v3904_v53, 2  ;;  %v4006_v39 = vrot.slane %v3907_v23, 2  ;;  %vm10347_vm9 = vmmov %vm10346_vm7  ;;  %v9229_v15 = vld [vmem:[#allocation7 + $0x228] sm:$0xff]   ;;  %v9235_v30 = vld [vmem:[#allocation7 + $0x220] sm:$0xff]  }
 0x27a   : > { %3429 = vmatprep.mubr.bf16.mxu1 %v3167_v57  ;;  %v9189_v4 = vsel %vm10346_vm7, %v3998_v31, %v4004_v48  ;;  %vm10348_vm5 = vmmov %vm10346_vm7  ;;  %v6105_v25 = vld [vmem:[#allocation7 + $0x1a8] sm:$0xff]   ;;  %v10365_v58 = vld [vmem:[#allocation25_spill] sm:$0xff] }
 0x27b   : > { %v9192_v14 = vsel %vm10347_vm9, %v4004_v48, %v4010_v18  ;;  %v9197_v50 = vsel %vm10348_vm5, %v4000_v12, %v4006_v39  ;;  %vm10349_vm14 = vmmov %vm10348_vm5  ;;  %v10366_v45 = vld [vmem:[#allocation30_spill] sm:$0xff]  ;;  %v6108_v57 = vld [vmem:[#allocation7 + $0x1d8] sm:$0xff]  }
 0x27c   : > { %v9200_v5 = vsel %vm10349_vm14, %v4006_v39, %v4012_v44  ;;  %vm10355_vm10 = vmand %vm10352_vm0, %vm10354_vm15  ;;  %vm10367_vm3 = vnez %v10366_v45  ;;  %v6107_v54 = vld [vmem:[#allocation7 + $0x1a0] sm:$0xff]   ;;  %v9243_v29 = vld [vmem:[#allocation7 + $0x218] sm:$0xff]   ;;  %vm10385_vm0 = vcmask 1045504   ;;  %v3968_v45 = vrot.slane %v8765_v28, 2 }
 0x27d   : > { %vm10360_vm13 = vmand %vm10357_vm4, %vm10359_vm2  ;;  %v6109_v53 = vld [vmem:[#allocation7 + $0x198] sm:$0xff]   ;;  %v6112_v48 = vld [vmem:[#allocation7 + $0x1d0] sm:$0xff]  }
 0x27e   : > { %5675 = vmatmul.mubr.bf16.gmra.mxu0 %v3169_v17  ;;  %vm4848_vm6 = vmpackc.low %vm10360_vm13, %vm10355_vm10  ;;  %v10364_v17 = vld [vmem:[#allocation34_spill] sm:$0xff]  ;;  %v9250_v23 = vld [vmem:[#allocation7 + $0x210] sm:$0xff]  }
 0x27f   : > { %5694 = vmatprep.mubr.msk.bf16.mxu0 %vm10208_vm8, %v10207_v8  ;;  %v10368_v44 = vld [vmem:[#allocation26_spill] sm:$0xff]  ;;  %v10369_v18 = vld [vmem:[#allocation35_spill] sm:$0xff]  ;;  %v6113_v39 = vld [vmem:[#allocation7 + $0x190] sm:$0xff]  }
 0x280   : > { %vm10370_vm12 = vnez %v10369_v18  ;;  %v9258_v51 = vld [vmem:[#allocation7 + $0x208] sm:$0xff]   ;;  %v6121_v10 = vld [vmem:[#allocation7 + $0x1c0] sm:$0xff]   ;;  %vm10386_vm15 = vmmov %vm10385_vm0 }
 0x281   : > { %3430 = vmatmul.mubr.bf16.gmra.mxu1 %v9162_v16  ;;  %v6118_v63 = vld [vmem:[#allocation7 + $0x188] sm:$0xff]   ;;  %v9265_v49 = vld [vmem:[#allocation7 + $0x200] sm:$0xff]   ;;  %vm10388_vm10 = vmmov %vm10385_vm0 }
 0x282   : > { %3719 = vmatprep.mubr.bf16.mxu1 %v10350_v56  ;;  %v6116_v56 = vld [vmem:[#allocation7 + $0x1c8] sm:$0xff]   ;;  %vm10389_vm4 = vmmov %vm10385_vm0 }
 0x283   : > { %vm10391_vm2 = vmmov %vm10385_vm0 }
 0x284   : > { %vm10392_vm13 = vmmov %vm10385_vm0 }
 0x286   : > { %5695 = vmatmul.mubr.bf16.vlgmr.msra.gmra.mxu0 %v10361_v20  ;;  %v10371_v20 = vld [vmem:[#allocation48_spill] sm:$0xff] }
 0x287   : > { %5698 = vmatprep.mubr.msk.bf16.mxu0 %vm10208_vm8, %v10207_v8  ;;  %5731 = vmatpush3.bf16.msra.mxu0 %v9206_v36 }
 0x288   : > { %5732 = vmatprep.subr.bf16.mxu0 %v10207_v8 }
 0x289   : > { %4850 = vmatmul.mubr.msk.bf16.vlgmr.msra.gmra.mxu1 %vm4848_vm6, %v10362_v35  ;;  %v10374_v35 = vld [vmem:[#allocation52_spill] sm:$0xff]  ;;  %vm10393_vm6 = vmmov %vm10385_vm0 }
 0x28a   : > { %3727 = vmatprep.mubr.bf16.mxu1 %v10363_v41  ;;  %5420 = vmatpush3.bf16.msra.mxu1 %v6101_v37  ;;  %v10372_v37 = vld [vmem:[#allocation37_spill] sm:$0xff]  ;;  %v10375_v41 = vld [vmem:[#allocation20_spill] sm:$0xff] }
 0x28b   : > { %5421 = vmatprep.subr.bf16.mxu1 %v6102_v32  ;;  %5733 = vmatpush3.bf16.msra.mxu0 %v9222_v61  ;;  %vm10373_vm11 = vnez %v10372_v37  ;;  %v6122_v32 = vld [vmem:[#allocation7 + $0x180] sm:$0xff]   ;;  %vm10376_vm1 = vnez %v10375_v41 }
 0x28c   : > { %5734 = vmatprep.subr.bf16.mxu0 %v10207_v8 }
 0x28e   : > { %5699 = vmatmul.mubr.bf16.gmra.mxu0 %v10364_v17  ;;  %5422 = vmatpush3.bf16.msra.mxu1 %v6103_v60  ;;  %v10377_v60 = vld [vmem:[#allocation29_spill] sm:$0xff]  ;;  %v3961_v17 = vrot.slane %v8661_v46, 2 }
 0x28f   : > { %5702 = vmatprep.mubr.msk.bf16.mxu0 %vm10208_vm8, %v10207_v8  ;;  %5423 = vmatprep.subr.bf16.mxu1 %v6104_v9  ;;  %vm10378_vm7 = vnez %v10377_v60  ;;  %v10379_v9 = vld [vmem:[#allocation57_spill] sm:$0xff] }
 0x290   : > { %5735 = vmatpush3.bf16.msra.mxu0 %v9229_v15  ;;  %vm10380_vm9 = vnez %v10379_v9 }
 0x291   : > { %4853 = vmatmul.mubr.msk.bf16.gmra.mxu1 %vm10367_vm3, %v10365_v58  ;;  %5736 = vmatprep.subr.bf16.mxu0 %v10207_v8  ;;  %v3964_v58 = vrot.slane %v8642_v33, 2  ;;  %vm10394_vm3 = vmmov %vm10385_vm0 }
 0x292   : > { %3735 = vmatprep.mubr.bf16.mxu1 %v8569_v34  ;;  %5424 = vmatpush3.bf16.msra.mxu1 %v6105_v25  ;;  %v3960_v25 = vrot.slane %v8569_v34, 2  ;;  %v10387_v34 = vld [vmem:[#allocation67_spill] sm:$0xff] }
 0x293   : > { %5425 = vmatprep.subr.bf16.mxu1 %v6106_v42 }
 0x294   : > { %5737 = vmatpush3.bf16.msra.mxu0 %v9235_v30  ;;  %v3962_v42 = vsel %vm10385_vm0, %v3960_v25, %v3961_v17 }
 0x295   : > { %5738 = vmatprep.subr.bf16.mxu0 %v10207_v8 }
 0x296   : > { %5703 = vmatmul.mubr.bf16.gmra.mxu0 %v8525_v38  ;;  %5426 = vmatpush3.bf16.msra.mxu1 %v6107_v54  ;;  %v3969_v54 = vsel %vm10388_vm10, %v3961_v17, %v3968_v45 }
 0x297   : > { %5706 = vmatprep.mubr.msk.bf16.mxu0 %vm10208_vm8, %v10207_v8  ;;  %5427 = vmatprep.subr.bf16.mxu1 %v6108_v57  ;;  %v3992_v57 = vrot.slane %v9144_v27, 2 }
 0x298   : > { %5739 = vmatpush3.bf16.msra.mxu0 %v9243_v29 }
 0x299   : > { %4856 = vmatmul.mubr.msk.bf16.gmra.mxu1 %vm10370_vm12, %v10368_v44  ;;  %5740 = vmatprep.subr.bf16.mxu0 %v10207_v8  ;;  %vm10395_vm12 = vmmov %vm10385_vm0 }
 0x29a   : > { %3743 = vmatprep.mubr.bf16.mxu1 %v8661_v46  ;;  %5428 = vmatpush3.bf16.msra.mxu1 %v6109_v53 }
 0x29b   : > { %5429 = vmatprep.subr.bf16.mxu1 %v6112_v48 }
 0x29c   : > { %5741 = vmatpush3.bf16.msra.mxu0 %v9250_v23 }
 0x29d   : > { %5742 = vmatprep.subr.bf16.mxu0 %v10207_v8 }
 0x29e   : > { %5707 = vmatmul.mubr.bf16.gmra.mxu0 %v8642_v33  ;;  %5430 = vmatpush3.bf16.msra.mxu1 %v6113_v39  ;;  %v3974_v33 = vrot.slane %v8838_v0, 2 }
 0x29f   : > { %5710 = vmatprep.mubr.msk.bf16.mxu0 %vm10208_vm8, %v10207_v8  ;;  %5431 = vmatprep.subr.bf16.mxu1 %v6116_v56 }
 0x2a0   : > { %5743 = vmatpush3.bf16.msra.mxu0 %v9258_v51 }
 0x2a1   : > { %4859 = vmatmul.mubr.msk.bf16.gmra.mxu1 %vm10373_vm11, %v10371_v20  ;;  %5744 = vmatprep.subr.bf16.mxu0 %v10207_v8  ;;  %vm10396_vm11 = vmmov %vm10385_vm0 }
 0x2a2   : > { %3751 = vmatprep.mubr.bf16.mxu1 %v8765_v28  ;;  %5432 = vmatpush3.bf16.msra.mxu1 %v6118_v63  ;;  %v10390_v28 = vld [vmem:[#allocation28_spill] sm:$0xff] }
 0x2a3   : > { %5433 = vmatprep.subr.bf16.mxu1 %v6121_v10 }
 0x2a4   : > { %5745 = vmatpush3.bf16.msra.mxu0 %v9265_v49 }
 0x2a6   : > { %5711 = vmatmul.mubr.bf16.gmra.mxu0 %v8752_v19  ;;  %5434 = vmatpush3.bf16.msra.mxu1 %v6122_v32 }
 0x2a7   : > { %5714 = vmatprep.mubr.msk.bf16.mxu0 %vm10208_vm8, %v10207_v8  ;;  %5782 = vmatprep.subr.bf16.mxu1 %v10207_v8 }
 0x2a9   : > { %4862 = vmatmul.mubr.msk.bf16.gmra.mxu1 %vm10376_vm1, %v10374_v35  ;;  %vm10397_vm1 = vmmov %vm10385_vm0 }
 0x2aa   : > { %3759 = vmatprep.mubr.bf16.mxu1 %v8838_v0 }
 0x2ae   : > { %5715 = vmatmul.mubr.bf16.gmra.mxu0 %v8824_v59 }
 0x2af   : > { %5718 = vmatprep.mubr.msk.bf16.mxu0 %vm10208_vm8, %v10207_v8 }
 0x2b1   : > { %4865 = vmatmul.mubr.msk.bf16.gmra.mxu1 %vm10378_vm7, %v8683_v2  ;;  %v10381_v2 = vld [vmem:[#allocation55_spill] sm:$0xff]  ;;  %vm10398_vm7 = vmmov %vm10385_vm0 }
 0x2b2   : > { %3767 = vmatprep.mubr.bf16.mxu1 %v8944_v22  ;;  %vm10382_vm5 = vnez %v10381_v2 }
 0x2b6   : > { %5719 = vmatmul.mubr.bf16.gmra.mxu0 %v8922_v62 }
 0x2b7   : > { %5722 = vmatprep.mubr.msk.bf16.mxu0 %vm10208_vm8, %v10207_v8 }
 0x2b9   : > { %4868 = vmatmul.mubr.msk.bf16.gmra.mxu1 %vm10380_vm9, %v8779_v40  ;;  %v10383_v40 = vld [vmem:[#allocation58_spill] sm:$0xff]  ;;  %vm10399_vm9 = vmmov %vm10385_vm0 }
 0x2ba   : > { %3775 = vmatprep.mubr.bf16.mxu1 %v9052_v1  ;;  %vm10384_vm14 = vnez %v10383_v40 }
 0x2be   : > { %5723 = vmatmul.mubr.bf16.gmra.mxu0 %v9031_v7 }
 0x2bf   : > { %5726 = vmatprep.mubr.msk.bf16.mxu0 %vm10208_vm8, %v10207_v8 }
 0x2c1   : > { %4871 = vmatmul.mubr.msk.bf16.gmra.mxu1 %vm10382_vm5, %v8855_v21  ;;  %v3963_v21 = vrot.slane %v8525_v38, 2  ;;  %vm10400_vm5 = vmmov %vm10385_vm0 }
 0x2c2   : > { %3783 = vmatprep.mubr.bf16.mxu1 %v9144_v27  ;;  %v3999_v27 = vsel %vm10399_vm9, %v3992_v57, %v3998_v31 }
 0x2c3   : > { %v3965_v46 = vsel %vm10386_vm15, %v3963_v21, %v3964_v58 }
 0x2c6   : > { %5727 = vmatmul.mubr.bf16.gmra.mxu0 %v9121_v3 }
 0x2c7   : > { %5746 = vmatprep.mubr.msk.bf16.mxu0 %vm10208_vm8, %v10207_v8 }
 0x2c9   : > { %4874 = vmatmul.mubr.msk.bf16.gmra.mxu1 %vm10384_vm14, %v8965_v43  ;;  %v3970_v43 = vrot.slane %v8752_v19, 2  ;;  %v3975_v19 = vsel %vm10391_vm2, %v3968_v45, %v3974_v33 }
 0x2ca   : > { %4217 = vmatprep.mubr.bf16.mxu1 %v3962_v42 }
 0x2cb   : > { %v3971_v38 = vsel %vm10389_vm4, %v3964_v58, %v3970_v43 }
 0x2ce   : > { %5747 = vmatmul.mubr.bf16.vlgmr.msra.gmra.mxu0 %v3965_v46 }
 0x2cf   : > { %5750 = vmatprep.mubr.msk.bf16.mxu0 %vm10208_vm8, %v10207_v8 }
 0x2d1   : > { %4218 = vmatmul.mubr.bf16.vlgmr.msra.gmra.mxu1 %v10387_v34 }
 0x2d2   : > { %4225 = vmatprep.mubr.bf16.mxu1 %v3969_v54  ;;  %5790 = vmatpush3.bf16.msra.mxu1 %v9206_v36  ;;  %v3976_v36 = vrot.slane %v8824_v59, 2 }
 0x2d3   : > { %5783 = vmatprep.subr.bf16.mxu1 %v10207_v8 }
 0x2d4   : > { %v3977_v0 = vsel %vm10392_vm13, %v3970_v43, %v3976_v36 }
 0x2d6   : > { %5751 = vmatmul.mubr.bf16.gmra.mxu0 %v3971_v38  ;;  %5791 = vmatpush3.bf16.msra.mxu1 %v9222_v61  ;;  %v3980_v61 = vrot.slane %v8944_v22, 2 }
 0x2d7   : > { %5754 = vmatprep.mubr.msk.bf16.mxu0 %vm10208_vm8, %v10207_v8  ;;  %5784 = vmatprep.subr.bf16.mxu1 %v10207_v8 }
 0x2d8   : > { %v3981_v59 = vsel %vm10393_vm6, %v3974_v33, %v3980_v61 }
 0x2d9   : > { %4226 = vmatmul.mubr.bf16.gmra.mxu1 %v10390_v28 }
 0x2da   : > { %4233 = vmatprep.mubr.bf16.mxu1 %v3975_v19  ;;  %5792 = vmatpush3.bf16.msra.mxu1 %v9229_v15  ;;  %v3982_v15 = vrot.slane %v8922_v62, 2  ;;  %v3988_v62 = vrot.slane %v9031_v7, 2  ;;  %v3994_v7 = vrot.slane %v9121_v3, 2 }
 0x2db   : > { %5785 = vmatprep.subr.bf16.mxu1 %v10207_v8 }
 0x2dc   : > { %v3983_v22 = vsel %vm10394_vm3, %v3976_v36, %v3982_v15 }
 0x2de   : > { %5755 = vmatmul.mubr.bf16.gmra.mxu0 %v3977_v0  ;;  %5793 = vmatpush3.bf16.msra.mxu1 %v9235_v30  ;;  %v3986_v30 = vrot.slane %v9052_v1, 2  ;;  %v3989_v1 = vsel %vm10396_vm11, %v3982_v15, %v3988_v62 }
 0x2df   : > { %5758 = vmatprep.mubr.msk.bf16.mxu0 %vm10208_vm8, %v10207_v8  ;;  %5786 = vmatprep.subr.bf16.mxu1 %v10207_v8 }
 0x2e1   : > { %4234 = vmatmul.mubr.bf16.gmra.mxu1 %v8772_v55  ;;  %v3987_v55 = vsel %vm10395_vm12, %v3980_v61, %v3986_v30 }
 0x2e2   : > { %4241 = vmatprep.mubr.bf16.mxu1 %v3981_v59  ;;  %5794 = vmatpush3.bf16.msra.mxu1 %v9243_v29  ;;  %v3995_v29 = vsel %vm10398_vm7, %v3988_v62, %v3994_v7 }
 0x2e3   : > { %5787 = vmatprep.subr.bf16.mxu1 %v10207_v8 }
 0x2e6   : > { %5759 = vmatmul.mubr.bf16.gmra.mxu0 %v3983_v22  ;;  %5795 = vmatpush3.bf16.msra.mxu1 %v9250_v23 }
 0x2e7   : > { %5762 = vmatprep.mubr.msk.bf16.mxu0 %vm10208_vm8, %v10207_v8  ;;  %5788 = vmatprep.subr.bf16.mxu1 %v10207_v8 }
 0x2e9   : > { %4242 = vmatmul.mubr.bf16.gmra.mxu1 %v8848_v11  ;;  %v3993_v11 = vsel %vm10397_vm1, %v3986_v30, %v3992_v57 }
 0x2ea   : > { %4249 = vmatprep.mubr.bf16.mxu1 %v3987_v55  ;;  %5796 = vmatpush3.bf16.msra.mxu1 %v9258_v51 }
 0x2eb   : > { %5789 = vmatprep.subr.bf16.mxu1 %v10207_v8 }
 0x2ee   : > { %5763 = vmatmul.mubr.bf16.gmra.mxu0 %v3989_v1  ;;  %5797 = vmatpush3.bf16.msra.mxu1 %v9265_v49 }
 0x2ef   : > { %5766 = vmatprep.mubr.msk.bf16.mxu0 %vm10208_vm8, %v10207_v8  ;;  %v3472_v53 = vpop.f32.mrf.mxu0 }
 0x2f1   : > { %4250 = vmatmul.mubr.bf16.gmra.mxu1 %v8958_v13  ;;  %v5644_v48 = vpop.f32.mrf.mxu0 }
 0x2f2   : > { %4257 = vmatprep.mubr.bf16.mxu1 %v3993_v11 }
 0x2f3   : > { %v5261_v23 = vpop.f32.mrf.mxu1  ;;  %v3475_v13 = vpop.f32.mrf.mxu0 }
 0x2f5   : > { %v5262_v3 = vpop.f32.mrf.mxu1  ;;  %v5645_v18 = vpop.f32.mrf.mxu0 }
 0x2f6   : > { %5767 = vmatmul.mubr.bf16.gmra.mxu0 %v3995_v29  ;;  %v5263_v44 = vadd.f32 %v5262_v3, %v5261_v23 }
 0x2f7   : > { %v5264_v39 = vpop.f32.mrf.mxu1 }
 0x2f8   : > { %v9370_v56 = vadd.f32 %v5263_v44, %v3472_v53 }
 0x2f9   : > { %4258 = vmatmul.mubr.bf16.gmra.mxu1 %v9057_v47  ;;  %v5265_v51 = vpop.f32.mrf.mxu1 }
 0x2fa   : > { %4265 = vmatprep.mubr.bf16.mxu1 %v3999_v27  ;;  %v5266_v6 = vadd.f32 %v5265_v51, %v5264_v39 }
 0x2fc   : > { %v3480_v47 = vpop.f32.mrf.mxu0  ;;  %v9373_v10 = vadd.f32 %v5266_v6, %v3475_v13 }
 0x2fe   : > { %v5648_v63 = vpop.f32.mrf.mxu0 }
 0x300   : > { %v5267_v31 = vpop.f32.mrf.mxu1  ;;  %v3483_v49 = vpop.f32.mrf.mxu0 }
 0x301   : > { %4266 = vmatmul.mubr.bf16.gmra.mxu1 %v9147_v26 }
 0x302   : > { %4273 = vmatprep.mubr.bf16.mxu1 %v9189_v4  ;;  %v5268_v26 = vpop.f32.mrf.mxu1  ;;  %v5649_v20 = vpop.f32.mrf.mxu0 }
 0x303   : > { %v5269_v4 = vadd.f32 %v5268_v26, %v5267_v31 }
 0x304   : > { %v5270_v37 = vpop.f32.mrf.mxu1 }
 0x305   : > { %v9376_v32 = vadd.f32 %v5269_v4, %v3480_v47 }
 0x306   : > { %v5271_v41 = vpop.f32.mrf.mxu1 }
 0x307   : > { %v3488_v35 = vpop.f32.mrf.mxu0  ;;  %v5272_v60 = vadd.f32 %v5271_v41, %v5270_v37 }
 0x309   : > { %4274 = vmatmul.mubr.bf16.gmra.mxu1 %v9166_v52  ;;  %v5652_v9 = vpop.f32.mrf.mxu0  ;;  %v9379_v17 = vadd.f32 %v5272_v60, %v3483_v49 }
 0x30a   : > { %4281 = vmatprep.mubr.bf16.mxu1 %v9192_v14 }
 0x30b   : > { %v5273_v2 = vpop.f32.mrf.mxu1  ;;  %v3491_v52 = vpop.f32.mrf.mxu0 }
 0x30d   : > { %v5274_v14 = vpop.f32.mrf.mxu1  ;;  %v5653_v40 = vpop.f32.mrf.mxu0 }
 0x30e   : > { %v5275_v25 = vadd.f32 %v5274_v14, %v5273_v2 }
 0x30f   : > { %v5276_v42 = vpop.f32.mrf.mxu1 }
 0x310   : > { %v9383_v58 = vadd.f32 %v5275_v25, %v3488_v35 }
 0x311   : > { %4282 = vmatmul.mubr.bf16.gmra.mxu1 %v9181_v24  ;;  %v5277_v46 = vpop.f32.mrf.mxu1  ;;  %v4001_v24 = vsel %vm10400_vm5, %v3994_v7, %v4000_v12 }
 0x312   : > { %5770 = vmatprep.mubr.msk.bf16.mxu1 %vm10208_vm8, %v10207_v8  ;;  %v3496_v21 = vpop.f32.mrf.mxu0  ;;  %v5278_v45 = vadd.f32 %v5277_v46, %v5276_v42 }
 0x314   : > { %v5656_v34 = vpop.f32.mrf.mxu0  ;;  %v9388_v43 = vadd.f32 %v5278_v45, %v3491_v52 }
 0x316   : > { %v3499_v38 = vpop.f32.mrf.mxu0 }
 0x317   : > { %v5279_v54 = vpop.f32.mrf.mxu1 }
 0x318   : > { %v5657_v19 = vpop.f32.mrf.mxu0 }
 0x319   : > { %5771 = vmatmul.mubr.bf16.vlgmr.msra.gmra.mxu1 %v4001_v24  ;;  %v5280_v33 = vpop.f32.mrf.mxu1 }
 0x31a   : > { %5774 = vmatprep.mubr.msk.bf16.mxu1 %vm10208_vm8, %v10207_v8  ;;  %v5281_v28 = vadd.f32 %v5280_v33, %v5279_v54 }
 0x31b   : > { %v5282_v36 = vpop.f32.mrf.mxu1 }
 0x31c   : > { %v9392_v0 = vadd.f32 %v5281_v28, %v3496_v21 }
 0x31d   : > { %v3504_v61 = vpop.f32.mrf.mxu0  ;;  %v5283_v59 = vpop.f32.mrf.mxu1 }
 0x31e   : > { %v5284_v15 = vadd.f32 %v5283_v59, %v5282_v36 }
 0x31f   : > { %v5660_v16 = vpop.f32.mrf.mxu0  ;;  %v5285_v22 = vpop.f32.mrf.mxu1 }
 0x320   : > { %v9395_v12 = vadd.f32 %v5284_v15, %v3499_v38 }
 0x321   : > { %5775 = vmatmul.mubr.bf16.gmra.mxu1 %v9197_v50  ;;  %v3507_v30 = vpop.f32.mrf.mxu0  ;;  %v5286_v55 = vpop.f32.mrf.mxu1 }
 0x322   : > { %5778 = vmatprep.mubr.msk.bf16.mxu1 %vm10208_vm8, %v10207_v8  ;;  %v5287_v62 = vadd.f32 %v5286_v55, %v5285_v22 }
 0x323   : > { %v5661_v1 = vpop.f32.mrf.mxu0  ;;  %v5288_v57 = vpop.f32.mrf.mxu1 }
 0x324   : > { %v9399_v11 = vadd.f32 %v5287_v62, %v3504_v61 }
 0x325   : > { %v5289_v29 = vpop.f32.mrf.mxu1 }
 0x326   : > { %v3512_v7 = vpop.f32.mrf.mxu0  ;;  %v5290_v27 = vadd.f32 %v5289_v29, %v5288_v57 }
 0x328   : > { %v5664_v53 = vpop.f32.mrf.mxu0  ;;  %v9402_v50 = vadd.f32 %v5290_v27, %v3507_v30 }
 0x329   : > { %v5291_v48 = vpop.f32.mrf.mxu1  ;;  %5779 = vmatmul.mubr.bf16.gmra.mxu1 %v9200_v5 }
 0x32a   : > { %v3515_v23 = vpop.f32.mrf.mxu0 }
 0x32b   : > { %v5292_v13 = vpop.f32.mrf.mxu1 }
 0x32c   : > { %v5293_v3 = vadd.f32 %v5292_v13, %v5291_v48  ;;  %v5665_v44 = vpop.f32.mrf.mxu0 }
 0x32d   : > { %v5294_v8 = vpop.f32.mrf.mxu1 }
 0x32e   : > { %v9404_v18 = vadd.f32 %v5293_v3, %v3512_v7  ;;  %v3520_v39 = vpop.f32.mrf.mxu0 }
 0x32f   : > { %v5295_v47 = vpop.f32.mrf.mxu1 }
 0x330   : > { %v5296_v51 = vadd.f32 %v5295_v47, %v5294_v8  ;;  %v5668_v6 = vpop.f32.mrf.mxu0 }
 0x331   : > { %v5297_v63 = vpop.f32.mrf.mxu1 }
 0x332   : > { %v9406_v31 = vadd.f32 %v5296_v51, %v3515_v23  ;;  %v3523_v49 = vpop.f32.mrf.mxu0 }
 0x333   : > { %v5298_v26 = vpop.f32.mrf.mxu1 }
 0x334   : > { %v5299_v4 = vadd.f32 %v5298_v26, %v5297_v63  ;;  %v5669_v5 = vpop.f32.mrf.mxu0 }
 0x335   : > { %v5300_v20 = vpop.f32.mrf.mxu1 }
 0x336   : > { %v9408_v37 = vadd.f32 %v5299_v4, %v3520_v39  ;;  %v3528_v35 = vpop.f32.mrf.mxu0 }
 0x337   : > { %v5301_v41 = vpop.f32.mrf.mxu1 }
 0x338   : > { %v5302_v60 = vadd.f32 %v5301_v41, %v5300_v20  ;;  %v5672_v9 = vpop.f32.mrf.mxu0 }
 0x339   : > { %v5303_v2 = vpop.f32.mrf.mxu1 }
 0x33a   : > { %v9410_v52 = vadd.f32 %v5302_v60, %v3523_v49  ;;  %v3531_v14 = vpop.f32.mrf.mxu0 }
 0x33b   : > { %v5304_v25 = vpop.f32.mrf.mxu1 }
 0x33c   : > { %v5305_v40 = vadd.f32 %v5304_v25, %v5303_v2  ;;  %v5673_v42 = vpop.f32.mrf.mxu0 }
 0x33d   : > { %v5306_v21 = vpop.f32.mrf.mxu1 }
 0x33e   : > { %v9412_v46 = vadd.f32 %v5305_v40, %v3528_v35  ;;  %v3536_v45 = vpop.f32.mrf.mxu0 }
 0x33f   : > { %v5307_v34 = vpop.f32.mrf.mxu1 }
 0x340   : > { %v5308_v24 = vadd.f32 %v5307_v34, %v5306_v21  ;;  %v5676_v54 = vpop.f32.mrf.mxu0 }
 0x341   : > { %v5309_v38 = vpop.f32.mrf.mxu1 }
 0x342   : > { %v9414_v33 = vadd.f32 %v5308_v24, %v3531_v14  ;;  %v3539_v28 = vpop.f32.mrf.mxu0 }
 0x343   : > { %v5310_v19 = vpop.f32.mrf.mxu1 }
 0x344   : > { %v5311_v36 = vadd.f32 %v5310_v19, %v5309_v38  ;;  %v5677_v61 = vpop.f32.mrf.mxu0 }
 0x345   : > { %v5312_v59 = vpop.f32.mrf.mxu1 }
 0x346   : > { %v9416_v15 = vadd.f32 %v5311_v36, %v3536_v45  ;;  %v3826_v16 = vpop.f32.mrf.mxu0 }
 0x347   : > { %v5313_v22 = vpop.f32.mrf.mxu1 }
 0x348   : > { %v5314_v30 = vadd.f32 %v5313_v22, %v5312_v59  ;;  %v5696_v55 = vpop.f32.mrf.mxu0 }
 0x349   : > { %v5348_v62 = vpop.f32.mrf.mxu1 }
 0x34a   : > { %v9418_v1 = vadd.f32 %v5314_v30, %v3539_v28  ;;  %v3829_v57 = vpop.f32.mrf.mxu0 }
 0x34b   : > { %v5349_v7 = vpop.f32.mrf.mxu1 }
 0x34c   : > { %v5350_v29 = vadd.f32 %v5349_v7, %v5348_v62  ;;  %v5697_v27 = vpop.f32.mrf.mxu0 }
 0x34d   : > { %v5351_v53 = vpop.f32.mrf.mxu1 }
 0x34e   : > { %v3722_v48 = vadd.f32 %v5350_v29, %v9370_v56  ;;  %v3834_v23 = vpop.f32.mrf.mxu0 }
 0x34f   : > { %v5352_v13 = vpop.f32.mrf.mxu1 }
 0x350   : > { %v9421_v3 = vadd.f32 %v3826_v16, %v3722_v48  ;;  %v5353_v44 = vadd.f32 %v5352_v13, %v5351_v53  ;;  %v5700_v8 = vpop.f32.mrf.mxu0 }
 0x351   : > { %v5354_v39 = vpop.f32.mrf.mxu1 }
 0x352   : > { %v3725_v47 = vadd.f32 %v5353_v44, %v9373_v10  ;;  %v3837_v51 = vpop.f32.mrf.mxu0 }
 0x353   : > { %v5355_v6 = vpop.f32.mrf.mxu1 }
 0x354   : > { %v9424_v63 = vadd.f32 %v3829_v57, %v3725_v47  ;;  %v5356_v49 = vadd.f32 %v5355_v6, %v5354_v39  ;;  %v5701_v26 = vpop.f32.mrf.mxu0 }
 0x355   : > { %v5357_v4 = vpop.f32.mrf.mxu1 }
 0x356   : > { %v3730_v5 = vadd.f32 %v5356_v49, %v9376_v32  ;;  %v3842_v20 = vpop.f32.mrf.mxu0 }
 0x357   : > { %v5358_v56 = vpop.f32.mrf.mxu1 }
 0x358   : > { %v9427_v35 = vadd.f32 %v3834_v23, %v3730_v5  ;;  %v5359_v41 = vadd.f32 %v5358_v56, %v5357_v4  ;;  %v5704_v60 = vpop.f32.mrf.mxu0 }
 0x359   : > { %v5360_v9 = vpop.f32.mrf.mxu1 }
 0x35a   : > { %v3733_v2 = vadd.f32 %v5359_v41, %v9379_v17  ;;  %v3845_v14 = vpop.f32.mrf.mxu0 }
 0x35b   : > { %v5361_v10 = vpop.f32.mrf.mxu1 }
 0x35c   : > { %v9430_v25 = vadd.f32 %v3837_v51, %v3733_v2  ;;  %v5362_v40 = vadd.f32 %v5361_v10, %v5360_v9  ;;  %v5705_v42 = vpop.f32.mrf.mxu0 }
 0x35d   : > { %v5363_v21 = vpop.f32.mrf.mxu1 }
 0x35e   : > { %v3738_v45 = vadd.f32 %v5362_v40, %v9383_v58  ;;  %v3850_v34 = vpop.f32.mrf.mxu0 }
 0x35f   : > { %v5364_v32 = vpop.f32.mrf.mxu1 }
 0x360   : > { %v9433_v24 = vadd.f32 %v3842_v20, %v3738_v45  ;;  %v5365_v54 = vadd.f32 %v5364_v32, %v5363_v21  ;;  %v5708_v38 = vpop.f32.mrf.mxu0 }
 0x361   : > { %v5366_v28 = vpop.f32.mrf.mxu1 }
 0x362   : > { %v3741_v19 = vadd.f32 %v5365_v54, %v9388_v43  ;;  %v3853_v36 = vpop.f32.mrf.mxu0 }
 0x363   : > { %v5367_v17 = vpop.f32.mrf.mxu1 }
 0x364   : > { %v9436_v61 = vadd.f32 %v3845_v14, %v3741_v19  ;;  %v5368_v59 = vadd.f32 %v5367_v17, %v5366_v28  ;;  %v5709_v16 = vpop.f32.mrf.mxu0 }
 0x365   : > { %v5369_v22 = vpop.f32.mrf.mxu1 }
 0x366   : > { %v3746_v30 = vadd.f32 %v5368_v59, %v9392_v0  ;;  %v3858_v55 = vpop.f32.mrf.mxu0 }
 0x367   : > { %v5370_v58 = vpop.f32.mrf.mxu1 }
 0x368   : > { %v9439_v62 = vadd.f32 %v3850_v34, %v3746_v30  ;;  %v5371_v57 = vadd.f32 %v5370_v58, %v5369_v22  ;;  %v5712_v7 = vpop.f32.mrf.mxu0 }
 0x369   : > { %v5372_v29 = vpop.f32.mrf.mxu1 }
 0x36a   : > { %v3749_v27 = vadd.f32 %v5371_v57, %v9395_v12  ;;  %v3861_v53 = vpop.f32.mrf.mxu0 }
 0x36b   : > { %v5373_v43 = vpop.f32.mrf.mxu1 }
 0x36c   : > { %v9442_v48 = vadd.f32 %v3853_v36, %v3749_v27  ;;  %v5374_v23 = vadd.f32 %v5373_v43, %v5372_v29  ;;  %v5713_v13 = vpop.f32.mrf.mxu0 }
 0x36d   : > { %v5375_v44 = vpop.f32.mrf.mxu1 }
 0x36e   : > { %v3754_v8 = vadd.f32 %v5374_v23, %v9399_v11  ;;  %v3866_v39 = vpop.f32.mrf.mxu0 }
 0x36f   : > { %v5376_v0 = vpop.f32.mrf.mxu1 }
 0x370   : > { %v9445_v47 = vadd.f32 %v3858_v55, %v3754_v8  ;;  %v5377_v51 = vadd.f32 %v5376_v0, %v5375_v44  ;;  %v5716_v6 = vpop.f32.mrf.mxu0 }
 0x371   : > { %v5378_v49 = vpop.f32.mrf.mxu1 }
 0x372   : > { %v3757_v26 = vadd.f32 %v5377_v51, %v9402_v50  ;;  %v3869_v4 = vpop.f32.mrf.mxu0 }
 0x373   : > { %v5379_v12 = vpop.f32.mrf.mxu1 }
 0x374   : > { %v9448_v5 = vadd.f32 %v3861_v53, %v3757_v26  ;;  %v5380_v20 = vadd.f32 %v5379_v12, %v5378_v49  ;;  %v5717_v56 = vpop.f32.mrf.mxu0 }
 0x375   : > { %v5381_v41 = vpop.f32.mrf.mxu1 }
 0x376   : > { %v3762_v60 = vadd.f32 %v5380_v20, %v9404_v18  ;;  %v3874_v9 = vpop.f32.mrf.mxu0 }
 0x377   : > { %v5382_v11 = vpop.f32.mrf.mxu1 }
 0x378   : > { %v9451_v2 = vadd.f32 %v3866_v39, %v3762_v60  ;;  %v5383_v14 = vadd.f32 %v5382_v11, %v5381_v41  ;;  %v5720_v10 = vpop.f32.mrf.mxu0 }
 0x379   : > { %v5384_v40 = vpop.f32.mrf.mxu1 }
 0x37a   : > { %v3765_v42 = vadd.f32 %v5383_v14, %v9406_v31  ;;  %v3877_v21 = vpop.f32.mrf.mxu0 }
 0x37b   : > { %v5385_v50 = vpop.f32.mrf.mxu1 }
 0x37c   : > { %v9454_v45 = vadd.f32 %v3869_v4, %v3765_v42  ;;  %v5386_v34 = vadd.f32 %v5385_v50, %v5384_v40  ;;  %v5721_v32 = vpop.f32.mrf.mxu0  ;;  %v9478_v40 = vld [vmem:[%s9632_s4] ss:$0 sm:$0xff] }
 0x37d   : > { %v5387_v54 = vpop.f32.mrf.mxu1 }
 0x37e   : > { %v3770_v38 = vadd.f32 %v5386_v34, %v9408_v37  ;;  %v3882_v28 = vpop.f32.mrf.mxu0  ;;  %v4899_v34 = vld [vmem:[%s6551_s25 + $0x26] sm:$0xff] }
 0x37f   : > { %v5388_v18 = vpop.f32.mrf.mxu1 }
 0x380   : > { %v5389_v19 = vadd.f32 %v5388_v18, %v5387_v54  ;;  %v5724_v36 = vpop.f32.mrf.mxu0  ;;  %v9457_v17 = vadd.f32 %v3874_v9, %v3770_v38 }
 0x381   : > { %v5390_v59 = vpop.f32.mrf.mxu1 }
 0x382   : > { %v3773_v16 = vadd.f32 %v5389_v19, %v9410_v52  ;;  %v3885_v22 = vpop.f32.mrf.mxu0 }
 0x383   : > { %v5391_v31 = vpop.f32.mrf.mxu1 }
 0x384   : > { %v5392_v30 = vadd.f32 %v5391_v31, %v5390_v59  ;;  %v5725_v55 = vpop.f32.mrf.mxu0  ;;  %v9460_v58 = vadd.f32 %v3877_v21, %v3773_v16 }
 0x385   : > { %v5393_v57 = vpop.f32.mrf.mxu1 }
 0x386   : > { %v3778_v7 = vadd.f32 %v5392_v30, %v9412_v46  ;;  %v3890_v29 = vpop.f32.mrf.mxu0 }
 0x387   : > { %v5394_v37 = vpop.f32.mrf.mxu1 }
 0x388   : > { %v5395_v27 = vadd.f32 %v5394_v37, %v5393_v57  ;;  %v5728_v53 = vpop.f32.mrf.mxu0  ;;  %v9463_v43 = vadd.f32 %v3882_v28, %v3778_v7 }
 0x389   : > { %v5396_v23 = vpop.f32.mrf.mxu1  ;;  %v4901_v53 = vld [vmem:[%s6551_s25 + $0x36] sm:$0xff] }
 0x38a   : > { %v3781_v13 = vadd.f32 %v5395_v27, %v9414_v33  ;;  %v3893_v44 = vpop.f32.mrf.mxu0 }
 0x38b   : > { %v5397_v52 = vpop.f32.mrf.mxu1 }
 0x38c   : > { %v5398_v8 = vadd.f32 %v5397_v52, %v5396_v23  ;;  %v5729_v39 = vpop.f32.mrf.mxu0  ;;  %v9466_v0 = vadd.f32 %v3885_v22, %v3781_v13  ;;  %v4900_v22 = vld [vmem:[%s6551_s25 + $0x2e] sm:$0xff] }
 0x38d   : > { %v5399_v51 = vpop.f32.mrf.mxu1 }
 0x38e   : > { %v3786_v6 = vadd.f32 %v5398_v8, %v9416_v15  ;;  %v4324_v46 = vpop.f32.mrf.mxu0 }
 0x38f   : > { %v5400_v49 = vpop.f32.mrf.mxu1 }
 0x390   : > { %v5401_v26 = vadd.f32 %v5400_v49, %v5399_v51  ;;  %v5748_v4 = vpop.f32.mrf.mxu0  ;;  %v9469_v12 = vadd.f32 %v3890_v29, %v3786_v6 }
 0x391   : > { %v5435_v20 = vpop.f32.mrf.mxu1 }
 0x392   : > { %v3789_v33 = vadd.f32 %v5401_v26, %v9418_v1  ;;  %v4327_v56 = vpop.f32.mrf.mxu0  ;;  %v4902_v26 = vld [vmem:[%s6551_s25 + $0x3e] sm:$0xff] }
 0x393   : > { %v5436_v41 = vpop.f32.mrf.mxu1 }
 0x394   : > { %v5437_v60 = vadd.f32 %v5436_v41, %v5435_v20  ;;  %v5749_v9 = vpop.f32.mrf.mxu0  ;;  %v9472_v11 = vadd.f32 %v3893_v44, %v3789_v33 }
 0x395   : > { %v5438_v14 = vpop.f32.mrf.mxu1 }
 0x396   : > { %v4325_v15 = vadd.f32 %v5437_v60, %v4324_v46  ;;  %v4332_v10 = vpop.f32.mrf.mxu0 }
 0x397   : > { %v5439_v42 = vpop.f32.mrf.mxu1 }
 0x398   : > { %v4395_v1 = vadd.f32 %v4325_v15, %v9421_v3  ;;  %v5440_v21 = vadd.f32 %v5439_v42, %v5438_v14  ;;  %v5752_v50 = vpop.f32.mrf.mxu0 }
 0x399   : > { %v5441_v32 = vpop.f32.mrf.mxu1 }
 0x39a   : > { %v4440_v54 = vadd.f32 %v9478_v40, %v4395_v1  ;;  %v4328_v38 = vadd.f32 %v5440_v21, %v4327_v56  ;;  %v4335_v28 = vpop.f32.mrf.mxu0 }
 0x39b   : > { %v5442_v18 = vpop.f32.mrf.mxu1 }
 0x39c   : > { %v4458_v19 = vadd.f32 %v4899_v34, %v4440_v54  ;;  %v4396_v36 = vadd.f32 %v4328_v38, %v9424_v63  ;;  %v5443_v59 = vadd.f32 %v5442_v18, %v5441_v32  ;;  %v5753_v16 = vpop.f32.mrf.mxu0  ;;  %v4904_v18 = vld [vmem:[%s6551_s25 + $0x4e] sm:$0xff] }
 0x39d   : > { %v5444_v31 = vpop.f32.mrf.mxu1 }
 0x39e   : > { %v4476_v3 = vmax.f32 %v4458_v19, 0.0  ;;  %v4441_v30 = vadd.f32 %v9478_v40, %v4396_v36  ;;  %v4333_v55 = vadd.f32 %v5443_v59, %v4332_v10  ;;  %v4340_v57 = vpop.f32.mrf.mxu0  ;;  %v4903_v10 = vld [vmem:[%s6551_s25 + $0x46] sm:$0xff] }
 0x39f   : > { %v5445_v7 = vpop.f32.mrf.mxu1 }
 0x3a0   : > { %4494 = vst [vmem:[%s9488_s14] sm:$0xff] %v4476_v3  ;;  %v4459_v29 = vadd.f32 %v4900_v22, %v4441_v30  ;;  %v4397_v63 = vadd.f32 %v4333_v55, %v9427_v35  ;;  %v5446_v37 = vadd.f32 %v5445_v7, %v5444_v31  ;;  %v5756_v27 = vpop.f32.mrf.mxu0 }
 0x3a1   : > { %v5447_v23 = vpop.f32.mrf.mxu1 }
 0x3a2   : > { %v4477_v13 = vmax.f32 %v4459_v29, 0.0  ;;  %v4442_v44 = vadd.f32 %v9478_v40, %v4397_v63  ;;  %v4336_v52 = vadd.f32 %v5446_v37, %v4335_v28  ;;  %v4343_v8 = vpop.f32.mrf.mxu0 }
 0x3a3   : > { %v5448_v39 = vpop.f32.mrf.mxu1 }
 0x3a4   : > { %4495 = vst [vmem:[%s9488_s14 + $0x8] sm:$0xff] %v4477_v13  ;;  %v4460_v51 = vadd.f32 %v4901_v53, %v4442_v44  ;;  %v4398_v6 = vadd.f32 %v4336_v52, %v9430_v25  ;;  %v5449_v46 = vadd.f32 %v5448_v39, %v5447_v23  ;;  %v5757_v49 = vpop.f32.mrf.mxu0  ;;  %v4906_v52 = vld [vmem:[%s6551_s25 + $0x5e] sm:$0xff] }
 0x3a5   : > { %v5450_v35 = vpop.f32.mrf.mxu1 }
 0x3a6   : > { %v4478_v4 = vmax.f32 %v4460_v51, 0.0  ;;  %v4443_v20 = vadd.f32 %v9478_v40, %v4398_v6  ;;  %v4341_v33 = vadd.f32 %v5449_v46, %v4340_v57  ;;  %v4348_v56 = vpop.f32.mrf.mxu0  ;;  %v4905_v57 = vld [vmem:[%s6551_s25 + $0x56] sm:$0xff] }
 0x3a7   : > { %v5451_v41 = vpop.f32.mrf.mxu1 }
 0x3a8   : > { %4496 = vst [vmem:[%s9488_s14 + $0x10] sm:$0xff] %v4478_v4  ;;  %v4461_v60 = vadd.f32 %v4902_v26, %v4443_v20  ;;  %v4399_v9 = vadd.f32 %v4341_v33, %v9433_v24  ;;  %v5452_v14 = vadd.f32 %v5451_v41, %v5450_v35  ;;  %v5760_v15 = vpop.f32.mrf.mxu0  ;;  %v4907_v20 = vld [vmem:[%s6551_s25 + $0x66] sm:$0xff] }
 0x3a9   : > { %v5453_v25 = vpop.f32.mrf.mxu1 }
 0x3aa   : > { %v4479_v42 = vmax.f32 %v4461_v60, 0.0  ;;  %v4444_v1 = vadd.f32 %v9478_v40, %v4399_v9  ;;  %v4344_v21 = vadd.f32 %v5452_v14, %v4343_v8  ;;  %v4351_v50 = vpop.f32.mrf.mxu0 }
 0x3ab   : > { %v5454_v34 = vpop.f32.mrf.mxu1 }
 0x3ac   : > { %4497 = vst [vmem:[%s9488_s14 + $0x18] sm:$0xff] %v4479_v42  ;;  %v4462_v32 = vadd.f32 %v4903_v10, %v4444_v1  ;;  %v4400_v54 = vadd.f32 %v4344_v21, %v9436_v61  ;;  %v5455_v38 = vadd.f32 %v5454_v34, %v5453_v25  ;;  %v5761_v28 = vpop.f32.mrf.mxu0  ;;  %v4908_v42 = vld [vmem:[%s6551_s25 + $0x6e] sm:$0xff] }
 0x3ad   : > { %v5456_v24 = vpop.f32.mrf.mxu1  ;;  %v4909_v28 = vld [vmem:[%s6551_s25 + $0x76] sm:$0xff] }
 0x3ae   : > { %v4480_v19 = vmax.f32 %v4462_v32, 0.0  ;;  %v4445_v36 = vadd.f32 %v9478_v40, %v4400_v54  ;;  %v4349_v59 = vadd.f32 %v5455_v38, %v4348_v56  ;;  %v4356_v16 = vpop.f32.mrf.mxu0 }
 0x3af   : > { %v5457_v22 = vpop.f32.mrf.mxu1 }
 0x3b0   : > { %4498 = vst [vmem:[%s9488_s14 + $0x20] sm:$0xff] %v4480_v19  ;;  %v4463_v31 = vadd.f32 %v4904_v18, %v4445_v36  ;;  %v4401_v3 = vadd.f32 %v4349_v59, %v9439_v62  ;;  %v5458_v30 = vadd.f32 %v5457_v22, %v5456_v24  ;;  %v5764_v55 = vpop.f32.mrf.mxu0  ;;  %v4910_v22 = vld [vmem:[%s6551_s25 + $0x7e] sm:$0xff] }
 0x3b1   : > { %v5459_v61 = vpop.f32.mrf.mxu1 }
 0x3b2   : > { %v4481_v7 = vmax.f32 %v4463_v31, 0.0  ;;  %v4446_v29 = vadd.f32 %v9478_v40, %v4401_v3  ;;  %v4352_v63 = vadd.f32 %v5458_v30, %v4351_v50  ;;  %v4359_v37 = vpop.f32.mrf.mxu0 }
 0x3b3   : > { %v5460_v27 = vpop.f32.mrf.mxu1 }
 0x3b4   : > { %4499 = vst [vmem:[%s9488_s14 + $0x28] sm:$0xff] %v4481_v7  ;;  %v4464_v53 = vadd.f32 %v4905_v57, %v4446_v29  ;;  %v4402_v23 = vadd.f32 %v4352_v63, %v9442_v48  ;;  %v5461_v13 = vadd.f32 %v5460_v27, %v5459_v61  ;;  %v5765_v44 = vpop.f32.mrf.mxu0 }
 0x3b5   : > { %v5462_v62 = vpop.f32.mrf.mxu1 }
 0x3b6   : > { %v4482_v8 = vmax.f32 %v4464_v53, 0.0  ;;  %v4447_v39 = vadd.f32 %v9478_v40, %v4402_v23  ;;  %v4357_v51 = vadd.f32 %v5461_v13, %v4356_v16  ;;  %v4364_v6 = vpop.f32.mrf.mxu0 }
 0x3b7   : > { %v5463_v46 = vpop.f32.mrf.mxu1 }
 0x3b8   : > { %4500 = vst [vmem:[%s9488_s14 + $0x30] sm:$0xff] %v4482_v8  ;;  %v4465_v49 = vadd.f32 %v4906_v52, %v4447_v39  ;;  %v4403_v26 = vadd.f32 %v4357_v51, %v9445_v47  ;;  %v5464_v35 = vadd.f32 %v5463_v46, %v5462_v62  ;;  %v5768_v4 = vpop.f32.mrf.mxu0  ;;  %v4911_v39 = vld [vmem:[%s6551_s25 + $0x86] sm:$0xff] }
 0x3b9   : > { %v5465_v48 = vpop.f32.mrf.mxu1 }
 0x3ba   : > { %v4483_v33 = vmax.f32 %v4465_v49, 0.0  ;;  %v4448_v56 = vadd.f32 %v9478_v40, %v4403_v26  ;;  %v4360_v41 = vadd.f32 %v5464_v35, %v4359_v37  ;;  %v4367_v60 = vpop.f32.mrf.mxu0 }
 0x3bb   : > { %v5466_v9 = vpop.f32.mrf.mxu1 }
 0x3bc   : > { %4501 = vst [vmem:[%s9488_s14 + $0x38] sm:$0xff] %v4483_v33  ;;  %v4466_v14 = vadd.f32 %v4907_v20, %v4448_v56  ;;  %v4404_v15 = vadd.f32 %v4360_v41, %v9448_v5  ;;  %v5467_v10 = vadd.f32 %v5466_v9, %v5465_v48  ;;  %v5769_v25 = vpop.f32.mrf.mxu0  ;;  %v4912_v20 = vld [vmem:[%s6551_s25 + $0x8e] sm:$0xff] }
 0x3bd   : > { %v5468_v47 = vpop.f32.mrf.mxu1 }
 0x3be   : > { %v4484_v1 = vmax.f32 %v4466_v14, 0.0  ;;  %v4449_v21 = vadd.f32 %v9478_v40, %v4404_v15  ;;  %v4365_v50 = vadd.f32 %v5467_v10, %v4364_v6  ;;  %v4913_v15 = vld [vmem:[%s6551_s25 + $0x96] sm:$0xff] }
 0x3bf   : > { %v5469_v34 = vpop.f32.mrf.mxu1 }
 0x3c0   : > { %4502 = vst [vmem:[%s9488_s14 + $0x40] sm:$0xff] %v4484_v1  ;;  %v4467_v32 = vadd.f32 %v4908_v42, %v4449_v21  ;;  %v4405_v54 = vadd.f32 %v4365_v50, %v9451_v2  ;;  %v5470_v38 = vadd.f32 %v5469_v34, %v5468_v47  ;;  %v4914_v34 = vld [vmem:[%s6551_s25 + $0x9e] sm:$0xff] }
 0x3c1   : > { %v5471_v18 = vpop.f32.mrf.mxu1 }
 0x3c2   : > { %v4485_v5 = vmax.f32 %v4467_v32, 0.0  ;;  %v4450_v24 = vadd.f32 %v9478_v40, %v4405_v54  ;;  %v4368_v19 = vadd.f32 %v5470_v38, %v4367_v60 }
 0x3c3   : > { %v5472_v36 = vpop.f32.mrf.mxu1 }
 0x3c4   : > { %4503 = vst [vmem:[%s9488_s14 + $0x48] sm:$0xff] %v4485_v5  ;;  %v4468_v59 = vadd.f32 %v4909_v28, %v4450_v24  ;;  %v4406_v16 = vadd.f32 %v4368_v19, %v9454_v45  ;;  %v5473_v23 = vadd.f32 %v5472_v36, %v5471_v18  ;;  %v4915_v19 = vld [vmem:[%s6551_s25 + $0xa6] sm:$0xff] }
 0x3c5   : > { %v5474_v31 = vpop.f32.mrf.mxu1 }
 0x3c6   : > { %v4486_v3 = vmax.f32 %v4468_v59, 0.0  ;;  %v4451_v30 = vadd.f32 %v9478_v40, %v4406_v16 }
 0x3c7   : > { %v5475_v2 = vpop.f32.mrf.mxu1 }
 0x3c8   : > { %4504 = vst [vmem:[%s9488_s14 + $0x50] sm:$0xff] %v4486_v3  ;;  %v4469_v55 = vadd.f32 %v4910_v22, %v4451_v30  ;;  %v5476_v62 = vadd.f32 %v5475_v2, %v5474_v31  ;;  %v4916_v30 = vld [vmem:[%s6551_s25 + $0xae] sm:$0xff]  ;;  %s9568_s25 = scalar_lea.sflag [#allocation4], %s283_s1 }
 0x3c9   : > { %v5477_v57 = vpop.f32.mrf.mxu1 }
 0x3ca   : > { %v4487_v61 = vmax.f32 %v4469_v55, 0.0 }
 0x3cb   : > { %v5478_v7 = vpop.f32.mrf.mxu1 }
 0x3cc   : > { %4505 = vst [vmem:[%s9488_s14 + $0x58] sm:$0xff] %v4487_v61  ;;  %v5479_v26 = vadd.f32 %v5478_v7, %v5477_v57 }
 0x3cd   : > { %v5480_v29 = vpop.f32.mrf.mxu1 }
 0x3cf   : > { %v5481_v63 = vpop.f32.mrf.mxu1 }
 0x3d0   : > { %v5482_v60 = vadd.f32 %v5481_v63, %v5480_v29 }
 0x3d1   : > { %v5483_v37 = vpop.f32.mrf.mxu1 }
 0x3d3   : > { %v5484_v27 = vpop.f32.mrf.mxu1 }
 0x3d4   : > { %v5485_v1 = vadd.f32 %v5484_v27, %v5483_v37 }
 0x3d5   : > { %v5486_v53 = vpop.f32.mrf.mxu1 }
 0x3d7   : > { %v5487_v45 = vpop.f32.mrf.mxu1 }
 0x3d8   : > { %v5488_v18 = vadd.f32 %v5487_v45, %v5486_v53 }
 0x3d9   : > { %v4372_v13 = vpop.f32.mrf.mxu1 }
 0x3da   : > { %v4373_v44 = vadd.f32 %v5473_v23, %v4372_v13 }
 0x3db   : > { %v5772_v52 = vpop.f32.mrf.mxu1 }
 0x3dc   : > { %v4407_v8 = vadd.f32 %v4373_v44, %v9457_v17 }
 0x3dd   : > { %v4375_v51 = vpop.f32.mrf.mxu1 }
 0x3de   : > { %v4452_v6 = vadd.f32 %v9478_v40, %v4407_v8  ;;  %v4376_v46 = vadd.f32 %v5476_v62, %v4375_v51 }
 0x3df   : > { %v5773_v49 = vpop.f32.mrf.mxu1 }
 0x3e0   : > { %v4470_v35 = vadd.f32 %v4911_v39, %v4452_v6  ;;  %v4408_v4 = vadd.f32 %v4376_v46, %v9460_v58 }
 0x3e1   : > { %v4380_v48 = vpop.f32.mrf.mxu1 }
 0x3e2   : > { %v4488_v33 = vmax.f32 %v4470_v35, 0.0  ;;  %v4453_v56 = vadd.f32 %v9478_v40, %v4408_v4  ;;  %v4381_v41 = vadd.f32 %v5479_v26, %v4380_v48 }
 0x3e3   : > { %v5776_v17 = vpop.f32.mrf.mxu1 }
 0x3e4   : > { %4506 = vst [vmem:[%s9488_s14 + $0x60] sm:$0xff] %v4488_v33  ;;  %v4471_v9 = vadd.f32 %v4912_v20, %v4453_v56  ;;  %v4409_v14 = vadd.f32 %v4381_v41, %v9463_v43 }
 0x3e5   : > { %v4383_v10 = vpop.f32.mrf.mxu1 }
 0x3e6   : > { %v4489_v25 = vmax.f32 %v4471_v9, 0.0  ;;  %v4454_v58 = vadd.f32 %v9478_v40, %v4409_v14  ;;  %v4384_v42 = vadd.f32 %v5482_v60, %v4383_v10 }
 0x3e7   : > { %v5777_v47 = vpop.f32.mrf.mxu1 }
 0x3e8   : > { %4507 = vst [vmem:[%s9488_s14 + $0x68] sm:$0xff] %v4489_v25  ;;  %v4472_v21 = vadd.f32 %v4913_v15, %v4454_v58  ;;  %v4410_v50 = vadd.f32 %v4384_v42, %v9466_v0 }
 0x3e9   : > { %v4388_v32 = vpop.f32.mrf.mxu1 }
 0x3ea   : > { %v4490_v54 = vmax.f32 %v4472_v21, 0.0  ;;  %v4455_v43 = vadd.f32 %v9478_v40, %v4410_v50  ;;  %v4389_v38 = vadd.f32 %v5485_v1, %v4388_v32 }
 0x3eb   : > { %v5780_v28 = vpop.f32.mrf.mxu1 }
 0x3ec   : > { %4508 = vst [vmem:[%s9488_s14 + $0x70] sm:$0xff] %v4490_v54  ;;  %v4473_v5 = vadd.f32 %v4914_v34, %v4455_v43  ;;  %v4411_v24 = vadd.f32 %v4389_v38, %v9469_v12 }
 0x3ed   : > { %v4391_v0 = vpop.f32.mrf.mxu1 }
 0x3ee   : > { %v4491_v36 = vmax.f32 %v4473_v5, 0.0  ;;  %v4456_v59 = vadd.f32 %v9478_v40, %v4411_v24  ;;  %v4392_v16 = vadd.f32 %v5488_v18, %v4391_v0 }
 0x3ef   : > { %v5781_v22 = vpop.f32.mrf.mxu1 }
 0x3f0   : > { %4509 = vst [vmem:[%s9488_s14 + $0x78] sm:$0xff] %v4491_v36  ;;  %v4474_v31 = vadd.f32 %v4915_v19, %v4456_v59  ;;  %v4412_v3 = vadd.f32 %v4392_v16, %v9472_v11 }
 0x3f2   : > { %v4492_v2 = vmax.f32 %v4474_v31, 0.0  ;;  %v4457_v12 = vadd.f32 %v9478_v40, %v4412_v3 }
 0x3f4   : > { %4510 = vst [vmem:[%s9488_s14 + $0x80] sm:$0xff] %v4492_v2  ;;  %v4475_v55 = vadd.f32 %v4916_v30, %v4457_v12 }
 0x3f6   : > { %v4493_v57 = vmax.f32 %v4475_v55, 0.0 }
 0x3f8   : > { %4511 = vst [vmem:[%s9488_s14 + $0x88] sm:$0xff] %v4493_v57 }
 0x3f9   : > { %6218 = shalt.err (!%p6215_p5)
}
 0x3fa   : > { %s6219_s1 = scalar_lea.hbm %s9563_s9, 2304  ;;  %s6223_s5 = scalar_lea.hbm %s10403_s8, 9216 }
 0x3fb   : > { %p6220_p1 = scmp.ne.s32.totalorder %s9563_s9, %s6219_s1  ;;  %p6224_p13 = scmp.lt.s32.totalorder %s9563_s9, %s10403_s8 }
 0x3fc   : > { %p6225_p0 = scmp.lt.s32.totalorder %s6223_s5, %s6219_s1 }
 0x3fd   : > { %p6221_p7 = pnand %p6220_p1, %p10404_p11 }
 0x3fe   : > { %p6226_p8 = por %p6225_p0, %p6224_p13 }
 0x3ff   : > { %p6222_p9 = pneg %p6221_p7 }
 0x401   : > { %p6227_p3 = pnand %p6226_p8, %p6222_p9 }
 0x403   : > { %6230 = shalt.err (!%p6227_p3)
}
 0x404   : > { %s6341_s21 = smov 128   ;;  %s6342_s15 = smov 8  }
 0x405   : > { %5859 = dma.vmem_to_hbm [thread:$0]  (%p10404_p11), %s9558_s29, 2304, %s9563_s9, %s9568_s25, %s6341_s21, %s6341_s21, %s6342_s15  }
 0x406 PF: > { %s10405_s3 = sld [smem:[#allocation12_spill]]  ;;  %p5881_p10 = scmp.ge.s32.totalorder %s6329_s28, 2 }
 0x407   : > { %s10406_s6 = sld [smem:[#allocation16_spill]] }
 0x40c   : > { %s4543_s11 = sand.u32 1, %s10405_s3  }
 0x40d   : > { %p10407_p12 = scmp.ne.s32.totalorder %s10406_s6, 0  ;;  %s4544_s17 = scalar_lea.sflag [#allocation4], %s4543_s11 }
 0x40f   : > { %p5873_p2 = pnand %p5881_p10, %p10407_p12 }
 0x411   : > { %p5874_p4 = pneg %p5873_p2 }
 0x413   : > { %6284 = dma.done.wait (%p5874_p4), %s4544_s17, 2304  }
 0x414   : > { %6286 = vsyncadd (%p5874_p4), %s4544_s17, 4294964992  ;;  %s22_s28 = sadd.s32 1, %s6329_s28   ;;  %s10408_s12 = smov %s6517_s18 }
 0x415   : > { %p19_p6 = scmp.ge.s32.totalorder %s22_s28, 6   ;;  %s10409_s24 = sld [smem:[#allocation14_spill]] }
 0x416   : > { %s10410_s26 = sld [smem:[#allocation17_spill]]  ;;  %s10411_s18 = smov %s6293_s19 }
 0x417   : > { %s10412_s19 = smov %s6297_s20  ;;  %s10413_s20 = smov %s10408_s12 }
 0x418   : > { %s10414_s21 = smov %s6305_s22  ;;  %s10415_s22 = smov %s6309_s23 }
 0x419   : > { %s10416_s23 = smov %s6512_s13  ;;  %s10417_s25 = smov %s6325_s27 }
 0x41a   : > { %s10418_s27 = smov %s10424_s30  ;;  %21 = sbr.rel (!%p19_p6) target bundleno = 14 (0xe), region = 97 }
 0x41f   :  { %4549 = vsyncpa [#allocation3], 1 }
 0x420   :  { %4551 = vsyncpa [#allocation3 + $0x1], 1 }
 0x421   :  { %4552 = vsyncpa [#allocation6], 1 }
 0x422   :  { %4553 = vsyncpa [#allocation4], 1 }
 0x423   :  { %4555 = vsyncpa [#allocation4 + $0x1], 1 }

// kernel: tpu_custom_call.1
= control target key start
LH: loop header
LB: loop body
LE: loop exit
PB: predicated region body
PF: predicated region fallthrough
CT: control target
= control target key end

     0   :  { %s9628_s0 = inlined_call_operand.hbm [shape: f32[2,368,128], index: 0, kind: input, shape index: {}]   ;;  %s9629_s1 = inlined_call_operand.hbm [shape: bf16[1152,128], index: 1, kind: input, shape index: {}]   ;;  %s9630_s2 = inlined_call_operand.vmem [shape: f32[1,128], index: 2, kind: input, shape index: {}]   ;;  %s9631_s3 = inlined_call_operand.hbm [shape: bf16[1152,128], index: 3, kind: input, shape index: {}]   ;;  %s9632_s4 = inlined_call_operand.vmem [shape: f32[1,128], index: 4, kind: input, shape index: {}]   ;;  %s9633_s5 = inlined_call_operand.hbm [shape: f32[2,288,128], index: 5, kind: output, shape index: {}]  }
   0x1   :  { %9771 = sst [smem:[#allocation70_spill]] %s9629_s1 }
   0x2   :  { %9772 = sst [smem:[#allocation71_spill]] %s9631_s3 }
   0x3   :  { %9773 = sst [smem:[#allocation72_spill]] %s9633_s5 }
   0x4   :  { %10 = vsyncpa [#allocation3], 0 }
   0x5   :  { %12 = vsyncpa [#allocation3 + $0x1], 0 }
   0x6   :  { %13 = vsyncpa [#allocation6], 0 }
   0x7   :  { %14 = vsyncpa [#allocation4], 0 }
   0x8   :  { %16 = vsyncpa [#allocation4 + $0x1], 0  ;;  %s6373_s18 = smov 0   ;;  %s6375_s19 = smov 0  }
   0x9   :  { %s6377_s20 = smov 0   ;;  %s6379_s21 = smov 0  }
   0xa   :  { %s6381_s22 = smov 0   ;;  %s6383_s23 = smov 0  }
   0xb   :  { %s6385_s24 = smov 0   ;;  %s6387_s25 = smov 0  }
   0xc   :  { %s6389_s26 = smov 0   ;;  %s6391_s27 = smov 0  }
   0xd   :  { %s6393_s28 = smov 0  }
   0xe LB: > { %9774 = sst [smem:[#allocation12_spill]] %s6289_s18  ;;  %s4645_s29 = sadd.s32 4294967295, %s6329_s28   ;;  %s6329_s28 = sphi %s6393_s28, %s22_s28   ;;  %s6325_s27 = sphi %s6391_s27, %s10418_s27   ;;  %s6321_s26 = sphi %s6389_s26, %s10410_s26   ;;  %s6317_s25 = sphi %s6387_s25, %s10417_s25   ;;  %s6313_s24 = sphi %s6385_s24, %s10409_s24   ;;  %s6309_s23 = sphi %s6383_s23, %s10416_s23   ;;  %s6305_s22 = sphi %s6381_s22, %s10415_s22   ;;  %s6301_s21 = sphi %s6379_s21, %s10414_s21   ;;  %s6297_s20 = sphi %s6377_s20, %s10413_s20   ;;  %s6293_s19 = sphi %s6375_s19, %s10412_s19   ;;  %s6289_s18 = sphi %s6373_s18, %s10411_s18  }
   0xf   : > { %9775 = sst [smem:[#allocation13_spill]] %s6317_s25  ;;  %s4646_s30 = sadd.s32 4294967294, %s6329_s28  }
  0x10   : > { %9776 = sst [smem:[#allocation14_spill]] %s6321_s26  ;;  %p54_p0 = scmp.ne.s32.totalorder %s6305_s22, %s6301_s21 }
  0x11   : > { %p6429_p1 = scmp.eq.s32.totalorder %s4645_s29, 0  ;;  %p163_p2 = scmp.ne.s32.totalorder %s6297_s20, %s6293_s19 }
  0x12   : > { %p164_p4 = scmp.eq.s32.totalorder %s4645_s29, 3  ;;  %p169_p5 = scmp.ne.s32.totalorder %s6293_s19, %s6289_s18 }
  0x13   : > { %s9777_s6 = scalar_select %p6429_p1, 1, 0 }
  0x14   : > { %p6438_p3 = por %p6429_p1, %p54_p0  ;;  %p170_p6 = scmp.eq.s32.totalorder %s4646_s30, 3 }
  0x15   : > { %p6444_p7 = por %p164_p4, %p163_p2  ;;  %p4647_p8 = scmp.ge.s32.totalorder %s6329_s28, 1 }
  0x16   : > { %p6449_p9 = por %p170_p6, %p169_p5  ;;  %p177_p10 = scmp.lt.s32.totalorder %s6329_s28, 5 }
  0x17   : > { %s9779_s9 = scalar_select %p6444_p7, 1, 0 }
  0x18   : > { %s9781_s10 = scalar_select %p6449_p9, 1, 0 }
  0x19   : > { %9780 = sst [smem:[#allocation15_spill]] %s9779_s9  ;;  %p6454_p11 = pnand %p4647_p8, %p177_p10 }
  0x1a   : > { %9782 = sst [smem:[#allocation16_spill]] %s9781_s10  ;;  %s6331_s12 = smov [#allocation5]  }
  0x1b   : > { %s189_s13 = sshll.u32 %s6331_s12, 4  ;;  %p5861_p12 = pneg %p6454_p11  ;;  %s190_s13 = int_to_ptr.vmem [resolvable:$true] %s189_s13 }
  0x1c   : > { %s6332_s15 = smov [#allocation7]   ;;  %s6136_s17 = scalar_lea.vmem %s190_s13, 9216 }
  0x1d   : > { %p6462_p13 = pnand %p5861_p12, %p6429_p1  ;;  %s205_s16 = sshll.u32 %s6332_s15, 4  ;;  %s206_s16 = int_to_ptr.vmem [resolvable:$true] %s205_s16 }
  0x1e   : > { %p6137_p2 = scmp.ne.s32.totalorder %s190_s13, %s6136_s17  ;;  %p6144_p6 = scmp.lt.s32.totalorder %s190_s13, %s190_s13 }
  0x1f   : > { %p6127_p0 = pneg %p6462_p13  ;;  %p6145_p8 = scmp.lt.s32.totalorder %s6136_s17, %s6136_s17 }
  0x21   : > { %p6139_p4 = pnand %p6137_p2, %p6127_p0  ;;  %p6146_p10 = por %p6145_p8, %p6144_p6 }
  0x23   : > { %p6140_p5 = pneg %p6139_p4 }
  0x25   : > { %p6147_p12 = pnand %p6146_p10, %p6140_p5 }
  0x27   : > { %6150 = shalt.err (!%p6147_p12)
}
  0x28   : > { %s6333_s21 = smov 64   ;;  %s6334_s29 = smov 4  }
  0x29   : > { %s9785_s1 = sld [smem:[#allocation70_spill]]  ;;  %s6162_s15 = scalar_lea.vmem %s206_s16, 9216 }
  0x2a   : > { %p6163_p9 = scmp.ne.s32.totalorder %s206_s16, %s6162_s15  ;;  %p6170_p7 = scmp.lt.s32.totalorder %s206_s16, %s206_s16 }
  0x2b   : > { %p6171_p1 = scmp.lt.s32.totalorder %s6162_s15, %s6162_s15 }
  0x2c   : > { %p6165_p2 = pnand %p6163_p9, %p6127_p0 }
  0x2d   : > { %p6172_p6 = por %p6171_p1, %p6170_p7 }
  0x2e   : > { %p6166_p4 = pneg %p6165_p2 }
  0x2f   : > { %5864 = dma.hbm_to_vmem [thread:$0]  (!%p6462_p13), %s9785_s1, 9216, %s190_s13, [#allocation6], %s6333_s21, %s6333_s21, %s6334_s29  }
  0x30   : > { %p6173_p5 = pnand %p6172_p6, %p6166_p4 }
  0x32   : > { %6176 = shalt.err (!%p6173_p5)
}
  0x33   : > { %s9786_s3 = sld [smem:[#allocation71_spill]]  ;;  %s31_s13 = sadd.s32 1, %s6321_s26 }
  0x34   : > { %s34_s30 = sadd.s32 1, %s6325_s27  ;;  %p32_p1 = scmp.ge.s32.totalorder %s31_s13, 2 }
  0x35   : > { %s41_s14 = sadd.s32 1, %s6309_s23  ;;  %p48_p7 = scmp.ne.s32.totalorder %s6309_s23, %s6305_s22 }
  0x36   : > { %p49_p9 = scmp.eq.s32.totalorder %s6329_s28, 0  ;;  %s10420_s13 = smov (%p32_p1, %s31_s13), 0 }
  0x37   : > { %9787 = sst [smem:[#allocation17_spill]] %s10420_s13  ;;  %s10422_s30 = smov (!%p32_p1, %s34_s30), %s6325_s27 }
  0x38   : > { %p6493_p0 = por %p49_p9, %p48_p7  ;;  %s149_s12 = ssub.s32 %s6321_s26, %s10420_s13 }
  0x39   : > { %5867 = dma.hbm_to_vmem [thread:$0]  (!%p6462_p13), %s9786_s3, 9216, %s206_s16, [#allocation6], %s6333_s21, %s6333_s21, %s6334_s29  }
  0x3a   : > { %p36_p13 = scmp.ge.s32.totalorder %s10422_s30, 2  ;;  %p5878_p8 = scmp.lt.s32.totalorder %s6329_s28, 4 }
  0x3b   : > { %s222_s16 = sand.u32 1, %s6309_s23   ;;  %s5799_s21 = smul.u32 5888, %s6325_s27 }
  0x3c   : > { %s10424_s30 = smov (%p36_p13, %s10422_s30), 0  ;;  %s5798_s29 = smul.u32 368, %s222_s16 }
  0x3d   : > { %s38_s15 = ssub.s32 %s6325_s27, %s10424_s30  ;;  %s6509_s3 = scalar_lea.hbm %s9628_s0, %s5799_s21 }
  0x3e   : > { %p39_p10 = scmp.eq.s32.totalorder %s38_s15, 0  ;;  %s150_s10 = sor.u32 %s149_s12, %s38_s15 }
  0x3f   : > { %p151_p12 = scmp.eq.s32.totalorder %s150_s10, 0  ;;  %s9789_s26 = sadd.s32 1, %s6297_s20 }
  0x40   : > { %s6512_s13 = scalar_select %p39_p10, %s6309_s23, %s41_s14  }
  0x41   : > { %s6517_s18 = scalar_select %p151_p12, %s6297_s20, %s9789_s26  }
  0x42   : > { %s226_s5 = scalar_lea.vmem [#allocation2], %s5798_s29  ;;  %p6523_p2 = pnand %p5878_p8, %p6493_p0 }
  0x43   : > { %s233_s9 = sshll.u32 %s226_s5, 4  ;;  %s223_s1 = scalar_lea.sflag [#allocation3], %s222_s16  ;;  %s234_s9 = int_to_ptr.vmem [resolvable:$true] %s233_s9 }
  0x44   : > { %p6179_p4 = pneg %p6523_p2  ;;  %s6190_s12 = scalar_lea.vmem %s234_s9, 5888 }
  0x45   : > { %p6191_p6 = scmp.ne.s32.totalorder %s234_s9, %s6190_s12  ;;  %s6335_s10 = smov [#allocation2]  }
  0x46   : > { %s6195_s26 = sshll.u32 %s6335_s10, 4  ;;  %s6196_s26 = int_to_ptr.vmem [resolvable:$false] %s6195_s26 }
  0x47   : > { %p6193_p5 = pnand %p6191_p6, %p6179_p4  ;;  %s6197_s14 = scalar_lea.vmem %s6196_s26, 11776 }
  0x48   : > { %p6198_p7 = scmp.lt.s32.totalorder %s234_s9, %s6196_s26  ;;  %p6199_p9 = scmp.lt.s32.totalorder %s6197_s14, %s6190_s12 }
  0x49   : > { %p6194_p1 = pneg %p6193_p5 }
  0x4a   : > { %p6200_p13 = por %p6199_p9, %p6198_p7 }
  0x4c   : > { %p6201_p0 = pnand %p6200_p13, %p6194_p1 }
  0x4e   : > { %6204 = shalt.err (!%p6201_p0)
}
  0x4f   : > { %s6336_s5 = smov 128   ;;  %s6337_s7 = smov 8  }
  0x50   : > { %5871 = dma.hbm_to_vmem [thread:$0]  (!%p6523_p2), %s6509_s3, 5888, %s234_s9, %s223_s1, %s6336_s5, %s6336_s5, %s6337_s7  }
  0x51   : > { %245 = sbr.rel (%p6454_p11) target bundleno = 1030 (0x406), region = 40 }
  0x56   : > { %s247_s16 = sand.u32 1, %s6305_s22  }
  0x57   : > { %s6535_s21 = smul.u32 368, %s247_s16  ;;  %s248_s29 = scalar_lea.sflag [#allocation3], %s247_s16 }
  0x59   : > { %s251_s15 = scalar_lea.vmem [#allocation2], %s6535_s21 }
  0x5a   : > { %6276 = dma.done.wait (%p6438_p3), %s248_s29, 5888  }
  0x5b   : > { %6278 = vsyncadd (%p6438_p3), %s248_s29, 4294961408  ;;  %p9791_p8 = scmp.ne.s32.totalorder %s9777_s6, 0 }
  0x5d   : > { %6280 = dma.done.wait (%p9791_p8), [#allocation6], 18432  }
  0x5e   : > { %6282 = vsyncadd (%p9791_p8), [#allocation6], 4294948864  ;;  %v5980_v0 = vld [vmem:[#allocation5 + $0x138] sm:$0xff]   ;;  %v5983_v3 = vld [vmem:[#allocation5 + $0x130] sm:$0xff]   ;;  %s288_s3 = smul.u32 144, %s6313_s24  ;;  %vm9668_vm0 = vcmask 1046528  }
  0x5f   : > { %v5981_v1 = vld [vmem:[#allocation5 + $0x178] sm:$0xff]   ;;  %4921 = vmatprep.subr.bf16.mxu0 %v5980_v0  ;;  %v5984_v4 = vld [vmem:[#allocation5 + $0x170] sm:$0xff]   ;;  %v5986_v6 = vld [vmem:[#allocation5 + $0x128] sm:$0xff]   ;;  %vm9667_vm1 = vsmask.f32 7424  ;;  %vm9665_vm3 = vmmov 0  }
  0x60   : > { %v5982_v2 = vld [vmem:[#allocation5 + $0xf8] sm:$0xff]   ;;  %5506 = vmatprep.subr.bf16.mxu1 %v5981_v1  ;;  %v5985_v5 = vld [vmem:[#allocation5 + $0xf0] sm:$0xff]   ;;  %v5987_v7 = vld [vmem:[#allocation5 + $0x168] sm:$0xff]   ;;  %s6551_s25 = scalar_lea.vmem %s251_s15, %s288_s3 [#allocation2]  ;;  %s4776_s6 = sadd.s32 4294967277, %s288_s3 }
  0x61   : > { %4922 = vmatpush3.bf16.msra.mxu0 %v5982_v2  ;;  %5507 = vmatpush3.bf16.msra.mxu1 %v5981_v1  ;;  %v5988_v8 = vld [vmem:[#allocation5 + $0xe8] sm:$0xff]   ;;  %v5989_v9 = vld [vmem:[#allocation5 + $0x120] sm:$0xff]   ;;  %v5992_v12 = vld [vmem:[#allocation5 + $0x118] sm:$0xff]   ;;  %s283_s1 = sand.u32 1, %s6293_s19   ;;  %s10401_s5 = sld [smem:[#allocation13_spill]] }
  0x62   : > { %4923 = vmatprep.subr.bf16.mxu0 %v5983_v3  ;;  %5508 = vmatprep.subr.bf16.mxu1 %v5984_v4  ;;  %v5990_v10 = vld [vmem:[#allocation5 + $0x160] sm:$0xff]   ;;  %v5993_v13 = vld [vmem:[#allocation5 + $0x158] sm:$0xff]   ;;  %v5995_v15 = vld [vmem:[#allocation5 + $0x110] sm:$0xff]   ;;  %s5801_s26 = smul.u32 144, %s283_s1  ;;  %s10403_s8 = sld [smem:[#allocation72_spill]] }
  0x63   : > { %v5991_v11 = vld [vmem:[#allocation5 + $0xe0] sm:$0xff]   ;;  %v5994_v14 = vld [vmem:[#allocation5 + $0xd8] sm:$0xff]   ;;  %v5996_v16 = vld [vmem:[#allocation5 + $0x150] sm:$0xff]   ;;  %s4520_s7 = smul.u32 18, %s6313_s24  ;;  %s10402_s24 = sld [smem:[#allocation15_spill]] }
  0x64   : > { %v5997_v17 = vld [vmem:[#allocation5 + $0xd0] sm:$0xff]   ;;  %v5998_v18 = vld [vmem:[#allocation5 + $0x108] sm:$0xff]   ;;  %v6001_v21 = vld [vmem:[#allocation5 + $0x100] sm:$0xff]   ;;  %s9488_s14 = scalar_lea.vmem [#allocation8], %s5801_s26  ;;  %s6340_s17 = smov [#allocation8]  }
  0x65   : > { %4924 = vmatpush3.bf16.msra.mxu0 %v5985_v5  ;;  %5509 = vmatpush3.bf16.msra.mxu1 %v5984_v4  ;;  %v5999_v19 = vld [vmem:[#allocation5 + $0x148] sm:$0xff]   ;;  %v6002_v22 = vld [vmem:[#allocation5 + $0x140] sm:$0xff]   ;;  %v4655_v23 = vld [vmem:[%s6551_s25 + $0x12] sm:$0xff]  ;;  %s4528_s29 = sshll.u32 %s9488_s14, 4  ;;  %s6209_s12 = sshll.u32 %s6340_s17, 4  ;;  %s9558_s29 = int_to_ptr.vmem [resolvable:$true] %s4528_s29  ;;  %s6210_s12 = int_to_ptr.vmem [resolvable:$false] %s6209_s12 }
  0x66   : > { %4925 = vmatprep.subr.bf16.mxu0 %v5986_v6  ;;  %5510 = vmatprep.subr.bf16.mxu1 %v5987_v7  ;;  %v6000_v20 = vld [vmem:[#allocation5 + $0xc8] sm:$0xff]   ;;  %v4656_v24 = vld [vmem:[%s6551_s25 + $0x1a] sm:$0xff]  ;;  %v4659_v28 = vld [vmem:[%s6551_s25 + $0x32] sm:$0xff]  ;;  %s6205_s11 = scalar_lea.vmem %s9558_s29, 2304  ;;  %s6211_s10 = scalar_lea.vmem %s6210_s12, 4608 }
  0x67   : > { %v4657_v25 = vld [vmem:[%s6551_s25 + $0x22] sm:$0xff]  ;;  %v4658_v26 = vld [vmem:[%s6551_s25 + $0x2a] sm:$0xff]  ;;  %v556_v27 = vpack.c.bf16 %v4656_v24, %v4655_v23  ;;  %v4660_v29 = vld [vmem:[%s6551_s25 + $0x3a] sm:$0xff]  ;;  %s5848_s16 = smul.u32 36, %s10401_s5  ;;  %p6206_p3 = scmp.ne.s32.totalorder %s9558_s29, %s6205_s11 }
  0x68   : > { %v6003_v30 = vld [vmem:[#allocation5 + $0xc0] sm:$0xff]   ;;  %v6559_v31 = vpack.c.bf16 %v4658_v26, %v4657_v25  ;;  %v6561_v32 = vpack.c.bf16 %v4660_v29, %v4659_v28  ;;  %v6004_v36 = vld [vmem:[#allocation5 + $0xb8] sm:$0xff]   ;;  %v4662_v38 = vld [vmem:[%s6551_s25 + $0x4a] sm:$0xff]  ;;  %p6212_p2 = scmp.lt.s32.totalorder %s9558_s29, %s6210_s12  ;;  %p6213_p4 = scmp.lt.s32.totalorder %s6211_s10, %s6205_s11 }
  0x69   : > { %4926 = vmatpush3.bf16.msra.mxu0 %v5988_v8  ;;  %5511 = vmatpush3.bf16.msra.mxu1 %v5987_v7  ;;  %v569_v33 = vshrl.u32 %v556_v27, 16  ;;  %v571_v34 = vshll.u32 %v556_v27, 16  ;;  %v687_v35 = vrot.slane %v556_v27, 1  ;;  %v4661_v37 = vld [vmem:[%s6551_s25 + $0x42] sm:$0xff]  ;;  %v4663_v43 = vld [vmem:[%s6551_s25 + $0x52] sm:$0xff]  ;;  %v4664_v44 = vld [vmem:[%s6551_s25 + $0x5a] sm:$0xff]  ;;  %s4525_s21 = sadd.s32 %s5848_s16, %s4520_s7 }
  0x6a   : > { %4927 = vmatprep.subr.bf16.mxu0 %v5989_v9  ;;  %5512 = vmatprep.subr.bf16.mxu1 %v5990_v10  ;;  %v576_v39 = vshll.u32 %v6559_v31, 16  ;;  %v688_v40 = vrot.slane %v6559_v31, 1  ;;  %v690_v41 = vrot.slane %v6561_v32, 1  ;;  %v580_v42 = vshrl.u32 %v6559_v31, 16  ;;  %v4665_v50 = vld [vmem:[%s6551_s25 + $0x62] sm:$0xff]  ;;  %v4666_v51 = vld [vmem:[%s6551_s25 + $0x6a] sm:$0xff]  ;;  %p6214_p6 = por %p6213_p4, %p6212_p2 }
  0x6b   : > { %v573_v45 = vrot.slane %v571_v34, 1  ;;  %v584_v46 = vshll.u32 %v6561_v32, 16  ;;  %v6572_v47 = vpack.c.bf16 %v4662_v38, %v4661_v37  ;;  %v6579_v57 = vpack.c.bf16 %v4664_v44, %v4663_v43  ;;  %v6006_v59 = vld [vmem:[#allocation5 + $0x78] sm:$0xff]   ;;  %v6005_v61 = vld [vmem:[#allocation5 + $0xb0] sm:$0xff]   ;;  %v6013_v26 = vld [vmem:[#allocation5 + $0x60] sm:$0xff]   ;;  %s4918_s15 = sshll.u32 %s4525_s21, 7 }
  0x6c   : > { %v578_v48 = vrot.slane %v576_v39, 1  ;;  %v689_v49 = vsel %vm9668_vm0, %v687_v35, %v688_v40  ;;  %v691_v55 = vsel %vm9668_vm0, %v688_v40, %v690_v41  ;;  %v588_v62 = vshrl.u32 %v6561_v32, 16  ;;  %v6007_v2 = vld [vmem:[#allocation5 + $0x38] sm:$0xff]   ;;  %v6008_v3 = vld [vmem:[#allocation5 + $0x70] sm:$0xff]   ;;  %v6014_v28 = vld [vmem:[#allocation5 + $0x20] sm:$0xff]   ;;  %s9563_s9 = scalar_lea.hbm %s10403_s8, %s4918_s15  ;;  %p10404_p11 = scmp.ne.s32.totalorder %s10402_s24, 0 }
  0x6d   : > { %4928 = vmatpush3.bf16.msra.mxu0 %v5991_v11  ;;  %5513 = vmatpush3.bf16.msra.mxu1 %v5990_v10  ;;  %v574_v52 = vor.u32 %v573_v45, %v569_v33  ;;  %v586_v53 = vrot.slane %v584_v46, 1  ;;  %v692_v54 = vrot.slane %v6572_v47, 1  ;;  %v592_v58 = vshll.u32 %v6572_v47, 16  ;;  %v4667_v6 = vld [vmem:[%s6551_s25 + $0x72] sm:$0xff]  ;;  %v4668_v7 = vld [vmem:[%s6551_s25 + $0x7a] sm:$0xff]  ;;  %v4669_v11 = vld [vmem:[%s6551_s25 + $0x82] sm:$0xff] }
  0x6e   : > { %4929 = vmatprep.subr.bf16.mxu0 %v5992_v12  ;;  %5514 = vmatprep.subr.bf16.mxu1 %v5993_v13  ;;  %v582_v56 = vor.u32 %v580_v42, %v578_v48  ;;  %v6584_v63 = vpack.c.bf16 %v4666_v51, %v4665_v50  ;;  %v694_v4 = vrot.slane %v6579_v57, 1  ;;  %v6009_v8 = vld [vmem:[#allocation5 + $0x30] sm:$0xff]   ;;  %v4672_v25 = vld [vmem:[%s6551_s25 + $0x9a] sm:$0xff]  ;;  %v4673_v33 = vld [vmem:[%s6551_s25 + $0xa2] sm:$0xff]  ;;  %v604_v37 = vshrl.u32 %v6579_v57, 16  ;;  %p6207_p10 = pnand %p6206_p3, %p10404_p11 }
  0x6f   : > { %5522 = vmatprep.mubr.bf16.mxu1 %v689_v49  ;;  %v579_v60 = vsel %vm9667_vm1, %v574_v52, %v578_v48  ;;  %v693_v1 = vsel %vm9668_vm0, %v690_v41, %v692_v54  ;;  %v594_v5 = vrot.slane %v592_v58, 1  ;;  %v590_v9 = vor.u32 %v588_v62, %v586_v53  ;;  %v4670_v12 = vld [vmem:[%s6551_s25 + $0x8a] sm:$0xff]  ;;  %v4671_v24 = vld [vmem:[%s6551_s25 + $0x92] sm:$0xff]  ;;  %v4676_v48 = vld [vmem:[%s6551_s25 + $0xba] sm:$0xff] }
  0x70   : > { %946 = vmatprep.mubr.bf16.mxu0 %v579_v60  ;;  %v587_v0 = vsel %vm9667_vm1, %v582_v56, %v586_v53  ;;  %v696_v10 = vrot.slane %v6584_v63, 1  ;;  %v4674_v34 = vld [vmem:[%s6551_s25 + $0xaa] sm:$0xff]  ;;  %v608_v40 = vshll.u32 %v6584_v63, 16  ;;  %v6015_v42 = vld [vmem:[#allocation5 + $0x58] sm:$0xff]   ;;  %v4677_v53 = vld [vmem:[%s6551_s25 + $0xc2] sm:$0xff]  ;;  %v612_v60 = vshrl.u32 %v6584_v63, 16  ;;  %p6208_p12 = pneg %p6207_p10 }
  0x71   : > { %4930 = vmatpush3.bf16.msra.mxu0 %v5994_v14  ;;  %5515 = vmatpush3.bf16.msra.mxu1 %v5993_v13  ;;  %v6594_v13 = vpack.c.bf16 %v4668_v7, %v4667_v6  ;;  %v6011_v14 = vld [vmem:[#allocation5 + $0xa8] sm:$0xff]   ;;  %v6617_v41 = vpack.c.bf16 %v4674_v34, %v4673_v33  ;;  %v6016_v43 = vld [vmem:[#allocation5 + $0x18] sm:$0xff]   ;;  %v6017_v45 = vld [vmem:[#allocation5 + $0x50] sm:$0xff]  }
  0x72   : > { %4931 = vmatprep.subr.bf16.mxu0 %v5995_v15  ;;  %5516 = vmatprep.subr.bf16.mxu1 %v5996_v16  ;;  %v695_v15 = vsel %vm9668_vm0, %v692_v54, %v694_v4  ;;  %v4675_v44 = vld [vmem:[%s6551_s25 + $0xb2] sm:$0xff]  ;;  %v610_v50 = vrot.slane %v608_v40, 1  ;;  %v4678_v54 = vld [vmem:[%s6551_s25 + $0xca] sm:$0x3]  ;;  %p6215_p5 = pnand %p6214_p6, %p6208_p12 }
  0x73   : > { %v698_v23 = vrot.slane %v6594_v13, 1  ;;  %v704_v51 = vrot.slane %v6617_v41, 1  ;;  %v6019_v52 = vld [vmem:[#allocation5 + $0x10] sm:$0xff]   ;;  %v6024_v56 = vld [vmem:[#allocation5 + $0x98] sm:$0xff]   ;;  %v6020_v62 = vld [vmem:[#allocation5 + $0x48] sm:$0xff]  }
  0x74   : > { %v6025_v6 = vld [vmem:[#allocation5 + $0x90] sm:$0xff]   ;;  %v293_v7 = vld [vmem:[%s6551_s25 + $0x18] sm:$0xff] }
  0x75   : > { %4932 = vmatpush3.bf16.msra.mxu0 %v5997_v17  ;;  %5517 = vmatpush3.bf16.msra.mxu1 %v5996_v16  ;;  %v600_v16 = vshll.u32 %v6579_v57, 16  ;;  %v595_v17 = vsel %vm9667_vm1, %v590_v9, %v594_v5  ;;  %v699_v35 = vsel %vm9668_vm0, %v696_v10, %v698_v23  ;;  %v6027_v9 = vld [vmem:[#allocation5 + $0x88] sm:$0xff]   ;;  %v296_v40 = vld [vmem:[%s6551_s25 + $0x30] sm:$0xff] }
  0x76   : > { %4933 = vmatprep.subr.bf16.mxu0 %v5998_v18  ;;  %5518 = vmatprep.subr.bf16.mxu1 %v5999_v19  ;;  %v697_v18 = vsel %vm9668_vm0, %v694_v4, %v696_v10  ;;  %v292_v4 = vld [vmem:[%s6551_s25 + $0x10] sm:$0xff] }
  0x79   : > { %4934 = vmatpush3.bf16.msra.mxu0 %v6000_v20  ;;  %5519 = vmatpush3.bf16.msra.mxu1 %v5999_v19  ;;  %v596_v19 = vshrl.u32 %v6572_v47, 16  ;;  %v6601_v20 = vpack.c.bf16 %v4670_v12, %v4669_v11  ;;  %v614_v12 = vor.u32 %v612_v60, %v610_v50  ;;  %v6028_v60 = vld [vmem:[#allocation5 + $0x230] sm:$0xff]  }
  0x7a   : > { %4935 = vmatprep.subr.bf16.mxu0 %v6001_v21  ;;  %5520 = vmatprep.subr.bf16.mxu1 %v6002_v22  ;;  %v6010_v21 = vld [vmem:[#allocation5 + $0x68] sm:$0xff]  }
  0x7b   : > { %v598_v29 = vor.u32 %v596_v19, %v594_v5  ;;  %v624_v19 = vshll.u32 %v6601_v20, 16 }
  0x7d   : > { %4936 = vmatpush3.bf16.msra.mxu0 %v6003_v30  ;;  %5521 = vmatpush3.bf16.msra.mxu1 %v6002_v22  ;;  %v6012_v22 = vld [vmem:[#allocation5 + $0x28] sm:$0xff]   ;;  %v700_v30 = vrot.slane %v6601_v20, 1 }
  0x7e   : > { %5546 = vmatprep.subr.bf16.mxu0 %v6004_v36  ;;  %5029 = vmatprep.subr.bf16.mxu1 %v6006_v59  ;;  %v6629_v59 = vpack.c.bf16 %v4676_v48, %v4675_v44 }
  0x7f   : > { %v701_v39 = vsel %vm9668_vm0, %v698_v23, %v700_v30  ;;  %v295_v23 = vld [vmem:[%s6551_s25 + $0x28] sm:$0xff] }
  0x80   : > { %947 = vmatmul.mubr.bf16.vlgmr.msra.gmra.mxu0 %v556_v27  ;;  %5523 = vmatmul.mubr.bf16.vlgmr.msra.gmra.mxu1 %v691_v55  ;;  %v602_v27 = vrot.slane %v600_v16, 1  ;;  %v291_v55 = vld [vmem:[%s6551_s25 + $0x8] sm:$0xff]  ;;  %v706_v10 = vrot.slane %v6629_v59, 1 }
  0x81   : > { %5547 = vmatpush3.bf16.msra.mxu0 %v6004_v36  ;;  %954 = vmatprep.mubr.bf16.mxu0 %v587_v0  ;;  %v6611_v36 = vpack.c.bf16 %v4672_v25, %v4671_v24  ;;  %v6021_v0 = vld [vmem:[#allocation5 + $0x8] sm:$0xff]  }
  0x82   : > { %5526 = vmatprep.mubr.bf16.mxu1 %v693_v1  ;;  %5548 = vmatprep.subr.bf16.mxu0 %v6005_v61  ;;  %v603_v38 = vsel %vm9667_vm1, %v598_v29, %v602_v27  ;;  %v606_v49 = vor.u32 %v604_v37, %v602_v27  ;;  %v6029_v29 = vld [vmem:[#allocation5 + $0x80] sm:$0xff]  }
  0x83   : > { %5030 = vmatpush3.bf16.msra.mxu1 %v6007_v2  ;;  %v702_v46 = vrot.slane %v6611_v36, 1 }
  0x84   : > { %5031 = vmatprep.subr.bf16.mxu1 %v6008_v3  ;;  %v611_v1 = vsel %vm9667_vm1, %v606_v49, %v610_v50  ;;  %v6635_v3 = vpack.c.bf16 %v4678_v54, %v4677_v53  ;;  %v640_v53 = vshll.u32 %v6617_v41, 16 }
  0x85   : > { %5549 = vmatpush3.bf16.msra.mxu0 %v6005_v61  ;;  %v703_v58 = vsel %vm9668_vm0, %v700_v30, %v702_v46  ;;  %v616_v61 = vshll.u32 %v6594_v13, 16  ;;  %v705_v2 = vsel %vm9668_vm0, %v702_v46, %v704_v51  ;;  %v6031_v30 = vld [vmem:[#allocation5 + $0x1f8] sm:$0xff]  }
  0x86   : > { %5550 = vmatprep.subr.bf16.mxu0 %v6011_v14 }
  0x87   : > { %5032 = vmatpush3.bf16.msra.mxu1 %v6009_v8  ;;  %v6022_v8 = vld [vmem:[#allocation5 + $0x40] sm:$0xff]   ;;  %v618_v11 = vrot.slane %v616_v61, 1  ;;  %v642_v61 = vrot.slane %v640_v53, 1 }
  0x88   : > { %955 = vmatmul.mubr.bf16.gmra.mxu0 %v6559_v31  ;;  %5527 = vmatmul.mubr.bf16.gmra.mxu1 %v695_v15  ;;  %v6018_v31 = vld [vmem:[#allocation5 + $0xa0] sm:$0xff]   ;;  %v6644_v15 = vpack.c.bf16 %v293_v7, %v292_v4  ;;  %v6030_v4 = vld [vmem:[#allocation5 + $0x228] sm:$0xff]   ;;  %v648_v7 = vshll.u32 %v6629_v59, 16 }
  0x89   : > { %962 = vmatprep.mubr.bf16.mxu0 %v595_v17  ;;  %5530 = vmatprep.mubr.bf16.mxu1 %v697_v18  ;;  %v620_v17 = vshrl.u32 %v6594_v13, 16  ;;  %v707_v18 = vsel %vm9668_vm0, %v704_v51, %v706_v10  ;;  %v619_v24 = vsel %vm9667_vm1, %v614_v12, %v618_v11  ;;  %v301_v12 = vld [vmem:[%s6551_s25 + $0x58] sm:$0xff] }
  0x8a   : > { %5033 = vmatprep.subr.bf16.mxu1 %v6010_v21  ;;  %5551 = vmatpush3.bf16.msra.mxu0 %v6011_v14  ;;  %v708_v14 = vrot.slane %v6635_v3, 1  ;;  %v335_v27 = vshll.u32 %v6644_v15, 16  ;;  %v448_v53 = vrot.slane %v6644_v15, 1 }
  0x8b   : > { %5034 = vmatpush3.bf16.msra.mxu1 %v6012_v22  ;;  %5552 = vmatprep.subr.bf16.mxu0 %v6018_v31  ;;  %v294_v22 = vld [vmem:[%s6551_s25 + $0x20] sm:$0xff]  ;;  %v622_v34 = vor.u32 %v620_v17, %v618_v11  ;;  %v300_v11 = vld [vmem:[%s6551_s25 + $0x50] sm:$0xff] }
  0x8c   : > { %5035 = vmatprep.subr.bf16.mxu1 %v6013_v26  ;;  %v709_v25 = vsel %vm9668_vm0, %v706_v10, %v708_v14  ;;  %v6657_v33 = vpack.c.bf16 %v295_v23, %v294_v22  ;;  %v337_v37 = vrot.slane %v335_v27, 1  ;;  %v652_v22 = vshrl.u32 %v6629_v59, 16 }
  0x8e   : > { %5553 = vmatpush3.bf16.msra.mxu0 %v6018_v31  ;;  %v626_v31 = vrot.slane %v624_v19, 1  ;;  %v6692_v19 = vpack.c.bf16 %v301_v12, %v300_v11 }
  0x8f   : > { %5036 = vmatpush3.bf16.msra.mxu1 %v6014_v28  ;;  %5554 = vmatprep.subr.bf16.mxu0 %v6024_v56  ;;  %v6026_v28 = vld [vmem:[#allocation5 + $0x238] sm:$0xff]  }
  0x90   : > { %963 = vmatmul.mubr.bf16.gmra.mxu0 %v6561_v32  ;;  %5531 = vmatmul.mubr.bf16.gmra.mxu1 %v699_v35  ;;  %v290_v32 = vld [vmem:[%s6551_s25] sm:$0xff]  ;;  %v627_v44 = vsel %vm9667_vm1, %v622_v34, %v626_v31  ;;  %v6043_v34 = vld [vmem:[#allocation5 + $0x210] sm:$0xff]  }
  0x91   : > { %970 = vmatprep.mubr.bf16.mxu0 %v603_v38  ;;  %5534 = vmatprep.mubr.bf16.mxu1 %v701_v39  ;;  %v6638_v5 = vpack.c.bf16 %v291_v55, %v290_v32  ;;  %v628_v38 = vshrl.u32 %v6601_v20, 16  ;;  %v632_v39 = vshll.u32 %v6611_v36, 16  ;;  %v347_v55 = vshrl.u32 %v6657_v33, 16 }
  0x92   : > { %5037 = vmatprep.subr.bf16.mxu1 %v6015_v42  ;;  %5555 = vmatpush3.bf16.msra.mxu0 %v6024_v56  ;;  %v343_v42 = vshll.u32 %v6657_v33, 16  ;;  %v298_v56 = vld [vmem:[%s6551_s25 + $0x40] sm:$0xff] }
  0x93   : > { %5038 = vmatpush3.bf16.msra.mxu1 %v6016_v43  ;;  %v330_v16 = vshll.u32 %v6638_v5, 16  ;;  %5556 = vmatprep.subr.bf16.mxu0 %v6025_v6  ;;  %v328_v21 = vshrl.u32 %v6638_v5, 16  ;;  %v297_v43 = vld [vmem:[%s6551_s25 + $0x38] sm:$0xff]  ;;  %v630_v48 = vor.u32 %v628_v38, %v626_v31  ;;  %v634_v49 = vrot.slane %v632_v39, 1 }
  0x94   : > { %5039 = vmatprep.subr.bf16.mxu1 %v6017_v45  ;;  %v6668_v46 = vpack.c.bf16 %v297_v43, %v296_v40  ;;  %v345_v51 = vrot.slane %v343_v42, 1  ;;  %v6048_v40 = vld [vmem:[#allocation5 + $0x208] sm:$0xff]   ;;  %v306_v43 = vld [vmem:[%s6551_s25 + $0x80] sm:$0xff] }
  0x95   : > { %v332_v26 = vrot.slane %v330_v16, 1  ;;  %v635_v32 = vsel %vm9667_vm1, %v630_v48, %v634_v49  ;;  %v650_v16 = vrot.slane %v648_v7, 1  ;;  %v310_v7 = vld [vmem:[%s6551_s25 + $0xa0] sm:$0xff] }
  0x96   : > { %5557 = vmatpush3.bf16.msra.mxu0 %v6025_v6  ;;  %v351_v54 = vshll.u32 %v6668_v46, 16  ;;  %v644_v6 = vshrl.u32 %v6617_v41, 16 }
  0x97   : > { %5040 = vmatpush3.bf16.msra.mxu1 %v6019_v52  ;;  %5558 = vmatprep.subr.bf16.mxu0 %v6027_v9  ;;  %v333_v35 = vor.u32 %v332_v26, %v328_v21  ;;  %v636_v52 = vshrl.u32 %v6611_v36, 16  ;;  %v6038_v21 = vld [vmem:[#allocation5 + $0x218] sm:$0xff]   ;;  %v304_v26 = vld [vmem:[%s6551_s25 + $0x70] sm:$0xff] }
  0x98   : > { %971 = vmatmul.mubr.bf16.gmra.mxu0 %v6572_v47  ;;  %5535 = vmatmul.mubr.bf16.gmra.mxu1 %v703_v58  ;;  %v6023_v47 = vld [vmem:[#allocation5] sm:$0xff]   ;;  %v299_v58 = vld [vmem:[%s6551_s25 + $0x48] sm:$0xff] }
  0x99   : > { %978 = vmatprep.mubr.bf16.mxu0 %v611_v1  ;;  %5538 = vmatprep.mubr.bf16.mxu1 %v705_v2  ;;  %v338_v45 = vsel %vm9667_vm1, %v333_v35, %v337_v37  ;;  %v349_v1 = vor.u32 %v347_v55, %v345_v51  ;;  %v6680_v2 = vpack.c.bf16 %v299_v58, %v298_v56  ;;  %v450_v55 = vrot.slane %v6657_v33, 1 }
  0x9a   : > { %5041 = vmatprep.subr.bf16.mxu1 %v6020_v62  ;;  %5559 = vmatpush3.bf16.msra.mxu0 %v6027_v9  ;;  %v353_v62 = vrot.slane %v351_v54, 1 }
  0x9b   : > { %5042 = vmatpush3.bf16.msra.mxu1 %v6021_v0  ;;  %5560 = vmatprep.subr.bf16.mxu0 %v6029_v29  ;;  %v638_v0 = vor.u32 %v636_v52, %v634_v49  ;;  %v359_v10 = vshll.u32 %v6680_v2, 16  ;;  %v363_v23 = vshrl.u32 %v6680_v2, 16  ;;  %v660_v49 = vshrl.u32 %v6635_v3, 16 }
  0x9c   : > { %5043 = vmatprep.subr.bf16.mxu1 %v6022_v8  ;;  %v354_v9 = vsel %vm9667_vm1, %v349_v1, %v353_v62  ;;  %v447_v52 = vrot.slane %v6638_v5, 1 }
  0x9d   : > { %v643_v8 = vsel %vm9667_vm1, %v638_v0, %v642_v61 }
  0x9e   : > { %5561 = vmatpush3.bf16.msra.mxu0 %v6029_v29  ;;  %v367_v29 = vshll.u32 %v6692_v19, 16 }
  0x9f   : > { %5044 = vmatpush3.bf16.msra.mxu1 %v6023_v47  ;;  %5137 = vmatprep.subr.bf16.mxu0 %v6031_v30  ;;  %v646_v47 = vor.u32 %v644_v6, %v642_v61  ;;  %v305_v30 = vld [vmem:[%s6551_s25 + $0x78] sm:$0xff] }
  0xa0   : > { %979 = vmatmul.mubr.bf16.gmra.mxu0 %v6579_v57  ;;  %5539 = vmatmul.mubr.bf16.gmra.mxu1 %v707_v18  ;;  %v339_v57 = vshrl.u32 %v6644_v15, 16  ;;  %v361_v18 = vrot.slane %v359_v10, 1  ;;  %v6708_v35 = vpack.c.bf16 %v305_v30, %v304_v26  ;;  %v6034_v26 = vld [vmem:[#allocation5 + $0x1f0] sm:$0xff]  }
  0xa1   : > { %986 = vmatprep.mubr.bf16.mxu0 %v619_v24  ;;  %5542 = vmatprep.mubr.bf16.mxu1 %v709_v25  ;;  %v302_v24 = vld [vmem:[%s6551_s25 + $0x60] sm:$0xff]  ;;  %v303_v25 = vld [vmem:[%s6551_s25 + $0x68] sm:$0xff]  ;;  %v651_v27 = vsel %vm9667_vm1, %v646_v47, %v650_v16  ;;  %v449_v47 = vsel %vm9668_vm0, %v447_v52, %v448_v53 }
  0xa2   : > { %5586 = vmatprep.subr.bf16.mxu1 %v6026_v28  ;;  %v341_v50 = vor.u32 %v339_v57, %v337_v37  ;;  %v6706_v31 = vpack.c.bf16 %v303_v25, %v302_v24  ;;  %v654_v37 = vor.u32 %v652_v22, %v650_v16  ;;  %v365_v39 = vor.u32 %v363_v23, %v361_v18  ;;  %v313_v16 = vld [vmem:[%s6551_s25 + $0xb8] sm:$0x3] }
  0xa3   : > { %v369_v57 = vrot.slane %v367_v29, 1  ;;  %v460_v12 = vrot.slane %v6708_v35, 1  ;;  %v6032_v25 = vld [vmem:[#allocation5 + $0x1b8] sm:$0xff]  }
  0xa4   : > { %v375_v42 = vshll.u32 %v6706_v31, 16 }
  0xa5   : > { %v370_v48 = vsel %vm9667_vm1, %v365_v39, %v369_v57  ;;  %v6037_v39 = vld [vmem:[#allocation5 + $0x1a8] sm:$0xff]  }
  0xa8   : > { %987 = vmatmul.mubr.bf16.gmra.mxu0 %v6584_v63  ;;  %5543 = vmatmul.mubr.bf16.gmra.mxu1 %v708_v14  ;;  %v346_v63 = vsel %vm9667_vm1, %v341_v50, %v345_v51  ;;  %v6033_v14 = vld [vmem:[#allocation5 + $0x220] sm:$0xff]   ;;  %v371_v50 = vshrl.u32 %v6692_v19, 16  ;;  %v379_v51 = vshrl.u32 %v6706_v31, 16 }
  0xa9   : > { %994 = vmatprep.mubr.bf16.mxu0 %v627_v44  ;;  %1346 = vmatprep.mubr.bf16.mxu1 %v338_v45  ;;  %v307_v44 = vld [vmem:[%s6551_s25 + $0x88] sm:$0xff] }
  0xaa   : > { %v6721_v54 = vpack.c.bf16 %v307_v44, %v306_v43  ;;  %v373_v58 = vor.u32 %v371_v50, %v369_v57  ;;  %v6042_v50 = vld [vmem:[#allocation5 + $0x198] sm:$0xff]  }
  0xac   : > { %v391_v61 = vshll.u32 %v6721_v54, 16 }
  0xb0   : > { %995 = vmatmul.mubr.bf16.gmra.mxu0 %v6594_v13  ;;  %1347 = vmatmul.mubr.bf16.vlgmr.msra.gmra.mxu1 %v6638_v5  ;;  %v355_v13 = vshrl.u32 %v6668_v46, 16  ;;  %v387_v5 = vshrl.u32 %v6708_v35, 16 }
  0xb1   : > { %1002 = vmatprep.mubr.bf16.mxu0 %v635_v32  ;;  %1354 = vmatprep.mubr.bf16.mxu1 %v346_v63  ;;  %v6051_v32 = vld [vmem:[#allocation5 + $0x200] sm:$0xff]   ;;  %v377_v63 = vrot.slane %v375_v42, 1 }
  0xb2   : > { %5587 = vmatpush3.bf16.msra.mxu1 %v6026_v28  ;;  %v357_v17 = vor.u32 %v355_v13, %v353_v62  ;;  %v309_v62 = vld [vmem:[%s6551_s25 + $0x98] sm:$0xff]  ;;  %v6039_v42 = vld [vmem:[#allocation5 + $0x1e0] sm:$0xff]  }
  0xb3   : > { %5588 = vmatprep.subr.bf16.mxu1 %v6028_v60  ;;  %v378_v1 = vsel %vm9667_vm1, %v373_v58, %v377_v63  ;;  %v381_v13 = vor.u32 %v379_v51, %v377_v63  ;;  %v6044_v51 = vld [vmem:[#allocation5 + $0x1d0] sm:$0xff]   ;;  %v4727_v63 = vld [vmem:[%s6551_s25 + $0x24] sm:$0xff] }
  0xb4   : > { %v362_v28 = vsel %vm9667_vm1, %v357_v17, %v361_v18  ;;  %v6049_v58 = vld [vmem:[#allocation5 + $0x1c0] sm:$0xff]  }
  0xb6   : > { %5589 = vmatpush3.bf16.msra.mxu1 %v6028_v60  ;;  %v454_v60 = vrot.slane %v6680_v2, 1 }
  0xb7   : > { %5590 = vmatprep.subr.bf16.mxu1 %v6030_v4 }
  0xb8   : > { %1003 = vmatmul.mubr.bf16.gmra.mxu0 %v6601_v20  ;;  %1355 = vmatmul.mubr.bf16.gmra.mxu1 %v6644_v15  ;;  %v656_v20 = vshll.u32 %v6635_v3, 16  ;;  %v452_v15 = vrot.slane %v6668_v46, 1 }
  0xb9   : > { %1010 = vmatprep.mubr.bf16.mxu0 %v643_v8  ;;  %1362 = vmatprep.mubr.bf16.mxu1 %v354_v9  ;;  %v393_v8 = vrot.slane %v391_v61, 1  ;;  %v311_v9 = vld [vmem:[%s6551_s25 + $0xa8] sm:$0xff] }
  0xba   : > { %5591 = vmatpush3.bf16.msra.mxu1 %v6030_v4  ;;  %v658_v38 = vrot.slane %v656_v20, 1  ;;  %v456_v4 = vrot.slane %v6692_v19, 1  ;;  %v6749_v17 = vpack.c.bf16 %v311_v9, %v310_v7  ;;  %v453_v30 = vsel %vm9668_vm0, %v450_v55, %v452_v15 }
  0xbb   : > { %5592 = vmatprep.subr.bf16.mxu1 %v6033_v14  ;;  %v455_v43 = vsel %vm9668_vm0, %v452_v15, %v454_v60  ;;  %v4729_v15 = vld [vmem:[%s6551_s25 + $0x34] sm:$0xff] }
  0xbc   : > { %v659_v45 = vsel %vm9667_vm1, %v654_v37, %v658_v38  ;;  %v662_v0 = vor.u32 %v660_v49, %v658_v38  ;;  %v407_v23 = vshll.u32 %v6749_v17, 16  ;;  %v411_v24 = vshrl.u32 %v6749_v17, 16  ;;  %v6036_v37 = vld [vmem:[#allocation5 + $0x1e8] sm:$0xff]  }
  0xbe   : > { %5593 = vmatpush3.bf16.msra.mxu1 %v6033_v14  ;;  %v312_v14 = vld [vmem:[%s6551_s25 + $0xb0] sm:$0xff]  ;;  %v409_v57 = vrot.slane %v407_v23, 1 }
  0xbf   : > { %5594 = vmatprep.subr.bf16.mxu1 %v6038_v21  ;;  %v6754_v22 = vpack.c.bf16 %v313_v16, %v312_v14 }
  0xc0   : > { %1011 = vmatmul.mubr.bf16.gmra.mxu0 %v6611_v36  ;;  %1363 = vmatmul.mubr.bf16.gmra.mxu1 %v6657_v33  ;;  %v383_v36 = vshll.u32 %v6708_v35, 16  ;;  %v395_v33 = vshrl.u32 %v6721_v54, 16 }
  0xc1   : > { %1018 = vmatprep.mubr.bf16.mxu0 %v651_v27  ;;  %1370 = vmatprep.mubr.bf16.mxu1 %v362_v28  ;;  %v415_v27 = vshll.u32 %v6754_v22, 16  ;;  %v451_v28 = vsel %vm9668_vm0, %v448_v53, %v450_v55  ;;  %v4728_v55 = vld [vmem:[%s6551_s25 + $0x2c] sm:$0xff] }
  0xc2   : > { %5595 = vmatpush3.bf16.msra.mxu1 %v6038_v21  ;;  %v385_v56 = vrot.slane %v383_v36, 1  ;;  %v462_v21 = vrot.slane %v6721_v54, 1  ;;  %v397_v38 = vor.u32 %v395_v33, %v393_v8  ;;  %v457_v36 = vsel %vm9668_vm0, %v454_v60, %v456_v4 }
  0xc3   : > { %5596 = vmatprep.subr.bf16.mxu1 %v6043_v34  ;;  %v419_v33 = vshrl.u32 %v6754_v22, 16 }
  0xc4   : > { %v389_v20 = vor.u32 %v387_v5, %v385_v56  ;;  %v6047_v5 = vld [vmem:[#allocation5 + $0x188] sm:$0xff]  }
  0xc6   : > { %5597 = vmatpush3.bf16.msra.mxu1 %v6043_v34  ;;  %v394_v29 = vsel %vm9667_vm1, %v389_v20, %v393_v8  ;;  %v6035_v34 = vld [vmem:[#allocation5 + $0x1b0] sm:$0xff]  }
  0xc7   : > { %5598 = vmatprep.subr.bf16.mxu1 %v6048_v40 }
  0xc8   : > { %1019 = vmatmul.mubr.bf16.gmra.mxu0 %v6617_v41  ;;  %1371 = vmatmul.mubr.bf16.gmra.mxu1 %v6668_v46  ;;  %v308_v41 = vld [vmem:[%s6551_s25 + $0x90] sm:$0xff]  ;;  %v458_v46 = vrot.slane %v6706_v31, 1 }
  0xc9   : > { %1026 = vmatprep.mubr.bf16.mxu0 %v659_v45  ;;  %1378 = vmatprep.mubr.bf16.mxu1 %v370_v48  ;;  %v6738_v6 = vpack.c.bf16 %v309_v62, %v308_v41  ;;  %v6040_v45 = vld [vmem:[#allocation5 + $0x1a0] sm:$0xff]   ;;  %v6041_v48 = vld [vmem:[#allocation5 + $0x1d8] sm:$0xff]   ;;  %v1596_v41 = vpack.c.bf16 %v4728_v55, %v4727_v63 }
  0xca   : > { %5599 = vmatpush3.bf16.msra.mxu1 %v6048_v40  ;;  %v417_v40 = vrot.slane %v415_v27, 1  ;;  %v461_v53 = vsel %vm9668_vm0, %v458_v46, %v460_v12  ;;  %v4730_v62 = vld [vmem:[%s6551_s25 + $0x3c] sm:$0xff] }
  0xcb   : > { %5600 = vmatprep.subr.bf16.mxu1 %v6051_v32  ;;  %v399_v10 = vshll.u32 %v6738_v6, 16  ;;  %v403_v11 = vshrl.u32 %v6738_v6, 16  ;;  %v1609_v8 = vshrl.u32 %v1596_v41, 16  ;;  %v1727_v16 = vrot.slane %v1596_v41, 1 }
  0xcc   : > { %v421_v7 = vor.u32 %v419_v33, %v417_v40 }
  0xcd   : > { %v401_v18 = vrot.slane %v399_v10, 1 }
  0xce   : > { %5601 = vmatpush3.bf16.msra.mxu1 %v6051_v32  ;;  %v6045_v32 = vld [vmem:[#allocation5 + $0x190] sm:$0xff]  }
  0xcf   : > { %v402_v44 = vsel %vm9667_vm1, %v397_v38, %v401_v18  ;;  %v405_v49 = vor.u32 %v403_v11, %v401_v18  ;;  %v4731_v11 = vld [vmem:[%s6551_s25 + $0x44] sm:$0xff]  ;;  %v4733_v18 = vld [vmem:[%s6551_s25 + $0x54] sm:$0xff] }
  0xd0   : > { %1027 = vmatmul.mubr.bf16.gmra.mxu0 %v6629_v59  ;;  %1379 = vmatmul.mubr.bf16.gmra.mxu1 %v6680_v2  ;;  %v386_v59 = vsel %vm9667_vm1, %v381_v13, %v385_v56  ;;  %v459_v2 = vsel %vm9668_vm0, %v456_v4, %v458_v46  ;;  %v413_v56 = vor.u32 %v411_v24, %v409_v57  ;;  %v1611_v4 = vshll.u32 %v1596_v41, 16 }
  0xd1   : > { %1034 = vmatprep.mubr.bf16.mxu0 %v662_v0  ;;  %1386 = vmatprep.mubr.bf16.mxu1 %v378_v1  ;;  %v410_v52 = vsel %vm9667_vm1, %v405_v49, %v409_v57  ;;  %v468_v0 = vrot.slane %v6754_v22, 1  ;;  %v6805_v1 = vpack.c.bf16 %v4730_v62, %v4729_v15  ;;  %v4739_v49 = vld [vmem:[%s6551_s25 + $0x84] sm:$0xff]  ;;  %v4746_v62 = vld [vmem:[%s6551_s25 + $0xbc] sm:$0xff] }
  0xd2   : > { %v418_v60 = vsel %vm9667_vm1, %v413_v56, %v417_v40  ;;  %v1613_v9 = vrot.slane %v1611_v4, 1 }
  0xd3   : > { %v1616_v10 = vshll.u32 %v6805_v1, 16  ;;  %v1620_v23 = vshrl.u32 %v6805_v1, 16 }
  0xd5   : > { %v1618_v14 = vrot.slane %v1616_v10, 1  ;;  %v4747_v10 = vld [vmem:[%s6551_s25 + $0xc4] sm:$0xff] }
  0xd7   : > { %v1622_v27 = vor.u32 %v1620_v23, %v1618_v14 }
  0xd8   : > { %1035 = vmatmul.mubr.bf16.gmra.mxu0 %v6635_v3  ;;  %1387 = vmatmul.mubr.bf16.gmra.mxu1 %v6692_v19  ;;  %v464_v3 = vrot.slane %v6738_v6, 1  ;;  %v6046_v19 = vld [vmem:[#allocation5 + $0x1c8] sm:$0xff]  }
  0xd9   : > { %1394 = vmatprep.mubr.bf16.mxu1 %v386_v59  ;;  %5562 = vmatprep.mubr.bf16.mxu0 %v449_v47  ;;  %v1728_v59 = vrot.slane %v6805_v1, 1 }
  0xda   : > { %v465_v61 = vsel %vm9668_vm0, %v462_v21, %v464_v3 }
  0xe0   : > { %1395 = vmatmul.mubr.bf16.gmra.mxu1 %v6706_v31  ;;  %5563 = vmatmul.mubr.bf16.vlgmr.msra.gmra.mxu0 %v451_v28  ;;  %v463_v31 = vsel %vm9668_vm0, %v460_v12, %v462_v21  ;;  %v4732_v12 = vld [vmem:[%s6551_s25 + $0x4c] sm:$0xff]  ;;  %v4734_v21 = vld [vmem:[%s6551_s25 + $0x5c] sm:$0xff] }
  0xe1   : > { %5138 = vmatpush3.bf16.msra.mxu0 %v6032_v25  ;;  %1402 = vmatprep.mubr.bf16.mxu1 %v394_v29  ;;  %v6816_v47 = vpack.c.bf16 %v4732_v12, %v4731_v11  ;;  %v6825_v25 = vpack.c.bf16 %v4734_v21, %v4733_v18  ;;  %v4735_v29 = vld [vmem:[%s6551_s25 + $0x64] sm:$0xff]  ;;  %v4748_v11 = vld [vmem:[%s6551_s25 + $0xcc] sm:$0xff]  ;;  %v4749_v12 = vld [vmem:[%s6551_s25 + $0xd4] sm:$0xff] }
  0xe2   : > { %5139 = vmatprep.subr.bf16.mxu0 %v6034_v26  ;;  %5566 = vmatprep.mubr.bf16.mxu0 %v453_v30  ;;  %v4736_v30 = vld [vmem:[%s6551_s25 + $0x6c] sm:$0xff] }
  0xe3   : > { %v1624_v24 = vshll.u32 %v6816_v47, 16  ;;  %v1730_v26 = vrot.slane %v6816_v47, 1  ;;  %v1732_v28 = vrot.slane %v6825_v25, 1  ;;  %v1632_v40 = vshll.u32 %v6825_v25, 16 }
  0xe5   : > { %5140 = vmatpush3.bf16.msra.mxu0 %v6035_v34  ;;  %v4737_v34 = vld [vmem:[%s6551_s25 + $0x74] sm:$0xff]  ;;  %v1731_v38 = vsel %vm9668_vm0, %v1728_v59, %v1730_v26 }
  0xe6   : > { %5141 = vmatprep.subr.bf16.mxu0 %v6036_v37  ;;  %v4738_v37 = vld [vmem:[%s6551_s25 + $0x7c] sm:$0xff] }
  0xe8   : > { %1403 = vmatmul.mubr.bf16.gmra.mxu1 %v6708_v35  ;;  %5567 = vmatmul.mubr.bf16.gmra.mxu0 %v455_v43  ;;  %v466_v35 = vrot.slane %v6749_v17, 1  ;;  %v6840_v43 = vpack.c.bf16 %v4738_v37, %v4737_v34 }
  0xe9   : > { %5142 = vmatpush3.bf16.msra.mxu0 %v6037_v39  ;;  %1410 = vmatprep.mubr.bf16.mxu1 %v402_v44  ;;  %v6835_v39 = vpack.c.bf16 %v4736_v30, %v4735_v29 }
  0xea   : > { %5570 = vmatprep.mubr.bf16.mxu0 %v457_v36  ;;  %5143 = vmatprep.subr.bf16.mxu0 %v6039_v42  ;;  %v467_v46 = vsel %vm9668_vm0, %v464_v3, %v466_v35  ;;  %v469_v13 = vsel %vm9668_vm0, %v466_v35, %v468_v0  ;;  %v1626_v3 = vrot.slane %v1624_v24, 1  ;;  %v1733_v42 = vsel %vm9668_vm0, %v1730_v26, %v1732_v28 }
  0xeb   : > { %v1734_v44 = vrot.slane %v6835_v39, 1  ;;  %v1640_v63 = vshll.u32 %v6835_v39, 16  ;;  %v1644_v33 = vshrl.u32 %v6835_v39, 16 }
  0xec   : > { %v1627_v57 = vsel %vm9667_vm1, %v1622_v27, %v1626_v3 }
  0xed   : > { %5144 = vmatpush3.bf16.msra.mxu0 %v6040_v45  ;;  %v1634_v45 = vrot.slane %v1632_v40, 1 }
  0xee   : > { %5145 = vmatprep.subr.bf16.mxu0 %v6041_v48  ;;  %v1736_v48 = vrot.slane %v6840_v43, 1 }
  0xf0   : > { %1411 = vmatmul.mubr.bf16.gmra.mxu1 %v6721_v54  ;;  %5571 = vmatmul.mubr.bf16.gmra.mxu0 %v459_v2  ;;  %v6050_v54 = vld [vmem:[#allocation5 + $0x180] sm:$0xff]   ;;  %v4741_v2 = vld [vmem:[%s6551_s25 + $0x94] sm:$0xff]  ;;  %v1737_v55 = vsel %vm9668_vm0, %v1734_v44, %v1736_v48 }
  0xf1   : > { %1418 = vmatprep.mubr.bf16.mxu1 %v410_v52  ;;  %5574 = vmatprep.mubr.bf16.mxu0 %v461_v53  ;;  %v1735_v52 = vsel %vm9668_vm0, %v1732_v28, %v1734_v44  ;;  %v1636_v53 = vshrl.u32 %v6825_v25, 16 }
  0xf2   : > { %5146 = vmatpush3.bf16.msra.mxu0 %v6042_v50  ;;  %v4740_v50 = vld [vmem:[%s6551_s25 + $0x8c] sm:$0xff] }
  0xf3   : > { %5147 = vmatprep.subr.bf16.mxu0 %v6044_v51  ;;  %v4742_v51 = vld [vmem:[%s6551_s25 + $0x9c] sm:$0xff] }
  0xf4   : > { %v6855_v56 = vpack.c.bf16 %v4742_v51, %v4741_v2 }
  0xf6   : > { %5148 = vmatpush3.bf16.msra.mxu0 %v6045_v32  ;;  %v6850_v32 = vpack.c.bf16 %v4740_v50, %v4739_v49  ;;  %v1740_v15 = vrot.slane %v6855_v56, 1  ;;  %v1664_v29 = vshll.u32 %v6855_v56, 16 }
  0xf7   : > { %5149 = vmatprep.subr.bf16.mxu0 %v6046_v19 }
  0xf8   : > { %1419 = vmatmul.mubr.bf16.gmra.mxu1 %v6738_v6  ;;  %5575 = vmatmul.mubr.bf16.gmra.mxu0 %v463_v31  ;;  %v1614_v6 = vor.u32 %v1613_v9, %v1609_v8  ;;  %v1638_v31 = vor.u32 %v1636_v53, %v1634_v45  ;;  %v1656_v18 = vshll.u32 %v6850_v32, 16  ;;  %v1660_v28 = vshrl.u32 %v6850_v32, 16 }
  0xf9   : > { %1426 = vmatprep.mubr.bf16.mxu1 %v418_v60  ;;  %5578 = vmatprep.mubr.bf16.mxu0 %v465_v61  ;;  %v4743_v60 = vld [vmem:[%s6551_s25 + $0xa4] sm:$0xff]  ;;  %v4744_v61 = vld [vmem:[%s6551_s25 + $0xac] sm:$0xff]  ;;  %v1666_v34 = vrot.slane %v1664_v29, 1 }
  0xfa   : > { %5150 = vmatpush3.bf16.msra.mxu0 %v6047_v5  ;;  %v1619_v20 = vsel %vm9667_vm1, %v1614_v6, %v1618_v14  ;;  %v1738_v5 = vrot.slane %v6850_v32, 1  ;;  %v4750_v6 = vld [vmem:[%s6551_s25 + $0xdc] sm:$0x3]  ;;  %v1652_v14 = vshrl.u32 %v6840_v43, 16  ;;  %v1658_v24 = vrot.slane %v1656_v18, 1 }
  0xfb   : > { %5151 = vmatprep.subr.bf16.mxu0 %v6049_v58  ;;  %v1642_v58 = vrot.slane %v1640_v63, 1 }
  0xfc   : > { %v1739_v35 = vsel %vm9668_vm0, %v1736_v48, %v1738_v5  ;;  %v1741_v4 = vsel %vm9668_vm0, %v1738_v5, %v1740_v15 }
  0xfe   : > { %5152 = vmatpush3.bf16.msra.mxu0 %v6050_v54  ;;  %v1643_v54 = vsel %vm9667_vm1, %v1638_v31, %v1642_v58 }
 0x100   : > { %1427 = vmatmul.mubr.bf16.gmra.mxu1 %v6749_v17  ;;  %5579 = vmatmul.mubr.bf16.gmra.mxu0 %v467_v46  ;;  %v1729_v17 = vsel %vm9668_vm0, %v1727_v16, %v1728_v59  ;;  %v6882_v59 = vpack.c.bf16 %v4748_v11, %v4747_v10 }
 0x101   : > { %1434 = vmatprep.mubr.bf16.mxu1 %v421_v7  ;;  %5582 = vmatprep.mubr.bf16.mxu0 %v469_v13  ;;  %v1646_v13 = vor.u32 %v1644_v33, %v1642_v58 }
 0x102   : > { %v1688_v31 = vshll.u32 %v6882_v59, 16 }
 0x108   : > { %1435 = vmatmul.mubr.bf16.gmra.mxu1 %v6754_v22  ;;  %5583 = vmatmul.mubr.bf16.gmra.mxu0 %v468_v0  ;;  %v1628_v22 = vshrl.u32 %v6816_v47, 16  ;;  %v6866_v0 = vpack.c.bf16 %v4744_v61, %v4743_v60 }
 0x109   : > { %1986 = vmatprep.mubr.bf16.mxu0 %v1619_v20  ;;  %5602 = vmatprep.mubr.bf16.mxu1 %v1729_v17  ;;  %v6887_v20 = vpack.c.bf16 %v4750_v6, %v4749_v12  ;;  %v1746_v17 = vrot.slane %v6882_v59, 1 }
 0x10a   : > { %v1630_v36 = vor.u32 %v1628_v22, %v1626_v3  ;;  %v1742_v7 = vrot.slane %v6866_v0, 1  ;;  %v1672_v22 = vshll.u32 %v6866_v0, 16 }
 0x10b   : > { %v1748_v26 = vrot.slane %v6887_v20, 1 }
 0x10c   : > { %v1635_v19 = vsel %vm9667_vm1, %v1630_v36, %v1634_v45  ;;  %v1743_v16 = vsel %vm9668_vm0, %v1740_v15, %v1742_v7  ;;  %v1674_v40 = vrot.slane %v1672_v22, 1 }
 0x10d   : > { %v1749_v30 = vsel %vm9668_vm0, %v1746_v17, %v1748_v26 }
 0x110   : > { %1987 = vmatmul.mubr.bf16.vlgmr.msra.gmra.mxu0 %v1596_v41  ;;  %5603 = vmatmul.mubr.bf16.vlgmr.msra.gmra.mxu1 %v1731_v38  ;;  %v4745_v41 = vld [vmem:[%s6551_s25 + $0xb4] sm:$0xff]  ;;  %v1668_v38 = vshrl.u32 %v6855_v56, 16 }
 0x111   : > { %1994 = vmatprep.mubr.bf16.mxu0 %v1627_v57  ;;  %5606 = vmatprep.mubr.bf16.mxu1 %v1733_v42  ;;  %v6871_v46 = vpack.c.bf16 %v4746_v62, %v4745_v41  ;;  %v1690_v62 = vrot.slane %v1688_v31, 1  ;;  %v6055_v31 = vld [vmem:[#allocation7 + $0x130] sm:$0xff]  }
 0x112   : > { %v1670_v57 = vor.u32 %v1668_v38, %v1666_v34 }
 0x113   : > { %v1744_v9 = vrot.slane %v6871_v46, 1  ;;  %v1680_v44 = vshll.u32 %v6871_v46, 16  ;;  %v1684_v5 = vshrl.u32 %v6871_v46, 16 }
 0x114   : > { %v1675_v42 = vsel %vm9667_vm1, %v1670_v57, %v1674_v40  ;;  %v6052_v57 = vld [vmem:[#allocation7 + $0x138] sm:$0xff]  }
 0x115   : > { %v1745_v21 = vsel %vm9668_vm0, %v1742_v7, %v1744_v9  ;;  %v1747_v27 = vsel %vm9668_vm0, %v1744_v9, %v1746_v17  ;;  %v1682_v2 = vrot.slane %v1680_v44, 1  ;;  %v1696_v9 = vshll.u32 %v6887_v20, 16  ;;  %v6054_v44 = vld [vmem:[#allocation7 + $0x178] sm:$0xff]   ;;  %5245 = vmatprep.subr.bf16.mxu1 %v6052_v57 }
 0x117   : > { %v1686_v41 = vor.u32 %v1684_v5, %v1682_v2  ;;  %v6970_v5 = vstv %s4776_s6 }
 0x118   : > { %1995 = vmatmul.mubr.bf16.gmra.mxu0 %v6805_v1  ;;  %5607 = vmatmul.mubr.bf16.gmra.mxu1 %v1735_v52  ;;  %v1648_v1 = vshll.u32 %v6840_v43, 16 }
 0x119   : > { %2002 = vmatprep.mubr.bf16.mxu0 %v1635_v19  ;;  %5610 = vmatprep.mubr.bf16.mxu1 %v1737_v55 }
 0x11a   : > { %v1650_v8 = vrot.slane %v1648_v1, 1 }
 0x11c   : > { %v1654_v23 = vor.u32 %v1652_v14, %v1650_v8 }
 0x11e   : > { %v1659_v3 = vsel %vm9667_vm1, %v1654_v23, %v1658_v24 }
 0x120   : > { %2003 = vmatmul.mubr.bf16.gmra.mxu0 %v6816_v47  ;;  %5611 = vmatmul.mubr.bf16.gmra.mxu1 %v1739_v35  ;;  %v1651_v47 = vsel %vm9667_vm1, %v1646_v13, %v1650_v8  ;;  %v1691_v13 = vsel %vm9667_vm1, %v1686_v41, %v1690_v62  ;;  %v1692_v8 = vshrl.u32 %v6882_v59, 16 }
 0x121   : > { %2010 = vmatprep.mubr.bf16.mxu0 %v1643_v54  ;;  %5614 = vmatprep.mubr.bf16.mxu1 %v1741_v4 }
 0x128   : > { %2011 = vmatmul.mubr.bf16.gmra.mxu0 %v6825_v25  ;;  %5615 = vmatmul.mubr.bf16.gmra.mxu1 %v1743_v16  ;;  %v1662_v25 = vor.u32 %v1660_v28, %v1658_v24  ;;  %v1694_v16 = vor.u32 %v1692_v8, %v1690_v62  ;;  %v1700_v28 = vshrl.u32 %v6887_v20, 16 }
 0x129   : > { %2018 = vmatprep.mubr.bf16.mxu0 %v1651_v47  ;;  %5618 = vmatprep.mubr.bf16.mxu1 %v1745_v21  ;;  %v1698_v47 = vrot.slane %v1696_v9, 1  ;;  %v6057_v9 = vld [vmem:[#allocation7 + $0x128] sm:$0xff]  }
 0x12a   : > { %v1667_v37 = vsel %vm9667_vm1, %v1662_v25, %v1666_v34 }
 0x12b   : > { %v1702_v22 = vor.u32 %v1700_v28, %v1698_v47 }
 0x130   : > { %2019 = vmatmul.mubr.bf16.gmra.mxu0 %v6835_v39  ;;  %5619 = vmatmul.mubr.bf16.gmra.mxu1 %v1747_v27  ;;  %v1676_v39 = vshrl.u32 %v6866_v0, 16 }
 0x131   : > { %2026 = vmatprep.mubr.bf16.mxu0 %v1659_v3  ;;  %5622 = vmatprep.mubr.bf16.mxu1 %v1749_v30 }
 0x132   : > { %v1678_v50 = vor.u32 %v1676_v39, %v1674_v40  ;;  %v6053_v40 = vld [vmem:[#allocation7 + $0xf8] sm:$0xff]  }
 0x133   : > { %5246 = vmatpush3.bf16.msra.mxu1 %v6053_v40 }
 0x134   : > { %v1683_v55 = vsel %vm9667_vm1, %v1678_v50, %v1682_v2  ;;  %5247 = vmatprep.subr.bf16.mxu1 %v6055_v31 }
 0x138   : > { %2027 = vmatmul.mubr.bf16.gmra.mxu0 %v6840_v43  ;;  %5623 = vmatmul.mubr.bf16.gmra.mxu1 %v1748_v26 }
 0x139   : > { %2034 = vmatprep.mubr.bf16.mxu0 %v1667_v37 }
 0x140   : > { %v4937_v36 = vpop.f32.mrf.mxu0  ;;  %v5524_v45 = vpop.f32.mrf.mxu1  ;;  %2035 = vmatmul.mubr.bf16.gmra.mxu0 %v6850_v32 }
 0x141   : > { %2042 = vmatprep.mubr.bf16.mxu0 %v1675_v42 }
 0x142   : > { %v4938_v48 = vpop.f32.mrf.mxu0  ;;  %v1076_v49 = vpop.f32.mrf.mxu1 }
 0x143   : > { %v4939_v43 = vadd.f32 %v4938_v48, %v4937_v36 }
 0x144   : > { %v4940_v51 = vpop.f32.mrf.mxu0  ;;  %v5525_v52 = vpop.f32.mrf.mxu1 }
 0x145   : > { %v6906_v53 = vadd.f32 %v4939_v43, %v1076_v49  ;;  %v2286_v49 = vlaneseq }
 0x146   : > { %v4941_v19 = vpop.f32.mrf.mxu0  ;;  %v6908_v63 = vpop.f32.mrf.mxu1 }
 0x147   : > { %v6913_v32 = vadd.f32 %v4941_v19, %v4940_v51 }
 0x148   : > { %v4943_v58 = vpop.f32.mrf.mxu0  ;;  %v5528_v15 = vpop.f32.mrf.mxu1  ;;  %2043 = vmatmul.mubr.bf16.gmra.mxu0 %v6855_v56 }
 0x149   : > { %2050 = vmatprep.mubr.bf16.mxu0 %v1683_v55  ;;  %v6966_v55 = vshrl.u32 %v2286_v49, 7 }
 0x14a   : > { %v4944_v60 = vpop.f32.mrf.mxu0  ;;  %v1092_v61 = vpop.f32.mrf.mxu1 }
 0x14b   : > { %v4945_v35 = vadd.f32 %v4944_v60, %v4943_v58  ;;  %v6056_v58 = vld [vmem:[#allocation7 + $0xf0] sm:$0xff]   ;;  %v2288_v8 = vadd.s32 8, %v6966_v55  ;;  %v2290_v40 = vadd.s32 24, %v6966_v55 }
 0x14c   : > { %v4946_v33 = vpop.f32.mrf.mxu0  ;;  %v5529_v54 = vpop.f32.mrf.mxu1  ;;  %5248 = vmatpush3.bf16.msra.mxu1 %v6056_v58 }
 0x14d   : > { %v6916_v1 = vadd.f32 %v5524_v45, %v4945_v35  ;;  %v6981_v35 = vadd.s32 %v6970_v5, %v6966_v55  ;;  %5249 = vmatprep.subr.bf16.mxu1 %v6057_v9  ;;  %v6995_v28 = vadd.s32 %v6970_v5, %v2288_v8  ;;  %v7023_v8 = vadd.s32 %v6970_v5, %v2290_v40  ;;  %v6069_v9 = vld [vmem:[#allocation7 + $0x150] sm:$0xff]  }
 0x14e   : > { %v4947_v4 = vpop.f32.mrf.mxu0  ;;  %v6918_v7 = vpop.f32.mrf.mxu1  ;;  %v2292_v40 = vadd.s32 40, %v6966_v55 }
 0x14f   : > { %v4948_v56 = vadd.f32 %v4947_v4, %v4946_v33  ;;  %v6062_v33 = vld [vmem:[#allocation7 + $0x168] sm:$0xff]   ;;  %vm2404_vm2 = vcmp.lt.s32.totalorder %v6981_v35, 0  ;;  %vm2415_vm4 = vcmp.lt.s32.totalorder %v6995_v28, 0  ;;  %vm2437_vm8 = vcmp.lt.s32.totalorder %v7023_v8, 0 }
 0x150   : > { %v4949_v10 = vpop.f32.mrf.mxu0  ;;  %v6923_v11 = vpop.f32.mrf.mxu1  ;;  %2051 = vmatmul.mubr.bf16.gmra.mxu0 %v6866_v0  ;;  %v1699_v0 = vsel %vm9667_vm1, %v1694_v16, %v1698_v47  ;;  %v6060_v16 = vld [vmem:[#allocation7 + $0x120] sm:$0xff]  }
 0x151   : > { %v6926_v12 = vadd.f32 %v5525_v52, %v4948_v56  ;;  %2058 = vmatprep.mubr.bf16.mxu0 %v1691_v13  ;;  %v6065_v47 = vld [vmem:[#allocation7 + $0x160] sm:$0xff]  }
 0x152   : > { %v4950_v6 = vpop.f32.mrf.mxu0  ;;  %v1108_v14 = vpop.f32.mrf.mxu1 }
 0x153   : > { %v4951_v18 = vadd.f32 %v4950_v6, %v4949_v10  ;;  %v6058_v6 = vld [vmem:[#allocation7 + $0xe8] sm:$0xff]  }
 0x154   : > { %v6928_v21 = vpop.f32.mrf.mxu0  ;;  %v6930_v17 = vpop.f32.mrf.mxu1  ;;  %5250 = vmatpush3.bf16.msra.mxu1 %v6058_v6 }
 0x155   : > { %v6932_v23 = vadd.f32 %v4951_v18, %v1092_v61  ;;  %v6059_v61 = vld [vmem:[#allocation7 + $0x170] sm:$0xff]   ;;  %5251 = vmatprep.subr.bf16.mxu1 %v6060_v16 }
 0x156   : > { %v6934_v24 = vpop.f32.mrf.mxu0  ;;  %v6936_v26 = vpop.f32.mrf.mxu1 }
 0x158   : > { %v4955_v27 = vpop.f32.mrf.mxu0  ;;  %v6939_v3 = vpop.f32.mrf.mxu1  ;;  %2059 = vmatmul.mubr.bf16.gmra.mxu0 %v6871_v46  ;;  %v9644_v46 = vmov 0.0  }
 0x159   : > { %2066 = vmatprep.mubr.bf16.mxu0 %v1699_v0  ;;  %5626 = vmatprep.subr.bf16.mxu0 %v9644_v46 }
 0x15a   : > { %v4956_v29 = vpop.f32.mrf.mxu0  ;;  %v6943_v30 = vpop.f32.mrf.mxu1  ;;  %5627 = vmatpush3.bf16.msra.mxu0 %v6054_v44 }
 0x15b   : > { %v4957_v25 = vadd.f32 %v4956_v29, %v4955_v27  ;;  %5628 = vmatprep.subr.bf16.mxu0 %v9644_v46 }
 0x15c   : > { %v4958_v34 = vpop.f32.mrf.mxu0  ;;  %v6945_v37 = vpop.f32.mrf.mxu1 }
 0x15d   : > { %v6947_v38 = vadd.f32 %v5528_v15, %v4957_v25 }
 0x15e   : > { %v4959_v42 = vpop.f32.mrf.mxu0  ;;  %v6949_v39 = vpop.f32.mrf.mxu1  ;;  %5629 = vmatpush3.bf16.msra.mxu0 %v6059_v61 }
 0x15f   : > { %v4960_v36 = vadd.f32 %v4959_v42, %v4958_v34  ;;  %5630 = vmatprep.subr.bf16.mxu0 %v9644_v46  ;;  %v2289_v34 = vadd.s32 16, %v6966_v55  ;;  %v6067_v42 = vld [vmem:[#allocation7 + $0x158] sm:$0xff]  }
 0x160   : > { %v4961_v45 = vpop.f32.mrf.mxu0  ;;  %v6952_v48 = vpop.f32.mrf.mxu1  ;;  %2067 = vmatmul.mubr.bf16.gmra.mxu0 %v6882_v59 }
 0x161   : > { %v6955_v50 = vadd.f32 %v5529_v54, %v4960_v36  ;;  %2074 = vmatprep.mubr.bf16.mxu0 %v1702_v22  ;;  %v6061_v22 = vld [vmem:[#allocation7 + $0xe0] sm:$0xff]  }
 0x162   : > { %v4962_v2 = vpop.f32.mrf.mxu0  ;;  %v6957_v43 = vpop.f32.mrf.mxu1  ;;  %5631 = vmatpush3.bf16.msra.mxu0 %v6062_v33  ;;  %5252 = vmatpush3.bf16.msra.mxu1 %v6061_v22  ;;  %v6064_v33 = vld [vmem:[#allocation7 + $0xd8] sm:$0xff]   ;;  %v6072_v22 = vld [vmem:[#allocation7 + $0x148] sm:$0xff]  }
 0x163   : > { %v4963_v51 = vadd.f32 %v4962_v2, %v4961_v45  ;;  %5632 = vmatprep.subr.bf16.mxu0 %v9644_v46  ;;  %v2416_v2 = vsub.s32 0, %v6995_v28 }
 0x164   : > { %v6962_v52 = vpop.f32.mrf.mxu0  ;;  %v6964_v19 = vpop.f32.mrf.mxu1 }
 0x165   : > { %v6968_v59 = vadd.f32 %v4963_v51, %v1108_v14  ;;  %v6063_v51 = vld [vmem:[#allocation7 + $0x118] sm:$0xff]   ;;  %v7031_v6 = vmin.u32 %v2416_v2, %v6995_v28 }
 0x166   : > { %v6972_v15 = vpop.f32.mrf.mxu0  ;;  %v6974_v60 = vpop.f32.mrf.mxu1  ;;  %5633 = vmatpush3.bf16.msra.mxu0 %v6065_v47  ;;  %5253 = vmatprep.subr.bf16.mxu1 %v6063_v51 }
 0x167   : > { %5634 = vmatprep.subr.bf16.mxu0 %v9644_v46  ;;  %5254 = vmatpush3.bf16.msra.mxu1 %v6064_v33 }
 0x168   : > { %v4967_v41 = vpop.f32.mrf.mxu0  ;;  %v6976_v62 = vpop.f32.mrf.mxu1  ;;  %2075 = vmatmul.mubr.bf16.gmra.mxu0 %v6887_v20  ;;  %v2405_v20 = vsub.s32 0, %v6981_v35 }
 0x169   : > { %5642 = vmatprep.mubr.msk.bf16.mxu0 %vm9665_vm3, %v9644_v46 }
 0x16a   : > { %v4968_v54 = vpop.f32.mrf.mxu0  ;;  %v6983_v4 = vpop.f32.mrf.mxu1  ;;  %5635 = vmatpush3.bf16.msra.mxu0 %v6067_v42 }
 0x16b   : > { %v4969_v13 = vadd.f32 %v4968_v54, %v4967_v41  ;;  %v7014_v41 = vadd.s32 %v6970_v5, %v2289_v34  ;;  %5636 = vmatprep.subr.bf16.mxu0 %v9644_v46  ;;  %v2438_v34 = vsub.s32 0, %v7023_v8 }
 0x16c   : > { %v4970_v56 = vpop.f32.mrf.mxu0  ;;  %v5545_v10 = vpop.f32.mrf.mxu1 }
 0x16d   : > { %v6989_v14 = vadd.f32 %v6923_v11, %v4969_v13  ;;  %v6998_v11 = vmin.u32 %v2405_v20, %v6981_v35  ;;  %v1080_v20 = vadd.f32 %v6913_v32, %v6908_v63  ;;  %vm2426_vm7 = vcmp.lt.s32.totalorder %v7014_v41, 0 }
 0x16e   : > { %v4971_v18 = vpop.f32.mrf.mxu0  ;;  %v6991_v0 = vpop.f32.mrf.mxu1  ;;  %5637 = vmatpush3.bf16.msra.mxu0 %v6069_v9  ;;  %v6071_v9 = vld [vmem:[#allocation7 + $0xc8] sm:$0xff]   ;;  %vm2360_vm3 = vcmp.lt.s32.totalorder %v7014_v41, 288 }
 0x16f   : > { %9792 = vst [vmem:[#allocation18_spill] sm:$0xff] %v6991_v0  ;;  %v4972_v27 = vadd.f32 %v4971_v18, %v4970_v56  ;;  %v2427_v18 = vsub.s32 0, %v7014_v41  ;;  %5638 = vmatprep.subr.bf16.mxu0 %v9644_v46 }
 0x170   : > { %v4973_v29 = vpop.f32.mrf.mxu0  ;;  %v5045_v25 = vpop.f32.mrf.mxu1 }
 0x171   : > { %v7002_v57 = vadd.f32 %v6930_v17, %v4972_v27  ;;  %v7010_v17 = vmul.u32.u64.low 3817748708, %v6998_v11  ;;  %v7011_v61 = vmul.u32.u64.high 3817748708, %v6998_v11, %v7010_v17  ;;  %v2291_v27 = vadd.s32 32, %v6966_v55 }
 0x172   : > { %v4974_v44 = vpop.f32.mrf.mxu0  ;;  %v5046_v36 = vpop.f32.mrf.mxu1  ;;  %v7046_v17 = vmin.u32 %v2427_v18, %v7014_v41  ;;  %5639 = vmatpush3.bf16.msra.mxu0 %v6072_v22 }
 0x173   : > { %v4975_v45 = vadd.f32 %v4974_v44, %v4973_v29  ;;  %v5047_v49 = vadd.f32 %v5046_v36, %v5045_v25  ;;  %v6068_v29 = vld [vmem:[#allocation7 + $0xd0] sm:$0xff]   ;;  %v7049_v33 = vadd.s32 %v6970_v5, %v2291_v27  ;;  %5640 = vmatprep.subr.bf16.mxu0 %v9644_v46  ;;  %v6073_v27 = vld [vmem:[#allocation7 + $0x100] sm:$0xff]  }
 0x174   : > { %v7007_v31 = vpop.f32.mrf.mxu0  ;;  %v5048_v58 = vpop.f32.mrf.mxu1 }
 0x175   : > { %v7017_v54 = vadd.f32 %v4975_v45, %v6943_v30  ;;  %v7020_v13 = vadd.f32 %v5047_v49, %v6906_v53  ;;  %v6066_v53 = vld [vmem:[#allocation7 + $0x110] sm:$0xff]   ;;  %v7041_v36 = vmul.u32.u64.low 3817748708, %v7031_v6  ;;  %v7042_v45 = vmul.u32.u64.high 3817748708, %v7031_v6, %v7041_v36  ;;  %v6070_v49 = vld [vmem:[#allocation7 + $0x108] sm:$0xff]   ;;  %9794 = vst [vmem:[#allocation20_spill] sm:$0xff] %v7049_v33 }
 0x176   : > { %v7025_v56 = vpop.f32.mrf.mxu0  ;;  %v5049_v10 = vpop.f32.mrf.mxu1  ;;  %5255 = vmatprep.subr.bf16.mxu1 %v6066_v53  ;;  %v6074_v53 = vld [vmem:[#allocation7 + $0x140] sm:$0xff]   ;;  %v2449_v22 = vsub.s32 0, %v7049_v33 }
 0x177   : > { %v5050_v30 = vadd.f32 %v5049_v10, %v5048_v58  ;;  %5256 = vmatpush3.bf16.msra.mxu1 %v6068_v29  ;;  %v2410_v58 = vshrl.u32 %v7011_v61, 4  ;;  %5641 = vmatpush3.bf16.msra.mxu0 %v6074_v53 }
 0x178   : > { %v4979_v16 = vpop.f32.mrf.mxu0  ;;  %v5051_v47 = vpop.f32.mrf.mxu1  ;;  %5257 = vmatprep.subr.bf16.mxu1 %v6070_v49  ;;  %5678 = vmatprep.subr.bf16.mxu0 %v9644_v46 }
 0x179   : > { %v7035_v25 = vadd.f32 %v5050_v30, %v1080_v20  ;;  %v7058_v30 = vmin.u32 %v2438_v34, %v7023_v8 }
 0x17a   : > { %v4980_v63 = vpop.f32.mrf.mxu0  ;;  %v5052_v32 = vpop.f32.mrf.mxu1 }
 0x17b   : > { %9793 = vst [vmem:[#allocation19_spill] sm:$0xff] %v7035_v25  ;;  %v4981_v42 = vadd.f32 %v4980_v63, %v4979_v16  ;;  %v5053_v44 = vadd.f32 %v5052_v32, %v5051_v47  ;;  %v7061_v47 = vadd.s32 %v6970_v5, %v2292_v40  ;;  %5258 = vmatpush3.bf16.msra.mxu1 %v6071_v9  ;;  %v2411_v63 = vmul.u32 18, %v2410_v58 }
 0x17c   : > { %v4982_v2 = vpop.f32.mrf.mxu0  ;;  %v5054_v51 = vpop.f32.mrf.mxu1  ;;  %v7065_v34 = vmul.u32.u64.low 3817748708, %v7046_v17  ;;  %v7066_v32 = vmul.u32.u64.high 3817748708, %v7046_v17, %v7065_v34  ;;  %v7076_v36 = vmul.u32.u64.low 3817748708, %v7058_v30  ;;  %v7077_v49 = vmul.u32.u64.high 3817748708, %v7058_v30, %v7076_v36  ;;  %5259 = vmatprep.subr.bf16.mxu1 %v6073_v27 }
 0x17d   : > { %v7052_v10 = vadd.f32 %v6939_v3, %v4981_v42  ;;  %v7055_v20 = vadd.f32 %v5053_v44, %v6916_v1  ;;  %9795 = vst [vmem:[#allocation21_spill] sm:$0xff] %v7061_v47  ;;  %v6075_v42 = vld [vmem:[#allocation7 + $0xc0] sm:$0xff]   ;;  %v2460_v58 = vsub.s32 0, %v7061_v47  ;;  %v2412_v34 = vsub.s32 %v6998_v11, %v2411_v63 }
 0x17e   : > { %v4983_v61 = vpop.f32.mrf.mxu0  ;;  %v5055_v16 = vpop.f32.mrf.mxu1 }
 0x17f   : > { %v4984_v18 = vadd.f32 %v4983_v61, %v4982_v2  ;;  %v5056_v3 = vadd.f32 %v5055_v16, %v5054_v51  ;;  %5260 = vmatpush3.bf16.msra.mxu1 %v6075_v42  ;;  %v2413_v63 = vsub.s32 0, %v2412_v34 }
 0x180   : > { %v4985_v29 = vpop.f32.mrf.mxu0  ;;  %v5057_v1 = vpop.f32.mrf.mxu1 }
 0x181   : > { %v7070_v44 = vadd.f32 %v6945_v37, %v4984_v18  ;;  %v7073_v40 = vadd.f32 %v5056_v3, %v6926_v12  ;;  %v4954_v37 = vadd.f32 %v6934_v24, %v6928_v21  ;;  %v2421_v12 = vshrl.u32 %v7042_v45, 4 }
 0x182   : > { %v4986_v2 = vpop.f32.mrf.mxu0  ;;  %v5058_v51 = vpop.f32.mrf.mxu1  ;;  %v7087_v3 = vmin.u32 %v2449_v22, %v7049_v33  ;;  %v7099_v24 = vmin.u32 %v2460_v58, %v7061_v47  ;;  %v2293_v45 = vadd.s32 48, %v6966_v55  ;;  %v2443_v58 = vshrl.u32 %v7077_v49, 4 }
 0x183   : > { %v4987_v9 = vadd.f32 %v4986_v2, %v4985_v29  ;;  %v5059_v61 = vadd.f32 %v5058_v51, %v5057_v1  ;;  %v1096_v29 = vadd.f32 %v4954_v37, %v6918_v7  ;;  %v2422_v22 = vmul.u32 18, %v2421_v12 }
 0x184   : > { %v7084_v16 = vpop.f32.mrf.mxu0  ;;  %v5060_v18 = vpop.f32.mrf.mxu1  ;;  %v2432_v2 = vshrl.u32 %v7066_v32, 4  ;;  %v7113_v7 = vmul.u32.u64.low 3817748708, %v7099_v24  ;;  %v7114_v37 = vmul.u32.u64.high 3817748708, %v7099_v24, %v7113_v7  ;;  %v7117_v12 = vadd.s32 %v6970_v5, %v2293_v45 }
 0x185   : > { %v7090_v53 = vadd.f32 %v4987_v9, %v6957_v43  ;;  %v7093_v27 = vadd.f32 %v5059_v61, %v6932_v23  ;;  %v7105_v23 = vmul.u32.u64.low 3817748708, %v7087_v3  ;;  %v7106_v51 = vmul.u32.u64.high 3817748708, %v7087_v3, %v7105_v23 }
 0x186   : > { %v7096_v42 = vpop.f32.mrf.mxu0  ;;  %v5061_v21 = vpop.f32.mrf.mxu1  ;;  %9797 = vst [vmem:[#allocation23_spill] sm:$0xff] %v7117_v12  ;;  %v2433_v49 = vmul.u32 18, %v2432_v2  ;;  %v7130_v45 = vsel %vm2404_vm2, %v2413_v63, %v2412_v34 }
 0x187   : > { %v5062_v1 = vadd.f32 %v5061_v21, %v5060_v18  ;;  %v2423_v21 = vsub.s32 %v7031_v6, %v2422_v22  ;;  %9798 = vst [vmem:[#allocation24_spill] sm:$0xff] %v7130_v45  ;;  %vm2657_vm5 = vcmp.ne.s32.totalorder %v7130_v45, 0  ;;  %v2454_v34 = vshrl.u32 %v7106_v51, 4 }
 0x188   : > { %v4991_v36 = vpop.f32.mrf.mxu0  ;;  %v5063_v43 = vpop.f32.mrf.mxu1  ;;  %vm2680_vm6 = vcmp.lt.s32.totalorder %v7130_v45, 0 }
 0x189   : > { %v7108_v11 = vadd.f32 %v5062_v1, %v1096_v29  ;;  %v2424_v46 = vsub.s32 0, %v2423_v21  ;;  %vm7184_vm9 = vmand %vm2680_vm6, %vm2657_vm5  ;;  %vm2459_vm5 = vcmp.lt.s32.totalorder %v7061_v47, 0 }
 0x18a   : > { %v4992_v9 = vpop.f32.mrf.mxu0  ;;  %v5064_v61 = vpop.f32.mrf.mxu1 }
 0x18b   : > { %9796 = vst [vmem:[#allocation22_spill] sm:$0xff] %v7108_v11  ;;  %v4993_v32 = vadd.f32 %v4992_v9, %v4991_v36  ;;  %v5065_v18 = vadd.f32 %v5064_v61, %v5063_v43  ;;  %v2444_v36 = vmul.u32 18, %v2443_v58  ;;  %v6076_v43 = vld [vmem:[#allocation7 + $0x78] sm:$0xff]   ;;  %v2471_v9 = vsub.s32 0, %v7117_v12 }
 0x18c   : > { %v4994_v29 = vpop.f32.mrf.mxu0  ;;  %v5066_v1 = vpop.f32.mrf.mxu1  ;;  %5332 = vmatprep.subr.bf16.mxu1 %v6076_v43  ;;  %v7147_v43 = vadd.s32 18, %v7130_v45 }
 0x18d   : > { %v7123_v23 = vadd.f32 %v6952_v48, %v4993_v32  ;;  %v7126_v11 = vadd.f32 %v5065_v18, %v6947_v38  ;;  %v2434_v38 = vsub.s32 %v7046_v17, %v2433_v49  ;;  %v2445_v32 = vsub.s32 %v7058_v30, %v2444_v36 }
 0x18e   : > { %v4995_v6 = vpop.f32.mrf.mxu0  ;;  %v5067_v22 = vpop.f32.mrf.mxu1  ;;  %v2294_v18 = vadd.s32 56, %v6966_v55  ;;  %9799 = vst [vmem:[#allocation25_spill] sm:$0xff] %v7147_v43  ;;  %v2465_v17 = vshrl.u32 %v7114_v37, 4  ;;  %v7151_v51 = vmin.u32 %v2471_v9, %v7117_v12  ;;  %v7157_v30 = vsel %vm2415_vm4, %v2424_v46, %v2423_v21 }
 0x18f   : > { %v4996_v61 = vadd.f32 %v4995_v6, %v4994_v29  ;;  %v5068_v7 = vadd.f32 %v5067_v22, %v5066_v1  ;;  %9800 = vst [vmem:[#allocation26_spill] sm:$0xff] %v7157_v30  ;;  %v2435_v22 = vsub.s32 0, %v2434_v38  ;;  %v2455_v37 = vmul.u32 18, %v2454_v34 }
 0x190   : > { %v4997_v2 = vpop.f32.mrf.mxu0  ;;  %v5069_v48 = vpop.f32.mrf.mxu1  ;;  %v2295_v34 = vadd.s32 64, %v6966_v55  ;;  %vm2658_vm10 = vcmp.ne.s32.totalorder %v7157_v30, 0  ;;  %vm2681_vm11 = vcmp.lt.s32.totalorder %v7157_v30, 0  ;;  %vm2448_vm4 = vcmp.lt.s32.totalorder %v7049_v33, 0 }
 0x191   : > { %v7138_v63 = vadd.f32 %v6964_v19, %v4996_v61  ;;  %v7141_v58 = vadd.f32 %v5068_v7, %v6955_v50  ;;  %v4966_v50 = vadd.f32 %v6972_v15, %v6962_v52  ;;  %v2446_v15 = vsub.s32 0, %v2445_v32  ;;  %vm7219_vm13 = vmand %vm2681_vm11, %vm2658_vm10 }
 0x192   : > { %v4998_v29 = vpop.f32.mrf.mxu0  ;;  %v5070_v1 = vpop.f32.mrf.mxu1  ;;  %v7170_v61 = vadd.s32 %v6970_v5, %v2294_v18  ;;  %v2466_v7 = vmul.u32 18, %v2465_v17  ;;  %v7191_v17 = vsel %vm2426_vm7, %v2435_v22, %v2434_v38 }
 0x193   : > { %v4999_v19 = vadd.f32 %v4998_v29, %v4997_v2  ;;  %v5071_v49 = vadd.f32 %v5070_v1, %v5069_v48  ;;  %v7175_v2 = vmul.u32.u64.low 3817748708, %v7151_v51  ;;  %v7176_v48 = vmul.u32.u64.high 3817748708, %v7151_v51, %v7175_v2 }
 0x194   : > { %v7159_v36 = vpop.f32.mrf.mxu0  ;;  %v5072_v6 = vpop.f32.mrf.mxu1  ;;  %v2467_v22 = vsub.s32 %v7099_v24, %v2466_v7  ;;  %vm2659_vm12 = vcmp.ne.s32.totalorder %v7191_v17, 0  ;;  %v9806_v24 = vmov 0  ;;  %vm2682_vm14 = vcmp.lt.s32.totalorder %v7191_v17, 0 }
 0x195   : > { %v7164_v9 = vadd.f32 %v4999_v19, %v6983_v4  ;;  %v7167_v52 = vadd.f32 %v5071_v49, %v6968_v59  ;;  %v1112_v4 = vadd.f32 %v4966_v50, %v6936_v26  ;;  %v9801_v59 = vmov 0  ;;  %vm7251_vm6 = vmand %vm2682_vm14, %vm2659_vm12 }
 0x196   : > { %v7172_v46 = vpop.f32.mrf.mxu0  ;;  %v5073_v21 = vpop.f32.mrf.mxu1  ;;  %v9802_v59 = vsel %vm7184_vm9, 4294967295, %v9801_v59  ;;  %v2456_v19 = vsub.s32 %v7087_v3, %v2455_v37  ;;  %v7199_v50 = vsel %vm2437_vm8, %v2446_v15, %v2445_v32  ;;  %v2482_v49 = vsub.s32 0, %v7170_v61 }
 0x197   : > { %v5074_v29 = vadd.f32 %v5073_v21, %v5072_v6  ;;  %9803 = vst [vmem:[#allocation27_spill] sm:$0xff] %v9802_v59  ;;  %v7208_v3 = vadd.s32 %v6970_v5, %v2295_v34  ;;  %v2296_v37 = vadd.s32 72, %v6966_v55  ;;  %v7212_v32 = vadd.s32 18, %v7157_v30 }
 0x198   : > { %v5003_v18 = vpop.f32.mrf.mxu0  ;;  %v5075_v1 = vpop.f32.mrf.mxu1  ;;  %v9807_v24 = vsel %vm7219_vm13, 4294967295, %v9806_v24  ;;  %vm2660_vm15 = vcmp.ne.s32.totalorder %v7199_v50, 0  ;;  %vm2683_vm2 = vcmp.lt.s32.totalorder %v7199_v50, 0  ;;  %v2457_v7 = vsub.s32 0, %v2456_v19 }
 0x199   : > { %v7194_v26 = vadd.f32 %v5074_v29, %v1112_v4  ;;  %9805 = vst [vmem:[#allocation29_spill] sm:$0xff] %v7212_v32  ;;  %9808 = vst [vmem:[#allocation30_spill] sm:$0xff] %v9807_v24  ;;  %v2476_v38 = vshrl.u32 %v7176_v48, 4  ;;  %v7239_v25 = vadd.s32 %v6970_v5, %v2296_v37  ;;  %v7256_v37 = vadd.s32 18, %v7191_v17 }
 0x19a   : > { %v5004_v6 = vpop.f32.mrf.mxu0  ;;  %v5076_v21 = vpop.f32.mrf.mxu1  ;;  %vm7276_vm7 = vmand %vm2683_vm2, %vm2660_vm15  ;;  %vm2470_vm2 = vcmp.lt.s32.totalorder %v7117_v12, 0 }
 0x19b   : > { %9804 = vst [vmem:[#allocation28_spill] sm:$0xff] %v7194_v26  ;;  %v5005_v2 = vadd.f32 %v5004_v6, %v5003_v18  ;;  %v5077_v4 = vadd.f32 %v5076_v21, %v5075_v1  ;;  %v7234_v1 = vmin.u32 %v2482_v49, %v7170_v61  ;;  %v2493_v26 = vsub.s32 0, %v7208_v3 }
 0x19c   : > { %v5006_v15 = vpop.f32.mrf.mxu0  ;;  %v5078_v29 = vpop.f32.mrf.mxu1  ;;  %v2297_v49 = vadd.s32 80, %v6966_v55 }
 0x19d   : > { %v7227_v34 = vadd.f32 %v6976_v62, %v5005_v2  ;;  %v7230_v18 = vadd.f32 %v5077_v4, %v6989_v14  ;;  %v2468_v15 = vsub.s32 0, %v2467_v22 }
 0x19e   : > { %v5007_v6 = vpop.f32.mrf.mxu0  ;;  %v5079_v21 = vpop.f32.mrf.mxu1  ;;  %v7296_v45 = vadd.s32 %v6970_v5, %v2297_v49 }
 0x19f   : > { %9809 = vst [vmem:[#allocation31_spill] sm:$0xff] %v7227_v34  ;;  %v5080_v62 = vadd.f32 %v5079_v21, %v5078_v29  ;;  %v7259_v29 = vadd.s32 18, %v7199_v50  ;;  %v7263_v6 = vsel %vm2448_vm4, %v2457_v7, %v2456_v19  ;;  %v2298_v21 = vadd.s32 88, %v6966_v55 }
 0x1a0   : > { %v5081_v2 = vpop.f32.mrf.mxu1  ;;  %v5564_v4 = vpop.f32.mrf.mxu0  ;;  %9812 = vst [vmem:[#allocation32_spill] sm:$0xff] %v7263_v6  ;;  %v7281_v24 = vmul.u32.u64.low 3817748708, %v7234_v1  ;;  %v7282_v19 = vmul.u32.u64.high 3817748708, %v7234_v1, %v7281_v24  ;;  %v7284_v47 = vsel %vm2459_vm5, %v2468_v15, %v2467_v22  ;;  %9818 = vst [vmem:[#allocation36_spill] sm:$0xff] %v7296_v45  ;;  %vm2661_vm8 = vcmp.ne.s32.totalorder %v7263_v6, 0 }
 0x1a1   : > { %v7267_v14 = vadd.f32 %v5564_v4, %v7055_v20  ;;  %v7270_v30 = vadd.f32 %v5080_v62, %v7002_v57  ;;  %9816 = vst [vmem:[#allocation34_spill] sm:$0xff] %v7284_v47  ;;  %v2477_v20 = vmul.u32 18, %v2476_v38  ;;  %v7287_v57 = vmin.u32 %v2493_v26, %v7208_v3 }
 0x1a2   : > { %v5082_v7 = vpop.f32.mrf.mxu1  ;;  %v1476_v34 = vpop.f32.mrf.mxu0  ;;  %v2504_v62 = vsub.s32 0, %v7239_v25  ;;  %v4978_v4 = vadd.f32 %v7025_v56, %v7007_v31  ;;  %v7307_v31 = vadd.s32 %v6970_v5, %v2298_v21  ;;  %vm2684_vm10 = vcmp.lt.s32.totalorder %v7263_v6, 0 }
 0x1a3   : > { %9813 = vst [vmem:[#allocation33_spill] sm:$0xff] %v7267_v14  ;;  %v5083_v14 = vadd.f32 %v5082_v7, %v5081_v2  ;;  %v7293_v33 = vadd.f32 %v1476_v34, %v7020_v13  ;;  %v2299_v13 = vadd.s32 96, %v6966_v55  ;;  %vm2662_vm11 = vcmp.ne.s32.totalorder %v7284_v47, 0  ;;  %vm7350_vm14 = vmand %vm2684_vm10, %vm2661_vm8 }
 0x1a4   : > { %v5084_v24 = vpop.f32.mrf.mxu1  ;;  %v5565_v43 = vpop.f32.mrf.mxu0  ;;  %9819 = vst [vmem:[#allocation37_spill] sm:$0xff] %v7307_v31  ;;  %v7322_v49 = vmul.u32.u64.low 3817748708, %v7287_v57  ;;  %v7323_v2 = vmul.u32.u64.high 3817748708, %v7287_v57, %v7322_v49  ;;  %v7326_v21 = vmin.u32 %v2504_v62, %v7239_v25  ;;  %vm2685_vm12 = vcmp.lt.s32.totalorder %v7284_v47, 0 }
 0x1a5   : > { %9817 = vst [vmem:[#allocation35_spill] sm:$0xff] %v7293_v33  ;;  %v7311_v56 = vadd.f32 %v5565_v43, %v7073_v40  ;;  %v7314_v22 = vadd.f32 %v5083_v14, %v7017_v54  ;;  %v1128_v40 = vadd.f32 %v4978_v4, %v6949_v39  ;;  %v2478_v43 = vsub.s32 %v7151_v51, %v2477_v20  ;;  %vm7369_vm15 = vmand %vm2685_vm12, %vm2662_vm11 }
 0x1a6   : > { %v5085_v34 = vpop.f32.mrf.mxu1  ;;  %v7318_v15 = vpop.f32.mrf.mxu0  ;;  %v2515_v14 = vsub.s32 0, %v7296_v45  ;;  %v2526_v26 = vsub.s32 0, %v7307_v31  ;;  %v2300_v49 = vadd.s32 104, %v6966_v55  ;;  %v7343_v51 = vadd.s32 18, %v7263_v6 }
 0x1a7   : > { %9820 = vst [vmem:[#allocation38_spill] sm:$0xff] %v7311_v56  ;;  %9821 = vst [vmem:[#allocation39_spill] sm:$0xff] %v7318_v15  ;;  %v5086_v54 = vadd.f32 %v5085_v34, %v5084_v24  ;;  %v7334_v56 = vadd.s32 %v6970_v5, %v2299_v13  ;;  %v2487_v20 = vshrl.u32 %v7282_v19, 4  ;;  %vm2481_vm4 = vcmp.lt.s32.totalorder %v7170_v61, 0 }
 0x1a8   : > { %v5087_v7 = vpop.f32.mrf.mxu1  ;;  %v5568_v38 = vpop.f32.mrf.mxu0  ;;  %9825 = vst [vmem:[#allocation43_spill] sm:$0xff] %v7343_v51  ;;  %v7374_v15 = vmin.u32 %v2515_v14, %v7296_v45  ;;  %vm2492_vm10 = vcmp.lt.s32.totalorder %v7208_v3, 0  ;;  %vm2503_vm12 = vcmp.lt.s32.totalorder %v7239_v25, 0 }
 0x1a9   : > { %9822 = vst [vmem:[#allocation40_spill] sm:$0xff] %v7334_v56  ;;  %v7338_v62 = vadd.f32 %v5568_v38, %v7126_v11  ;;  %v7340_v39 = vadd.f32 %v5086_v54, %v1128_v40  ;;  %v7355_v11 = vadd.s32 18, %v7284_v47  ;;  %v2301_v40 = vadd.s32 112, %v6966_v55 }
 0x1aa   : > { %v5088_v4 = vpop.f32.mrf.mxu1  ;;  %v1492_v24 = vpop.f32.mrf.mxu0  ;;  %v7358_v38 = vmul.u32.u64.low 3817748708, %v7326_v21  ;;  %v7359_v34 = vmul.u32.u64.high 3817748708, %v7326_v21, %v7358_v38  ;;  %v2488_v59 = vmul.u32 18, %v2487_v20 }
 0x1ab   : > { %9823 = vst [vmem:[#allocation41_spill] sm:$0xff] %v7338_v62  ;;  %9824 = vst [vmem:[#allocation42_spill] sm:$0xff] %v7340_v39  ;;  %v5089_v19 = vadd.f32 %v5088_v4, %v5087_v7  ;;  %v7363_v54 = vadd.f32 %v1492_v24, %v7093_v27  ;;  %v9830_v62 = vmov 0  ;;  %v2479_v39 = vsub.s32 0, %v2478_v43 }
 0x1ac   : > { %9828 = vst [vmem:[#allocation44_spill] sm:$0xff] %v7355_v11  ;;  %v9831_v62 = vsel %vm7369_vm15, 4294967295, %v9830_v62  ;;  %v5090_v33 = vpop.f32.mrf.mxu1  ;;  %v5569_v38 = vpop.f32.mrf.mxu0  ;;  %v7378_v7 = vmin.u32 %v2526_v26, %v7307_v31  ;;  %v2537_v27 = vsub.s32 0, %v7334_v56  ;;  %v7382_v4 = vadd.s32 %v6970_v5, %v2300_v49 }
 0x1ad   : > { %9829 = vst [vmem:[#allocation45_spill] sm:$0xff] %v7363_v54  ;;  %9832 = vst [vmem:[#allocation46_spill] sm:$0xff] %v9831_v62  ;;  %v7385_v24 = vadd.f32 %v5569_v38, %v7141_v58  ;;  %v1405_v54 = vadd.f32 %v5089_v19, %v7052_v10  ;;  %v2498_v58 = vshrl.u32 %v7323_v2, 4  ;;  %v7401_v10 = vadd.s32 %v6970_v5, %v2301_v40 }
 0x1ae   : > { %9833 = vst [vmem:[#allocation47_spill] sm:$0xff] %v7382_v4  ;;  %v5091_v12 = vpop.f32.mrf.mxu1  ;;  %v7392_v0 = vpop.f32.mrf.mxu0  ;;  %v7403_v19 = vsel %vm2470_vm2, %v2479_v39, %v2478_v43  ;;  %v7406_v20 = vmul.u32.u64.low 3817748708, %v7374_v15  ;;  %v7407_v38 = vmul.u32.u64.high 3817748708, %v7374_v15, %v7406_v20  ;;  %v7414_v26 = vmin.u32 %v2537_v27, %v7334_v56 }
 0x1af   : > { %9834 = vst [vmem:[#allocation48_spill] sm:$0xff] %v7385_v24  ;;  %9835 = vst [vmem:[#allocation49_spill] sm:$0xff] %v7392_v0  ;;  %v5092_v49 = vadd.f32 %v5091_v12, %v5090_v33  ;;  %v7410_v0 = vmul.u32.u64.low 3817748708, %v7378_v7  ;;  %v7411_v62 = vmul.u32.u64.high 3817748708, %v7378_v7, %v7410_v0  ;;  %v2548_v2 = vsub.s32 0, %v7382_v4 }
 0x1b0   : > { %9836 = vst [vmem:[#allocation50_spill] sm:$0xff] %v7401_v10  ;;  %v5093_v14 = vpop.f32.mrf.mxu1  ;;  %v5572_v24 = vpop.f32.mrf.mxu0  ;;  %v2489_v12 = vsub.s32 %v7234_v1, %v2488_v59  ;;  %v2302_v43 = vadd.s32 120, %v6966_v55  ;;  %vm2663_vm5 = vcmp.ne.s32.totalorder %v7403_v19, 0  ;;  %v2499_v47 = vmul.u32 18, %v2498_v58 }
 0x1b1   : > { %v7418_v40 = vadd.f32 %v5572_v24, %v7230_v18  ;;  %v1408_v33 = vadd.f32 %v5092_v49, %v7070_v44  ;;  %v2559_v0 = vsub.s32 0, %v7401_v10  ;;  %v2303_v27 = vadd.s32 128, %v6966_v55 }
 0x1b2   : > { %v5094_v39 = vpop.f32.mrf.mxu1  ;;  %v1508_v20 = vpop.f32.mrf.mxu0  ;;  %v4990_v11 = vadd.f32 %v7096_v42, %v7084_v16  ;;  %v2509_v44 = vshrl.u32 %v7359_v34, 4  ;;  %vm2686_vm8 = vcmp.lt.s32.totalorder %v7403_v19, 0  ;;  %v7448_v34 = vadd.s32 %v6970_v5, %v2302_v43 }
 0x1b3   : > { %9837 = vst [vmem:[#allocation51_spill] sm:$0xff] %v7418_v40  ;;  %v5095_v18 = vadd.f32 %v5094_v39, %v5093_v14  ;;  %v7429_v24 = vadd.f32 %v1508_v20, %v7167_v52  ;;  %v7435_v58 = vmul.u32.u64.low 3817748708, %v7414_v26  ;;  %v7436_v49 = vmul.u32.u64.high 3817748708, %v7414_v26, %v7435_v58  ;;  %vm7483_vm11 = vmand %vm2686_vm8, %vm2663_vm5 }
 0x1b4   : > { %v5096_v59 = vpop.f32.mrf.mxu1  ;;  %v5573_v1 = vpop.f32.mrf.mxu0  ;;  %v7439_v40 = vmin.u32 %v2548_v2, %v7382_v4  ;;  %v2490_v52 = vsub.s32 0, %v2489_v12  ;;  %v7453_v20 = vadd.s32 18, %v7403_v19  ;;  %v7456_v58 = vmin.u32 %v2559_v0, %v7401_v10 }
 0x1b5   : > { %9838 = vst [vmem:[#allocation52_spill] sm:$0xff] %v7429_v24  ;;  %v7442_v16 = vadd.f32 %v5573_v1, %v7270_v30  ;;  %v7445_v42 = vadd.f32 %v5095_v18, %v7090_v53  ;;  %v7459_v2 = vadd.s32 %v6970_v5, %v2303_v27  ;;  %v2304_v30 = vadd.s32 136, %v6966_v55 }
 0x1b6   : > { %v5097_v14 = vpop.f32.mrf.mxu1  ;;  %v7450_v39 = vpop.f32.mrf.mxu0  ;;  %v1144_v53 = vadd.f32 %v4990_v11, %v6974_v60  ;;  %v2500_v43 = vsub.s32 %v7287_v57, %v2499_v47  ;;  %v2510_v1 = vmul.u32 18, %v2509_v44  ;;  %v2531_v6 = vshrl.u32 %v7411_v62, 4 }
 0x1b7   : > { %9839 = vst [vmem:[#allocation53_spill] sm:$0xff] %v7442_v16  ;;  %9840 = vst [vmem:[#allocation54_spill] sm:$0xff] %v7450_v39  ;;  %v5098_v18 = vadd.f32 %v5097_v14, %v5096_v59  ;;  %v2520_v39 = vshrl.u32 %v7407_v38, 4  ;;  %v7467_v0 = vmul.u32.u64.low 3817748708, %v7439_v40  ;;  %v7468_v10 = vmul.u32.u64.high 3817748708, %v7439_v40, %v7467_v0 }
 0x1b8   : > { %9841 = vst [vmem:[#allocation55_spill] sm:$0xff] %v7459_v2  ;;  %v5099_v16 = vpop.f32.mrf.mxu1  ;;  %v5576_v24 = vpop.f32.mrf.mxu0  ;;  %v7476_v60 = vsel %vm2481_vm4, %v2490_v52, %v2489_v12  ;;  %v2570_v47 = vsub.s32 0, %v7448_v34  ;;  %v9844_v62 = vmov 0  ;;  %v7493_v12 = vadd.s32 %v6970_v5, %v2304_v30 }
 0x1b9   : > { %v7470_v27 = vadd.f32 %v5576_v24, %v1405_v54  ;;  %v7472_v51 = vadd.f32 %v5098_v18, %v1144_v53  ;;  %v9845_v62 = vsel %vm7483_vm11, 4294967295, %v9844_v62  ;;  %v2581_v24 = vsub.s32 0, %v7459_v2 }
 0x1ba   : > { %v5100_v57 = vpop.f32.mrf.mxu1  ;;  %v1524_v11 = vpop.f32.mrf.mxu0  ;;  %v7488_v54 = vmul.u32.u64.low 3817748708, %v7456_v58  ;;  %v7489_v38 = vmul.u32.u64.high 3817748708, %v7456_v58, %v7488_v54  ;;  %9846 = vst [vmem:[#allocation58_spill] sm:$0xff] %v7493_v12  ;;  %v2501_v52 = vsub.s32 0, %v2500_v43  ;;  %v2511_v14 = vsub.s32 %v7326_v21, %v2510_v1 }
 0x1bb   : > { %9842 = vst [vmem:[#allocation56_spill] sm:$0xff] %v7470_v27  ;;  %9843 = vst [vmem:[#allocation57_spill] sm:$0xff] %v7472_v51  ;;  %v5101_v44 = vadd.f32 %v5100_v57, %v5099_v16  ;;  %v7496_v59 = vadd.f32 %v1524_v11, %v7314_v22  ;;  %v2521_v0 = vmul.u32 18, %v2520_v39  ;;  %v2532_v27 = vmul.u32 18, %v2531_v6 }
 0x1bc   : > { %v5102_v53 = vpop.f32.mrf.mxu1  ;;  %v5577_v18 = vpop.f32.mrf.mxu0  ;;  %v2542_v54 = vshrl.u32 %v7436_v49, 4  ;;  %v7509_v16 = vmin.u32 %v2570_v47, %v7448_v34  ;;  %vm2664_vm2 = vcmp.ne.s32.totalorder %v7476_v60, 0  ;;  %vm2687_vm4 = vcmp.lt.s32.totalorder %v7476_v60, 0 }
 0x1bd   : > { %9847 = vst [vmem:[#allocation59_spill] sm:$0xff] %v7496_v59  ;;  %v7501_v51 = vadd.f32 %v5577_v18, %v1408_v33  ;;  %v1421_v30 = vadd.f32 %v5101_v44, %v7123_v23  ;;  %vm2514_vm5 = vcmp.lt.s32.totalorder %v7296_v45, 0  ;;  %v7517_v6 = vmin.u32 %v2581_v24, %v7459_v2 }
 0x1be   : > { %v5103_v21 = vpop.f32.mrf.mxu1  ;;  %v7511_v1 = vpop.f32.mrf.mxu0  ;;  %v2592_v23 = vsub.s32 0, %v7493_v12  ;;  %vm2337_vm8 = vcmp.ge.s32.totalorder %v7014_v41, 0  ;;  %v7523_v49 = vadd.s32 18, %v7476_v60  ;;  %v7527_v39 = vsel %vm2492_vm10, %v2501_v52, %v2500_v43  ;;  %vm7541_vm10 = vmand %vm2687_vm4, %vm2664_vm2 }
 0x1bf   : > { %9848 = vst [vmem:[#allocation60_spill] sm:$0xff] %v7501_v51  ;;  %9849 = vst [vmem:[#allocation61_spill] sm:$0xff] %v7511_v1  ;;  %v5104_v33 = vadd.f32 %v5103_v21, %v5102_v53  ;;  %v2512_v47 = vsub.s32 0, %v2511_v14  ;;  %v2522_v24 = vsub.s32 %v7374_v15, %v2521_v0  ;;  %v2533_v44 = vsub.s32 %v7378_v7, %v2532_v27 }
 0x1c0   : > { %v5105_v57 = vpop.f32.mrf.mxu1  ;;  %v5580_v11 = vpop.f32.mrf.mxu0  ;;  %v2543_v53 = vmul.u32 18, %v2542_v54  ;;  %v2553_v18 = vshrl.u32 %v7468_v10, 4  ;;  %v9851_v43 = vmov 0  ;;  %v2564_v10 = vshrl.u32 %v7489_v38, 4 }
 0x1c1   : > { %v7534_v21 = vadd.f32 %v5580_v11, %v1421_v30  ;;  %v1424_v22 = vadd.f32 %v5104_v33, %v7138_v63  ;;  %v9852_v43 = vsel %vm7541_vm10, 4294967295, %v9851_v43  ;;  %v7555_v63 = vmin.u32 %v2592_v23, %v7493_v12 }
 0x1c2   : > { %v7546_v52 = vmul.u32.u64.low 3817748708, %v7509_v16  ;;  %v7547_v15 = vmul.u32.u64.high 3817748708, %v7509_v16, %v7546_v52  ;;  %v5106_v7 = vpop.f32.mrf.mxu1  ;;  %v1540_v27 = vpop.f32.mrf.mxu0  ;;  %v7551_v0 = vmul.u32.u64.low 3817748708, %v7517_v6  ;;  %v7552_v54 = vmul.u32.u64.high 3817748708, %v7517_v6, %v7551_v0 }
 0x1c3   : > { %9850 = vst [vmem:[#allocation62_spill] sm:$0xff] %v7534_v21  ;;  %v5002_v30 = vadd.f32 %v7172_v46, %v7159_v36  ;;  %v5107_v33 = vadd.f32 %v5106_v7, %v5105_v57  ;;  %v7560_v11 = vadd.f32 %v1540_v27, %v7445_v42  ;;  %v2305_v38 = vadd.s32 144, %v6966_v55 }
 0x1c4   : > { %v5108_v52 = vpop.f32.mrf.mxu1  ;;  %v5581_v21 = vpop.f32.mrf.mxu0  ;;  %v9854_v23 = vsel %vm7251_vm6, %v7256_v37, %v7191_v17  ;;  %v9855_v0 = vmov 0  ;;  %v7581_v46 = vsel %vm2503_vm12, %v2512_v47, %v2511_v14  ;;  %v2523_v42 = vsub.s32 0, %v2522_v24 }
 0x1c5   : > { %9853 = vst [vmem:[#allocation63_spill] sm:$0xff] %v7560_v11  ;;  %vm7570_vm1 = vcmp.lt.s32.totalorder %v9854_v23, 16  ;;  %v7583_v48 = vadd.f32 %v5581_v21, %v1424_v22  ;;  %v1429_v17 = vadd.f32 %v5107_v33, %v7164_v9  ;;  %v9859_v37 = vsel %vm7276_vm7, %v7259_v29, %v7199_v50  ;;  %v9864_v50 = vld [vmem:[#allocation18_spill] sm:$0xff] }
 0x1c6   : > { %v9856_v0 = vsel %vm7570_vm1, 4294967295, %v9855_v0  ;;  %vm7591_vm6 = vcmp.lt.s32.totalorder %v9859_v37, 16  ;;  %v9860_v57 = vmov 0  ;;  %v2534_v7 = vsub.s32 0, %v2533_v44  ;;  %v5109_v23 = vpop.f32.mrf.mxu1  ;;  %v7595_v36 = vpop.f32.mrf.mxu0 }
 0x1c7   : > { %9857 = vst [vmem:[#allocation64_spill] sm:$0xff] %v9856_v0  ;;  %9858 = vst [vmem:[#allocation65_spill] sm:$0xff] %v7583_v48  ;;  %v9861_v57 = vsel %vm7591_vm6, 4294967295, %v9860_v57  ;;  %v2554_v27 = vmul.u32 18, %v2553_v18  ;;  %v2544_v9 = vsub.s32 %v7414_v26, %v2543_v53  ;;  %v2565_v14 = vmul.u32 18, %v2564_v10 }
 0x1c8   : > { %9862 = vst [vmem:[#allocation66_spill] sm:$0xff] %v9861_v57  ;;  %9863 = vst [vmem:[#allocation67_spill] sm:$0xff] %v7595_v36  ;;  %v7601_v32 = vmul.u32.u64.low 3817748708, %v7555_v63  ;;  %v7602_v22 = vmul.u32.u64.high 3817748708, %v7555_v63, %v7601_v32  ;;  %v1160_v29 = vadd.f32 %v5002_v30, %v9864_v50  ;;  %v5110_v47 = vadd.f32 %v5109_v23, %v5108_v52  ;;  %v5111_v21 = vpop.f32.mrf.mxu1  ;;  %v5584_v33 = vpop.f32.mrf.mxu0  ;;  %v9868_v23 = vld [vmem:[#allocation25_spill] sm:$0xff] }
 0x1c9   : > { %vm2525_vm7 = vcmp.lt.s32.totalorder %v7307_v31, 0  ;;  %v7607_v18 = vadd.s32 %v6970_v5, %v2305_v38  ;;  %vm2688_vm12 = vcmp.lt.s32.totalorder %v7527_v39, 0  ;;  %v7611_v37 = vadd.s32 18, %v7527_v39  ;;  %v9869_v32 = vld [vmem:[#allocation24_spill] sm:$0xff] }
 0x1ca   : > { %v7615_v26 = vadd.f32 %v5110_v47, %v1160_v29  ;;  %v7619_v53 = vsel %vm2514_vm5, %v2523_v42, %v2522_v24  ;;  %v2555_v10 = vsub.s32 %v7439_v40, %v2554_v27  ;;  %v5112_v30 = vpop.f32.mrf.mxu1  ;;  %v1556_v38 = vpop.f32.mrf.mxu0  ;;  %v9870_v50 = vsel %vm7184_vm9, %v9868_v23, %v9869_v32  ;;  %vm7636_vm5 = vmand %vm2337_vm8, %vm2360_vm3  ;;  %v9877_v40 = vld [vmem:[#allocation20_spill] sm:$0xff]  ;;  %v9884_v32 = vld [vmem:[#allocation21_spill] sm:$0xff] }
 0x1cb   : > { %9865 = vst [vmem:[#allocation18_spill] sm:$0xff] %v7607_v18  ;;  %vm7628_vm4 = vcmp.lt.s32.totalorder %v9870_v50, 16  ;;  %v9871_v48 = vmov 0  ;;  %v9874_v24 = vmov 0  ;;  %v7644_v42 = vsel %vm2525_vm7, %v2534_v7, %v2533_v44 }
 0x1cc   : > { %9866 = vst [vmem:[#allocation68_spill] sm:$0xff] %v7615_v26  ;;  %v9872_v48 = vsel %vm7628_vm4, 4294967295, %v9871_v48  ;;  %v9875_v24 = vsel %vm7636_vm5, 4294967295, %v9874_v24  ;;  %v2545_v27 = vsub.s32 0, %v2544_v9  ;;  %v2566_v29 = vsub.s32 %v7456_v58, %v2565_v14  ;;  %v5114_v7 = vpop.f32.mrf.mxu1 }
 0x1cd   : > { %9873 = vst [vmem:[#allocation27_spill] sm:$0xff] %v9872_v48  ;;  %9876 = vst [vmem:[#allocation25_spill] sm:$0xff] %v9875_v24  ;;  %v2575_v47 = vshrl.u32 %v7547_v15, 4  ;;  %v5113_v52 = vadd.f32 %v5112_v30, %v5111_v21  ;;  %v7648_v23 = vadd.f32 %v1556_v38, %v1429_v17  ;;  %vm9879_vm3 = vcmp.lt.s32.totalorder %v7023_v8, 288  ;;  %v5585_v15 = vpop.f32.mrf.mxu0  ;;  %v9889_v21 = vld [vmem:[#allocation43_spill] sm:$0xff]  ;;  %v9890_v30 = vld [vmem:[#allocation32_spill] sm:$0xff] }
 0x1ce   : > { %vm9880_vm9 = vcmp.ge.s32.totalorder %v7023_v8, 0  ;;  %v9881_v41 = vmov 0  ;;  %v2586_v44 = vshrl.u32 %v7552_v54, 4  ;;  %v2603_v58 = vsub.s32 0, %v7607_v18  ;;  %v9888_v54 = vld [vmem:[#allocation31_spill] sm:$0xff]  ;;  %v9898_v7 = vld [vmem:[#allocation50_spill] sm:$0xff] }
 0x1cf   : > { %9878 = vst [vmem:[#allocation24_spill] sm:$0xff] %v7648_v23  ;;  %vm7654_vm8 = vmand %vm9880_vm9, %vm9879_vm3  ;;  %vm9885_vm2 = vcmp.ne.s32.totalorder %v7527_v39, 0  ;;  %v9886_v8 = vmov 0  ;;  %v7671_v17 = vadd.s32 18, %v7581_v46  ;;  %v1437_v14 = vadd.f32 %v5113_v52, %v9888_v54  ;;  %v7696_v13 = vpop.f32.mrf.mxu0  ;;  %v5115_v54 = vpop.f32.mrf.mxu1 }
 0x1d0   : > { %v9882_v41 = vsel %vm7654_vm8, 4294967295, %v9881_v41  ;;  %vm7666_vm10 = vmand %vm2688_vm12, %vm9885_vm2  ;;  %v9891_v38 = vsel %vm7350_vm14, %v9889_v21, %v9890_v30  ;;  %v9892_v50 = vmov 0  ;;  %vm9894_vm12 = vcmp.ne.s32.totalorder %v7581_v46, 0  ;;  %9899 = vst [vmem:[#allocation21_spill] sm:$0xff] %v7696_v13  ;;  %v9909_v54 = vld [vmem:[#allocation44_spill] sm:$0xff]  ;;  %v9910_v13 = vld [vmem:[#allocation34_spill] sm:$0xff] }
 0x1d1   : > { %9883 = vst [vmem:[#allocation20_spill] sm:$0xff] %v9882_v41  ;;  %v9887_v8 = vsel %vm7666_vm10, 4294967295, %v9886_v8  ;;  %vm7682_vm2 = vcmp.lt.s32.totalorder %v9891_v38, 16  ;;  %vm9895_vm7 = vcmp.lt.s32.totalorder %v7581_v46, 0  ;;  %v9896_v15 = vmov 0 }
 0x1d2   : > { %v9893_v50 = vsel %vm7682_vm2, 4294967295, %v9892_v50  ;;  %vm7690_vm3 = vmand %vm9895_vm7, %vm9894_vm12  ;;  %v2556_v52 = vsub.s32 0, %v2555_v10  ;;  %vm9900_vm14 = vcmp.lt.s32.totalorder %v6981_v35, 288  ;;  %vm9901_vm2 = vcmp.ge.s32.totalorder %v6981_v35, 0  ;;  %v9920_v35 = vld [vmem:[#allocation29_spill] sm:$0xff] }
 0x1d3   : > { %v9897_v15 = vsel %vm7690_vm3, 4294967295, %v9896_v15  ;;  %vm7702_vm11 = vmand %vm9901_vm2, %vm9900_vm14  ;;  %v9902_v21 = vmov 0  ;;  %vm9905_vm7 = vcmp.lt.s32.totalorder %v7334_v56, 0  ;;  %v2567_v38 = vsub.s32 0, %v2566_v29 }
 0x1d4   : > { %v9903_v21 = vsel %vm7702_vm11, 4294967295, %v9902_v21  ;;  %v7708_v30 = vsel %vm9905_vm7, %v2545_v27, %v2544_v9  ;;  %v2576_v26 = vmul.u32 18, %v2575_v47  ;;  %v2597_v23 = vshrl.u32 %v7602_v22, 4  ;;  %v7730_v27 = vpop.f32.mrf.mxu1 }
 0x1d5   : > { %9904 = vst [vmem:[#allocation31_spill] sm:$0xff] %v9903_v21  ;;  %9906 = vst [vmem:[#allocation43_spill] sm:$0xff] %v7708_v30  ;;  %v7711_v11 = vadd.f32 %v5584_v33, %v1437_v14  ;;  %v9911_v51 = vsel %vm7369_vm15, %v9909_v54, %v9910_v13  ;;  %v9912_v59 = vmov 0  ;;  %v2587_v9 = vmul.u32 18, %v2586_v44  ;;  %v5153_v33 = vpop.f32.mrf.mxu0  ;;  %v9921_v54 = vld [vmem:[#allocation26_spill] sm:$0xff] }
 0x1d6   : > { %vm7722_vm2 = vcmp.lt.s32.totalorder %v9911_v51, 16  ;;  %v7728_v22 = vmin.u32 %v2603_v58, %v7607_v18  ;;  %v7745_v44 = vadd.s32 18, %v7619_v53  ;;  %v2306_v58 = vadd.s32 152, %v6966_v55 }
 0x1d7   : > { %9907 = vst [vmem:[#allocation32_spill] sm:$0xff] %v7711_v11  ;;  %v9913_v59 = vsel %vm7722_vm2, 4294967295, %v9912_v59  ;;  %vm9914_vm15 = vcmp.lt.s32.totalorder %v6995_v28, 288  ;;  %vm9915_vm12 = vcmp.ge.s32.totalorder %v6995_v28, 0  ;;  %v9916_v14 = vmov 0  ;;  %v5154_v13 = vpop.f32.mrf.mxu0 }
 0x1d8   : > { %vm7752_vm7 = vmand %vm9915_vm12, %vm9914_vm15  ;;  %v9922_v51 = vsel %vm7219_vm13, %v9920_v35, %v9921_v54  ;;  %v9923_v47 = vmov 0  ;;  %vm9926_vm14 = vcmp.ne.s32.totalorder %v7619_v53, 0  ;;  %vm9927_vm0 = vcmp.lt.s32.totalorder %v7619_v53, 0  ;;  %v2116_v35 = vpop.f32.mrf.mxu1  ;;  %v9931_v54 = vld [vmem:[#allocation23_spill] sm:$0xff] }
 0x1d9   : > { %v9917_v14 = vsel %vm7752_vm7, 4294967295, %v9916_v14  ;;  %vm7761_vm9 = vcmp.lt.s32.totalorder %v9922_v51, 16  ;;  %vm7769_vm3 = vmand %vm9927_vm0, %vm9926_vm14  ;;  %v7774_v28 = vadd.s32 18, %v7644_v42  ;;  %vm2669_vm12 = vcmp.ne.s32.totalorder %v7708_v30, 0 }
 0x1da   : > { %9918 = vst [vmem:[#allocation46_spill] sm:$0xff] %v9917_v14  ;;  %v9924_v47 = vsel %vm7761_vm9, 4294967295, %v9923_v47  ;;  %vm2692_vm15 = vcmp.lt.s32.totalorder %v7708_v30, 0  ;;  %vm9930_vm13 = vcmp.lt.s32.totalorder %v7382_v4, 0  ;;  %vm9932_vm14 = vcmp.ne.s32.totalorder %v7644_v42, 0 }
 0x1db   : > { %9925 = vst [vmem:[#allocation44_spill] sm:$0xff] %v9924_v47  ;;  %v7780_v51 = vsel %vm9930_vm13, %v2556_v52, %v2555_v10  ;;  %vm9933_vm7 = vcmp.lt.s32.totalorder %v7644_v42, 0  ;;  %v9934_v36 = vmov 0  ;;  %v7793_v56 = vadd.s32 18, %v7708_v30  ;;  %vm7831_vm10 = vmand %vm2692_vm15, %vm2669_vm12 }
 0x1dc   : > { %vm7788_vm9 = vmand %vm9933_vm7, %vm9932_vm14  ;;  %vm9937_vm13 = vcmp.lt.s32.totalorder %v9898_v7, 0  ;;  %v2577_v52 = vsub.s32 %v7509_v16, %v2576_v26  ;;  %v2598_v4 = vmul.u32 18, %v2597_v23  ;;  %v5155_v1 = vadd.f32 %v5154_v13, %v5153_v33  ;;  %v5156_v26 = vpop.f32.mrf.mxu0 }
 0x1dd   : > { %v9935_v36 = vsel %vm7788_vm9, 4294967295, %v9934_v36  ;;  %9936 = vst [vmem:[#allocation34_spill] sm:$0xff] %v7793_v56  ;;  %v7797_v10 = vsel %vm9937_vm13, %v2567_v38, %v2566_v29  ;;  %v2588_v31 = vsub.s32 %v7517_v6, %v2587_v9  ;;  %vm9938_vm7 = vmand %vm7636_vm5, %vm7570_vm1  ;;  %v9940_v16 = vmov 0  ;;  %v7821_v6 = vpop.f32.mrf.mxu1 }
 0x1de   : > { %v7804_v18 = vmul.u32.u64.low 3817748708, %v7728_v22  ;;  %v7805_v45 = vmul.u32.u64.high 3817748708, %v7728_v22, %v7804_v18  ;;  %vm9939_vm14 = vmand %vm7654_vm8, %vm7591_vm6  ;;  %v9943_v29 = vmov 0  ;;  %v7838_v23 = vadd.s32 %v6970_v5, %v2306_v58 }
 0x1df   : > { %vm7817_vm13 = vmpackc.low %vm9939_vm14, %vm9938_vm7  ;;  %v9944_v29 = vsel %vm7831_vm10, 4294967295, %v9943_v29  ;;  %v2117_v38 = vadd.f32 %v5155_v1, %v2116_v35  ;;  %vm9947_vm12 = vcmp.ge.s32.totalorder %v9877_v40, 0  ;;  %vm9950_vm7 = vnez %v9845_v62  ;;  %v7872_v62 = vld [vmem:[%s9630_s2] ss:$0 sm:$0xff]  ;;  %v9962_v18 = vld [vmem:[#allocation35_spill] sm:$0xff] }
 0x1e0   : > { %v9941_v16 = vsel %vm7817_vm13, 4294967295, %v9940_v16  ;;  %9945 = vst [vmem:[#allocation29_spill] sm:$0xff] %v9944_v29  ;;  %vm9946_vm13 = vcmp.lt.s32.totalorder %v9877_v40, 288  ;;  %v9951_v33 = vsel %vm9950_vm7, %v7453_v20, %v7403_v19  ;;  %v9952_v1 = vmov 0  ;;  %v5157_v19 = vpop.f32.mrf.mxu0  ;;  %v2119_v20 = vpop.f32.mrf.mxu1  ;;  %v9975_v29 = vld [vmem:[#allocation22_spill] sm:$0xff] }
 0x1e1   : > { %9942 = vst [vmem:[#allocation30_spill] sm:$0xff] %v9941_v16  ;;  %vm7848_vm15 = vmand %vm9947_vm12, %vm9946_vm13  ;;  %vm7857_vm14 = vcmp.lt.s32.totalorder %v9951_v33, 16  ;;  %v7866_v40 = vadd.s32 18, %v7780_v51  ;;  %vm9954_vm7 = vcmp.lt.s32.totalorder %v9884_v32, 288  ;;  %vm9955_vm12 = vcmp.ge.s32.totalorder %v9884_v32, 0 }
 0x1e2   : > { %v9953_v1 = vsel %vm7857_vm14, 4294967295, %v9952_v1  ;;  %vm7878_vm0 = vmand %vm9955_vm12, %vm9954_vm7  ;;  %v9956_v13 = vmov 0  ;;  %vm9958_vm6 = vnez %v9852_v43  ;;  %v9960_v33 = vmov 0  ;;  %v7907_v57 = vpop.f32.mrf.mxu1 }
 0x1e3   : > { %v9957_v13 = vsel %vm7878_vm0, 4294967295, %v9956_v13  ;;  %v9959_v35 = vsel %vm9958_vm6, %v7523_v49, %v7476_v60  ;;  %v2578_v58 = vsub.s32 0, %v2577_v52  ;;  %v2599_v32 = vsub.s32 %v7555_v63, %v2598_v4  ;;  %9967 = vst [vmem:[#allocation26_spill] sm:$0xff] %v7907_v57  ;;  %v9976_v57 = vld [vmem:[#allocation49_spill] sm:$0xff] }
 0x1e4   : > { %vm7887_vm13 = vcmp.lt.s32.totalorder %v9959_v35, 16  ;;  %v2210_v16 = vadd.f32 %v2117_v38, %v9962_v18  ;;  %v5158_v7 = vadd.f32 %v5157_v19, %v5156_v26  ;;  %vm9963_vm6 = vcmp.ne.s32.totalorder %v7780_v51, 0  ;;  %v5159_v35 = vpop.f32.mrf.mxu0  ;;  %v9969_v18 = vld [vmem:[#allocation19_spill] sm:$0xff]  ;;  %v7935_v24 = vpop.f32.mrf.mxu1 }
 0x1e5   : > { %v9961_v33 = vsel %vm7887_vm13, 4294967295, %v9960_v33  ;;  %vm9964_vm7 = vcmp.lt.s32.totalorder %v7780_v51, 0  ;;  %v9965_v60 = vmov 0  ;;  %v2589_v49 = vsub.s32 0, %v2588_v31  ;;  %v9970_v38 = vld [vmem:[#allocation39_spill] sm:$0xff] }
 0x1e6   : > { %vm7903_vm12 = vmand %vm9964_vm7, %vm9963_vm6  ;;  %vm9968_vm1 = vnez %v9893_v50  ;;  %v7914_v4 = vadd.s32 18, %v7797_v10  ;;  %v2614_v63 = vsub.s32 0, %v7838_v23  ;;  %v2307_v26 = vadd.s32 160, %v6966_v55  ;;  %v5160_v0 = vpop.f32.mrf.mxu0 }
 0x1e7   : > { %v9966_v60 = vsel %vm7903_vm12, 4294967295, %v9965_v60  ;;  %v1480_v19 = vadd.f32 %v9970_v38, %v9969_v18  ;;  %v2240_v43 = vadd.f32 %v7872_v62, %v2210_v16  ;;  %v2120_v30 = vadd.f32 %v5158_v7, %v2119_v20 }
 0x1e8   : > { %vm9971_vm6 = vcmp.ne.s32.totalorder %v7797_v10, 0  ;;  %vm9972_vm7 = vcmp.lt.s32.totalorder %v7797_v10, 0  ;;  %v9973_v56 = vmov 0  ;;  %v7933_v41 = vadd.f32 %v9976_v57, %v9975_v29 }
 0x1e9   : > { %vm7926_vm8 = vmand %vm9972_vm7, %vm9971_vm6  ;;  %vm9977_vm7 = vcmp.lt.s32.totalorder %v7448_v34, 0  ;;  %v2600_v16 = vsub.s32 0, %v2599_v32  ;;  %v2211_v29 = vadd.f32 %v2120_v30, %v1480_v19  ;;  %v5161_v20 = vadd.f32 %v5160_v0, %v5159_v35 }
 0x1ea   : > { %v9974_v56 = vsel %vm7926_vm8, 4294967295, %v9973_v56  ;;  %v7949_v57 = vsel %vm9977_vm7, %v2578_v58, %v2577_v52  ;;  %vm9978_vm9 = vcmp.lt.s32.totalorder %v7459_v2, 0  ;;  %v2608_v38 = vshrl.u32 %v7805_v45, 4  ;;  %vm9980_vm6 = vmand %vm7848_vm15, %vm9968_vm1  ;;  %v5162_v45 = vpop.f32.mrf.mxu0 }
 0x1eb   : > { %v7955_v18 = vsel %vm9978_vm9, %v2589_v49, %v2588_v31  ;;  %vm9981_vm7 = vmand %vm7878_vm0, %vm7722_vm2  ;;  %v9982_v0 = vmov 0  ;;  %v2263_v30 = vmax.f32 %v2240_v43, 0.0  ;;  %vm9985_vm9 = vnez %v9924_v47  ;;  %v7976_v31 = vpop.f32.mrf.mxu1 }
 0x1ec   : > { %9979 = vst [vmem:[#allocation23_spill] sm:$0xff] %v7955_v18  ;;  %vm7968_vm12 = vmpackc.low %vm9981_vm7, %vm9980_vm6  ;;  %vm9986_vm10 = vnez %v9917_v14  ;;  %v7983_v58 = vmin.u32 %v2614_v63, %v7838_v23  ;;  %v7986_v49 = vadd.s32 %v6970_v5, %v2307_v26  ;;  %v2241_v43 = vadd.f32 %v7872_v62, %v2211_v29  ;;  %v5163_v63 = vpop.f32.mrf.mxu0 }
 0x1ed   : > { %v9983_v0 = vsel %vm7968_vm12, 4294967295, %v9982_v0  ;;  %v2125_v35 = vadd.f32 %v7730_v27, %v5161_v20  ;;  %vm9988_vm6 = vcmp.lt.s32.totalorder %v9931_v54, 288  ;;  %vm9989_vm7 = vcmp.ge.s32.totalorder %v9931_v54, 0  ;;  %v8000_v52 = vpop.f32.mrf.mxu1 }
 0x1ee   : > { %9984 = vst [vmem:[#allocation35_spill] sm:$0xff] %v9983_v0  ;;  %9987 = vst [vmem:[#allocation19_spill] sm:$0xff] %v7986_v49  ;;  %vm9992_vm2 = vcmp.lt.s32.totalorder %v7170_v61, 288  ;;  %vm9993_vm0 = vcmp.ge.s32.totalorder %v7170_v61, 0  ;;  %v9994_v27 = vmov 0  ;;  %v9998_v26 = vmov 0 }
 0x1ef   : > { %vm7994_vm5 = vmand %vm9989_vm7, %vm9988_vm6  ;;  %vm9996_vm6 = vnez %v9887_v8  ;;  %v8020_v29 = vadd.s32 18, %v7949_v57  ;;  %v2264_v20 = vmax.f32 %v2241_v43, 0.0  ;;  %v10002_v8 = vld [vmem:[#allocation33_spill] sm:$0xff]  ;;  %v5164_v0 = vadd.f32 %v5163_v63, %v5162_v45 }
 0x1f0   : > { %vm8006_vm1 = vmand %vm9993_vm0, %vm9992_vm2  ;;  %v9997_v54 = vsel %vm9996_vm6, %v7611_v37, %v7527_v39  ;;  %vm10001_vm2 = vcmp.lt.s32.totalorder %v7493_v12, 0  ;;  %v2212_v7 = vadd.f32 %v2125_v35, %v10002_v8  ;;  %vm10003_vm0 = vnez %v9897_v15  ;;  %v8047_v15 = vpop.f32.mrf.mxu1  ;;  %v10012_v8 = vld [vmem:[#allocation28_spill] sm:$0xff] }
 0x1f1   : > { %v9995_v27 = vsel %vm8006_vm1, 4294967295, %v9994_v27  ;;  %vm8015_vm7 = vcmp.lt.s32.totalorder %v9997_v54, 16  ;;  %v8026_v61 = vsel %vm10001_vm2, %v2600_v16, %v2599_v32  ;;  %v10004_v39 = vsel %vm10003_vm0, %v7671_v17, %v7581_v46  ;;  %vm10008_vm2 = vmand %vm7702_vm11, %vm7628_vm4  ;;  %v5165_v16 = vpop.f32.mrf.mxu0  ;;  %10009 = vst [vmem:[#allocation49_spill] sm:$0xff] %v8047_v15 }
 0x1f2   : > { %v9999_v26 = vsel %vm8015_vm7, 4294967295, %v9998_v26  ;;  %vm8034_vm6 = vcmp.lt.s32.totalorder %v10004_v39, 16  ;;  %v10005_v37 = vmov 0  ;;  %v2609_v54 = vmul.u32 18, %v2608_v38  ;;  %vm10010_vm0 = vmand %vm9986_vm10, %vm9985_vm9  ;;  %v10013_v39 = vld [vmem:[#allocation54_spill] sm:$0xff]  ;;  %v8073_v48 = vpop.f32.mrf.mxu1 }
 0x1f3   : > { %10000 = vst [vmem:[#allocation39_spill] sm:$0xff] %v9999_v26  ;;  %v10006_v37 = vsel %vm8034_vm6, 4294967295, %v10005_v37  ;;  %v2864_v32 = vsel %vm10008_vm2, %v2263_v30, 0.0  ;;  %v8050_v46 = vmul.u32.u64.low 3817748708, %v7983_v58  ;;  %v8051_v17 = vmul.u32.u64.high 3817748708, %v7983_v58, %v8050_v46  ;;  %v5166_v47 = vpop.f32.mrf.mxu0  ;;  %v10095_v26 = vld [vmem:[#allocation41_spill] sm:$0xff] }
 0x1f4   : > { %10007 = vst [vmem:[#allocation22_spill] sm:$0xff] %v10006_v37  ;;  %v2625_v38 = vsub.s32 0, %v7986_v49  ;;  %v2865_v45 = vsel %vm10010_vm0, %v2264_v20, 0.0  ;;  %v8059_v43 = vpack.c.bf16 %v2264_v20, %v2263_v30  ;;  %v2242_v35 = vadd.f32 %v7872_v62, %v2212_v7  ;;  %v10020_v30 = vld [vmem:[#allocation38_spill] sm:$0xff] }
 0x1f5   : > { %v2128_v63 = vadd.f32 %v7821_v6, %v5164_v0  ;;  %v8069_v46 = vadd.f32 %v10013_v39, %v10012_v8  ;;  %v8071_v14 = vpack.c.bf16 %v2865_v45, %v2864_v32  ;;  %vm10015_vm0 = vcmp.ne.s32.totalorder %v7949_v57, 0  ;;  %v10021_v45 = vld [vmem:[#allocation36_spill] sm:$0xff]  ;;  %v10026_v39 = vld [vmem:[#allocation18_spill] sm:$0xff] }
 0x1f6   : > { %10011 = vst [vmem:[#allocation33_spill] sm:$0xff] %v8059_v43  ;;  %vm10016_vm12 = vcmp.lt.s32.totalorder %v7949_v57, 0  ;;  %v8084_v7 = vadd.s32 18, %v7955_v18  ;;  %v2308_v0 = vadd.s32 168, %v6966_v55  ;;  %v5167_v32 = vadd.f32 %v5166_v47, %v5165_v16  ;;  %v8102_v47 = vpop.f32.mrf.mxu1  ;;  %v10028_v16 = vld [vmem:[#allocation37_spill] sm:$0xff] }
 0x1f7   : > { %10014 = vst [vmem:[#allocation28_spill] sm:$0xff] %v8069_v46  ;;  %vm8079_vm8 = vmand %vm10016_vm12, %vm10015_vm0  ;;  %v2213_v20 = vadd.f32 %v2128_v63, %v10020_v30  ;;  %vm10022_vm10 = vcmp.ne.s32.totalorder %v7955_v18, 0  ;;  %vm10023_vm4 = vcmp.lt.s32.totalorder %v7955_v18, 0  ;;  %v10024_v8 = vmov 0  ;;  %v5168_v63 = vpop.f32.mrf.mxu0  ;;  %v10051_v46 = vld [vmem:[#allocation45_spill] sm:$0xff] }
 0x1f8   : > { %10019 = vst [vmem:[#allocation54_spill] sm:$0xff] %v8084_v7  ;;  %vm8094_vm12 = vmand %vm10023_vm4, %vm10022_vm10  ;;  %v8100_v43 = vsub.s32 %v7728_v22, %v2609_v54  ;;  %v2265_v21 = vmax.f32 %v2242_v35, 0.0  ;;  %v8109_v30 = vmin.u32 %v2625_v38, %v7986_v49  ;;  %v10032_v22 = vmov 0 }
 0x1f9   : > { %v10025_v8 = vsel %vm8094_vm12, 4294967295, %v10024_v8  ;;  %10027 = vst [vmem:[#allocation38_spill] sm:$0xff] %v8102_v47  ;;  %vm10030_vm4 = vmand %vm7994_vm5, %vm7857_vm14  ;;  %v2243_v54 = vadd.f32 %v7872_v62, %v2213_v20  ;;  %v2133_v35 = vadd.f32 %v5167_v32, %v7935_v24  ;;  %vm10035_vm9 = vcmp.lt.s32.totalorder %v7208_v3, 288  ;;  %v10041_v20 = vld [vmem:[#allocation61_spill] sm:$0xff]  ;;  %v5169_v24 = vpop.f32.mrf.mxu0  ;;  %v8146_v32 = vpop.f32.mrf.mxu1 }
 0x1fa   : > { %10029 = vst [vmem:[#allocation36_spill] sm:$0xff] %v8109_v30  ;;  %vm10031_vm0 = vmand %vm8006_vm1, %vm7887_vm13  ;;  %vm10036_vm10 = vcmp.ge.s32.totalorder %v7208_v3, 0  ;;  %v10037_v38 = vmov 0  ;;  %v8140_v49 = vadd.s32 18, %v8026_v61  ;;  %v10045_v3 = vmov 0 }
 0x1fb   : > { %vm8121_vm2 = vmpackc.low %vm10031_vm0, %vm10030_vm4  ;;  %vm10044_vm0 = vcmp.ge.s32.totalorder %v7239_v25, 0  ;;  %v10048_v47 = vsel %vm7769_vm3, %v7745_v44, %v7619_v53  ;;  %v2214_v11 = vadd.f32 %v2133_v35, %v10051_v46  ;;  %v5170_v2 = vadd.f32 %v5169_v24, %v5168_v63  ;;  %v10060_v63 = vld [vmem:[#allocation25_spill] sm:$0xff] }
 0x1fc   : > { %v10033_v22 = vsel %vm8121_vm2, 4294967295, %v10032_v22  ;;  %vm8131_vm11 = vmand %vm10036_vm10, %vm10035_vm9  ;;  %vm10043_vm9 = vcmp.lt.s32.totalorder %v7239_v25, 288  ;;  %vm8161_vm4 = vcmp.lt.s32.totalorder %v10048_v47, 16  ;;  %v8170_v25 = vadd.s32 %v6970_v5, %v2308_v0  ;;  %v8197_v47 = vpop.f32.mrf.mxu1 }
 0x1fd   : > { %10034 = vst [vmem:[#allocation37_spill] sm:$0xff] %v10033_v22  ;;  %v10038_v38 = vsel %vm8131_vm11, 4294967295, %v10037_v38  ;;  %v10040_v22 = vld [vmem:[#allocation42_spill] sm:$0xff]  ;;  %vm8152_vm10 = vmand %vm10044_vm0, %vm10043_vm9  ;;  %vm10052_vm3 = vnez %v9935_v36  ;;  %v10054_v44 = vmov 0  ;;  %vm10056_vm0 = vcmp.ne.s32.totalorder %v8026_v61, 0  ;;  %v10062_v36 = vld [vmem:[#allocation64_spill] sm:$0xff] }
 0x1fe   : > { %10039 = vst [vmem:[#allocation69_spill] sm:$0xff] %v10038_v38  ;;  %v8144_v15 = vadd.f32 %v10041_v20, %v10040_v22  ;;  %v10046_v3 = vsel %vm8152_vm10, 4294967295, %v10045_v3  ;;  %v2902_v20 = vshll.u32 %v8071_v14, 16  ;;  %v10053_v53 = vsel %vm10052_vm3, %v7774_v28, %v7644_v42  ;;  %v5171_v28 = vpop.f32.mrf.mxu0  ;;  %10065 = vst [vmem:[#allocation45_spill] sm:$0xff] %v8197_v47  ;;  %v10068_v22 = vld [vmem:[#allocation66_spill] sm:$0xff] }
 0x1ff   : > { %10047 = vst [vmem:[#allocation61_spill] sm:$0xff] %v10046_v3  ;;  %vm8179_vm9 = vcmp.lt.s32.totalorder %v10053_v53, 16  ;;  %vm10057_vm2 = vcmp.lt.s32.totalorder %v8026_v61, 0  ;;  %v10058_v0 = vmov 0  ;;  %v2611_v46 = vsub.s32 0, %v8100_v43  ;;  %v10066_v53 = vld [vmem:[#allocation20_spill] sm:$0xff] }
 0x200   : > { %10042 = vst [vmem:[#allocation42_spill] sm:$0xff] %v8144_v15  ;;  %v2266_v15 = vmax.f32 %v2243_v54, 0.0  ;;  %v10055_v44 = vsel %vm8179_vm9, 4294967295, %v10054_v44  ;;  %vm8187_vm12 = vmand %vm10057_vm2, %vm10056_vm0  ;;  %vm10061_vm13 = vnez %v10060_v63  ;;  %vm10063_vm1 = vnez %v10062_v36  ;;  %v10088_v3 = vld [vmem:[#allocation43_spill] sm:$0xff] }
 0x201   : > { %v10059_v0 = vsel %vm8187_vm12, 4294967295, %v10058_v0  ;;  %vm10064_vm14 = vmand %vm10061_vm13, %vm10063_vm1  ;;  %v2619_v54 = vshrl.u32 %v8051_v17, 4  ;;  %v8201_v35 = vmul.u32.u64.low 3817748708, %v8109_v30  ;;  %v8202_v24 = vmul.u32.u64.high 3817748708, %v8109_v30, %v8201_v35 }
 0x202   : > { %v2866_v42 = vsel %vm10064_vm14, %v2265_v21, 0.0  ;;  %vm10067_vm2 = vnez %v10066_v53  ;;  %vm10069_vm3 = vnez %v10068_v22  ;;  %v8209_v63 = vpack.c.bf16 %v2266_v15, %v2265_v21  ;;  %vm9731_vm1 = vmand %vm8131_vm11, %vm8015_vm7  ;;  %v5172_v35 = vpop.f32.mrf.mxu0  ;;  %v8223_v22 = vpop.f32.mrf.mxu1 }
 0x203   : > { %vm10070_vm0 = vmand %vm10067_vm2, %vm10069_vm3  ;;  %v2244_v36 = vadd.f32 %v7872_v62, %v2214_v11  ;;  %v2136_v7 = vadd.f32 %v5170_v2, %v8000_v52  ;;  %10072 = vst [vmem:[#allocation64_spill] sm:$0xff] %v8223_v22  ;;  %v2636_v21 = vsub.s32 0, %v8170_v25  ;;  %v2904_v52 = vrot.slane %v2902_v20, 1  ;;  %v10073_v11 = vld [vmem:[#allocation40_spill] sm:$0xff]  ;;  %v10078_v2 = vld [vmem:[#allocation47_spill] sm:$0xff] }
 0x204   : > { %v2867_v18 = vsel %vm10070_vm0, %v2266_v15, 0.0  ;;  %10071 = vst [vmem:[#allocation25_spill] sm:$0xff] %v8209_v63  ;;  %vm9729_vm14 = vmand %vm8152_vm10, %vm8034_vm6  ;;  %v2900_v53 = vshrl.u32 %v8071_v14, 16  ;;  %v2994_v63 = vrot.slane %v8071_v14, 1  ;;  %v10079_v22 = vld [vmem:[#allocation26_spill] sm:$0xff]  ;;  %vm10082_vm2 = vcmp.ge.s32.totalorder %v10021_v45, 0 }
 0x205   : > { %v8217_v17 = vpack.c.bf16 %v2867_v18, %v2866_v42  ;;  %v2215_v15 = vadd.f32 %v2136_v7, %v7933_v41  ;;  %v5173_v18 = vadd.f32 %v5172_v35, %v5171_v28  ;;  %v2309_v42 = vadd.s32 176, %v6966_v55  ;;  %vm8245_vm3 = vmpackc.low %vm9729_vm14, %vm9731_vm1  ;;  %v5174_v55 = vpop.f32.mrf.mxu0  ;;  %v8250_v28 = vpop.f32.mrf.mxu1  ;;  %v10085_v14 = vld [vmem:[#allocation29_spill] sm:$0xff] }
 0x206   : > { %v10074_v41 = vmov 0  ;;  %v2267_v20 = vmax.f32 %v2244_v36, 0.0  ;;  %10077 = vst [vmem:[#allocation66_spill] sm:$0xff] %v8250_v28  ;;  %vm10080_vm14 = vcmp.lt.s32.totalorder %v10026_v39, 0  ;;  %v2620_v36 = vmul.u32 18, %v2619_v54 }
 0x207   : > { %v10075_v41 = vsel %vm8245_vm3, 4294967295, %v10074_v41  ;;  %v2907_v35 = vshll.u32 %v8217_v17, 16  ;;  %v2245_v47 = vadd.f32 %v7872_v62, %v2215_v15  ;;  %v2141_v37 = vadd.f32 %v10079_v22, %v5173_v18  ;;  %v10087_v15 = vld [vmem:[#allocation34_spill] sm:$0xff] }
 0x208   : > { %10076 = vst [vmem:[#allocation20_spill] sm:$0xff] %v10075_v41  ;;  %v8261_v7 = vsel %vm10080_vm14, %v2611_v46, %v8100_v43  ;;  %v5175_v41 = vpop.f32.mrf.mxu0  ;;  %vm10081_vm1 = vcmp.lt.s32.totalorder %v10021_v45, 288  ;;  %vm10086_vm13 = vnez %v10085_v14  ;;  %v10090_v18 = vmov 0  ;;  %v8280_v43 = vpop.f32.mrf.mxu1 }
 0x209   : > { %vm8267_vm0 = vmand %vm10082_vm2, %vm10081_vm1  ;;  %v10089_v22 = vsel %vm10086_vm13, %v10087_v15, %v10088_v3  ;;  %v2909_v46 = vrot.slane %v2907_v35, 1  ;;  %v8283_v54 = vmin.u32 %v2636_v21, %v8170_v25  ;;  %v2905_v45 = vor.u32 %v2904_v52, %v2900_v53  ;;  %v10112_v52 = vld [vmem:[#allocation48_spill] sm:$0xff] }
 0x20a   : > { %vm8276_vm3 = vcmp.lt.s32.totalorder %v10089_v22, 16  ;;  %v10092_v39 = vrot.slane %v8217_v17, 1  ;;  %vm10093_vm1 = vcmask 1046528   ;;  %v2268_v14 = vmax.f32 %v2245_v47, 0.0 }
 0x20b   : > { %v10091_v18 = vsel %vm8276_vm3, 4294967295, %v10090_v18  ;;  %v2216_v38 = vadd.f32 %v2141_v37, %v10095_v26  ;;  %v5176_v3 = vadd.f32 %v5175_v41, %v5174_v55  ;;  %vm10096_vm14 = vcmp.lt.s32.totalorder %v10028_v16, 288  ;;  %v10113_v41 = vld [vmem:[#allocation50_spill] sm:$0xff] }
 0x20c   : > { %v8288_v30 = vsel %vm10093_vm1, %v2994_v63, %v10092_v39  ;;  %vm10097_vm13 = vcmp.ge.s32.totalorder %v10028_v16, 0  ;;  %v10098_v15 = vmov 0  ;;  %vm10100_vm6 = vnez %v9966_v60  ;;  %v5177_v16 = vpop.f32.mrf.mxu0  ;;  %v8317_v60 = vpop.f32.mrf.mxu1 }
 0x20d   : > { %10094 = vst [vmem:[#allocation40_spill] sm:$0xff] %v8288_v30  ;;  %vm8295_vm2 = vmand %vm10097_vm13, %vm10096_vm14  ;;  %v10101_v21 = vsel %vm10100_vm6, %v7866_v40, %v7780_v51  ;;  %v10102_v39 = vmov 0  ;;  %v8310_v26 = vadd.s32 %v6970_v5, %v2309_v42  ;;  %vm10104_vm14 = vnez %v9893_v50  ;;  %v10209_v30 = vld [vmem:[#allocation64_spill] sm:$0xff] }
 0x20e   : > { %v10099_v15 = vsel %vm8295_vm2, 4294967295, %v10098_v15  ;;  %vm8304_vm10 = vcmp.lt.s32.totalorder %v10101_v21, 16  ;;  %vm10105_vm13 = vmand %vm7848_vm15, %vm10104_vm14  ;;  %vm2675_vm6 = vcmp.ne.s32.totalorder %v8261_v7, 0  ;;  %vm2698_vm7 = vcmp.lt.s32.totalorder %v8261_v7, 0  ;;  %v5178_v63 = vpop.f32.mrf.mxu0 }
 0x20f   : > { %v10103_v39 = vsel %vm8304_vm10, 4294967295, %v10102_v39  ;;  %v2868_v37 = vsel %vm10105_vm13, %v2267_v20, 0.0  ;;  %vm10106_vm11 = vsmask.f32 7424  ;;  %vm10108_vm1 = vnez %v9957_v13  ;;  %vm9744_vm15 = vmand %vm8267_vm0, %vm8161_vm4 }
 0x210   : > { %v8322_v51 = vsel %vm10106_vm11, %v2905_v45, %v2909_v46  ;;  %vm10109_vm12 = vnez %v9913_v59  ;;  %v8329_v9 = vpack.c.bf16 %v2268_v14, %v2267_v20  ;;  %v2246_v50 = vadd.f32 %v7872_v62, %v2216_v38  ;;  %vm9743_vm11 = vmand %vm8295_vm2, %vm8179_vm9  ;;  %v8343_v59 = vpop.f32.mrf.mxu1  ;;  %v5180_v22 = vpop.f32.mrf.mxu0 }
 0x211   : > { %10107 = vst [vmem:[#allocation47_spill] sm:$0xff] %v8322_v51  ;;  %vm10110_vm10 = vmand %vm10108_vm1, %vm10109_vm12  ;;  %v2144_v40 = vadd.f32 %v7976_v31, %v5176_v3  ;;  %v2621_v13 = vsub.s32 %v7983_v58, %v2620_v36  ;;  %v8347_v38 = vmul.u32.u64.low 3817748708, %v8283_v54  ;;  %v8348_v31 = vmul.u32.u64.high 3817748708, %v8283_v54, %v8347_v38  ;;  %v10220_v51 = vld [vmem:[#allocation59_spill] sm:$0xff] }
 0x212   : > { %v2869_v5 = vsel %vm10110_vm10, %v2268_v14, 0.0  ;;  %10111 = vst [vmem:[#allocation26_spill] sm:$0xff] %v8329_v9  ;;  %v5179_v53 = vadd.f32 %v5178_v63, %v5177_v16  ;;  %v8354_v20 = vadd.s32 18, %v8261_v7  ;;  %v2647_v55 = vsub.s32 0, %v8310_v26  ;;  %vm8367_vm1 = vmpackc.low %vm9743_vm11, %vm9744_vm15  ;;  %v8376_v3 = vpop.f32.mrf.mxu1  ;;  %v10131_v9 = vld [vmem:[#allocation67_spill] sm:$0xff] }
 0x213   : > { %v8337_v47 = vpack.c.bf16 %v2869_v5, %v2868_v37  ;;  %v2217_v42 = vadd.f32 %v2144_v40, %v10112_v52  ;;  %v10114_v58 = vmov 0  ;;  %v2269_v36 = vmax.f32 %v2246_v50, 0.0  ;;  %vm8384_vm11 = vmand %vm2698_vm7, %vm2675_vm6  ;;  %v5181_v50 = vpop.f32.mrf.mxu0 }
 0x214   : > { %v10115_v58 = vsel %vm8367_vm1, 4294967295, %v10114_v58  ;;  %v2911_v45 = vshrl.u32 %v8217_v17, 16  ;;  %v2149_v37 = vadd.f32 %v5179_v53, %v8073_v48  ;;  %v10117_v16 = vmov 0 }
 0x215   : > { %10116 = vst [vmem:[#allocation29_spill] sm:$0xff] %v10115_v58  ;;  %v9746_v35 = vrot.slane %v8337_v47, 1  ;;  %v2915_v14 = vshll.u32 %v8337_v47, 16  ;;  %v2247_v21 = vadd.f32 %v7872_v62, %v2217_v42  ;;  %v10118_v16 = vsel %vm8384_vm11, 4294967295, %v10117_v16  ;;  %v8413_v42 = vpop.f32.mrf.mxu1  ;;  %v10130_v58 = vld [vmem:[#allocation57_spill] sm:$0xff] }
 0x216   : > { %v2630_v5 = vshrl.u32 %v8202_v24, 4  ;;  %vm10119_vm14 = vcmp.lt.s32.totalorder %v10073_v11, 288  ;;  %vm10120_vm13 = vcmp.ge.s32.totalorder %v10073_v11, 0  ;;  %v10121_v40 = vmov 0 }
 0x217   : > { %vm8393_vm12 = vmand %vm10120_vm13, %vm10119_vm14  ;;  %v10123_v48 = vrot.slane %v8217_v17, 1  ;;  %vm10124_vm7 = vcmask 1046528   ;;  %v2913_v38 = vor.u32 %v2911_v45, %v2909_v46  ;;  %v2917_v52 = vrot.slane %v2915_v14, 1 }
 0x218   : > { %v10122_v40 = vsel %vm8393_vm12, 4294967295, %v10121_v40  ;;  %vm10126_vm6 = vnez %v9974_v56  ;;  %v2622_v53 = vsub.s32 0, %v2621_v13  ;;  %v8417_v17 = vadd.f32 %v10131_v9, %v10130_v58 }
 0x219   : > { %v8402_v63 = vsel %vm10124_vm7, %v10123_v48, %v9746_v35  ;;  %v10127_v24 = vsel %vm10126_vm6, %v7914_v4, %v7797_v10  ;;  %v2270_v48 = vmax.f32 %v2247_v21, 0.0  ;;  %v10132_v35 = vld [vmem:[#allocation52_spill] sm:$0xff]  ;;  %v5182_v45 = vadd.f32 %v5181_v50, %v5180_v22 }
 0x21a   : > { %10125 = vst [vmem:[#allocation34_spill] sm:$0xff] %v8402_v63  ;;  %vm8409_vm15 = vcmp.lt.s32.totalorder %v10127_v24, 16  ;;  %v2218_v46 = vadd.f32 %v2149_v37, %v10132_v35  ;;  %vm10133_vm14 = vcmp.lt.s32.totalorder %v10078_v2, 288  ;;  %vm10134_vm13 = vcmp.ge.s32.totalorder %v10078_v2, 0  ;;  %v5183_v2 = vpop.f32.mrf.mxu0  ;;  %v10153_v37 = vld [vmem:[#allocation28_spill] sm:$0xff] }
 0x21b   : > { %vm8424_vm7 = vmand %vm10134_vm13, %vm10133_vm14  ;;  %v10135_v56 = vmov 0  ;;  %v10137_v10 = vsel %vm8079_vm8, %v8020_v29, %v7949_v57  ;;  %vm10140_vm10 = vnez %v9953_v1  ;;  %vm10142_vm14 = vsmask.f32 7424  ;;  %v8449_v57 = vpop.f32.mrf.mxu1 }
 0x21c   : > { %v10136_v56 = vsel %vm8424_vm7, 4294967295, %v10135_v56  ;;  %vm8433_vm6 = vcmp.lt.s32.totalorder %v10137_v10, 16  ;;  %vm10141_vm1 = vmand %vm7994_vm5, %vm10140_vm10  ;;  %v8443_v58 = vsel %vm10142_vm14, %v2913_v38, %v2917_v52  ;;  %10144 = vst [vmem:[#allocation41_spill] sm:$0xff] %v8449_v57  ;;  %v8452_v29 = vmin.u32 %v2647_v55, %v8310_v26  ;;  %v5184_v55 = vpop.f32.mrf.mxu0 }
 0x21d   : > { %v2870_v9 = vsel %vm10141_vm1, %v2269_v36, 0.0  ;;  %10143 = vst [vmem:[#allocation43_spill] sm:$0xff] %v8443_v58  ;;  %vm10145_vm8 = vnez %v9995_v27  ;;  %vm10146_vm13 = vnez %v9961_v33  ;;  %v8459_v19 = vpack.c.bf16 %v2270_v48, %v2269_v36  ;;  %vm9747_vm10 = vmand %vm8393_vm12, %vm8276_vm3  ;;  %v10150_v33 = vld [vmem:[#allocation55_spill] sm:$0xff] }
 0x21e   : > { %vm10147_vm5 = vmand %vm10145_vm8, %vm10146_vm13  ;;  %v2248_v35 = vadd.f32 %v7872_v62, %v2218_v46  ;;  %v2152_v22 = vadd.f32 %v5182_v45, %v8146_v32  ;;  %vm10149_vm1 = vnez %v10103_v39  ;;  %v8479_v32 = vpop.f32.mrf.mxu1  ;;  %v2631_v36 = vmul.u32 18, %v2630_v5  ;;  %v5186_v46 = vpop.f32.mrf.mxu0 }
 0x21f   : > { %v2871_v1 = vsel %vm10147_vm5, %v2270_v48, 0.0  ;;  %10148 = vst [vmem:[#allocation48_spill] sm:$0xff] %v8459_v19  ;;  %vm10151_vm5 = vcmp.lt.s32.totalorder %v7838_v23, 0  ;;  %10152 = vst [vmem:[#allocation50_spill] sm:$0xff] %v8479_v32  ;;  %v2641_v21 = vshrl.u32 %v8348_v31, 4  ;;  %v5185_v38 = vadd.f32 %v5184_v55, %v5183_v2  ;;  %v10154_v48 = vld [vmem:[#allocation58_spill] sm:$0xff] }
 0x220   : > { %v8467_v14 = vpack.c.bf16 %v2871_v1, %v2870_v9  ;;  %v8477_v27 = vsel %vm10151_vm5, %v2622_v53, %v2621_v13  ;;  %v2219_v50 = vadd.f32 %v2152_v22, %v10153_v37  ;;  %v2919_v24 = vshrl.u32 %v8337_v47, 16  ;;  %vm10155_vm5 = vmand %vm8424_vm7, %vm10149_vm1  ;;  %v5625_v10 = vpop.f32.mrf.mxu1  ;;  %v10159_v1 = vld [vmem:[#allocation49_spill] sm:$0xff]  ;;  %v10161_v55 = vld [vmem:[#allocation54_spill] sm:$0xff] }
 0x221   : > { %vm8496_vm13 = vmpackc.low %vm10155_vm5, %vm9747_vm10  ;;  %v10156_v13 = vmov 0  ;;  %v3957_v31 = vrot.slane %v8337_v47, 2  ;;  %v2271_v53 = vmax.f32 %v2248_v35, 0.0  ;;  %v2157_v22 = vadd.f32 %v10159_v1, %v5185_v38  ;;  %v10162_v37 = vld [vmem:[#allocation23_spill] sm:$0xff]  ;;  %v5187_v10 = vpop.f32.mrf.mxu0 }
 0x222   : > { %v10157_v13 = vsel %vm8496_vm13, 4294967295, %v10156_v13  ;;  %v2923_v45 = vshll.u32 %v8467_v14, 16  ;;  %v2249_v2 = vadd.f32 %v7872_v62, %v2219_v50  ;;  %vm10160_vm5 = vnez %v10025_v8 }
 0x223   : > { %10158 = vst [vmem:[#allocation57_spill] sm:$0xff] %v10157_v13  ;;  %v10163_v6 = vsel %vm10160_vm5, %v10161_v55, %v10162_v37  ;;  %v8516_v35 = vmul.u32.u64.low 3817748708, %v8452_v29  ;;  %v8517_v5 = vmul.u32.u64.high 3817748708, %v8452_v29, %v8516_v35  ;;  %v10166_v9 = vrot.slane %v8467_v14, 1 }
 0x224   : > { %vm8511_vm10 = vcmp.lt.s32.totalorder %v10163_v6, 16  ;;  %v10167_v50 = vrot.slane %v8337_v47, 1  ;;  %vm10168_vm14 = vcmask 1046528   ;;  %v2921_v8 = vor.u32 %v2919_v24, %v2917_v52 }
 0x225   : > { %v2925_v1 = vrot.slane %v2923_v45, 1  ;;  %vm10169_vm5 = vcmp.lt.s32.totalorder %v10113_v41, 288  ;;  %vm10170_vm8 = vcmp.ge.s32.totalorder %v10113_v41, 0  ;;  %vm10173_vm11 = vnez %v10059_v0  ;;  %v10180_v41 = vld [vmem:[#allocation51_spill] sm:$0xff]  ;;  %v10186_v0 = vld [vmem:[#allocation69_spill] sm:$0xff] }
 0x226   : > { %v8525_v38 = vsel %vm10168_vm14, %v10167_v50, %v10166_v9  ;;  %vm8531_vm13 = vmand %vm10170_vm8, %vm10169_vm5  ;;  %v10174_v55 = vsel %vm10173_vm11, %v8140_v49, %v8026_v61  ;;  %v10175_v47 = vmov 0  ;;  %v10177_v52 = vrot.slane %v8467_v14, 2  ;;  %v10185_v61 = vld [vmem:[#allocation19_spill] sm:$0xff] }
 0x227   : > { %vm8540_vm1 = vcmp.lt.s32.totalorder %v10174_v55, 16  ;;  %vm10178_vm14 = vcmask 1045504   ;;  %v2272_v45 = vmax.f32 %v2249_v2, 0.0  ;;  %v2220_v9 = vadd.f32 %v2157_v22, %v10180_v41  ;;  %v5189_v2 = vpop.f32.mrf.mxu0  ;;  %v6086_v55 = vld [vmem:[#allocation7 + $0xb8] sm:$0xff]   ;;  %v10195_v41 = vld [vmem:[#allocation22_spill] sm:$0xff] }
 0x228   : > { %v10176_v47 = vsel %vm8540_vm1, 4294967295, %v10175_v47  ;;  %v8547_v24 = vsel %vm10178_vm14, %v3957_v31, %v10177_v52  ;;  %v5188_v37 = vadd.f32 %v5187_v10, %v5186_v46  ;;  %vm10181_vm8 = vcmp.lt.s32.totalorder %v7448_v34, 288  ;;  %v10188_v31 = vld [vmem:[#allocation39_spill] sm:$0xff]  ;;  %v10192_v10 = vld [vmem:[#allocation36_spill] sm:$0xff]  ;;  %v10193_v52 = vld [vmem:[#allocation61_spill] sm:$0xff] }
 0x229   : > { %10179 = vst [vmem:[#allocation67_spill] sm:$0xff] %v8547_v24  ;;  %vm10182_vm5 = vcmp.ge.s32.totalorder %v7448_v34, 0  ;;  %vm2676_vm7 = vcmp.ne.s32.totalorder %v8477_v27, 0  ;;  %vm10187_vm12 = vnez %v10186_v0  ;;  %vm10189_vm1 = vnez %v10188_v31  ;;  %v10199_v24 = vld [vmem:[#allocation38_spill] sm:$0xff] }
 0x22a   : > { %vm8555_vm11 = vmand %vm10182_vm5, %vm10181_vm8  ;;  %v3135_v22 = vrot.slane %v8402_v63, 1  ;;  %vm10191_vm2 = vsmask.f32 7424  ;;  %v8572_v50 = vsub.s32 %v10192_v10, %v2631_v36  ;;  %vm10194_vm8 = vnez %v10193_v52 }
 0x22b   : > { %vm10190_vm9 = vmand %vm10187_vm12, %vm10189_vm1  ;;  %v8569_v34 = vsel %vm10191_vm2, %v2921_v8, %v2925_v1  ;;  %vm10196_vm5 = vnez %v10195_v41  ;;  %v8579_v35 = vpack.c.bf16 %v2272_v45, %v2271_v53  ;;  %v2250_v31 = vadd.f32 %v7872_v62, %v2220_v9  ;;  %v5190_v8 = vpop.f32.mrf.mxu0 }
 0x22c   : > { %v2872_v46 = vsel %vm10190_vm9, %v2271_v53, 0.0  ;;  %vm10197_vm14 = vmand %vm10194_vm8, %vm10196_vm5  ;;  %v2160_v19 = vadd.f32 %v10199_v24, %v5188_v37  ;;  %v10200_v10 = vrot.slane %v8525_v38, 1  ;;  %vm10201_vm2 = vcmask 1046528   ;;  %v10202_v24 = vld [vmem:[#allocation53_spill] sm:$0xff] }
 0x22d   : > { %v2873_v0 = vsel %vm10197_vm14, %v2272_v45, 0.0  ;;  %10198 = vst [vmem:[#allocation52_spill] sm:$0xff] %v8579_v35  ;;  %vm9760_vm9 = vmand %vm8531_vm13, %vm8409_vm15  ;;  %v3132_v41 = vrot.slane %v8443_v58, 1  ;;  %v9761_v53 = vrot.slane %v8569_v34, 1  ;;  %v5191_v9 = vadd.f32 %v5190_v8, %v5189_v2  ;;  %v6077_v37 = vld [vmem:[#allocation7 + $0x38] sm:$0xff]   ;;  %v5192_v2 = vpop.f32.mrf.mxu0  ;;  %v6087_v35 = vld [vmem:[#allocation7 + $0xb0] sm:$0xff]  }
 0x22e   : > { %v8587_v36 = vpack.c.bf16 %v2873_v0, %v2872_v46  ;;  %v3137_v52 = vsel %vm10201_vm2, %v3135_v22, %v10200_v10  ;;  %vm9759_vm12 = vmand %vm8555_vm11, %vm8433_vm6  ;;  %v2221_v45 = vadd.f32 %v2160_v19, %v10202_v24  ;;  %v2927_v46 = vshrl.u32 %v8467_v14, 16  ;;  %v6078_v24 = vld [vmem:[#allocation7 + $0x70] sm:$0xff]  }
 0x22f   : > { %5643 = vmatmul.mubr.bf16.vlgmr.msra.gmra.mxu0 %v3137_v52  ;;  %v2642_v0 = vmul.u32 18, %v2641_v21  ;;  %vm8610_vm1 = vmpackc.low %vm9759_vm12, %vm9760_vm9  ;;  %v10203_v22 = vmov 0  ;;  %v2273_v19 = vmax.f32 %v2250_v31, 0.0  ;;  %v10207_v8 = vmov 0.0  }
 0x230   : > { %v10204_v22 = vsel %vm8610_vm1, 4294967295, %v10203_v22  ;;  %vm10206_vm14 = vmmov %vm10201_vm2  ;;  %vm10208_vm8 = vmmov 0   ;;  %v9763_v10 = vrot.slane %v8587_v36, 1  ;;  %v2931_v52 = vshll.u32 %v8587_v36, 16  ;;  %5679 = vmatpush3.bf16.msra.mxu0 %v6086_v55 }
 0x231   : > { %10205 = vst [vmem:[#allocation55_spill] sm:$0xff] %v10204_v22  ;;  %v3134_v21 = vsel %vm10206_vm14, %v3132_v41, %v9761_v53  ;;  %5646 = vmatprep.mubr.msk.bf16.mxu0 %vm10208_vm8, %v10207_v8  ;;  %v2251_v58 = vadd.f32 %v7872_v62, %v2221_v45  ;;  %v2165_v22 = vadd.f32 %v5191_v9, %v10209_v30  ;;  %vm10210_vm5 = vcmp.lt.s32.totalorder %v10150_v33, 288  ;;  %v5193_v45 = vpop.f32.mrf.mxu0 }
 0x232   : > { %3365 = vmatprep.mubr.bf16.mxu1 %v3134_v21  ;;  %vm10211_vm2 = vcmp.ge.s32.totalorder %v10150_v33, 0  ;;  %v8632_v41 = vadd.s32 18, %v8477_v27  ;;  %5680 = vmatprep.subr.bf16.mxu0 %v10207_v8  ;;  %v10214_v30 = vrot.slane %v8467_v14, 1  ;;  %vm10215_vm12 = vcmask 1046528  }
 0x233   : > { %vm8627_vm14 = vmand %vm10211_vm2, %vm10210_vm5  ;;  %3366 = vmatmul.mubr.bf16.vlgmr.msra.gmra.mxu1 %v8402_v63  ;;  %v2929_v9 = vor.u32 %v2927_v46, %v2925_v1  ;;  %v2933_v21 = vrot.slane %v2931_v52, 1  ;;  %vm10216_vm5 = vcmp.lt.s32.totalorder %v10154_v48, 288  ;;  %vm10217_vm2 = vcmp.ge.s32.totalorder %v10154_v48, 0  ;;  %v5195_v1 = vpop.f32.mrf.mxu0 }
 0x234   : > { %v8642_v33 = vsel %vm10215_vm12, %v10214_v30, %v9763_v10  ;;  %vm8648_vm9 = vmand %vm10217_vm2, %vm10216_vm5  ;;  %v2633_v55 = vsub.s32 0, %v8572_v50  ;;  %v2274_v63 = vmax.f32 %v2251_v58, 0.0  ;;  %v2222_v57 = vadd.f32 %v2165_v22, %v10220_v51  ;;  %5333 = vmatpush3.bf16.msra.mxu1 %v6077_v37  ;;  %v6079_v10 = vld [vmem:[#allocation7 + $0x30] sm:$0xff]   ;;  %v6080_v51 = vld [vmem:[#allocation7 + $0x68] sm:$0xff]   ;;  %5681 = vmatpush3.bf16.msra.mxu0 %v6087_v35 }
 0x235   : > { %v5194_v32 = vadd.f32 %v5193_v45, %v5192_v2  ;;  %v9765_v30 = vrot.slane %v8642_v33, 1  ;;  %vm10221_vm12 = vmand %vm8267_vm0, %vm8161_vm4  ;;  %vm10222_vm5 = vsmask.f32 7424  ;;  %5334 = vmatprep.subr.bf16.mxu1 %v6078_v24  ;;  %v8669_v58 = vsub.s32 %v8283_v54, %v2642_v0  ;;  %5682 = vmatprep.subr.bf16.mxu0 %v10207_v8  ;;  %v10237_v0 = vld [vmem:[#allocation42_spill] sm:$0xff] }
 0x236   : > { %v2874_v48 = vsel %vm10221_vm12, %v2273_v19, 0.0  ;;  %v8661_v46 = vsel %vm10222_vm5, %v2929_v9, %v2933_v21  ;;  %v10223_v12 = vrot.slane %v8587_v36, 2  ;;  %v10224_v28 = vrot.slane %v8467_v14, 2  ;;  %v6090_v14 = vld [vmem:[#allocation7 + $0xa8] sm:$0xff]  }
 0x237   : > { %vm10225_vm4 = vcmask 1045504   ;;  %vm10227_vm0 = vnez %v10099_v15  ;;  %vm10228_vm12 = vnez %v10055_v44  ;;  %v8683_v2 = vpack.c.bf16 %v2274_v63, %v2273_v19  ;;  %v5196_v15 = vpop.f32.mrf.mxu0  ;;  %v6081_v9 = vld [vmem:[#allocation7 + $0x28] sm:$0xff]  }
 0x238   : > { %v8676_v37 = vsel %vm10225_vm4, %v10224_v28, %v10223_v12  ;;  %vm10229_vm5 = vmand %vm10227_vm0, %vm10228_vm12  ;;  %v2252_v52 = vadd.f32 %v7872_v62, %v2222_v57  ;;  %v2168_v54 = vadd.f32 %v5194_v32, %v8280_v43  ;;  %vm10230_vm3 = vnez %v10176_v47  ;;  %5335 = vmatpush3.bf16.msra.mxu1 %v6079_v10 }
 0x239   : > { %10226 = vst [vmem:[#allocation28_spill] sm:$0xff] %v8676_v37  ;;  %v2875_v22 = vsel %vm10229_vm5, %v2274_v63, 0.0  ;;  %vm9767_vm2 = vmand %vm8648_vm9, %vm10230_vm3  ;;  %v10231_v44 = vrot.slane %v8525_v38, 1  ;;  %vm10232_vm4 = vcmask 1046528   ;;  %v9764_v57 = vrot.slane %v8661_v46, 1  ;;  %5336 = vmatprep.subr.bf16.mxu1 %v6080_v51  ;;  %5683 = vmatpush3.bf16.msra.mxu0 %v6090_v14 }
 0x23a   : > { %v8692_v35 = vpack.c.bf16 %v2875_v22, %v2874_v48  ;;  %vm10233_vm0 = vcmp.lt.s32.totalorder %v8477_v27, 0  ;;  %vm10236_vm5 = vcmp.lt.s32.totalorder %v10185_v61, 0  ;;  %v2223_v19 = vadd.f32 %v2168_v54, %v10237_v0  ;;  %v6082_v22 = vld [vmem:[#allocation7 + $0x60] sm:$0xff]   ;;  %5684 = vmatprep.subr.bf16.mxu0 %v10207_v8 }
 0x23b   : > { %v3141_v63 = vsel %vm10232_vm4, %v10231_v44, %v9765_v30  ;;  %vm8704_vm12 = vmand %vm10233_vm0, %vm2676_vm7  ;;  %v8711_v32 = vsel %vm10236_vm5, %v2633_v55, %v8572_v50  ;;  %v5197_v24 = vadd.f32 %v5196_v15, %v5195_v1  ;;  %v2935_v45 = vshrl.u32 %v8587_v36, 16  ;;  %v5198_v55 = vpop.f32.mrf.mxu0  ;;  %v10244_v15 = vld [vmem:[#allocation45_spill] sm:$0xff]  ;;  %v6091_v0 = vld [vmem:[#allocation7 + $0xa0] sm:$0xff]  }
 0x23c   : > { %5647 = vmatmul.mubr.bf16.gmra.mxu0 %v3141_v63  ;;  %v2652_v48 = vshrl.u32 %v8517_v5, 4  ;;  %vm10238_vm7 = vmand %vm8627_vm14, %vm8511_vm10  ;;  %v10239_v50 = vmov 0  ;;  %v2275_v10 = vmax.f32 %v2252_v52, 0.0  ;;  %v10242_v5 = vrot.slane %v8569_v34, 1  ;;  %5337 = vmatpush3.bf16.msra.mxu1 %v6081_v9 }
 0x23d   : > { %vm8726_vm4 = vmpackc.low %vm9767_vm2, %vm10238_vm7  ;;  %vm10243_vm0 = vcmask 1046528   ;;  %5650 = vmatprep.mubr.msk.bf16.mxu0 %vm10208_vm8, %v10207_v8  ;;  %v3003_v12 = vrot.slane %v8692_v35, 1  ;;  %v2939_v28 = vshll.u32 %v8692_v35, 16  ;;  %v2253_v54 = vadd.f32 %v7872_v62, %v2223_v19  ;;  %5338 = vmatprep.subr.bf16.mxu1 %v6082_v22  ;;  %v10257_v22 = vld [vmem:[#allocation66_spill] sm:$0xff] }
 0x23e   : > { %v10240_v50 = vsel %vm8726_vm4, 4294967295, %v10239_v50  ;;  %v3139_v1 = vsel %vm10243_vm0, %v10242_v5, %v9764_v57  ;;  %v2173_v52 = vadd.f32 %v10244_v15, %v5197_v24  ;;  %v2644_v63 = vsub.s32 0, %v8669_v58  ;;  %v5199_v5 = vpop.f32.mrf.mxu0  ;;  %vm10246_vm5 = vmmov %vm10243_vm0  ;;  %v10247_v57 = vld [vmem:[#allocation56_spill] sm:$0xff]  ;;  %5685 = vmatpush3.bf16.msra.mxu0 %v6091_v0 }
 0x23f   : > { %10241 = vst [vmem:[#allocation58_spill] sm:$0xff] %v10240_v50  ;;  %3373 = vmatprep.mubr.bf16.mxu1 %v3139_v1  ;;  %v10245_v51 = vrot.slane %v8587_v36, 1  ;;  %v2937_v24 = vor.u32 %v2935_v45, %v2933_v21  ;;  %v2941_v1 = vrot.slane %v2939_v28, 1  ;;  %v3972_v15 = vrot.slane %v8692_v35, 2  ;;  %v6083_v50 = vld [vmem:[#allocation7 + $0x20] sm:$0xff]   ;;  %5686 = vmatprep.subr.bf16.mxu0 %v10207_v8 }
 0x240   : > { %3374 = vmatmul.mubr.bf16.gmra.mxu1 %v8525_v38  ;;  %v2276_v44 = vmax.f32 %v2253_v54, 0.0  ;;  %v2224_v14 = vadd.f32 %v2173_v52, %v10247_v57  ;;  %v5200_v30 = vadd.f32 %v5199_v5, %v5198_v55  ;;  %vm10248_vm0 = vnez %v10122_v40  ;;  %v5201_v45 = vpop.f32.mrf.mxu0  ;;  %v6084_v54 = vld [vmem:[#allocation7 + $0x58] sm:$0xff]  }
 0x241   : > { %v8752_v19 = vsel %vm10246_vm5, %v10245_v51, %v3003_v12  ;;  %vm10249_vm5 = vnez %v10091_v18  ;;  %vm10251_vm4 = vsmask.f32 7424  ;;  %v2653_v57 = vmul.u32 18, %v2652_v48  ;;  %v6093_v48 = vld [vmem:[#allocation7 + $0x98] sm:$0xff]   ;;  %5339 = vmatpush3.bf16.msra.mxu1 %v6083_v50 }
 0x242   : > { %v9770_v37 = vrot.slane %v8752_v19, 1  ;;  %vm10250_vm2 = vmand %vm10248_vm0, %vm10249_vm5  ;;  %v8765_v28 = vsel %vm10251_vm4, %v2937_v24, %v2941_v1  ;;  %v10252_v9 = vrot.slane %v8587_v36, 2  ;;  %vm10253_vm1 = vcmask 1045504   ;;  %v5202_v36 = vpop.f32.mrf.mxu0  ;;  %5340 = vmatprep.subr.bf16.mxu1 %v6084_v54  ;;  %5687 = vmatpush3.bf16.msra.mxu0 %v6093_v48 }
 0x243   : > { %v2876_v21 = vsel %vm10250_vm2, %v2275_v10, 0.0  ;;  %vm10254_vm7 = vnez %v10136_v56  ;;  %vm10255_vm3 = vnez %v10103_v39  ;;  %v8779_v40 = vpack.c.bf16 %v2276_v44, %v2275_v10  ;;  %v10260_v10 = vld [vmem:[#allocation60_spill] sm:$0xff]  ;;  %5688 = vmatprep.subr.bf16.mxu0 %v10207_v8 }
 0x244   : > { %v8772_v55 = vsel %vm10253_vm1, %v10252_v9, %v3972_v15  ;;  %vm10256_vm0 = vmand %vm10254_vm7, %vm10255_vm3  ;;  %v2254_v52 = vadd.f32 %v7872_v62, %v2224_v14  ;;  %v2176_v5 = vadd.f32 %v10257_v22, %v5200_v30  ;;  %v10258_v24 = vrot.slane %v8642_v33, 1 }
 0x245   : > { %v2877_v18 = vsel %vm10256_vm0, %v2276_v44, 0.0  ;;  %vm10259_vm1 = vcmask 1046528   ;;  %v9769_v39 = vrot.slane %v8765_v28, 1  ;;  %vm2700_vm3 = vcmp.lt.s32.totalorder %v8711_v32, 0 }
 0x246   : > { %v8783_v51 = vpack.c.bf16 %v2877_v18, %v2876_v21  ;;  %v3145_v56 = vsel %vm10259_vm1, %v10258_v24, %v9770_v37  ;;  %v2225_v44 = vadd.f32 %v2176_v5, %v10260_v10  ;;  %v5203_v30 = vadd.f32 %v5202_v36, %v5201_v45  ;;  %v6085_v21 = vld [vmem:[#allocation7 + $0x18] sm:$0xff]   ;;  %v5204_v18 = vpop.f32.mrf.mxu0  ;;  %vm10263_vm4 = vmmov %vm10259_vm1  ;;  %v6088_v5 = vld [vmem:[#allocation7 + $0x50] sm:$0xff]  }
 0x247   : > { %5651 = vmatmul.mubr.bf16.gmra.mxu0 %v3145_v56  ;;  %v2943_v0 = vshrl.u32 %v8692_v35, 16  ;;  %vm10261_vm2 = vcmp.lt.s32.totalorder %v8170_v25, 0  ;;  %v2277_v9 = vmax.f32 %v2254_v52, 0.0  ;;  %v10262_v22 = vrot.slane %v8661_v46, 1  ;;  %v6095_v56 = vld [vmem:[#allocation7 + $0x90] sm:$0xff]   ;;  %vm10264_vm5 = vmmov %vm10259_vm1  ;;  %5341 = vmatpush3.bf16.msra.mxu1 %v6085_v21 }
 0x248   : > { %v8798_v14 = vsel %vm10261_vm2, %v2644_v63, %v8669_v58  ;;  %5654 = vmatprep.mubr.msk.bf16.mxu0 %vm10208_vm8, %v10207_v8  ;;  %v3005_v45 = vrot.slane %v8783_v51, 1  ;;  %v2947_v50 = vshll.u32 %v8783_v51, 16  ;;  %v2255_v58 = vadd.f32 %v7872_v62, %v2225_v44  ;;  %v5205_v10 = vpop.f32.mrf.mxu0  ;;  %v6089_v37 = vld [vmem:[#allocation7 + $0x10] sm:$0xff]   ;;  %vm10267_vm2 = vmand %vm8531_vm13, %vm8409_vm15  ;;  %5342 = vmatprep.subr.bf16.mxu1 %v6088_v5 }
 0x249   : > { %v3143_v24 = vsel %vm10263_vm4, %v10262_v22, %v9769_v39  ;;  %v2181_v63 = vadd.f32 %v5203_v30, %v8343_v59  ;;  %v8812_v52 = vadd.s32 18, %v8711_v32  ;;  %v8816_v36 = vsub.s32 %v8452_v29, %v2653_v57  ;;  %v10265_v57 = vld [vmem:[#allocation63_spill] sm:$0xff]  ;;  %vm10270_vm15 = vmand %vm8555_vm11, %vm8433_vm6  ;;  %5689 = vmatpush3.bf16.msra.mxu0 %v6095_v56 }
 0x24a   : > { %3381 = vmatprep.mubr.bf16.mxu1 %v3143_v24  ;;  %v8824_v59 = vsel %vm10264_vm5, %v3003_v12, %v3005_v45  ;;  %v2945_v54 = vor.u32 %v2943_v0, %v2941_v1  ;;  %v2949_v44 = vrot.slane %v2947_v50, 1  ;;  %v3978_v30 = vrot.slane %v8783_v51, 2  ;;  %v10266_v24 = vld [vmem:[#allocation18_spill] sm:$0xff]  ;;  %v5207_v1 = vpop.f32.mrf.mxu0  ;;  %5690 = vmatprep.subr.bf16.mxu0 %v10207_v8 }
 0x24b   : > { %3382 = vmatmul.mubr.bf16.gmra.mxu1 %v8642_v33  ;;  %v2278_v29 = vmax.f32 %v2255_v58, 0.0  ;;  %v2226_v48 = vadd.f32 %v2181_v63, %v10265_v57  ;;  %v5206_v22 = vadd.f32 %v5205_v10, %v5204_v18  ;;  %v3148_v39 = vrot.slane %v8824_v59, 1  ;;  %v6092_v18 = vld [vmem:[#allocation7 + $0x48] sm:$0xff]  }
 0x24c   : > { %v2878_v12 = vsel %vm10267_vm2, %v2277_v9, 0.0  ;;  %vm10268_vm4 = vsmask.f32 7424  ;;  %vm2354_vm5 = vcmp.ge.s32.totalorder %v7838_v23, 0  ;;  %vm2377_vm0 = vcmp.lt.s32.totalorder %v7838_v23, 288  ;;  %v6096_v58 = vld [vmem:[#allocation7 + $0x88] sm:$0xff]   ;;  %v5208_v35 = vpop.f32.mrf.mxu0  ;;  %5343 = vmatpush3.bf16.msra.mxu1 %v6089_v37 }
 0x24d   : > { %v8838_v0 = vsel %vm10268_vm4, %v2945_v54, %v2949_v44  ;;  %vm2678_vm1 = vcmp.ne.s32.totalorder %v8798_v14, 0  ;;  %vm10269_vm7 = vcmask 1045504   ;;  %v2879_v6 = vsel %vm10270_vm15, %v2278_v29, 0.0  ;;  %v6094_v57 = vld [vmem:[#allocation7 + $0x8] sm:$0xff]   ;;  %5344 = vmatprep.subr.bf16.mxu1 %v6092_v18  ;;  %5691 = vmatpush3.bf16.msra.mxu0 %v6096_v58 }
 0x24e   : > { %v8848_v11 = vsel %vm10269_vm7, %v3972_v15, %v3978_v30  ;;  %v8855_v21 = vpack.c.bf16 %v2278_v29, %v2277_v9  ;;  %v2256_v50 = vadd.f32 %v7872_v62, %v2226_v48  ;;  %v2184_v5 = vadd.f32 %v5206_v22, %v8413_v42  ;;  %v5210_v22 = vpop.f32.mrf.mxu0  ;;  %5692 = vmatprep.subr.bf16.mxu0 %v10207_v8 }
 0x24f   : > { %v8859_v63 = vpack.c.bf16 %v2879_v6, %v2878_v12  ;;  %vm10271_vm13 = vnez %v10118_v16  ;;  %v10275_v15 = vrot.slane %v8752_v19, 1  ;;  %vm10276_vm6 = vcmask 1046528   ;;  %v6097_v12 = vld [vmem:[#allocation7 + $0x40] sm:$0xff]  }
 0x250   : > { %v10272_v49 = vsel %vm10271_vm13, %v8354_v20, %v8261_v7  ;;  %v3146_v9 = vrot.slane %v8838_v0, 1  ;;  %vm10277_vm11 = vcmp.ne.s32.totalorder %v8711_v32, 0  ;;  %vm2701_vm4 = vcmp.lt.s32.totalorder %v8798_v14, 0  ;;  %5345 = vmatpush3.bf16.msra.mxu1 %v6094_v57  ;;  %v6100_v57 = vld [vmem:[#allocation7 + $0x1f8] sm:$0xff]  }
 0x251   : > { %vm8866_vm7 = vcmp.lt.s32.totalorder %v10272_v49, 16  ;;  %v3149_v42 = vsel %vm10276_vm6, %v10275_v15, %v3148_v39  ;;  %vm8880_vm2 = vmand %vm2700_vm3, %vm10277_vm11  ;;  %v2227_v7 = vadd.f32 %v2184_v5, %v8417_v17  ;;  %v5209_v20 = vadd.f32 %v5208_v35, %v5207_v1  ;;  %v6099_v5 = vld [vmem:[#allocation7 + $0x80] sm:$0xff]   ;;  %v5211_v35 = vpop.f32.mrf.mxu0  ;;  %5346 = vmatprep.subr.bf16.mxu1 %v6097_v12 }
 0x252   : > { %5655 = vmatmul.mubr.bf16.gmra.mxu0 %v3149_v42  ;;  %v10280_v56 = vsel %vm8704_vm12, %v8632_v41, %v8477_v27  ;;  %v2951_v54 = vshrl.u32 %v8783_v51, 16  ;;  %v2655_v29 = vsub.s32 0, %v8816_v36  ;;  %v2279_v48 = vmax.f32 %v2256_v50, 0.0  ;;  %vm10284_vm3 = vmmov %vm10276_vm6  ;;  %v10286_v42 = vld [vmem:[#allocation62_spill] sm:$0xff] }
 0x253   : > { %vm8892_vm15 = vcmp.lt.s32.totalorder %v10280_v56, 16  ;;  %v10283_v17 = vrot.slane %v8765_v28, 1  ;;  %5658 = vmatprep.mubr.msk.bf16.mxu0 %vm10208_vm8, %v10207_v8  ;;  %v3007_v27 = vrot.slane %v8859_v63, 1  ;;  %v2955_v41 = vshll.u32 %v8859_v63, 16  ;;  %vm10285_vm12 = vmmov %vm10284_vm3  ;;  %5693 = vmatpush3.bf16.msra.mxu0 %v6099_v5 }
 0x254   : > { %v2257_v37 = vadd.f32 %v7872_v62, %v2227_v7  ;;  %v2189_v1 = vadd.f32 %v8317_v60, %v5209_v20  ;;  %v2769_v6 = vsel %vm8880_vm2, %v8812_v52, %v8711_v32  ;;  %v8914_v50 = vadd.s32 18, %v8798_v14  ;;  %vm8934_vm11 = vmand %vm2701_vm4, %vm2678_vm1  ;;  %5730 = vmatprep.subr.bf16.mxu0 %v10207_v8 }
 0x255   : > { %v3147_v43 = vsel %vm10284_vm3, %v10283_v17, %v3146_v9  ;;  %v8922_v62 = vsel %vm10285_vm12, %v3005_v45, %v3007_v27  ;;  %v2953_v60 = vor.u32 %v2951_v54, %v2949_v44  ;;  %v2957_v18 = vrot.slane %v2955_v41, 1  ;;  %v6098_v44 = vld [vmem:[#allocation7] sm:$0xff]   ;;  %vm10289_vm3 = vmand %vm8627_vm14, %vm8511_vm10  ;;  %v5213_v54 = vpop.f32.mrf.mxu0 }
 0x256   : > { %3389 = vmatprep.mubr.bf16.mxu1 %v3147_v43  ;;  %v3984_v49 = vrot.slane %v8859_v63, 2  ;;  %v2280_v15 = vmax.f32 %v2257_v37, 0.0  ;;  %v2228_v58 = vadd.f32 %v2189_v1, %v10286_v42  ;;  %v5212_v7 = vadd.f32 %v5211_v35, %v5210_v22  ;;  %5347 = vmatpush3.bf16.msra.mxu1 %v6098_v44 }
 0x257   : > { %3390 = vmatmul.mubr.bf16.gmra.mxu1 %v8752_v19  ;;  %v3152_v20 = vrot.slane %v8922_v62, 1  ;;  %v2880_v56 = vsel %vm10289_vm3, %v2279_v48, 0.0  ;;  %vm10290_vm12 = vsmask.f32 7424  ;;  %vm2356_vm13 = vcmp.ge.s32.totalorder %v8170_v25, 0  ;;  %v5214_v53 = vpop.f32.mrf.mxu0  ;;  %5419 = vmatprep.subr.bf16.mxu1 %v6100_v57  ;;  %v10305_v57 = vld [vmem:[#allocation24_spill] sm:$0xff] }
 0x258   : > { %v8944_v22 = vsel %vm10290_vm12, %v2953_v60, %v2957_v18  ;;  %vm2379_vm6 = vcmp.lt.s32.totalorder %v8170_v25, 288  ;;  %vm10291_vm1 = vcmp.lt.s32.totalorder %v8310_v26, 0  ;;  %vm10292_vm10 = vcmask 1045504  }
 0x259   : > { %v8951_v17 = vsel %vm10291_vm1, %v2655_v29, %v8816_v36  ;;  %v8958_v13 = vsel %vm10292_vm10, %v3978_v30, %v3984_v49  ;;  %vm10293_vm14 = vnez %v10176_v47  ;;  %v8965_v43 = vpack.c.bf16 %v2280_v15, %v2279_v48  ;;  %v8970_v36 = vld [vmem:[%s9630_s2] ss:$0 sm:$0xff]  ;;  %vm9000_vm10 = vmand %vm2354_vm5, %vm2377_vm0 }
 0x25a   : > { %vm10294_vm4 = vmand %vm8648_vm9, %vm10293_vm14  ;;  %v2258_v29 = vadd.f32 %v8970_v36, %v2228_v58  ;;  %v2192_v51 = vadd.f32 %v8376_v3, %v5212_v7  ;;  %vm10295_vm3 = vcmp.lt.s32.totalorder %v10266_v24, 288  ;;  %vm10296_vm12 = vcmp.ge.s32.totalorder %v10266_v24, 0  ;;  %v10300_v24 = vld [vmem:[#allocation65_spill] sm:$0xff] }
 0x25b   : > { %v2881_v31 = vsel %vm10294_vm4, %v2280_v15, 0.0  ;;  %vm8980_vm9 = vmand %vm10296_vm12, %vm10295_vm3  ;;  %vm10299_vm1 = vcmask 1046528   ;;  %v3150_v3 = vrot.slane %v8944_v22, 1  ;;  %v2770_v41 = vsel %vm8934_vm11, %v8914_v50, %v8798_v14  ;;  %v5216_v50 = vpop.f32.mrf.mxu0 }
 0x25c   : > { %v8974_v30 = vpack.c.bf16 %v2881_v31, %v2880_v56  ;;  %v3153_v48 = vsel %vm10299_vm1, %v3148_v39, %v3152_v20  ;;  %v2229_v12 = vadd.f32 %v2192_v51, %v10300_v24  ;;  %v5215_v39 = vadd.f32 %v5214_v53, %v5213_v54  ;;  %vm10303_vm11 = vmmov %vm10299_vm1  ;;  %v10306_v53 = vld [vmem:[#allocation68_spill] sm:$0xff] }
 0x25d   : > { %5659 = vmatmul.mubr.bf16.gmra.mxu0 %v3153_v48  ;;  %vm2679_vm14 = vcmp.ne.s32.totalorder %v8951_v17, 0  ;;  %v2959_v1 = vshrl.u32 %v8859_v63, 16  ;;  %v2281_v14 = vmax.f32 %v2258_v29, 0.0  ;;  %v3151_v5 = vsel %vm10303_vm11, %v3146_v9, %v3150_v3  ;;  %vm2813_vm4 = vmand %vm8980_vm9, %vm8866_vm7  ;;  %v10304_v9 = vld [vmem:[#allocation50_spill] sm:$0xff]  ;;  %v5217_v58 = vpop.f32.mrf.mxu0  ;;  %v10307_v48 = vld [vmem:[#allocation21_spill] sm:$0xff] }
 0x25e   : > { %5662 = vmatprep.mubr.msk.bf16.mxu0 %vm10208_vm8, %v10207_v8  ;;  %vm2380_vm5 = vcmp.lt.s32.totalorder %v8310_v26, 288  ;;  %v3009_v23 = vrot.slane %v8974_v30, 1  ;;  %v2963_v35 = vshll.u32 %v8974_v30, 16  ;;  %v2259_v60 = vadd.f32 %v8970_v36, %v2229_v12  ;;  %3397 = vmatprep.mubr.bf16.mxu1 %v3151_v5  ;;  %vm2814_vm12 = vmand %vm9000_vm10, %vm8892_vm15  ;;  %v2199_v12 = vpop.f32.mrf.mxu1 }
 0x25f   : > { %v2197_v15 = vadd.f32 %v5215_v39, %v10304_v9  ;;  %vm2702_vm3 = vcmp.lt.s32.totalorder %v8951_v17, 0  ;;  %v2748_v42 = vadd.s32 18, %v8951_v17  ;;  %3398 = vmatmul.mubr.bf16.gmra.mxu1 %v8824_v59  ;;  %v2961_v45 = vor.u32 %v2959_v1, %v2957_v18  ;;  %v5219_v18 = vpop.f32.mrf.mxu0 }
 0x260   : > { %v9031_v7 = vsel %vm10299_vm1, %v3007_v27, %v3009_v23  ;;  %v2965_v44 = vrot.slane %v2963_v35, 1  ;;  %v3990_v56 = vrot.slane %v8974_v30, 2  ;;  %v2282_v54 = vmax.f32 %v2259_v60, 0.0  ;;  %vm9047_vm11 = vmand %vm2702_vm3, %vm2679_vm14 }
 0x261   : > { %v2230_v31 = vadd.f32 %v2197_v15, %v10305_v57  ;;  %v5218_v29 = vadd.f32 %v5217_v58, %v5216_v50  ;;  %v3156_v51 = vrot.slane %v9031_v7, 1  ;;  %v1560_v24 = vadd.f32 %v10307_v48, %v10306_v53 }
 0x262   : > { %v2882_v27 = vsel %vm2813_vm4, %v2281_v14, 0.0  ;;  %vm10310_vm1 = vsmask.f32 7424  ;;  %vm10311_vm0 = vcmask 1045504   ;;  %v2883_v4 = vsel %vm2814_vm12, %v2282_v54, 0.0  ;;  %vm9096_vm4 = vmand %vm2356_vm13, %vm2379_vm6 }
 0x263   : > { %v9052_v1 = vsel %vm10310_vm1, %v2961_v45, %v2965_v44  ;;  %v9057_v47 = vsel %vm10311_vm0, %v3984_v49, %v3990_v56  ;;  %v2260_v14 = vadd.f32 %v8970_v36, %v2230_v31  ;;  %v2200_v50 = vadd.f32 %v5218_v29, %v2199_v12  ;;  %v10326_v29 = vld [vmem:[#allocation32_spill] sm:$0xff] }
 0x264   : > { %vm10312_vm7 = vcmask 1046528   ;;  %v9068_v35 = vpack.c.bf16 %v2883_v4, %v2882_v27  ;;  %vm10313_vm9 = vcmp.lt.s32.totalorder %v10185_v61, 288  ;;  %vm10314_vm14 = vcmp.ge.s32.totalorder %v10185_v61, 0 }
 0x265   : > { %v3157_v5 = vsel %vm10312_vm7, %v3152_v20, %v3156_v51  ;;  %vm9074_vm0 = vmand %vm10314_vm14, %vm10313_vm9  ;;  %vm9083_vm15 = vcmp.lt.s32.totalorder %v2769_v6, 16  ;;  %vm9087_vm10 = vcmp.lt.s32.totalorder %v2770_v41, 16  ;;  %v5220_v20 = vpop.f32.mrf.mxu0  ;;  %v3154_v61 = vrot.slane %v9052_v1, 1 }
 0x266   : > { %v2231_v37 = vadd.f32 %v2200_v50, %v1560_v24  ;;  %v5221_v32 = vadd.f32 %v5220_v20, %v5219_v18  ;;  %v2771_v52 = vsel %vm9047_vm11, %v2748_v42, %v8951_v17  ;;  %5663 = vmatmul.mubr.bf16.gmra.mxu0 %v3157_v5  ;;  %v2967_v6 = vshrl.u32 %v8974_v30, 16  ;;  %vm10323_vm2 = vmmov %vm10312_vm7  ;;  %v10324_v42 = vld [vmem:[#allocation41_spill] sm:$0xff] }
 0x267   : > { %v2283_v41 = vmax.f32 %v2260_v14, 0.0  ;;  %v3155_v60 = vsel %vm10323_vm2, %v3150_v3, %v3154_v61  ;;  %5666 = vmatprep.mubr.msk.bf16.mxu0 %vm10208_vm8, %v10207_v8  ;;  %v3011_v25 = vrot.slane %v9068_v35, 1  ;;  %v2971_v9 = vshll.u32 %v9068_v35, 16  ;;  %v5222_v15 = vpop.f32.mrf.mxu0  ;;  %vm2815_vm13 = vmand %vm9074_vm0, %vm9083_vm15 }
 0x268   : > { %v2261_v17 = vadd.f32 %v8970_v36, %v2231_v37  ;;  %v2205_v30 = vadd.f32 %v10324_v42, %v5221_v32  ;;  %3405 = vmatprep.mubr.bf16.mxu1 %v3155_v60  ;;  %vm2816_vm6 = vmand %vm9096_vm4, %vm9087_vm10  ;;  %v2969_v58 = vor.u32 %v2967_v6, %v2965_v44  ;;  %v3996_v57 = vrot.slane %v9068_v35, 2 }
 0x269   : > { %3406 = vmatmul.mubr.bf16.gmra.mxu1 %v8922_v62  ;;  %vm10325_vm3 = vmmov %vm10323_vm2  ;;  %v2973_v45 = vrot.slane %v2971_v9, 1  ;;  %v5223_v54 = vpop.f32.mrf.mxu0  ;;  %vm10327_vm12 = vcmp.ge.s32.totalorder %v8310_v26, 0  ;;  %vm9133_vm1 = vcmp.lt.s32.totalorder %v2771_v52, 16  ;;  %v2884_v44 = vsel %vm2815_vm13, %v2283_v41, 0.0 }
 0x26a   : > { %v9121_v3 = vsel %vm10325_vm3, %v3009_v23, %v3011_v25  ;;  %v2284_v31 = vmax.f32 %v2261_v17, 0.0  ;;  %v2232_v53 = vadd.f32 %v2205_v30, %v10326_v29  ;;  %vm9129_vm11 = vmand %vm10327_vm12, %vm2380_vm5  ;;  %vm10332_vm7 = vsmask.f32 7424 }
 0x26b   : > { %v3160_v23 = vrot.slane %v9121_v3, 1  ;;  %v9144_v27 = vsel %vm10332_vm7, %v2969_v58, %v2973_v45  ;;  %vm10333_vm9 = vcmask 1045504   ;;  %vm10334_vm5 = vmmov %vm10323_vm2 }
 0x26c   : > { %v9147_v26 = vsel %vm10333_vm9, %v3990_v56, %v3996_v57  ;;  %v2885_v12 = vsel %vm2816_vm6, %v2284_v31, 0.0  ;;  %v2262_v18 = vadd.f32 %v8970_v36, %v2232_v53  ;;  %v3158_v4 = vrot.slane %v9144_v27, 1  ;;  %vm2817_vm14 = vmand %vm9129_vm11, %vm9133_vm1 }
 0x26d   : > { %v3161_v39 = vsel %vm10334_vm5, %v3156_v51, %v3160_v23  ;;  %v2897_v14 = vpack.c.bf16 %v2885_v12, %v2884_v44  ;;  %vm10335_vm0 = vmmov %vm10323_vm2  ;;  %v3070_v56 = vshrl.u32 %v9068_v35, 16 }
 0x26e   : > { %v2285_v50 = vmax.f32 %v2262_v18, 0.0  ;;  %5667 = vmatmul.mubr.bf16.gmra.mxu0 %v3161_v39  ;;  %v3159_v5 = vsel %vm10335_vm0, %v3154_v61, %v3158_v4  ;;  %vm10336_vm15 = vmmov %vm10335_vm0 }
 0x26f   : > { %3413 = vmatprep.mubr.bf16.mxu1 %v3159_v5  ;;  %5670 = vmatprep.mubr.msk.bf16.mxu0 %vm10208_vm8, %v10207_v8  ;;  %v3082_v36 = vrot.slane %v2897_v14, 1  ;;  %v3074_v51 = vshll.u32 %v2897_v14, 16  ;;  %v3072_v10 = vor.u32 %v3070_v56, %v2973_v45  ;;  %v3078_v49 = vshrl.u32 %v2897_v14, 16  ;;  %vm10337_vm10 = vmmov %vm10333_vm9  ;;  %v10350_v56 = vld [vmem:[#allocation47_spill] sm:$0xff] }
 0x270   : > { %v2886_v63 = vsel %vm2817_vm14, %v2285_v50, 0.0  ;;  %v4002_v20 = vrot.slane %v2897_v14, 2  ;;  %vm10338_vm4 = vmmov %vm10332_vm7 }
 0x271   : > { %v2898_v37 = vpack.c.bf16 %v2886_v63, %v2886_v63  ;;  %3414 = vmatmul.mubr.bf16.gmra.mxu1 %v9031_v7  ;;  %v9162_v16 = vsel %vm10336_vm15, %v3011_v25, %v3082_v36  ;;  %v3076_v32 = vrot.slane %v3074_v51, 1  ;;  %v3168_v61 = vrot.slane %v3082_v36, 1  ;;  %vm10339_vm2 = vmmov %vm10335_vm0  ;;  %v10351_v51 = vld [vmem:[#allocation31_spill] sm:$0xff] }
 0x272   : > { %v3164_v35 = vrot.slane %v9162_v16, 1  ;;  %v9166_v52 = vsel %vm10337_vm10, %v3996_v57, %v4002_v20  ;;  %vm10340_vm13 = vmmov %vm10335_vm0  ;;  %v4000_v12 = vrot.slane %v9162_v16, 2  ;;  %v10353_v63 = vld [vmem:[#allocation27_spill] sm:$0xff] }
 0x273   : > { %v9169_v6 = vsel %vm10338_vm4, %v3072_v10, %v3076_v32  ;;  %v3080_v41 = vor.u32 %v3078_v49, %v3076_v32  ;;  %v3898_v60 = vshll.u32 %v2898_v37, 16  ;;  %v3902_v30 = vshrl.u32 %v2898_v37, 16  ;;  %vm10341_vm6 = vmmov %vm10335_vm0  ;;  %v10356_v10 = vld [vmem:[#allocation46_spill] sm:$0xff]  ;;  %v10358_v49 = vld [vmem:[#allocation44_spill] sm:$0xff] }
 0x274   : > { %v3165_v9 = vsel %vm10339_vm2, %v3160_v23, %v3164_v35  ;;  %v3162_v15 = vrot.slane %v9169_v6, 1  ;;  %v3169_v17 = vsel %vm10340_vm13, %v3164_v35, %v3168_v61  ;;  %v4008_v58 = vrot.slane %v2898_v37, 2  ;;  %vm10342_vm3 = vmmov %vm10335_vm0  ;;  %v6102_v32 = vld [vmem:[#allocation7 + $0x1f0] sm:$0xff]   ;;  %v10362_v35 = vld [vmem:[#allocation33_spill] sm:$0xff] }
 0x275   : > { %v3166_v25 = vrot.slane %v3080_v41, 1  ;;  %v3900_v42 = vrot.slane %v3898_v60, 1  ;;  %v3906_v54 = vrot.slane %v2898_v37, 1  ;;  %v3998_v31 = vrot.slane %v9169_v6, 2  ;;  %vm10343_vm12 = vmmov %vm10338_vm4  ;;  %v6101_v37 = vld [vmem:[#allocation7 + $0x1b8] sm:$0xff]   ;;  %v9222_v61 = vld [vmem:[#allocation7 + $0x230] sm:$0xff]  }
 0x276   : > { %5671 = vmatmul.mubr.bf16.gmra.mxu0 %v3165_v9  ;;  %v3163_v45 = vsel %vm10341_vm6, %v3158_v4, %v3162_v15  ;;  %vm10344_vm11 = vmmov %vm10333_vm9  ;;  %vm10354_vm15 = vnez %v10353_v63  ;;  %vm10357_vm4 = vnez %v10356_v10  ;;  %vm10359_vm2 = vnez %v10358_v49  ;;  %v6103_v60 = vld [vmem:[#allocation7 + $0x1b0] sm:$0xff]   ;;  %v6104_v9 = vld [vmem:[#allocation7 + $0x1e8] sm:$0xff]  }
 0x277   : > { %3421 = vmatprep.mubr.bf16.mxu1 %v3163_v45  ;;  %v3167_v57 = vsel %vm10342_vm3, %v3162_v15, %v3166_v25  ;;  %5674 = vmatprep.mubr.msk.bf16.mxu0 %vm10208_vm8, %v10207_v8  ;;  %v3901_v29 = vsel %vm10343_vm12, %v3080_v41, %v3900_v42  ;;  %v3904_v53 = vor.u32 %v3902_v30, %v3900_v42  ;;  %vm10345_vm1 = vmmov %vm10335_vm0  ;;  %v4012_v44 = vrot.slane %v3906_v54, 2  ;;  %v10363_v41 = vld [vmem:[#allocation43_spill] sm:$0xff]  ;;  %v6106_v42 = vld [vmem:[#allocation7 + $0x1e0] sm:$0xff]  }
 0x278   : > { %v4004_v48 = vrot.slane %v3901_v29, 2  ;;  %v9181_v24 = vsel %vm10344_vm11, %v4002_v20, %v4008_v58  ;;  %v3907_v23 = vsel %vm10345_vm1, %v3082_v36, %v3906_v54  ;;  %vm10346_vm7 = vmmov %vm10333_vm9  ;;  %v9206_v36 = vld [vmem:[#allocation7 + $0x238] sm:$0xff]   ;;  %vm10352_vm0 = vnez %v10351_v51  ;;  %v10361_v20 = vld [vmem:[#allocation40_spill] sm:$0xff] }
 0x279   : > { %3422 = vmatmul.mubr.bf16.gmra.mxu1 %v9121_v3  ;;  %v4010_v18 = vrot.slane %v3904_v53, 2  ;;  %v4006_v39 = vrot.slane %v3907_v23, 2  ;;  %vm10347_vm9 = vmmov %vm10346_vm7  ;;  %v9229_v15 = vld [vmem:[#allocation7 + $0x228] sm:$0xff]   ;;  %v9235_v30 = vld [vmem:[#allocation7 + $0x220] sm:$0xff]  }
 0x27a   : > { %3429 = vmatprep.mubr.bf16.mxu1 %v3167_v57  ;;  %v9189_v4 = vsel %vm10346_vm7, %v3998_v31, %v4004_v48  ;;  %vm10348_vm5 = vmmov %vm10346_vm7  ;;  %v6105_v25 = vld [vmem:[#allocation7 + $0x1a8] sm:$0xff]   ;;  %v10365_v58 = vld [vmem:[#allocation25_spill] sm:$0xff] }
 0x27b   : > { %v9192_v14 = vsel %vm10347_vm9, %v4004_v48, %v4010_v18  ;;  %v9197_v50 = vsel %vm10348_vm5, %v4000_v12, %v4006_v39  ;;  %vm10349_vm14 = vmmov %vm10348_vm5  ;;  %v10366_v45 = vld [vmem:[#allocation30_spill] sm:$0xff]  ;;  %v6108_v57 = vld [vmem:[#allocation7 + $0x1d8] sm:$0xff]  }
 0x27c   : > { %v9200_v5 = vsel %vm10349_vm14, %v4006_v39, %v4012_v44  ;;  %vm10355_vm10 = vmand %vm10352_vm0, %vm10354_vm15  ;;  %vm10367_vm3 = vnez %v10366_v45  ;;  %v6107_v54 = vld [vmem:[#allocation7 + $0x1a0] sm:$0xff]   ;;  %v9243_v29 = vld [vmem:[#allocation7 + $0x218] sm:$0xff]   ;;  %vm10385_vm0 = vcmask 1045504   ;;  %v3968_v45 = vrot.slane %v8765_v28, 2 }
 0x27d   : > { %vm10360_vm13 = vmand %vm10357_vm4, %vm10359_vm2  ;;  %v6109_v53 = vld [vmem:[#allocation7 + $0x198] sm:$0xff]   ;;  %v6112_v48 = vld [vmem:[#allocation7 + $0x1d0] sm:$0xff]  }
 0x27e   : > { %5675 = vmatmul.mubr.bf16.gmra.mxu0 %v3169_v17  ;;  %vm4848_vm6 = vmpackc.low %vm10360_vm13, %vm10355_vm10  ;;  %v10364_v17 = vld [vmem:[#allocation34_spill] sm:$0xff]  ;;  %v9250_v23 = vld [vmem:[#allocation7 + $0x210] sm:$0xff]  }
 0x27f   : > { %5694 = vmatprep.mubr.msk.bf16.mxu0 %vm10208_vm8, %v10207_v8  ;;  %v10368_v44 = vld [vmem:[#allocation26_spill] sm:$0xff]  ;;  %v10369_v18 = vld [vmem:[#allocation35_spill] sm:$0xff]  ;;  %v6113_v39 = vld [vmem:[#allocation7 + $0x190] sm:$0xff]  }
 0x280   : > { %vm10370_vm12 = vnez %v10369_v18  ;;  %v9258_v51 = vld [vmem:[#allocation7 + $0x208] sm:$0xff]   ;;  %v6121_v10 = vld [vmem:[#allocation7 + $0x1c0] sm:$0xff]   ;;  %vm10386_vm15 = vmmov %vm10385_vm0 }
 0x281   : > { %3430 = vmatmul.mubr.bf16.gmra.mxu1 %v9162_v16  ;;  %v6118_v63 = vld [vmem:[#allocation7 + $0x188] sm:$0xff]   ;;  %v9265_v49 = vld [vmem:[#allocation7 + $0x200] sm:$0xff]   ;;  %vm10388_vm10 = vmmov %vm10385_vm0 }
 0x282   : > { %3719 = vmatprep.mubr.bf16.mxu1 %v10350_v56  ;;  %v6116_v56 = vld [vmem:[#allocation7 + $0x1c8] sm:$0xff]   ;;  %vm10389_vm4 = vmmov %vm10385_vm0 }
 0x283   : > { %vm10391_vm2 = vmmov %vm10385_vm0 }
 0x284   : > { %vm10392_vm13 = vmmov %vm10385_vm0 }
 0x286   : > { %5695 = vmatmul.mubr.bf16.vlgmr.msra.gmra.mxu0 %v10361_v20  ;;  %v10371_v20 = vld [vmem:[#allocation48_spill] sm:$0xff] }
 0x287   : > { %5698 = vmatprep.mubr.msk.bf16.mxu0 %vm10208_vm8, %v10207_v8  ;;  %5731 = vmatpush3.bf16.msra.mxu0 %v9206_v36 }
 0x288   : > { %5732 = vmatprep.subr.bf16.mxu0 %v10207_v8 }
 0x289   : > { %4850 = vmatmul.mubr.msk.bf16.vlgmr.msra.gmra.mxu1 %vm4848_vm6, %v10362_v35  ;;  %v10374_v35 = vld [vmem:[#allocation52_spill] sm:$0xff]  ;;  %vm10393_vm6 = vmmov %vm10385_vm0 }
 0x28a   : > { %3727 = vmatprep.mubr.bf16.mxu1 %v10363_v41  ;;  %5420 = vmatpush3.bf16.msra.mxu1 %v6101_v37  ;;  %v10372_v37 = vld [vmem:[#allocation37_spill] sm:$0xff]  ;;  %v10375_v41 = vld [vmem:[#allocation20_spill] sm:$0xff] }
 0x28b   : > { %5421 = vmatprep.subr.bf16.mxu1 %v6102_v32  ;;  %5733 = vmatpush3.bf16.msra.mxu0 %v9222_v61  ;;  %vm10373_vm11 = vnez %v10372_v37  ;;  %v6122_v32 = vld [vmem:[#allocation7 + $0x180] sm:$0xff]   ;;  %vm10376_vm1 = vnez %v10375_v41 }
 0x28c   : > { %5734 = vmatprep.subr.bf16.mxu0 %v10207_v8 }
 0x28e   : > { %5699 = vmatmul.mubr.bf16.gmra.mxu0 %v10364_v17  ;;  %5422 = vmatpush3.bf16.msra.mxu1 %v6103_v60  ;;  %v10377_v60 = vld [vmem:[#allocation29_spill] sm:$0xff]  ;;  %v3961_v17 = vrot.slane %v8661_v46, 2 }
 0x28f   : > { %5702 = vmatprep.mubr.msk.bf16.mxu0 %vm10208_vm8, %v10207_v8  ;;  %5423 = vmatprep.subr.bf16.mxu1 %v6104_v9  ;;  %vm10378_vm7 = vnez %v10377_v60  ;;  %v10379_v9 = vld [vmem:[#allocation57_spill] sm:$0xff] }
 0x290   : > { %5735 = vmatpush3.bf16.msra.mxu0 %v9229_v15  ;;  %vm10380_vm9 = vnez %v10379_v9 }
 0x291   : > { %4853 = vmatmul.mubr.msk.bf16.gmra.mxu1 %vm10367_vm3, %v10365_v58  ;;  %5736 = vmatprep.subr.bf16.mxu0 %v10207_v8  ;;  %v3964_v58 = vrot.slane %v8642_v33, 2  ;;  %vm10394_vm3 = vmmov %vm10385_vm0 }
 0x292   : > { %3735 = vmatprep.mubr.bf16.mxu1 %v8569_v34  ;;  %5424 = vmatpush3.bf16.msra.mxu1 %v6105_v25  ;;  %v3960_v25 = vrot.slane %v8569_v34, 2  ;;  %v10387_v34 = vld [vmem:[#allocation67_spill] sm:$0xff] }
 0x293   : > { %5425 = vmatprep.subr.bf16.mxu1 %v6106_v42 }
 0x294   : > { %5737 = vmatpush3.bf16.msra.mxu0 %v9235_v30  ;;  %v3962_v42 = vsel %vm10385_vm0, %v3960_v25, %v3961_v17 }
 0x295   : > { %5738 = vmatprep.subr.bf16.mxu0 %v10207_v8 }
 0x296   : > { %5703 = vmatmul.mubr.bf16.gmra.mxu0 %v8525_v38  ;;  %5426 = vmatpush3.bf16.msra.mxu1 %v6107_v54  ;;  %v3969_v54 = vsel %vm10388_vm10, %v3961_v17, %v3968_v45 }
 0x297   : > { %5706 = vmatprep.mubr.msk.bf16.mxu0 %vm10208_vm8, %v10207_v8  ;;  %5427 = vmatprep.subr.bf16.mxu1 %v6108_v57  ;;  %v3992_v57 = vrot.slane %v9144_v27, 2 }
 0x298   : > { %5739 = vmatpush3.bf16.msra.mxu0 %v9243_v29 }
 0x299   : > { %4856 = vmatmul.mubr.msk.bf16.gmra.mxu1 %vm10370_vm12, %v10368_v44  ;;  %5740 = vmatprep.subr.bf16.mxu0 %v10207_v8  ;;  %vm10395_vm12 = vmmov %vm10385_vm0 }
 0x29a   : > { %3743 = vmatprep.mubr.bf16.mxu1 %v8661_v46  ;;  %5428 = vmatpush3.bf16.msra.mxu1 %v6109_v53 }
 0x29b   : > { %5429 = vmatprep.subr.bf16.mxu1 %v6112_v48 }
 0x29c   : > { %5741 = vmatpush3.bf16.msra.mxu0 %v9250_v23 }
 0x29d   : > { %5742 = vmatprep.subr.bf16.mxu0 %v10207_v8 }
 0x29e   : > { %5707 = vmatmul.mubr.bf16.gmra.mxu0 %v8642_v33  ;;  %5430 = vmatpush3.bf16.msra.mxu1 %v6113_v39  ;;  %v3974_v33 = vrot.slane %v8838_v0, 2 }
 0x29f   : > { %5710 = vmatprep.mubr.msk.bf16.mxu0 %vm10208_vm8, %v10207_v8  ;;  %5431 = vmatprep.subr.bf16.mxu1 %v6116_v56 }
 0x2a0   : > { %5743 = vmatpush3.bf16.msra.mxu0 %v9258_v51 }
 0x2a1   : > { %4859 = vmatmul.mubr.msk.bf16.gmra.mxu1 %vm10373_vm11, %v10371_v20  ;;  %5744 = vmatprep.subr.bf16.mxu0 %v10207_v8  ;;  %vm10396_vm11 = vmmov %vm10385_vm0 }
 0x2a2   : > { %3751 = vmatprep.mubr.bf16.mxu1 %v8765_v28  ;;  %5432 = vmatpush3.bf16.msra.mxu1 %v6118_v63  ;;  %v10390_v28 = vld [vmem:[#allocation28_spill] sm:$0xff] }
 0x2a3   : > { %5433 = vmatprep.subr.bf16.mxu1 %v6121_v10 }
 0x2a4   : > { %5745 = vmatpush3.bf16.msra.mxu0 %v9265_v49 }
 0x2a6   : > { %5711 = vmatmul.mubr.bf16.gmra.mxu0 %v8752_v19  ;;  %5434 = vmatpush3.bf16.msra.mxu1 %v6122_v32 }
 0x2a7   : > { %5714 = vmatprep.mubr.msk.bf16.mxu0 %vm10208_vm8, %v10207_v8  ;;  %5782 = vmatprep.subr.bf16.mxu1 %v10207_v8 }
 0x2a9   : > { %4862 = vmatmul.mubr.msk.bf16.gmra.mxu1 %vm10376_vm1, %v10374_v35  ;;  %vm10397_vm1 = vmmov %vm10385_vm0 }
 0x2aa   : > { %3759 = vmatprep.mubr.bf16.mxu1 %v8838_v0 }
 0x2ae   : > { %5715 = vmatmul.mubr.bf16.gmra.mxu0 %v8824_v59 }
 0x2af   : > { %5718 = vmatprep.mubr.msk.bf16.mxu0 %vm10208_vm8, %v10207_v8 }
 0x2b1   : > { %4865 = vmatmul.mubr.msk.bf16.gmra.mxu1 %vm10378_vm7, %v8683_v2  ;;  %v10381_v2 = vld [vmem:[#allocation55_spill] sm:$0xff]  ;;  %vm10398_vm7 = vmmov %vm10385_vm0 }
 0x2b2   : > { %3767 = vmatprep.mubr.bf16.mxu1 %v8944_v22  ;;  %vm10382_vm5 = vnez %v10381_v2 }
 0x2b6   : > { %5719 = vmatmul.mubr.bf16.gmra.mxu0 %v8922_v62 }
 0x2b7   : > { %5722 = vmatprep.mubr.msk.bf16.mxu0 %vm10208_vm8, %v10207_v8 }
 0x2b9   : > { %4868 = vmatmul.mubr.msk.bf16.gmra.mxu1 %vm10380_vm9, %v8779_v40  ;;  %v10383_v40 = vld [vmem:[#allocation58_spill] sm:$0xff]  ;;  %vm10399_vm9 = vmmov %vm10385_vm0 }
 0x2ba   : > { %3775 = vmatprep.mubr.bf16.mxu1 %v9052_v1  ;;  %vm10384_vm14 = vnez %v10383_v40 }
 0x2be   : > { %5723 = vmatmul.mubr.bf16.gmra.mxu0 %v9031_v7 }
 0x2bf   : > { %5726 = vmatprep.mubr.msk.bf16.mxu0 %vm10208_vm8, %v10207_v8 }
 0x2c1   : > { %4871 = vmatmul.mubr.msk.bf16.gmra.mxu1 %vm10382_vm5, %v8855_v21  ;;  %v3963_v21 = vrot.slane %v8525_v38, 2  ;;  %vm10400_vm5 = vmmov %vm10385_vm0 }
 0x2c2   : > { %3783 = vmatprep.mubr.bf16.mxu1 %v9144_v27  ;;  %v3999_v27 = vsel %vm10399_vm9, %v3992_v57, %v3998_v31 }
 0x2c3   : > { %v3965_v46 = vsel %vm10386_vm15, %v3963_v21, %v3964_v58 }
 0x2c6   : > { %5727 = vmatmul.mubr.bf16.gmra.mxu0 %v9121_v3 }
 0x2c7   : > { %5746 = vmatprep.mubr.msk.bf16.mxu0 %vm10208_vm8, %v10207_v8 }
 0x2c9   : > { %4874 = vmatmul.mubr.msk.bf16.gmra.mxu1 %vm10384_vm14, %v8965_v43  ;;  %v3970_v43 = vrot.slane %v8752_v19, 2  ;;  %v3975_v19 = vsel %vm10391_vm2, %v3968_v45, %v3974_v33 }
 0x2ca   : > { %4217 = vmatprep.mubr.bf16.mxu1 %v3962_v42 }
 0x2cb   : > { %v3971_v38 = vsel %vm10389_vm4, %v3964_v58, %v3970_v43 }
 0x2ce   : > { %5747 = vmatmul.mubr.bf16.vlgmr.msra.gmra.mxu0 %v3965_v46 }
 0x2cf   : > { %5750 = vmatprep.mubr.msk.bf16.mxu0 %vm10208_vm8, %v10207_v8 }
 0x2d1   : > { %4218 = vmatmul.mubr.bf16.vlgmr.msra.gmra.mxu1 %v10387_v34 }
 0x2d2   : > { %4225 = vmatprep.mubr.bf16.mxu1 %v3969_v54  ;;  %5790 = vmatpush3.bf16.msra.mxu1 %v9206_v36  ;;  %v3976_v36 = vrot.slane %v8824_v59, 2 }
 0x2d3   : > { %5783 = vmatprep.subr.bf16.mxu1 %v10207_v8 }
 0x2d4   : > { %v3977_v0 = vsel %vm10392_vm13, %v3970_v43, %v3976_v36 }
 0x2d6   : > { %5751 = vmatmul.mubr.bf16.gmra.mxu0 %v3971_v38  ;;  %5791 = vmatpush3.bf16.msra.mxu1 %v9222_v61  ;;  %v3980_v61 = vrot.slane %v8944_v22, 2 }
 0x2d7   : > { %5754 = vmatprep.mubr.msk.bf16.mxu0 %vm10208_vm8, %v10207_v8  ;;  %5784 = vmatprep.subr.bf16.mxu1 %v10207_v8 }
 0x2d8   : > { %v3981_v59 = vsel %vm10393_vm6, %v3974_v33, %v3980_v61 }
 0x2d9   : > { %4226 = vmatmul.mubr.bf16.gmra.mxu1 %v10390_v28 }
 0x2da   : > { %4233 = vmatprep.mubr.bf16.mxu1 %v3975_v19  ;;  %5792 = vmatpush3.bf16.msra.mxu1 %v9229_v15  ;;  %v3982_v15 = vrot.slane %v8922_v62, 2  ;;  %v3988_v62 = vrot.slane %v9031_v7, 2  ;;  %v3994_v7 = vrot.slane %v9121_v3, 2 }
 0x2db   : > { %5785 = vmatprep.subr.bf16.mxu1 %v10207_v8 }
 0x2dc   : > { %v3983_v22 = vsel %vm10394_vm3, %v3976_v36, %v3982_v15 }
 0x2de   : > { %5755 = vmatmul.mubr.bf16.gmra.mxu0 %v3977_v0  ;;  %5793 = vmatpush3.bf16.msra.mxu1 %v9235_v30  ;;  %v3986_v30 = vrot.slane %v9052_v1, 2  ;;  %v3989_v1 = vsel %vm10396_vm11, %v3982_v15, %v3988_v62 }
 0x2df   : > { %5758 = vmatprep.mubr.msk.bf16.mxu0 %vm10208_vm8, %v10207_v8  ;;  %5786 = vmatprep.subr.bf16.mxu1 %v10207_v8 }
 0x2e1   : > { %4234 = vmatmul.mubr.bf16.gmra.mxu1 %v8772_v55  ;;  %v3987_v55 = vsel %vm10395_vm12, %v3980_v61, %v3986_v30 }
 0x2e2   : > { %4241 = vmatprep.mubr.bf16.mxu1 %v3981_v59  ;;  %5794 = vmatpush3.bf16.msra.mxu1 %v9243_v29  ;;  %v3995_v29 = vsel %vm10398_vm7, %v3988_v62, %v3994_v7 }
 0x2e3   : > { %5787 = vmatprep.subr.bf16.mxu1 %v10207_v8 }
 0x2e6   : > { %5759 = vmatmul.mubr.bf16.gmra.mxu0 %v3983_v22  ;;  %5795 = vmatpush3.bf16.msra.mxu1 %v9250_v23 }
 0x2e7   : > { %5762 = vmatprep.mubr.msk.bf16.mxu0 %vm10208_vm8, %v10207_v8  ;;  %5788 = vmatprep.subr.bf16.mxu1 %v10207_v8 }
 0x2e9   : > { %4242 = vmatmul.mubr.bf16.gmra.mxu1 %v8848_v11  ;;  %v3993_v11 = vsel %vm10397_vm1, %v3986_v30, %v3992_v57 }
 0x2ea   : > { %4249 = vmatprep.mubr.bf16.mxu1 %v3987_v55  ;;  %5796 = vmatpush3.bf16.msra.mxu1 %v9258_v51 }
 0x2eb   : > { %5789 = vmatprep.subr.bf16.mxu1 %v10207_v8 }
 0x2ee   : > { %5763 = vmatmul.mubr.bf16.gmra.mxu0 %v3989_v1  ;;  %5797 = vmatpush3.bf16.msra.mxu1 %v9265_v49 }
 0x2ef   : > { %5766 = vmatprep.mubr.msk.bf16.mxu0 %vm10208_vm8, %v10207_v8  ;;  %v3472_v53 = vpop.f32.mrf.mxu0 }
 0x2f1   : > { %4250 = vmatmul.mubr.bf16.gmra.mxu1 %v8958_v13  ;;  %v5644_v48 = vpop.f32.mrf.mxu0 }
 0x2f2   : > { %4257 = vmatprep.mubr.bf16.mxu1 %v3993_v11 }
 0x2f3   : > { %v5261_v23 = vpop.f32.mrf.mxu1  ;;  %v3475_v13 = vpop.f32.mrf.mxu0 }
 0x2f5   : > { %v5262_v3 = vpop.f32.mrf.mxu1  ;;  %v5645_v18 = vpop.f32.mrf.mxu0 }
 0x2f6   : > { %5767 = vmatmul.mubr.bf16.gmra.mxu0 %v3995_v29  ;;  %v5263_v44 = vadd.f32 %v5262_v3, %v5261_v23 }
 0x2f7   : > { %v5264_v39 = vpop.f32.mrf.mxu1 }
 0x2f8   : > { %v9370_v56 = vadd.f32 %v5263_v44, %v3472_v53 }
 0x2f9   : > { %4258 = vmatmul.mubr.bf16.gmra.mxu1 %v9057_v47  ;;  %v5265_v51 = vpop.f32.mrf.mxu1 }
 0x2fa   : > { %4265 = vmatprep.mubr.bf16.mxu1 %v3999_v27  ;;  %v5266_v6 = vadd.f32 %v5265_v51, %v5264_v39 }
 0x2fc   : > { %v3480_v47 = vpop.f32.mrf.mxu0  ;;  %v9373_v10 = vadd.f32 %v5266_v6, %v3475_v13 }
 0x2fe   : > { %v5648_v63 = vpop.f32.mrf.mxu0 }
 0x300   : > { %v5267_v31 = vpop.f32.mrf.mxu1  ;;  %v3483_v49 = vpop.f32.mrf.mxu0 }
 0x301   : > { %4266 = vmatmul.mubr.bf16.gmra.mxu1 %v9147_v26 }
 0x302   : > { %4273 = vmatprep.mubr.bf16.mxu1 %v9189_v4  ;;  %v5268_v26 = vpop.f32.mrf.mxu1  ;;  %v5649_v20 = vpop.f32.mrf.mxu0 }
 0x303   : > { %v5269_v4 = vadd.f32 %v5268_v26, %v5267_v31 }
 0x304   : > { %v5270_v37 = vpop.f32.mrf.mxu1 }
 0x305   : > { %v9376_v32 = vadd.f32 %v5269_v4, %v3480_v47 }
 0x306   : > { %v5271_v41 = vpop.f32.mrf.mxu1 }
 0x307   : > { %v3488_v35 = vpop.f32.mrf.mxu0  ;;  %v5272_v60 = vadd.f32 %v5271_v41, %v5270_v37 }
 0x309   : > { %4274 = vmatmul.mubr.bf16.gmra.mxu1 %v9166_v52  ;;  %v5652_v9 = vpop.f32.mrf.mxu0  ;;  %v9379_v17 = vadd.f32 %v5272_v60, %v3483_v49 }
 0x30a   : > { %4281 = vmatprep.mubr.bf16.mxu1 %v9192_v14 }
 0x30b   : > { %v5273_v2 = vpop.f32.mrf.mxu1  ;;  %v3491_v52 = vpop.f32.mrf.mxu0 }
 0x30d   : > { %v5274_v14 = vpop.f32.mrf.mxu1  ;;  %v5653_v40 = vpop.f32.mrf.mxu0 }
 0x30e   : > { %v5275_v25 = vadd.f32 %v5274_v14, %v5273_v2 }
 0x30f   : > { %v5276_v42 = vpop.f32.mrf.mxu1 }
 0x310   : > { %v9383_v58 = vadd.f32 %v5275_v25, %v3488_v35 }
 0x311   : > { %4282 = vmatmul.mubr.bf16.gmra.mxu1 %v9181_v24  ;;  %v5277_v46 = vpop.f32.mrf.mxu1  ;;  %v4001_v24 = vsel %vm10400_vm5, %v3994_v7, %v4000_v12 }
 0x312   : > { %5770 = vmatprep.mubr.msk.bf16.mxu1 %vm10208_vm8, %v10207_v8  ;;  %v3496_v21 = vpop.f32.mrf.mxu0  ;;  %v5278_v45 = vadd.f32 %v5277_v46, %v5276_v42 }
 0x314   : > { %v5656_v34 = vpop.f32.mrf.mxu0  ;;  %v9388_v43 = vadd.f32 %v5278_v45, %v3491_v52 }
 0x316   : > { %v3499_v38 = vpop.f32.mrf.mxu0 }
 0x317   : > { %v5279_v54 = vpop.f32.mrf.mxu1 }
 0x318   : > { %v5657_v19 = vpop.f32.mrf.mxu0 }
 0x319   : > { %5771 = vmatmul.mubr.bf16.vlgmr.msra.gmra.mxu1 %v4001_v24  ;;  %v5280_v33 = vpop.f32.mrf.mxu1 }
 0x31a   : > { %5774 = vmatprep.mubr.msk.bf16.mxu1 %vm10208_vm8, %v10207_v8  ;;  %v5281_v28 = vadd.f32 %v5280_v33, %v5279_v54 }
 0x31b   : > { %v5282_v36 = vpop.f32.mrf.mxu1 }
 0x31c   : > { %v9392_v0 = vadd.f32 %v5281_v28, %v3496_v21 }
 0x31d   : > { %v3504_v61 = vpop.f32.mrf.mxu0  ;;  %v5283_v59 = vpop.f32.mrf.mxu1 }
 0x31e   : > { %v5284_v15 = vadd.f32 %v5283_v59, %v5282_v36 }
 0x31f   : > { %v5660_v16 = vpop.f32.mrf.mxu0  ;;  %v5285_v22 = vpop.f32.mrf.mxu1 }
 0x320   : > { %v9395_v12 = vadd.f32 %v5284_v15, %v3499_v38 }
 0x321   : > { %5775 = vmatmul.mubr.bf16.gmra.mxu1 %v9197_v50  ;;  %v3507_v30 = vpop.f32.mrf.mxu0  ;;  %v5286_v55 = vpop.f32.mrf.mxu1 }
 0x322   : > { %5778 = vmatprep.mubr.msk.bf16.mxu1 %vm10208_vm8, %v10207_v8  ;;  %v5287_v62 = vadd.f32 %v5286_v55, %v5285_v22 }
 0x323   : > { %v5661_v1 = vpop.f32.mrf.mxu0  ;;  %v5288_v57 = vpop.f32.mrf.mxu1 }
 0x324   : > { %v9399_v11 = vadd.f32 %v5287_v62, %v3504_v61 }
 0x325   : > { %v5289_v29 = vpop.f32.mrf.mxu1 }
 0x326   : > { %v3512_v7 = vpop.f32.mrf.mxu0  ;;  %v5290_v27 = vadd.f32 %v5289_v29, %v5288_v57 }
 0x328   : > { %v5664_v53 = vpop.f32.mrf.mxu0  ;;  %v9402_v50 = vadd.f32 %v5290_v27, %v3507_v30 }
 0x329   : > { %v5291_v48 = vpop.f32.mrf.mxu1  ;;  %5779 = vmatmul.mubr.bf16.gmra.mxu1 %v9200_v5 }
 0x32a   : > { %v3515_v23 = vpop.f32.mrf.mxu0 }
 0x32b   : > { %v5292_v13 = vpop.f32.mrf.mxu1 }
 0x32c   : > { %v5293_v3 = vadd.f32 %v5292_v13, %v5291_v48  ;;  %v5665_v44 = vpop.f32.mrf.mxu0 }
 0x32d   : > { %v5294_v8 = vpop.f32.mrf.mxu1 }
 0x32e   : > { %v9404_v18 = vadd.f32 %v5293_v3, %v3512_v7  ;;  %v3520_v39 = vpop.f32.mrf.mxu0 }
 0x32f   : > { %v5295_v47 = vpop.f32.mrf.mxu1 }
 0x330   : > { %v5296_v51 = vadd.f32 %v5295_v47, %v5294_v8  ;;  %v5668_v6 = vpop.f32.mrf.mxu0 }
 0x331   : > { %v5297_v63 = vpop.f32.mrf.mxu1 }
 0x332   : > { %v9406_v31 = vadd.f32 %v5296_v51, %v3515_v23  ;;  %v3523_v49 = vpop.f32.mrf.mxu0 }
 0x333   : > { %v5298_v26 = vpop.f32.mrf.mxu1 }
 0x334   : > { %v5299_v4 = vadd.f32 %v5298_v26, %v5297_v63  ;;  %v5669_v5 = vpop.f32.mrf.mxu0 }
 0x335   : > { %v5300_v20 = vpop.f32.mrf.mxu1 }
 0x336   : > { %v9408_v37 = vadd.f32 %v5299_v4, %v3520_v39  ;;  %v3528_v35 = vpop.f32.mrf.mxu0 }
 0x337   : > { %v5301_v41 = vpop.f32.mrf.mxu1 }
 0x338   : > { %v5302_v60 = vadd.f32 %v5301_v41, %v5300_v20  ;;  %v5672_v9 = vpop.f32.mrf.mxu0 }
 0x339   : > { %v5303_v2 = vpop.f32.mrf.mxu1 }
 0x33a   : > { %v9410_v52 = vadd.f32 %v5302_v60, %v3523_v49  ;;  %v3531_v14 = vpop.f32.mrf.mxu0 }
 0x33b   : > { %v5304_v25 = vpop.f32.mrf.mxu1 }
 0x33c   : > { %v5305_v40 = vadd.f32 %v5304_v25, %v5303_v2  ;;  %v5673_v42 = vpop.f32.mrf.mxu0 }
 0x33d   : > { %v5306_v21 = vpop.f32.mrf.mxu1 }
 0x33e   : > { %v9412_v46 = vadd.f32 %v5305_v40, %v3528_v35  ;;  %v3536_v45 = vpop.f32.mrf.mxu0 }
 0x33f   : > { %v5307_v34 = vpop.f32.mrf.mxu1 }
 0x340   : > { %v5308_v24 = vadd.f32 %v5307_v34, %v5306_v21  ;;  %v5676_v54 = vpop.f32.mrf.mxu0 }
 0x341   : > { %v5309_v38 = vpop.f32.mrf.mxu1 }
 0x342   : > { %v9414_v33 = vadd.f32 %v5308_v24, %v3531_v14  ;;  %v3539_v28 = vpop.f32.mrf.mxu0 }
 0x343   : > { %v5310_v19 = vpop.f32.mrf.mxu1 }
 0x344   : > { %v5311_v36 = vadd.f32 %v5310_v19, %v5309_v38  ;;  %v5677_v61 = vpop.f32.mrf.mxu0 }
 0x345   : > { %v5312_v59 = vpop.f32.mrf.mxu1 }
 0x346   : > { %v9416_v15 = vadd.f32 %v5311_v36, %v3536_v45  ;;  %v3826_v16 = vpop.f32.mrf.mxu0 }
 0x347   : > { %v5313_v22 = vpop.f32.mrf.mxu1 }
 0x348   : > { %v5314_v30 = vadd.f32 %v5313_v22, %v5312_v59  ;;  %v5696_v55 = vpop.f32.mrf.mxu0 }
 0x349   : > { %v5348_v62 = vpop.f32.mrf.mxu1 }
 0x34a   : > { %v9418_v1 = vadd.f32 %v5314_v30, %v3539_v28  ;;  %v3829_v57 = vpop.f32.mrf.mxu0 }
 0x34b   : > { %v5349_v7 = vpop.f32.mrf.mxu1 }
 0x34c   : > { %v5350_v29 = vadd.f32 %v5349_v7, %v5348_v62  ;;  %v5697_v27 = vpop.f32.mrf.mxu0 }
 0x34d   : > { %v5351_v53 = vpop.f32.mrf.mxu1 }
 0x34e   : > { %v3722_v48 = vadd.f32 %v5350_v29, %v9370_v56  ;;  %v3834_v23 = vpop.f32.mrf.mxu0 }
 0x34f   : > { %v5352_v13 = vpop.f32.mrf.mxu1 }
 0x350   : > { %v9421_v3 = vadd.f32 %v3826_v16, %v3722_v48  ;;  %v5353_v44 = vadd.f32 %v5352_v13, %v5351_v53  ;;  %v5700_v8 = vpop.f32.mrf.mxu0 }
 0x351   : > { %v5354_v39 = vpop.f32.mrf.mxu1 }
 0x352   : > { %v3725_v47 = vadd.f32 %v5353_v44, %v9373_v10  ;;  %v3837_v51 = vpop.f32.mrf.mxu0 }
 0x353   : > { %v5355_v6 = vpop.f32.mrf.mxu1 }
 0x354   : > { %v9424_v63 = vadd.f32 %v3829_v57, %v3725_v47  ;;  %v5356_v49 = vadd.f32 %v5355_v6, %v5354_v39  ;;  %v5701_v26 = vpop.f32.mrf.mxu0 }
 0x355   : > { %v5357_v4 = vpop.f32.mrf.mxu1 }
 0x356   : > { %v3730_v5 = vadd.f32 %v5356_v49, %v9376_v32  ;;  %v3842_v20 = vpop.f32.mrf.mxu0 }
 0x357   : > { %v5358_v56 = vpop.f32.mrf.mxu1 }
 0x358   : > { %v9427_v35 = vadd.f32 %v3834_v23, %v3730_v5  ;;  %v5359_v41 = vadd.f32 %v5358_v56, %v5357_v4  ;;  %v5704_v60 = vpop.f32.mrf.mxu0 }
 0x359   : > { %v5360_v9 = vpop.f32.mrf.mxu1 }
 0x35a   : > { %v3733_v2 = vadd.f32 %v5359_v41, %v9379_v17  ;;  %v3845_v14 = vpop.f32.mrf.mxu0 }
 0x35b   : > { %v5361_v10 = vpop.f32.mrf.mxu1 }
 0x35c   : > { %v9430_v25 = vadd.f32 %v3837_v51, %v3733_v2  ;;  %v5362_v40 = vadd.f32 %v5361_v10, %v5360_v9  ;;  %v5705_v42 = vpop.f32.mrf.mxu0 }
 0x35d   : > { %v5363_v21 = vpop.f32.mrf.mxu1 }
 0x35e   : > { %v3738_v45 = vadd.f32 %v5362_v40, %v9383_v58  ;;  %v3850_v34 = vpop.f32.mrf.mxu0 }
 0x35f   : > { %v5364_v32 = vpop.f32.mrf.mxu1 }
 0x360   : > { %v9433_v24 = vadd.f32 %v3842_v20, %v3738_v45  ;;  %v5365_v54 = vadd.f32 %v5364_v32, %v5363_v21  ;;  %v5708_v38 = vpop.f32.mrf.mxu0 }
 0x361   : > { %v5366_v28 = vpop.f32.mrf.mxu1 }
 0x362   : > { %v3741_v19 = vadd.f32 %v5365_v54, %v9388_v43  ;;  %v3853_v36 = vpop.f32.mrf.mxu0 }
 0x363   : > { %v5367_v17 = vpop.f32.mrf.mxu1 }
 0x364   : > { %v9436_v61 = vadd.f32 %v3845_v14, %v3741_v19  ;;  %v5368_v59 = vadd.f32 %v5367_v17, %v5366_v28  ;;  %v5709_v16 = vpop.f32.mrf.mxu0 }
 0x365   : > { %v5369_v22 = vpop.f32.mrf.mxu1 }
 0x366   : > { %v3746_v30 = vadd.f32 %v5368_v59, %v9392_v0  ;;  %v3858_v55 = vpop.f32.mrf.mxu0 }
 0x367   : > { %v5370_v58 = vpop.f32.mrf.mxu1 }
 0x368   : > { %v9439_v62 = vadd.f32 %v3850_v34, %v3746_v30  ;;  %v5371_v57 = vadd.f32 %v5370_v58, %v5369_v22  ;;  %v5712_v7 = vpop.f32.mrf.mxu0 }
 0x369   : > { %v5372_v29 = vpop.f32.mrf.mxu1 }
 0x36a   : > { %v3749_v27 = vadd.f32 %v5371_v57, %v9395_v12  ;;  %v3861_v53 = vpop.f32.mrf.mxu0 }
 0x36b   : > { %v5373_v43 = vpop.f32.mrf.mxu1 }
 0x36c   : > { %v9442_v48 = vadd.f32 %v3853_v36, %v3749_v27  ;;  %v5374_v23 = vadd.f32 %v5373_v43, %v5372_v29  ;;  %v5713_v13 = vpop.f32.mrf.mxu0 }
 0x36d   : > { %v5375_v44 = vpop.f32.mrf.mxu1 }
 0x36e   : > { %v3754_v8 = vadd.f32 %v5374_v23, %v9399_v11  ;;  %v3866_v39 = vpop.f32.mrf.mxu0 }
 0x36f   : > { %v5376_v0 = vpop.f32.mrf.mxu1 }
 0x370   : > { %v9445_v47 = vadd.f32 %v3858_v55, %v3754_v8  ;;  %v5377_v51 = vadd.f32 %v5376_v0, %v5375_v44  ;;  %v5716_v6 = vpop.f32.mrf.mxu0 }
 0x371   : > { %v5378_v49 = vpop.f32.mrf.mxu1 }
 0x372   : > { %v3757_v26 = vadd.f32 %v5377_v51, %v9402_v50  ;;  %v3869_v4 = vpop.f32.mrf.mxu0 }
 0x373   : > { %v5379_v12 = vpop.f32.mrf.mxu1 }
 0x374   : > { %v9448_v5 = vadd.f32 %v3861_v53, %v3757_v26  ;;  %v5380_v20 = vadd.f32 %v5379_v12, %v5378_v49  ;;  %v5717_v56 = vpop.f32.mrf.mxu0 }
 0x375   : > { %v5381_v41 = vpop.f32.mrf.mxu1 }
 0x376   : > { %v3762_v60 = vadd.f32 %v5380_v20, %v9404_v18  ;;  %v3874_v9 = vpop.f32.mrf.mxu0 }
 0x377   : > { %v5382_v11 = vpop.f32.mrf.mxu1 }
 0x378   : > { %v9451_v2 = vadd.f32 %v3866_v39, %v3762_v60  ;;  %v5383_v14 = vadd.f32 %v5382_v11, %v5381_v41  ;;  %v5720_v10 = vpop.f32.mrf.mxu0 }
 0x379   : > { %v5384_v40 = vpop.f32.mrf.mxu1 }
 0x37a   : > { %v3765_v42 = vadd.f32 %v5383_v14, %v9406_v31  ;;  %v3877_v21 = vpop.f32.mrf.mxu0 }
 0x37b   : > { %v5385_v50 = vpop.f32.mrf.mxu1 }
 0x37c   : > { %v9454_v45 = vadd.f32 %v3869_v4, %v3765_v42  ;;  %v5386_v34 = vadd.f32 %v5385_v50, %v5384_v40  ;;  %v5721_v32 = vpop.f32.mrf.mxu0  ;;  %v9478_v40 = vld [vmem:[%s9632_s4] ss:$0 sm:$0xff] }
 0x37d   : > { %v5387_v54 = vpop.f32.mrf.mxu1 }
 0x37e   : > { %v3770_v38 = vadd.f32 %v5386_v34, %v9408_v37  ;;  %v3882_v28 = vpop.f32.mrf.mxu0  ;;  %v4899_v34 = vld [vmem:[%s6551_s25 + $0x26] sm:$0xff] }
 0x37f   : > { %v5388_v18 = vpop.f32.mrf.mxu1 }
 0x380   : > { %v5389_v19 = vadd.f32 %v5388_v18, %v5387_v54  ;;  %v5724_v36 = vpop.f32.mrf.mxu0  ;;  %v9457_v17 = vadd.f32 %v3874_v9, %v3770_v38 }
 0x381   : > { %v5390_v59 = vpop.f32.mrf.mxu1 }
 0x382   : > { %v3773_v16 = vadd.f32 %v5389_v19, %v9410_v52  ;;  %v3885_v22 = vpop.f32.mrf.mxu0 }
 0x383   : > { %v5391_v31 = vpop.f32.mrf.mxu1 }
 0x384   : > { %v5392_v30 = vadd.f32 %v5391_v31, %v5390_v59  ;;  %v5725_v55 = vpop.f32.mrf.mxu0  ;;  %v9460_v58 = vadd.f32 %v3877_v21, %v3773_v16 }
 0x385   : > { %v5393_v57 = vpop.f32.mrf.mxu1 }
 0x386   : > { %v3778_v7 = vadd.f32 %v5392_v30, %v9412_v46  ;;  %v3890_v29 = vpop.f32.mrf.mxu0 }
 0x387   : > { %v5394_v37 = vpop.f32.mrf.mxu1 }
 0x388   : > { %v5395_v27 = vadd.f32 %v5394_v37, %v5393_v57  ;;  %v5728_v53 = vpop.f32.mrf.mxu0  ;;  %v9463_v43 = vadd.f32 %v3882_v28, %v3778_v7 }
 0x389   : > { %v5396_v23 = vpop.f32.mrf.mxu1  ;;  %v4901_v53 = vld [vmem:[%s6551_s25 + $0x36] sm:$0xff] }
 0x38a   : > { %v3781_v13 = vadd.f32 %v5395_v27, %v9414_v33  ;;  %v3893_v44 = vpop.f32.mrf.mxu0 }
 0x38b   : > { %v5397_v52 = vpop.f32.mrf.mxu1 }
 0x38c   : > { %v5398_v8 = vadd.f32 %v5397_v52, %v5396_v23  ;;  %v5729_v39 = vpop.f32.mrf.mxu0  ;;  %v9466_v0 = vadd.f32 %v3885_v22, %v3781_v13  ;;  %v4900_v22 = vld [vmem:[%s6551_s25 + $0x2e] sm:$0xff] }
 0x38d   : > { %v5399_v51 = vpop.f32.mrf.mxu1 }
 0x38e   : > { %v3786_v6 = vadd.f32 %v5398_v8, %v9416_v15  ;;  %v4324_v46 = vpop.f32.mrf.mxu0 }
 0x38f   : > { %v5400_v49 = vpop.f32.mrf.mxu1 }
 0x390   : > { %v5401_v26 = vadd.f32 %v5400_v49, %v5399_v51  ;;  %v5748_v4 = vpop.f32.mrf.mxu0  ;;  %v9469_v12 = vadd.f32 %v3890_v29, %v3786_v6 }
 0x391   : > { %v5435_v20 = vpop.f32.mrf.mxu1 }
 0x392   : > { %v3789_v33 = vadd.f32 %v5401_v26, %v9418_v1  ;;  %v4327_v56 = vpop.f32.mrf.mxu0  ;;  %v4902_v26 = vld [vmem:[%s6551_s25 + $0x3e] sm:$0xff] }
 0x393   : > { %v5436_v41 = vpop.f32.mrf.mxu1 }
 0x394   : > { %v5437_v60 = vadd.f32 %v5436_v41, %v5435_v20  ;;  %v5749_v9 = vpop.f32.mrf.mxu0  ;;  %v9472_v11 = vadd.f32 %v3893_v44, %v3789_v33 }
 0x395   : > { %v5438_v14 = vpop.f32.mrf.mxu1 }
 0x396   : > { %v4325_v15 = vadd.f32 %v5437_v60, %v4324_v46  ;;  %v4332_v10 = vpop.f32.mrf.mxu0 }
 0x397   : > { %v5439_v42 = vpop.f32.mrf.mxu1 }
 0x398   : > { %v4395_v1 = vadd.f32 %v4325_v15, %v9421_v3  ;;  %v5440_v21 = vadd.f32 %v5439_v42, %v5438_v14  ;;  %v5752_v50 = vpop.f32.mrf.mxu0 }
 0x399   : > { %v5441_v32 = vpop.f32.mrf.mxu1 }
 0x39a   : > { %v4440_v54 = vadd.f32 %v9478_v40, %v4395_v1  ;;  %v4328_v38 = vadd.f32 %v5440_v21, %v4327_v56  ;;  %v4335_v28 = vpop.f32.mrf.mxu0 }
 0x39b   : > { %v5442_v18 = vpop.f32.mrf.mxu1 }
 0x39c   : > { %v4458_v19 = vadd.f32 %v4899_v34, %v4440_v54  ;;  %v4396_v36 = vadd.f32 %v4328_v38, %v9424_v63  ;;  %v5443_v59 = vadd.f32 %v5442_v18, %v5441_v32  ;;  %v5753_v16 = vpop.f32.mrf.mxu0  ;;  %v4904_v18 = vld [vmem:[%s6551_s25 + $0x4e] sm:$0xff] }
 0x39d   : > { %v5444_v31 = vpop.f32.mrf.mxu1 }
 0x39e   : > { %v4476_v3 = vmax.f32 %v4458_v19, 0.0  ;;  %v4441_v30 = vadd.f32 %v9478_v40, %v4396_v36  ;;  %v4333_v55 = vadd.f32 %v5443_v59, %v4332_v10  ;;  %v4340_v57 = vpop.f32.mrf.mxu0  ;;  %v4903_v10 = vld [vmem:[%s6551_s25 + $0x46] sm:$0xff] }
 0x39f   : > { %v5445_v7 = vpop.f32.mrf.mxu1 }
 0x3a0   : > { %4494 = vst [vmem:[%s9488_s14] sm:$0xff] %v4476_v3  ;;  %v4459_v29 = vadd.f32 %v4900_v22, %v4441_v30  ;;  %v4397_v63 = vadd.f32 %v4333_v55, %v9427_v35  ;;  %v5446_v37 = vadd.f32 %v5445_v7, %v5444_v31  ;;  %v5756_v27 = vpop.f32.mrf.mxu0 }
 0x3a1   : > { %v5447_v23 = vpop.f32.mrf.mxu1 }
 0x3a2   : > { %v4477_v13 = vmax.f32 %v4459_v29, 0.0  ;;  %v4442_v44 = vadd.f32 %v9478_v40, %v4397_v63  ;;  %v4336_v52 = vadd.f32 %v5446_v37, %v4335_v28  ;;  %v4343_v8 = vpop.f32.mrf.mxu0 }
 0x3a3   : > { %v5448_v39 = vpop.f32.mrf.mxu1 }
 0x3a4   : > { %4495 = vst [vmem:[%s9488_s14 + $0x8] sm:$0xff] %v4477_v13  ;;  %v4460_v51 = vadd.f32 %v4901_v53, %v4442_v44  ;;  %v4398_v6 = vadd.f32 %v4336_v52, %v9430_v25  ;;  %v5449_v46 = vadd.f32 %v5448_v39, %v5447_v23  ;;  %v5757_v49 = vpop.f32.mrf.mxu0  ;;  %v4906_v52 = vld [vmem:[%s6551_s25 + $0x5e] sm:$0xff] }
 0x3a5   : > { %v5450_v35 = vpop.f32.mrf.mxu1 }
 0x3a6   : > { %v4478_v4 = vmax.f32 %v4460_v51, 0.0  ;;  %v4443_v20 = vadd.f32 %v9478_v40, %v4398_v6  ;;  %v4341_v33 = vadd.f32 %v5449_v46, %v4340_v57  ;;  %v4348_v56 = vpop.f32.mrf.mxu0  ;;  %v4905_v57 = vld [vmem:[%s6551_s25 + $0x56] sm:$0xff] }
 0x3a7   : > { %v5451_v41 = vpop.f32.mrf.mxu1 }
 0x3a8   : > { %4496 = vst [vmem:[%s9488_s14 + $0x10] sm:$0xff] %v4478_v4  ;;  %v4461_v60 = vadd.f32 %v4902_v26, %v4443_v20  ;;  %v4399_v9 = vadd.f32 %v4341_v33, %v9433_v24  ;;  %v5452_v14 = vadd.f32 %v5451_v41, %v5450_v35  ;;  %v5760_v15 = vpop.f32.mrf.mxu0  ;;  %v4907_v20 = vld [vmem:[%s6551_s25 + $0x66] sm:$0xff] }
 0x3a9   : > { %v5453_v25 = vpop.f32.mrf.mxu1 }
 0x3aa   : > { %v4479_v42 = vmax.f32 %v4461_v60, 0.0  ;;  %v4444_v1 = vadd.f32 %v9478_v40, %v4399_v9  ;;  %v4344_v21 = vadd.f32 %v5452_v14, %v4343_v8  ;;  %v4351_v50 = vpop.f32.mrf.mxu0 }
 0x3ab   : > { %v5454_v34 = vpop.f32.mrf.mxu1 }
 0x3ac   : > { %4497 = vst [vmem:[%s9488_s14 + $0x18] sm:$0xff] %v4479_v42  ;;  %v4462_v32 = vadd.f32 %v4903_v10, %v4444_v1  ;;  %v4400_v54 = vadd.f32 %v4344_v21, %v9436_v61  ;;  %v5455_v38 = vadd.f32 %v5454_v34, %v5453_v25  ;;  %v5761_v28 = vpop.f32.mrf.mxu0  ;;  %v4908_v42 = vld [vmem:[%s6551_s25 + $0x6e] sm:$0xff] }
 0x3ad   : > { %v5456_v24 = vpop.f32.mrf.mxu1  ;;  %v4909_v28 = vld [vmem:[%s6551_s25 + $0x76] sm:$0xff] }
 0x3ae   : > { %v4480_v19 = vmax.f32 %v4462_v32, 0.0  ;;  %v4445_v36 = vadd.f32 %v9478_v40, %v4400_v54  ;;  %v4349_v59 = vadd.f32 %v5455_v38, %v4348_v56  ;;  %v4356_v16 = vpop.f32.mrf.mxu0 }
 0x3af   : > { %v5457_v22 = vpop.f32.mrf.mxu1 }
 0x3b0   : > { %4498 = vst [vmem:[%s9488_s14 + $0x20] sm:$0xff] %v4480_v19  ;;  %v4463_v31 = vadd.f32 %v4904_v18, %v4445_v36  ;;  %v4401_v3 = vadd.f32 %v4349_v59, %v9439_v62  ;;  %v5458_v30 = vadd.f32 %v5457_v22, %v5456_v24  ;;  %v5764_v55 = vpop.f32.mrf.mxu0  ;;  %v4910_v22 = vld [vmem:[%s6551_s25 + $0x7e] sm:$0xff] }
 0x3b1   : > { %v5459_v61 = vpop.f32.mrf.mxu1 }
 0x3b2   : > { %v4481_v7 = vmax.f32 %v4463_v31, 0.0  ;;  %v4446_v29 = vadd.f32 %v9478_v40, %v4401_v3  ;;  %v4352_v63 = vadd.f32 %v5458_v30, %v4351_v50  ;;  %v4359_v37 = vpop.f32.mrf.mxu0 }
 0x3b3   : > { %v5460_v27 = vpop.f32.mrf.mxu1 }
 0x3b4   : > { %4499 = vst [vmem:[%s9488_s14 + $0x28] sm:$0xff] %v4481_v7  ;;  %v4464_v53 = vadd.f32 %v4905_v57, %v4446_v29  ;;  %v4402_v23 = vadd.f32 %v4352_v63, %v9442_v48  ;;  %v5461_v13 = vadd.f32 %v5460_v27, %v5459_v61  ;;  %v5765_v44 = vpop.f32.mrf.mxu0 }
 0x3b5   : > { %v5462_v62 = vpop.f32.mrf.mxu1 }
 0x3b6   : > { %v4482_v8 = vmax.f32 %v4464_v53, 0.0  ;;  %v4447_v39 = vadd.f32 %v9478_v40, %v4402_v23  ;;  %v4357_v51 = vadd.f32 %v5461_v13, %v4356_v16  ;;  %v4364_v6 = vpop.f32.mrf.mxu0 }
 0x3b7   : > { %v5463_v46 = vpop.f32.mrf.mxu1 }
 0x3b8   : > { %4500 = vst [vmem:[%s9488_s14 + $0x30] sm:$0xff] %v4482_v8  ;;  %v4465_v49 = vadd.f32 %v4906_v52, %v4447_v39  ;;  %v4403_v26 = vadd.f32 %v4357_v51, %v9445_v47  ;;  %v5464_v35 = vadd.f32 %v5463_v46, %v5462_v62  ;;  %v5768_v4 = vpop.f32.mrf.mxu0  ;;  %v4911_v39 = vld [vmem:[%s6551_s25 + $0x86] sm:$0xff] }
 0x3b9   : > { %v5465_v48 = vpop.f32.mrf.mxu1 }
 0x3ba   : > { %v4483_v33 = vmax.f32 %v4465_v49, 0.0  ;;  %v4448_v56 = vadd.f32 %v9478_v40, %v4403_v26  ;;  %v4360_v41 = vadd.f32 %v5464_v35, %v4359_v37  ;;  %v4367_v60 = vpop.f32.mrf.mxu0 }
 0x3bb   : > { %v5466_v9 = vpop.f32.mrf.mxu1 }
 0x3bc   : > { %4501 = vst [vmem:[%s9488_s14 + $0x38] sm:$0xff] %v4483_v33  ;;  %v4466_v14 = vadd.f32 %v4907_v20, %v4448_v56  ;;  %v4404_v15 = vadd.f32 %v4360_v41, %v9448_v5  ;;  %v5467_v10 = vadd.f32 %v5466_v9, %v5465_v48  ;;  %v5769_v25 = vpop.f32.mrf.mxu0  ;;  %v4912_v20 = vld [vmem:[%s6551_s25 + $0x8e] sm:$0xff] }
 0x3bd   : > { %v5468_v47 = vpop.f32.mrf.mxu1 }
 0x3be   : > { %v4484_v1 = vmax.f32 %v4466_v14, 0.0  ;;  %v4449_v21 = vadd.f32 %v9478_v40, %v4404_v15  ;;  %v4365_v50 = vadd.f32 %v5467_v10, %v4364_v6  ;;  %v4913_v15 = vld [vmem:[%s6551_s25 + $0x96] sm:$0xff] }
 0x3bf   : > { %v5469_v34 = vpop.f32.mrf.mxu1 }
 0x3c0   : > { %4502 = vst [vmem:[%s9488_s14 + $0x40] sm:$0xff] %v4484_v1  ;;  %v4467_v32 = vadd.f32 %v4908_v42, %v4449_v21  ;;  %v4405_v54 = vadd.f32 %v4365_v50, %v9451_v2  ;;  %v5470_v38 = vadd.f32 %v5469_v34, %v5468_v47  ;;  %v4914_v34 = vld [vmem:[%s6551_s25 + $0x9e] sm:$0xff] }
 0x3c1   : > { %v5471_v18 = vpop.f32.mrf.mxu1 }
 0x3c2   : > { %v4485_v5 = vmax.f32 %v4467_v32, 0.0  ;;  %v4450_v24 = vadd.f32 %v9478_v40, %v4405_v54  ;;  %v4368_v19 = vadd.f32 %v5470_v38, %v4367_v60 }
 0x3c3   : > { %v5472_v36 = vpop.f32.mrf.mxu1 }
 0x3c4   : > { %4503 = vst [vmem:[%s9488_s14 + $0x48] sm:$0xff] %v4485_v5  ;;  %v4468_v59 = vadd.f32 %v4909_v28, %v4450_v24  ;;  %v4406_v16 = vadd.f32 %v4368_v19, %v9454_v45  ;;  %v5473_v23 = vadd.f32 %v5472_v36, %v5471_v18  ;;  %v4915_v19 = vld [vmem:[%s6551_s25 + $0xa6] sm:$0xff] }
 0x3c5   : > { %v5474_v31 = vpop.f32.mrf.mxu1 }
 0x3c6   : > { %v4486_v3 = vmax.f32 %v4468_v59, 0.0  ;;  %v4451_v30 = vadd.f32 %v9478_v40, %v4406_v16 }
 0x3c7   : > { %v5475_v2 = vpop.f32.mrf.mxu1 }
 0x3c8   : > { %4504 = vst [vmem:[%s9488_s14 + $0x50] sm:$0xff] %v4486_v3  ;;  %v4469_v55 = vadd.f32 %v4910_v22, %v4451_v30  ;;  %v5476_v62 = vadd.f32 %v5475_v2, %v5474_v31  ;;  %v4916_v30 = vld [vmem:[%s6551_s25 + $0xae] sm:$0xff]  ;;  %s9568_s25 = scalar_lea.sflag [#allocation4], %s283_s1 }
 0x3c9   : > { %v5477_v57 = vpop.f32.mrf.mxu1 }
 0x3ca   : > { %v4487_v61 = vmax.f32 %v4469_v55, 0.0 }
 0x3cb   : > { %v5478_v7 = vpop.f32.mrf.mxu1 }
 0x3cc   : > { %4505 = vst [vmem:[%s9488_s14 + $0x58] sm:$0xff] %v4487_v61  ;;  %v5479_v26 = vadd.f32 %v5478_v7, %v5477_v57 }
 0x3cd   : > { %v5480_v29 = vpop.f32.mrf.mxu1 }
 0x3cf   : > { %v5481_v63 = vpop.f32.mrf.mxu1 }
 0x3d0   : > { %v5482_v60 = vadd.f32 %v5481_v63, %v5480_v29 }
 0x3d1   : > { %v5483_v37 = vpop.f32.mrf.mxu1 }
 0x3d3   : > { %v5484_v27 = vpop.f32.mrf.mxu1 }
 0x3d4   : > { %v5485_v1 = vadd.f32 %v5484_v27, %v5483_v37 }
 0x3d5   : > { %v5486_v53 = vpop.f32.mrf.mxu1 }
 0x3d7   : > { %v5487_v45 = vpop.f32.mrf.mxu1 }
 0x3d8   : > { %v5488_v18 = vadd.f32 %v5487_v45, %v5486_v53 }
 0x3d9   : > { %v4372_v13 = vpop.f32.mrf.mxu1 }
 0x3da   : > { %v4373_v44 = vadd.f32 %v5473_v23, %v4372_v13 }
 0x3db   : > { %v5772_v52 = vpop.f32.mrf.mxu1 }
 0x3dc   : > { %v4407_v8 = vadd.f32 %v4373_v44, %v9457_v17 }
 0x3dd   : > { %v4375_v51 = vpop.f32.mrf.mxu1 }
 0x3de   : > { %v4452_v6 = vadd.f32 %v9478_v40, %v4407_v8  ;;  %v4376_v46 = vadd.f32 %v5476_v62, %v4375_v51 }
 0x3df   : > { %v5773_v49 = vpop.f32.mrf.mxu1 }
 0x3e0   : > { %v4470_v35 = vadd.f32 %v4911_v39, %v4452_v6  ;;  %v4408_v4 = vadd.f32 %v4376_v46, %v9460_v58 }
 0x3e1   : > { %v4380_v48 = vpop.f32.mrf.mxu1 }
 0x3e2   : > { %v4488_v33 = vmax.f32 %v4470_v35, 0.0  ;;  %v4453_v56 = vadd.f32 %v9478_v40, %v4408_v4  ;;  %v4381_v41 = vadd.f32 %v5479_v26, %v4380_v48 }
 0x3e3   : > { %v5776_v17 = vpop.f32.mrf.mxu1 }
 0x3e4   : > { %4506 = vst [vmem:[%s9488_s14 + $0x60] sm:$0xff] %v4488_v33  ;;  %v4471_v9 = vadd.f32 %v4912_v20, %v4453_v56  ;;  %v4409_v14 = vadd.f32 %v4381_v41, %v9463_v43 }
 0x3e5   : > { %v4383_v10 = vpop.f32.mrf.mxu1 }
 0x3e6   : > { %v4489_v25 = vmax.f32 %v4471_v9, 0.0  ;;  %v4454_v58 = vadd.f32 %v9478_v40, %v4409_v14  ;;  %v4384_v42 = vadd.f32 %v5482_v60, %v4383_v10 }
 0x3e7   : > { %v5777_v47 = vpop.f32.mrf.mxu1 }
 0x3e8   : > { %4507 = vst [vmem:[%s9488_s14 + $0x68] sm:$0xff] %v4489_v25  ;;  %v4472_v21 = vadd.f32 %v4913_v15, %v4454_v58  ;;  %v4410_v50 = vadd.f32 %v4384_v42, %v9466_v0 }
 0x3e9   : > { %v4388_v32 = vpop.f32.mrf.mxu1 }
 0x3ea   : > { %v4490_v54 = vmax.f32 %v4472_v21, 0.0  ;;  %v4455_v43 = vadd.f32 %v9478_v40, %v4410_v50  ;;  %v4389_v38 = vadd.f32 %v5485_v1, %v4388_v32 }
 0x3eb   : > { %v5780_v28 = vpop.f32.mrf.mxu1 }
 0x3ec   : > { %4508 = vst [vmem:[%s9488_s14 + $0x70] sm:$0xff] %v4490_v54  ;;  %v4473_v5 = vadd.f32 %v4914_v34, %v4455_v43  ;;  %v4411_v24 = vadd.f32 %v4389_v38, %v9469_v12 }
 0x3ed   : > { %v4391_v0 = vpop.f32.mrf.mxu1 }
 0x3ee   : > { %v4491_v36 = vmax.f32 %v4473_v5, 0.0  ;;  %v4456_v59 = vadd.f32 %v9478_v40, %v4411_v24  ;;  %v4392_v16 = vadd.f32 %v5488_v18, %v4391_v0 }
 0x3ef   : > { %v5781_v22 = vpop.f32.mrf.mxu1 }
 0x3f0   : > { %4509 = vst [vmem:[%s9488_s14 + $0x78] sm:$0xff] %v4491_v36  ;;  %v4474_v31 = vadd.f32 %v4915_v19, %v4456_v59  ;;  %v4412_v3 = vadd.f32 %v4392_v16, %v9472_v11 }
 0x3f2   : > { %v4492_v2 = vmax.f32 %v4474_v31, 0.0  ;;  %v4457_v12 = vadd.f32 %v9478_v40, %v4412_v3 }
 0x3f4   : > { %4510 = vst [vmem:[%s9488_s14 + $0x80] sm:$0xff] %v4492_v2  ;;  %v4475_v55 = vadd.f32 %v4916_v30, %v4457_v12 }
 0x3f6   : > { %v4493_v57 = vmax.f32 %v4475_v55, 0.0 }
 0x3f8   : > { %4511 = vst [vmem:[%s9488_s14 + $0x88] sm:$0xff] %v4493_v57 }
 0x3f9   : > { %6218 = shalt.err (!%p6215_p5)
}
 0x3fa   : > { %s6219_s1 = scalar_lea.hbm %s9563_s9, 2304  ;;  %s6223_s5 = scalar_lea.hbm %s10403_s8, 9216 }
 0x3fb   : > { %p6220_p1 = scmp.ne.s32.totalorder %s9563_s9, %s6219_s1  ;;  %p6224_p13 = scmp.lt.s32.totalorder %s9563_s9, %s10403_s8 }
 0x3fc   : > { %p6225_p0 = scmp.lt.s32.totalorder %s6223_s5, %s6219_s1 }
 0x3fd   : > { %p6221_p7 = pnand %p6220_p1, %p10404_p11 }
 0x3fe   : > { %p6226_p8 = por %p6225_p0, %p6224_p13 }
 0x3ff   : > { %p6222_p9 = pneg %p6221_p7 }
 0x401   : > { %p6227_p3 = pnand %p6226_p8, %p6222_p9 }
 0x403   : > { %6230 = shalt.err (!%p6227_p3)
}
 0x404   : > { %s6341_s21 = smov 128   ;;  %s6342_s15 = smov 8  }
 0x405   : > { %5859 = dma.vmem_to_hbm [thread:$0]  (%p10404_p11), %s9558_s29, 2304, %s9563_s9, %s9568_s25, %s6341_s21, %s6341_s21, %s6342_s15  }
 0x406 PF: > { %s10405_s3 = sld [smem:[#allocation12_spill]]  ;;  %p5881_p10 = scmp.ge.s32.totalorder %s6329_s28, 2 }
 0x407   : > { %s10406_s6 = sld [smem:[#allocation16_spill]] }
 0x40c   : > { %s4543_s11 = sand.u32 1, %s10405_s3  }
 0x40d   : > { %p10407_p12 = scmp.ne.s32.totalorder %s10406_s6, 0  ;;  %s4544_s17 = scalar_lea.sflag [#allocation4], %s4543_s11 }
 0x40f   : > { %p5873_p2 = pnand %p5881_p10, %p10407_p12 }
 0x411   : > { %p5874_p4 = pneg %p5873_p2 }
 0x413   : > { %6284 = dma.done.wait (%p5874_p4), %s4544_s17, 2304  }
 0x414   : > { %6286 = vsyncadd (%p5874_p4), %s4544_s17, 4294964992  ;;  %s22_s28 = sadd.s32 1, %s6329_s28   ;;  %s10408_s12 = smov %s6517_s18 }
 0x415   : > { %p19_p6 = scmp.ge.s32.totalorder %s22_s28, 6   ;;  %s10409_s24 = sld [smem:[#allocation14_spill]] }
 0x416   : > { %s10410_s26 = sld [smem:[#allocation17_spill]]  ;;  %s10411_s18 = smov %s6293_s19 }
 0x417   : > { %s10412_s19 = smov %s6297_s20  ;;  %s10413_s20 = smov %s10408_s12 }
 0x418   : > { %s10414_s21 = smov %s6305_s22  ;;  %s10415_s22 = smov %s6309_s23 }
 0x419   : > { %s10416_s23 = smov %s6512_s13  ;;  %s10417_s25 = smov %s6325_s27 }
 0x41a   : > { %s10418_s27 = smov %s10424_s30  ;;  %21 = sbr.rel (!%p19_p6) target bundleno = 14 (0xe), region = 97 }
 0x41f   :  { %4549 = vsyncpa [#allocation3], 1 }
 0x420   :  { %4551 = vsyncpa [#allocation3 + $0x1], 1 }
 0x421   :  { %4552 = vsyncpa [#allocation6], 1 }
 0x422   :  { %4553 = vsyncpa [#allocation4], 1 }
 0x423   :  { %4555 = vsyncpa [#allocation4 + $0x1], 1 }

</bundles_post_ra>
